<compile_context>
chip_gen: v6e
topology: v6e:2x2x1
jax: 0.10.0
libtpu: 0.0.40
codegen_flags: <defaults>
</compile_context>

<pallas_src>
import functools

import jax
import jax.numpy as jnp
from jax.experimental import pallas as pl
from jax.experimental.pallas import tpu as pltpu


# --------------------------------------------------------------------------
# Helpers
# --------------------------------------------------------------------------

def _round_up(x, m):
    return -(-x // m) * m


def _choose_k_tile(kp):
    """Pick a K tile (multiple of 128 that divides kp) near 512 for pipelining."""
    if kp <= 1024:
        return kp
    for tk in (512, 768, 640, 384, 896, 1024, 256, 128):
        if kp % tk == 0:
            return tk
    return 128  # kp is always a multiple of 128


# --------------------------------------------------------------------------
# Pallas kernel: K-tiled matmul + BN affine + (residual add) + activation
# --------------------------------------------------------------------------

def _mm_bn_act_kernel(*refs, act, nk, has_res):
    if has_res:
        a_ref, w_ref, scale_ref, shift_ref, res_ref, o_ref, acc_ref = refs
    else:
        a_ref, w_ref, scale_ref, shift_ref, o_ref, acc_ref = refs
        res_ref = None
    k = pl.program_id(0)

    @pl.when(k == 0)
    def _init():
        acc_ref[...] = jnp.zeros_like(acc_ref)

    acc_ref[...] += jnp.dot(a_ref[...], w_ref[...],
                            preferred_element_type=jnp.float32)

    @pl.when(k == nk - 1)
    def _finalize():
        out = acc_ref[...] * scale_ref[...] + shift_ref[...]
        if has_res:
            out = out + res_ref[...].astype(jnp.float32)
        if act == "relu":
            out = jnp.maximum(out, 0.0)
        elif act == "sigmoid":
            out = 1.0 / (1.0 + jnp.exp(-out))
        o_ref[...] = out.astype(o_ref.dtype)


def matmul_bn_act(a, w, scale, shift, act=None, residual=None,
                  out_dtype=jnp.bfloat16):
    """a: (M, K) bf16, w: (Kp, Np) bf16 pre-padded (Kp,Np multiples of 128),
    scale/shift: (Np,) f32.  Returns (M, Np) with a lane-dense N dimension."""
    m, k = a.shape
    kp, n = w.shape
    mp = _round_up(max(m, 8), 8)
    a_p = jnp.pad(a, ((0, mp - m), (0, kp - k)))
    scale2 = scale.reshape(1, n)
    shift2 = shift.reshape(1, n)

    tk = _choose_k_tile(kp)
    nk = kp // tk

    in_specs = [
        pl.BlockSpec((mp, tk), lambda kk: (0, kk)),
        pl.BlockSpec((tk, n), lambda kk: (kk, 0)),
        pl.BlockSpec((1, n), lambda kk: (0, 0)),
        pl.BlockSpec((1, n), lambda kk: (0, 0)),
    ]
    args = [a_p, w, scale2, shift2]
    has_res = residual is not None
    if has_res:
        rm, rn = residual.shape
        res_p = jnp.pad(residual, ((0, mp - rm), (0, n - rn)))
        in_specs.append(pl.BlockSpec((mp, n), lambda kk: (0, 0)))
        args.append(res_p)

    out = pl.pallas_call(
        functools.partial(_mm_bn_act_kernel, act=act, nk=nk, has_res=has_res),
        out_shape=jax.ShapeDtypeStruct((mp, n), out_dtype),
        grid=(nk,),
        in_specs=in_specs,
        out_specs=pl.BlockSpec((mp, n), lambda kk: (0, 0)),
        scratch_shapes=[pltpu.VMEM((mp, n), jnp.float32)],
        compiler_params=pltpu.CompilerParams(
            dimension_semantics=("arbitrary",)),
    )(*args)
    return out[:m] if mp != m else out


# --------------------------------------------------------------------------
# Conv / pool layers (im2col + pooling are XLA glue fused under jit)
# --------------------------------------------------------------------------

def conv2d_bn(x, wmat, scale, shift, *, kh, kw, stride, padding,
              act="relu", residual=None):
    """x: (1, H, W, Cp) bf16 NHWC (channels zero-padded to lane width),
    wmat: (Kp, Np) bf16 prepared with matching channel padding."""
    nb, h, w_, c = x.shape
    oh = (h + 2 * padding - kh) // stride + 1
    ow = (w_ + 2 * padding - kw) // stride + 1
    xp = jnp.pad(x, ((0, 0), (padding, padding), (padding, padding), (0, 0)))
    cols = []
    for dh in range(kh):
        for dw in range(kw):
            cols.append(xp[:, dh:dh + (oh - 1) * stride + 1:stride,
                            dw:dw + (ow - 1) * stride + 1:stride, :])
    patches = jnp.concatenate(cols, axis=-1)
    a = patches.reshape(nb * oh * ow, kh * kw * c).astype(jnp.bfloat16)
    res2 = None
    if residual is not None:
        res2 = residual.reshape(nb * oh * ow, residual.shape[-1])
    out = matmul_bn_act(a, wmat, scale, shift, act=act, residual=res2,
                        out_dtype=jnp.bfloat16)
    return out.reshape(nb, oh, ow, wmat.shape[1])


def maxpool_3x3_s2_p1(x):
    """MaxPool2d(kernel_size=3, stride=2, padding=1), plain jnp (XLA fuses)."""
    nb, h, w_, c = x.shape
    oh = (h + 2 - 3) // 2 + 1
    ow = (w_ + 2 - 3) // 2 + 1
    xp = jnp.pad(x, ((0, 0), (1, 1), (1, 1), (0, 0)),
                 constant_values=-jnp.inf)
    out = None
    for dh in range(3):
        for dw in range(3):
            win = xp[:, dh:dh + (oh - 1) * 2 + 1:2,
                        dw:dw + (ow - 1) * 2 + 1:2, :]
            out = win if out is None else jnp.maximum(out, win)
    return out


# --------------------------------------------------------------------------
# ResNet-18 forward (inference BN folded into scale/shift)
# --------------------------------------------------------------------------

def basic_block(x, bp, stride):
    if "down" in bp:
        identity = conv2d_bn(x, bp["down"]["w"], bp["down"]["scale"],
                             bp["down"]["shift"], kh=1, kw=1, stride=stride,
                             padding=0, act=None)
    else:
        identity = x
    out = conv2d_bn(x, bp["conv1"]["w"], bp["conv1"]["scale"],
                    bp["conv1"]["shift"], kh=3, kw=3, stride=stride,
                    padding=1, act="relu")
    # Residual add + ReLU fused into conv2's matmul epilogue.
    out = conv2d_bn(out, bp["conv2"]["w"], bp["conv2"]["scale"],
                    bp["conv2"]["shift"], kh=3, kw=3, stride=1, padding=1,
                    act="relu", residual=identity)
    return out


def resnet18_sigmoid_forward(x_chw, p):
    # torch.unsqueeze(x, dim=0): CHW -> NCHW with N=1, then NHWC for TPU.
    x = jnp.transpose(x_chw[None], (0, 2, 3, 1)).astype(jnp.bfloat16)

    x = conv2d_bn(x, p["conv1"]["w"], p["conv1"]["scale"], p["conv1"]["shift"],
                  kh=7, kw=7, stride=2, padding=3, act="relu")
    x = maxpool_3x3_s2_p1(x)

    for name, stride in (("layer1", 1), ("layer2", 2),
                         ("layer3", 2), ("layer4", 2)):
        b0, b1 = p[name]
        x = basic_block(x, b0, stride)
        x = basic_block(x, b1, 1)

    # Adaptive average pool to 1x1 (trivial jnp glue; channels are exact 512).
    feat = jnp.mean(x.astype(jnp.float32), axis=(1, 2))          # (1, 512)

    # fc (512 -> 1000, padded to 1024 lanes) + final Sigmoid fused in kernel.
    logits = matmul_bn_act(feat.astype(jnp.bfloat16), p["fc"]["w"],
                           p["fc"]["scale"], p["fc"]["shift"],
                           act="sigmoid", out_dtype=jnp.float32)
    return logits[:, :1000]


# --------------------------------------------------------------------------
# One-time parameter preparation: PyTorch layout -> padded bf16 matmul layout
# --------------------------------------------------------------------------

def _prep_conv(w, scale, shift, c_in_pad):
    oc, ic, kh, kw = w.shape
    n_pad = _round_up(oc, 128)
    wt = jnp.transpose(w, (2, 3, 1, 0))                      # (KH, KW, IC, OC)
    wt = jnp.pad(wt, ((0, 0), (0, 0), (0, c_in_pad - ic), (0, n_pad - oc)))
    k_raw = kh * kw * c_in_pad
    k_pad = _round_up(k_raw, 128)
    wm = jnp.pad(wt.reshape(k_raw, n_pad),
                 ((0, k_pad - k_raw), (0, 0))).astype(jnp.bfloat16)
    return {
        "w": wm,
        "scale": jnp.pad(scale, (0, n_pad - oc)).astype(jnp.float32),
        "shift": jnp.pad(shift, (0, n_pad - oc)).astype(jnp.float32),
    }


def prepare_params(params):
    prep = {}
    prep["conv1"] = _prep_conv(params["conv1_w"], params["bn1_scale"],
                               params["bn1_shift"], c_in_pad=3)
    c_prev = prep["conv1"]["w"].shape[1]                      # 128
    for name in ("layer1", "layer2", "layer3", "layer4"):
        blocks = []
        for bp in params[name]:
            b = {"conv1": _prep_conv(bp["conv1_w"], bp["bn1_scale"],
                                     bp["bn1_shift"], c_in_pad=c_prev)}
            c_out = b["conv1"]["w"].shape[1]
            b["conv2"] = _prep_conv(bp["conv2_w"], bp["bn2_scale"],
                                    bp["bn2_shift"], c_in_pad=c_out)
            if "down_w" in bp:
                b["down"] = _prep_conv(bp["down_w"], bp["dbn_scale"],
                                       bp["dbn_shift"], c_in_pad=c_prev)
            blocks.append(b)
            c_prev = c_out
        prep[name] = blocks
    # fc: x @ W.T + b, then sigmoid.  K = 512 (already lane aligned).
    n_pad = _round_up(1000, 128)
    prep["fc"] = {
        "w": jnp.pad(params["fc_w"].T, ((0, 0), (0, n_pad - 1000))
                     ).astype(jnp.bfloat16),
        "scale": jnp.pad(jnp.ones((1000,), jnp.float32), (0, n_pad - 1000)),
        "shift": jnp.pad(params["fc_b"], (0, n_pad - 1000)).astype(jnp.float32),
    }
    return prep


# --------------------------------------------------------------------------
# Deterministic synthetic parameter init (resnet18 shapes, no checkpoint load)
# --------------------------------------------------------------------------

def _init_conv(key, oc, ic, kh, kw):
    fan_in = ic * kh * kw
    return jax.random.normal(key, (oc, ic, kh, kw), jnp.float32) / jnp.sqrt(fan_in)


def _init_bn(key, c):
    k1, k2, k3, k4 = jax.random.split(key, 4)
    gamma = 1.0 + 0.1 * jax.random.normal(k1, (c,), jnp.float32)
    beta = 0.1 * jax.random.normal(k2, (c,), jnp.float32)
    mean = 0.1 * jax.random.normal(k3, (c,), jnp.float32)
    var = 1.0 + 0.1 * jax.random.uniform(k4, (c,), jnp.float32)
    eps = 1e-5
    scale = gamma / jnp.sqrt(var + eps)
    shift = beta - mean * scale
    return scale, shift


def _init_block(key, in_c, out_c, downsample):
    ks = jax.random.split(key, 6)
    p = {"conv1_w": _init_conv(ks[0], out_c, in_c, 3, 3)}
    p["bn1_scale"], p["bn1_shift"] = _init_bn(ks[1], out_c)
    p["conv2_w"] = _init_conv(ks[2], out_c, out_c, 3, 3)
    p["bn2_scale"], p["bn2_shift"] = _init_bn(ks[3], out_c)
    if downsample:
        p["down_w"] = _init_conv(ks[4], out_c, in_c, 1, 1)
        p["dbn_scale"], p["dbn_shift"] = _init_bn(ks[5], out_c)
    return p


def init_params(key):
    ks = jax.random.split(key, 16)
    params = {}
    params["conv1_w"] = _init_conv(ks[0], 64, 3, 7, 7)
    params["bn1_scale"], params["bn1_shift"] = _init_bn(ks[1], 64)
    layer_defs = [("layer1", 64, 64, 1), ("layer2", 64, 128, 2),
                  ("layer3", 128, 256, 2), ("layer4", 256, 512, 2)]
    ki = 2
    for name, in_c, out_c, stride in layer_defs:
        down = (stride != 1) or (in_c != out_c)
        b0 = _init_block(ks[ki], in_c, out_c, down); ki += 1
        b1 = _init_block(ks[ki], out_c, out_c, False); ki += 1
        params[name] = [b0, b1]
    params["fc_w"] = jax.random.normal(ks[ki], (1000, 512), jnp.float32) / jnp.sqrt(512.0)
    ki += 1
    params["fc_b"] = 0.01 * jax.random.normal(ks[ki], (1000,), jnp.float32)
    return params


# --------------------------------------------------------------------------

if __name__ == "__main__":
    key = jax.random.PRNGKey(0)
    kx, kp = jax.random.split(key)
    # RESNET_pre.forward unsqueezes dim 0, so the module input is a single CHW image.
    x = jax.random.normal(kx, (3, 32, 32), jnp.float32)
    raw_params = init_params(kp)
    params = prepare_params(raw_params)     # one-time: pad + bf16 matmul layout

    fwd = jax.jit(resnet18_sigmoid_forward)
    out = jax.block_until_ready(fwd(x, params))

    assert out.shape == (1, 1000), out.shape
    assert bool(jnp.all(jnp.isfinite(out)))
    assert bool(jnp.all((out >= 0.0) & (out <= 1.0)))
    print("KERNEL_OK")
</pallas_src>

<mosaic_0001>
module attributes {stable_mosaic.version = 11 : i64} {
  func.func @_mm_bn_act_kernel(%arg0: i32, %arg1: memref<256x256xbf16, #tpu.memory_space<vmem>>, %arg2: memref<256x128xbf16, #tpu.memory_space<vmem>>, %arg3: memref<1x128xf32, #tpu.memory_space<vmem>>, %arg4: memref<1x128xf32, #tpu.memory_space<vmem>>, %arg5: memref<256x128xbf16, #tpu.memory_space<vmem>>, %arg6: memref<256x128xf32, #tpu.memory_space<vmem>>) attributes {dimension_semantics = [#tpu.dimension_semantics<arbitrary>], iteration_bounds = array<i64: 1>, scalar_prefetch = 0 : i64, scratch_operands = 1 : i64, tpu.core_type = #tpu.core_type<tc>, window_params = [{transform_indices = @transform_0, window_bounds = array<i64: 256, 256>}, {transform_indices = @transform_1, window_bounds = array<i64: 256, 128>}, {pipeline_mode = #tpu.pipeline_mode<synchronous>, transform_indices = @transform_2, window_bounds = array<i64: 1, 128>}, {pipeline_mode = #tpu.pipeline_mode<synchronous>, transform_indices = @transform_3, window_bounds = array<i64: 1, 128>}, {pipeline_mode = #tpu.pipeline_mode<synchronous>, transform_indices = @transform_4, window_bounds = array<i64: 256, 128>}]} {
    %c0_i32 = arith.constant 0 : i32
    %0 = arith.cmpi eq, %arg0, %c0_i32 : i32
    %1 = arith.extui %0 : i1 to i32
    %c0_i32_0 = arith.constant 0 : i32
    %2 = arith.cmpi ne, %1, %c0_i32_0 : i32
    scf.if %2 {
      %cst_10 = arith.constant 0.000000e+00 : f32
      %12 = vector.broadcast %cst_10 : f32 to vector<256x128xf32>
      %c0_11 = arith.constant 0 : index
      %c0_12 = arith.constant 0 : index
      %13 = vector.load %arg6[%c0_11, %c0_12] : memref<256x128xf32, #tpu.memory_space<vmem>>, vector<256x128xf32>
      tpu.vector_store %arg6[%c0_11, %c0_12], %12 {strides = array<i32>} : memref<256x128xf32, #tpu.memory_space<vmem>>, vector<256x128xf32>,
    } else {
    }
    %c0 = arith.constant 0 : index
    %c0_1 = arith.constant 0 : index
    %3 = vector.load %arg6[%c0, %c0_1] : memref<256x128xf32, #tpu.memory_space<vmem>>, vector<256x128xf32>
    %c0_2 = arith.constant 0 : index
    %c0_3 = arith.constant 0 : index
    %4 = vector.load %arg1[%c0_2, %c0_3] : memref<256x256xbf16, #tpu.memory_space<vmem>>, vector<256x256xbf16>
    %c0_4 = arith.constant 0 : index
    %c0_5 = arith.constant 0 : index
    %5 = vector.load %arg2[%c0_4, %c0_5] : memref<256x128xbf16, #tpu.memory_space<vmem>>, vector<256x128xbf16>
    %cst = arith.constant dense<0.000000e+00> : vector<256x128xf32>
    %6 = tpu.matmul %4, %5, %cst {dimension_numbers = #tpu.dot_dimension_numbers<[1], [0], [0], [1], [0, 0, 1, 1], [], []>} : vector<256x256xbf16>, vector<256x128xbf16>, vector<256x128xf32> -> vector<256x128xf32>
    %7 = arith.addf %3, %6 : vector<256x128xf32>
    %c0_6 = arith.constant 0 : index
    %c0_7 = arith.constant 0 : index
    %8 = vector.load %arg6[%c0_6, %c0_7] : memref<256x128xf32, #tpu.memory_space<vmem>>, vector<256x128xf32>
    tpu.vector_store %arg6[%c0_6, %c0_7], %7 {strides = array<i32>} : memref<256x128xf32, #tpu.memory_space<vmem>>, vector<256x128xf32>,
    %c0_i32_8 = arith.constant 0 : i32
    %9 = arith.cmpi eq, %arg0, %c0_i32_8 : i32
    %10 = arith.extui %9 : i1 to i32
    %c0_i32_9 = arith.constant 0 : i32
    %11 = arith.cmpi ne, %10, %c0_i32_9 : i32
    scf.if %11 {
      %c0_10 = arith.constant 0 : index
      %c0_11 = arith.constant 0 : index
      %12 = vector.load %arg6[%c0_10, %c0_11] : memref<256x128xf32, #tpu.memory_space<vmem>>, vector<256x128xf32>
      %c0_12 = arith.constant 0 : index
      %c0_13 = arith.constant 0 : index
      %13 = vector.load %arg3[%c0_12, %c0_13] : memref<1x128xf32, #tpu.memory_space<vmem>>, vector<1x128xf32>
      %14 = vector.broadcast %13 : vector<1x128xf32> to vector<256x128xf32>
      %15 = arith.mulf %12, %14 : vector<256x128xf32>
      %c0_14 = arith.constant 0 : index
      %c0_15 = arith.constant 0 : index
      %16 = vector.load %arg4[%c0_14, %c0_15] : memref<1x128xf32, #tpu.memory_space<vmem>>, vector<1x128xf32>
      %17 = vector.broadcast %16 : vector<1x128xf32> to vector<256x128xf32>
      %18 = arith.addf %15, %17 : vector<256x128xf32>
      %cst_16 = arith.constant 0.000000e+00 : f32
      %19 = vector.broadcast %cst_16 : f32 to vector<256x128xf32>
      %20 = arith.maximumf %18, %19 : vector<256x128xf32>
      %21 = arith.truncf %20 : vector<256x128xf32> to vector<256x128xbf16>
      %c0_17 = arith.constant 0 : index
      %c0_18 = arith.constant 0 : index
      %22 = vector.load %arg5[%c0_17, %c0_18] : memref<256x128xbf16, #tpu.memory_space<vmem>>, vector<256x128xbf16>
      tpu.vector_store %arg5[%c0_17, %c0_18], %21 {strides = array<i32>} : memref<256x128xbf16, #tpu.memory_space<vmem>>, vector<256x128xbf16>,
    } else {
    }
    return
  }
  func.func @transform_0(%arg0: i32) -> (i32, i32) {
    %c0_i32 = arith.constant 0 : i32
    %c0_i32_0 = arith.constant 0 : i32
    return %c0_i32, %arg0 : i32, i32
  }
  func.func @transform_1(%arg0: i32) -> (i32, i32) {
    %c0_i32 = arith.constant 0 : i32
    %c0_i32_0 = arith.constant 0 : i32
    return %arg0, %c0_i32 : i32, i32
  }
  func.func @transform_2(%arg0: i32) -> (i32, i32) {
    %c0_i32 = arith.constant 0 : i32
    %c0_i32_0 = arith.constant 0 : i32
    %c0_i32_1 = arith.constant 0 : i32
    return %c0_i32, %c0_i32_0 : i32, i32
  }
  func.func @transform_3(%arg0: i32) -> (i32, i32) {
    %c0_i32 = arith.constant 0 : i32
    %c0_i32_0 = arith.constant 0 : i32
    %c0_i32_1 = arith.constant 0 : i32
    return %c0_i32, %c0_i32_0 : i32, i32
  }
  func.func @transform_4(%arg0: i32) -> (i32, i32) {
    %c0_i32 = arith.constant 0 : i32
    %c0_i32_0 = arith.constant 0 : i32
    %c0_i32_1 = arith.constant 0 : i32
    return %c0_i32, %c0_i32_0 : i32, i32
  }
}

module attributes {stable_mosaic.version = 11 : i64} {
  func.func @_mm_bn_act_kernel(%arg0: i32, %arg1: memref<64x384xbf16, #tpu.memory_space<vmem>>, %arg2: memref<384x128xbf16, #tpu.memory_space<vmem>>, %arg3: memref<1x128xf32, #tpu.memory_space<vmem>>, %arg4: memref<1x128xf32, #tpu.memory_space<vmem>>, %arg5: memref<64x128xbf16, #tpu.memory_space<vmem>>, %arg6: memref<64x128xf32, #tpu.memory_space<vmem>>) attributes {dimension_semantics = [#tpu.dimension_semantics<arbitrary>], iteration_bounds = array<i64: 3>, scalar_prefetch = 0 : i64, scratch_operands = 1 : i64, tpu.core_type = #tpu.core_type<tc>, window_params = [{transform_indices = @transform_0, window_bounds = array<i64: 64, 384>}, {transform_indices = @transform_1, window_bounds = array<i64: 384, 128>}, {pipeline_mode = #tpu.pipeline_mode<synchronous>, transform_indices = @transform_2, window_bounds = array<i64: 1, 128>}, {pipeline_mode = #tpu.pipeline_mode<synchronous>, transform_indices = @transform_3, window_bounds = array<i64: 1, 128>}, {pipeline_mode = #tpu.pipeline_mode<synchronous>, transform_indices = @transform_4, window_bounds = array<i64: 64, 128>}]} {
    %c0_i32 = arith.constant 0 : i32
    %0 = arith.cmpi eq, %arg0, %c0_i32 : i32
    %1 = arith.extui %0 : i1 to i32
    %c0_i32_0 = arith.constant 0 : i32
    %2 = arith.cmpi ne, %1, %c0_i32_0 : i32
    scf.if %2 {
      %cst_9 = arith.constant 0.000000e+00 : f32
      %12 = vector.broadcast %cst_9 : f32 to vector<64x128xf32>
      %c0_10 = arith.constant 0 : index
      %c0_11 = arith.constant 0 : index
      %13 = vector.load %arg6[%c0_10, %c0_11] : memref<64x128xf32, #tpu.memory_space<vmem>>, vector<64x128xf32>
      tpu.vector_store %arg6[%c0_10, %c0_11], %12 {strides = array<i32>} : memref<64x128xf32, #tpu.memory_space<vmem>>, vector<64x128xf32>,
    } else {
    }
    %c0 = arith.constant 0 : index
    %c0_1 = arith.constant 0 : index
    %3 = vector.load %arg6[%c0, %c0_1] : memref<64x128xf32, #tpu.memory_space<vmem>>, vector<64x128xf32>
    %c0_2 = arith.constant 0 : index
    %c0_3 = arith.constant 0 : index
    %4 = vector.load %arg1[%c0_2, %c0_3] : memref<64x384xbf16, #tpu.memory_space<vmem>>, vector<64x384xbf16>
    %c0_4 = arith.constant 0 : index
    %c0_5 = arith.constant 0 : index
    %5 = vector.load %arg2[%c0_4, %c0_5] : memref<384x128xbf16, #tpu.memory_space<vmem>>, vector<384x128xbf16>
    %cst = arith.constant dense<0.000000e+00> : vector<64x128xf32>
    %6 = tpu.matmul %4, %5, %cst {dimension_numbers = #tpu.dot_dimension_numbers<[1], [0], [0], [1], [0, 0, 1, 1], [], []>} : vector<64x384xbf16>, vector<384x128xbf16>, vector<64x128xf32> -> vector<64x128xf32>
    %7 = arith.addf %3, %6 : vector<64x128xf32>
    %c0_6 = arith.constant 0 : index
    %c0_7 = arith.constant 0 : index
    %8 = vector.load %arg6[%c0_6, %c0_7] : memref<64x128xf32, #tpu.memory_space<vmem>>, vector<64x128xf32>
    tpu.vector_store %arg6[%c0_6, %c0_7], %7 {strides = array<i32>} : memref<64x128xf32, #tpu.memory_space<vmem>>, vector<64x128xf32>,
    %c2_i32 = arith.constant 2 : i32
    %9 = arith.cmpi eq, %arg0, %c2_i32 : i32
    %10 = arith.extui %9 : i1 to i32
    %c0_i32_8 = arith.constant 0 : i32
    %11 = arith.cmpi ne, %10, %c0_i32_8 : i32
    scf.if %11 {
      %c0_9 = arith.constant 0 : index
      %c0_10 = arith.constant 0 : index
      %12 = vector.load %arg6[%c0_9, %c0_10] : memref<64x128xf32, #tpu.memory_space<vmem>>, vector<64x128xf32>
      %c0_11 = arith.constant 0 : index
      %c0_12 = arith.constant 0 : index
      %13 = vector.load %arg3[%c0_11, %c0_12] : memref<1x128xf32, #tpu.memory_space<vmem>>, vector<1x128xf32>
      %14 = vector.broadcast %13 : vector<1x128xf32> to vector<64x128xf32>
      %15 = arith.mulf %12, %14 : vector<64x128xf32>
      %c0_13 = arith.constant 0 : index
      %c0_14 = arith.constant 0 : index
      %16 = vector.load %arg4[%c0_13, %c0_14] : memref<1x128xf32, #tpu.memory_space<vmem>>, vector<1x128xf32>
      %17 = vector.broadcast %16 : vector<1x128xf32> to vector<64x128xf32>
      %18 = arith.addf %15, %17 : vector<64x128xf32>
      %cst_15 = arith.constant 0.000000e+00 : f32
      %19 = vector.broadcast %cst_15 : f32 to vector<64x128xf32>
      %20 = arith.maximumf %18, %19 : vector<64x128xf32>
      %21 = arith.truncf %20 : vector<64x128xf32> to vector<64x128xbf16>
      %c0_16 = arith.constant 0 : index
      %c0_17 = arith.constant 0 : index
      %22 = vector.load %arg5[%c0_16, %c0_17] : memref<64x128xbf16, #tpu.memory_space<vmem>>, vector<64x128xbf16>
      tpu.vector_store %arg5[%c0_16, %c0_17], %21 {strides = array<i32>} : memref<64x128xbf16, #tpu.memory_space<vmem>>, vector<64x128xbf16>,
    } else {
    }
    return
  }
  func.func @transform_0(%arg0: i32) -> (i32, i32) {
    %c0_i32 = arith.constant 0 : i32
    %c0_i32_0 = arith.constant 0 : i32
    return %c0_i32, %arg0 : i32, i32
  }
  func.func @transform_1(%arg0: i32) -> (i32, i32) {
    %c0_i32 = arith.constant 0 : i32
    %c0_i32_0 = arith.constant 0 : i32
    return %arg0, %c0_i32 : i32, i32
  }
  func.func @transform_2(%arg0: i32) -> (i32, i32) {
    %c0_i32 = arith.constant 0 : i32
    %c0_i32_0 = arith.constant 0 : i32
    %c0_i32_1 = arith.constant 0 : i32
    return %c0_i32, %c0_i32_0 : i32, i32
  }
  func.func @transform_3(%arg0: i32) -> (i32, i32) {
    %c0_i32 = arith.constant 0 : i32
    %c0_i32_0 = arith.constant 0 : i32
    %c0_i32_1 = arith.constant 0 : i32
    return %c0_i32, %c0_i32_0 : i32, i32
  }
  func.func @transform_4(%arg0: i32) -> (i32, i32) {
    %c0_i32 = arith.constant 0 : i32
    %c0_i32_0 = arith.constant 0 : i32
    %c0_i32_1 = arith.constant 0 : i32
    return %c0_i32, %c0_i32_0 : i32, i32
  }
}

module attributes {stable_mosaic.version = 11 : i64} {
  func.func @_mm_bn_act_kernel(%arg0: i32, %arg1: memref<64x384xbf16, #tpu.memory_space<vmem>>, %arg2: memref<384x128xbf16, #tpu.memory_space<vmem>>, %arg3: memref<1x128xf32, #tpu.memory_space<vmem>>, %arg4: memref<1x128xf32, #tpu.memory_space<vmem>>, %arg5: memref<64x128xbf16, #tpu.memory_space<vmem>>, %arg6: memref<64x128xbf16, #tpu.memory_space<vmem>>, %arg7: memref<64x128xf32, #tpu.memory_space<vmem>>) attributes {dimension_semantics = [#tpu.dimension_semantics<arbitrary>], iteration_bounds = array<i64: 3>, scalar_prefetch = 0 : i64, scratch_operands = 1 : i64, tpu.core_type = #tpu.core_type<tc>, window_params = [{transform_indices = @transform_0, window_bounds = array<i64: 64, 384>}, {transform_indices = @transform_1, window_bounds = array<i64: 384, 128>}, {pipeline_mode = #tpu.pipeline_mode<synchronous>, transform_indices = @transform_2, window_bounds = array<i64: 1, 128>}, {pipeline_mode = #tpu.pipeline_mode<synchronous>, transform_indices = @transform_3, window_bounds = array<i64: 1, 128>}, {pipeline_mode = #tpu.pipeline_mode<synchronous>, transform_indices = @transform_4, window_bounds = array<i64: 64, 128>}, {pipeline_mode = #tpu.pipeline_mode<synchronous>, transform_indices = @transform_5, window_bounds = array<i64: 64, 128>}]} {
    %c0_i32 = arith.constant 0 : i32
    %0 = arith.cmpi eq, %arg0, %c0_i32 : i32
    %1 = arith.extui %0 : i1 to i32
    %c0_i32_0 = arith.constant 0 : i32
    %2 = arith.cmpi ne, %1, %c0_i32_0 : i32
    scf.if %2 {
      %cst_9 = arith.constant 0.000000e+00 : f32
      %12 = vector.broadcast %cst_9 : f32 to vector<64x128xf32>
      %c0_10 = arith.constant 0 : index
      %c0_11 = arith.constant 0 : index
      %13 = vector.load %arg7[%c0_10, %c0_11] : memref<64x128xf32, #tpu.memory_space<vmem>>, vector<64x128xf32>
      tpu.vector_store %arg7[%c0_10, %c0_11], %12 {strides = array<i32>} : memref<64x128xf32, #tpu.memory_space<vmem>>, vector<64x128xf32>,
    } else {
    }
    %c0 = arith.constant 0 : index
    %c0_1 = arith.constant 0 : index
    %3 = vector.load %arg7[%c0, %c0_1] : memref<64x128xf32, #tpu.memory_space<vmem>>, vector<64x128xf32>
    %c0_2 = arith.constant 0 : index
    %c0_3 = arith.constant 0 : index
    %4 = vector.load %arg1[%c0_2, %c0_3] : memref<64x384xbf16, #tpu.memory_space<vmem>>, vector<64x384xbf16>
    %c0_4 = arith.constant 0 : index
    %c0_5 = arith.constant 0 : index
    %5 = vector.load %arg2[%c0_4, %c0_5] : memref<384x128xbf16, #tpu.memory_space<vmem>>, vector<384x128xbf16>
    %cst = arith.constant dense<0.000000e+00> : vector<64x128xf32>
    %6 = tpu.matmul %4, %5, %cst {dimension_numbers = #tpu.dot_dimension_numbers<[1], [0], [0], [1], [0, 0, 1, 1], [], []>} : vector<64x384xbf16>, vector<384x128xbf16>, vector<64x128xf32> -> vector<64x128xf32>
    %7 = arith.addf %3, %6 : vector<64x128xf32>
    %c0_6 = arith.constant 0 : index
    %c0_7 = arith.constant 0 : index
    %8 = vector.load %arg7[%c0_6, %c0_7] : memref<64x128xf32, #tpu.memory_space<vmem>>, vector<64x128xf32>
    tpu.vector_store %arg7[%c0_6, %c0_7], %7 {strides = array<i32>} : memref<64x128xf32, #tpu.memory_space<vmem>>, vector<64x128xf32>,
    %c2_i32 = arith.constant 2 : i32
    %9 = arith.cmpi eq, %arg0, %c2_i32 : i32
    %10 = arith.extui %9 : i1 to i32
    %c0_i32_8 = arith.constant 0 : i32
    %11 = arith.cmpi ne, %10, %c0_i32_8 : i32
    scf.if %11 {
      %c0_9 = arith.constant 0 : index
      %c0_10 = arith.constant 0 : index
      %12 = vector.load %arg7[%c0_9, %c0_10] : memref<64x128xf32, #tpu.memory_space<vmem>>, vector<64x128xf32>
      %c0_11 = arith.constant 0 : index
      %c0_12 = arith.constant 0 : index
      %13 = vector.load %arg3[%c0_11, %c0_12] : memref<1x128xf32, #tpu.memory_space<vmem>>, vector<1x128xf32>
      %14 = vector.broadcast %13 : vector<1x128xf32> to vector<64x128xf32>
      %15 = arith.mulf %12, %14 : vector<64x128xf32>
      %c0_13 = arith.constant 0 : index
      %c0_14 = arith.constant 0 : index
      %16 = vector.load %arg4[%c0_13, %c0_14] : memref<1x128xf32, #tpu.memory_space<vmem>>, vector<1x128xf32>
      %17 = vector.broadcast %16 : vector<1x128xf32> to vector<64x128xf32>
      %18 = arith.addf %15, %17 : vector<64x128xf32>
      %c0_15 = arith.constant 0 : index
      %c0_16 = arith.constant 0 : index
      %19 = vector.load %arg5[%c0_15, %c0_16] : memref<64x128xbf16, #tpu.memory_space<vmem>>, vector<64x128xbf16>
      %20 = arith.extf %19 : vector<64x128xbf16> to vector<64x128xf32>
      %21 = arith.addf %18, %20 : vector<64x128xf32>
      %cst_17 = arith.constant 0.000000e+00 : f32
      %22 = vector.broadcast %cst_17 : f32 to vector<64x128xf32>
      %23 = arith.maximumf %21, %22 : vector<64x128xf32>
      %24 = arith.truncf %23 : vector<64x128xf32> to vector<64x128xbf16>
      %c0_18 = arith.constant 0 : index
      %c0_19 = arith.constant 0 : index
      %25 = vector.load %arg6[%c0_18, %c0_19] : memref<64x128xbf16, #tpu.memory_space<vmem>>, vector<64x128xbf16>
      tpu.vector_store %arg6[%c0_18, %c0_19], %24 {strides = array<i32>} : memref<64x128xbf16, #tpu.memory_space<vmem>>, vector<64x128xbf16>,
    } else {
    }
    return
  }
  func.func @transform_0(%arg0: i32) -> (i32, i32) {
    %c0_i32 = arith.constant 0 : i32
    %c0_i32_0 = arith.constant 0 : i32
    return %c0_i32, %arg0 : i32, i32
  }
  func.func @transform_1(%arg0: i32) -> (i32, i32) {
    %c0_i32 = arith.constant 0 : i32
    %c0_i32_0 = arith.constant 0 : i32
    return %arg0, %c0_i32 : i32, i32
  }
  func.func @transform_2(%arg0: i32) -> (i32, i32) {
    %c0_i32 = arith.constant 0 : i32
    %c0_i32_0 = arith.constant 0 : i32
    %c0_i32_1 = arith.constant 0 : i32
    return %c0_i32, %c0_i32_0 : i32, i32
  }
  func.func @transform_3(%arg0: i32) -> (i32, i32) {
    %c0_i32 = arith.constant 0 : i32
    %c0_i32_0 = arith.constant 0 : i32
    %c0_i32_1 = arith.constant 0 : i32
    return %c0_i32, %c0_i32_0 : i32, i32
  }
  func.func @transform_4(%arg0: i32) -> (i32, i32) {
    %c0_i32 = arith.constant 0 : i32
    %c0_i32_0 = arith.constant 0 : i32
    %c0_i32_1 = arith.constant 0 : i32
    return %c0_i32, %c0_i32_0 : i32, i32
  }
  func.func @transform_5(%arg0: i32) -> (i32, i32) {
    %c0_i32 = arith.constant 0 : i32
    %c0_i32_0 = arith.constant 0 : i32
    %c0_i32_1 = arith.constant 0 : i32
    return %c0_i32, %c0_i32_0 : i32, i32
  }
}

module attributes {stable_mosaic.version = 11 : i64} {
  func.func @_mm_bn_act_kernel(%arg0: i32, %arg1: memref<16x384xbf16, #tpu.memory_space<vmem>>, %arg2: memref<384x128xbf16, #tpu.memory_space<vmem>>, %arg3: memref<1x128xf32, #tpu.memory_space<vmem>>, %arg4: memref<1x128xf32, #tpu.memory_space<vmem>>, %arg5: memref<16x128xbf16, #tpu.memory_space<vmem>>, %arg6: memref<16x128xf32, #tpu.memory_space<vmem>>) attributes {dimension_semantics = [#tpu.dimension_semantics<arbitrary>], iteration_bounds = array<i64: 3>, scalar_prefetch = 0 : i64, scratch_operands = 1 : i64, tpu.core_type = #tpu.core_type<tc>, window_params = [{transform_indices = @transform_0, window_bounds = array<i64: 16, 384>}, {transform_indices = @transform_1, window_bounds = array<i64: 384, 128>}, {pipeline_mode = #tpu.pipeline_mode<synchronous>, transform_indices = @transform_2, window_bounds = array<i64: 1, 128>}, {pipeline_mode = #tpu.pipeline_mode<synchronous>, transform_indices = @transform_3, window_bounds = array<i64: 1, 128>}, {pipeline_mode = #tpu.pipeline_mode<synchronous>, transform_indices = @transform_4, window_bounds = array<i64: 16, 128>}]} {
    %c0_i32 = arith.constant 0 : i32
    %0 = arith.cmpi eq, %arg0, %c0_i32 : i32
    %1 = arith.extui %0 : i1 to i32
    %c0_i32_0 = arith.constant 0 : i32
    %2 = arith.cmpi ne, %1, %c0_i32_0 : i32
    scf.if %2 {
      %cst_9 = arith.constant 0.000000e+00 : f32
      %12 = vector.broadcast %cst_9 : f32 to vector<16x128xf32>
      %c0_10 = arith.constant 0 : index
      %c0_11 = arith.constant 0 : index
      %13 = vector.load %arg6[%c0_10, %c0_11] : memref<16x128xf32, #tpu.memory_space<vmem>>, vector<16x128xf32>
      tpu.vector_store %arg6[%c0_10, %c0_11], %12 {strides = array<i32>} : memref<16x128xf32, #tpu.memory_space<vmem>>, vector<16x128xf32>,
    } else {
    }
    %c0 = arith.constant 0 : index
    %c0_1 = arith.constant 0 : index
    %3 = vector.load %arg6[%c0, %c0_1] : memref<16x128xf32, #tpu.memory_space<vmem>>, vector<16x128xf32>
    %c0_2 = arith.constant 0 : index
    %c0_3 = arith.constant 0 : index
    %4 = vector.load %arg1[%c0_2, %c0_3] : memref<16x384xbf16, #tpu.memory_space<vmem>>, vector<16x384xbf16>
    %c0_4 = arith.constant 0 : index
    %c0_5 = arith.constant 0 : index
    %5 = vector.load %arg2[%c0_4, %c0_5] : memref<384x128xbf16, #tpu.memory_space<vmem>>, vector<384x128xbf16>
    %cst = arith.constant dense<0.000000e+00> : vector<16x128xf32>
    %6 = tpu.matmul %4, %5, %cst {dimension_numbers = #tpu.dot_dimension_numbers<[1], [0], [0], [1], [0, 0, 1, 1], [], []>} : vector<16x384xbf16>, vector<384x128xbf16>, vector<16x128xf32> -> vector<16x128xf32>
    %7 = arith.addf %3, %6 : vector<16x128xf32>
    %c0_6 = arith.constant 0 : index
    %c0_7 = arith.constant 0 : index
    %8 = vector.load %arg6[%c0_6, %c0_7] : memref<16x128xf32, #tpu.memory_space<vmem>>, vector<16x128xf32>
    tpu.vector_store %arg6[%c0_6, %c0_7], %7 {strides = array<i32>} : memref<16x128xf32, #tpu.memory_space<vmem>>, vector<16x128xf32>,
    %c2_i32 = arith.constant 2 : i32
    %9 = arith.cmpi eq, %arg0, %c2_i32 : i32
    %10 = arith.extui %9 : i1 to i32
    %c0_i32_8 = arith.constant 0 : i32
    %11 = arith.cmpi ne, %10, %c0_i32_8 : i32
    scf.if %11 {
      %c0_9 = arith.constant 0 : index
      %c0_10 = arith.constant 0 : index
      %12 = vector.load %arg6[%c0_9, %c0_10] : memref<16x128xf32, #tpu.memory_space<vmem>>, vector<16x128xf32>
      %c0_11 = arith.constant 0 : index
      %c0_12 = arith.constant 0 : index
      %13 = vector.load %arg3[%c0_11, %c0_12] : memref<1x128xf32, #tpu.memory_space<vmem>>, vector<1x128xf32>
      %14 = vector.broadcast %13 : vector<1x128xf32> to vector<16x128xf32>
      %15 = arith.mulf %12, %14 : vector<16x128xf32>
      %c0_13 = arith.constant 0 : index
      %c0_14 = arith.constant 0 : index
      %16 = vector.load %arg4[%c0_13, %c0_14] : memref<1x128xf32, #tpu.memory_space<vmem>>, vector<1x128xf32>
      %17 = vector.broadcast %16 : vector<1x128xf32> to vector<16x128xf32>
      %18 = arith.addf %15, %17 : vector<16x128xf32>
      %cst_15 = arith.constant 0.000000e+00 : f32
      %19 = vector.broadcast %cst_15 : f32 to vector<16x128xf32>
      %20 = arith.maximumf %18, %19 : vector<16x128xf32>
      %21 = arith.truncf %20 : vector<16x128xf32> to vector<16x128xbf16>
      %c0_16 = arith.constant 0 : index
      %c0_17 = arith.constant 0 : index
      %22 = vector.load %arg5[%c0_16, %c0_17] : memref<16x128xbf16, #tpu.memory_space<vmem>>, vector<16x128xbf16>
      tpu.vector_store %arg5[%c0_16, %c0_17], %21 {strides = array<i32>} : memref<16x128xbf16, #tpu.memory_space<vmem>>, vector<16x128xbf16>,
    } else {
    }
    return
  }
  func.func @transform_0(%arg0: i32) -> (i32, i32) {
    %c0_i32 = arith.constant 0 : i32
    %c0_i32_0 = arith.constant 0 : i32
    return %c0_i32, %arg0 : i32, i32
  }
  func.func @transform_1(%arg0: i32) -> (i32, i32) {
    %c0_i32 = arith.constant 0 : i32
    %c0_i32_0 = arith.constant 0 : i32
    return %arg0, %c0_i32 : i32, i32
  }
  func.func @transform_2(%arg0: i32) -> (i32, i32) {
    %c0_i32 = arith.constant 0 : i32
    %c0_i32_0 = arith.constant 0 : i32
    %c0_i32_1 = arith.constant 0 : i32
    return %c0_i32, %c0_i32_0 : i32, i32
  }
  func.func @transform_3(%arg0: i32) -> (i32, i32) {
    %c0_i32 = arith.constant 0 : i32
    %c0_i32_0 = arith.constant 0 : i32
    %c0_i32_1 = arith.constant 0 : i32
    return %c0_i32, %c0_i32_0 : i32, i32
  }
  func.func @transform_4(%arg0: i32) -> (i32, i32) {
    %c0_i32 = arith.constant 0 : i32
    %c0_i32_0 = arith.constant 0 : i32
    %c0_i32_1 = arith.constant 0 : i32
    return %c0_i32, %c0_i32_0 : i32, i32
  }
}

module attributes {stable_mosaic.version = 11 : i64} {
  func.func @_mm_bn_act_kernel(%arg0: i32, %arg1: memref<16x384xbf16, #tpu.memory_space<vmem>>, %arg2: memref<384x128xbf16, #tpu.memory_space<vmem>>, %arg3: memref<1x128xf32, #tpu.memory_space<vmem>>, %arg4: memref<1x128xf32, #tpu.memory_space<vmem>>, %arg5: memref<16x128xbf16, #tpu.memory_space<vmem>>, %arg6: memref<16x128xbf16, #tpu.memory_space<vmem>>, %arg7: memref<16x128xf32, #tpu.memory_space<vmem>>) attributes {dimension_semantics = [#tpu.dimension_semantics<arbitrary>], iteration_bounds = array<i64: 3>, scalar_prefetch = 0 : i64, scratch_operands = 1 : i64, tpu.core_type = #tpu.core_type<tc>, window_params = [{transform_indices = @transform_0, window_bounds = array<i64: 16, 384>}, {transform_indices = @transform_1, window_bounds = array<i64: 384, 128>}, {pipeline_mode = #tpu.pipeline_mode<synchronous>, transform_indices = @transform_2, window_bounds = array<i64: 1, 128>}, {pipeline_mode = #tpu.pipeline_mode<synchronous>, transform_indices = @transform_3, window_bounds = array<i64: 1, 128>}, {pipeline_mode = #tpu.pipeline_mode<synchronous>, transform_indices = @transform_4, window_bounds = array<i64: 16, 128>}, {pipeline_mode = #tpu.pipeline_mode<synchronous>, transform_indices = @transform_5, window_bounds = array<i64: 16, 128>}]} {
    %c0_i32 = arith.constant 0 : i32
    %0 = arith.cmpi eq, %arg0, %c0_i32 : i32
    %1 = arith.extui %0 : i1 to i32
    %c0_i32_0 = arith.constant 0 : i32
    %2 = arith.cmpi ne, %1, %c0_i32_0 : i32
    scf.if %2 {
      %cst_9 = arith.constant 0.000000e+00 : f32
      %12 = vector.broadcast %cst_9 : f32 to vector<16x128xf32>
      %c0_10 = arith.constant 0 : index
      %c0_11 = arith.constant 0 : index
      %13 = vector.load %arg7[%c0_10, %c0_11] : memref<16x128xf32, #tpu.memory_space<vmem>>, vector<16x128xf32>
      tpu.vector_store %arg7[%c0_10, %c0_11], %12 {strides = array<i32>} : memref<16x128xf32, #tpu.memory_space<vmem>>, vector<16x128xf32>,
    } else {
    }
    %c0 = arith.constant 0 : index
    %c0_1 = arith.constant 0 : index
    %3 = vector.load %arg7[%c0, %c0_1] : memref<16x128xf32, #tpu.memory_space<vmem>>, vector<16x128xf32>
    %c0_2 = arith.constant 0 : index
    %c0_3 = arith.constant 0 : index
    %4 = vector.load %arg1[%c0_2, %c0_3] : memref<16x384xbf16, #tpu.memory_space<vmem>>, vector<16x384xbf16>
    %c0_4 = arith.constant 0 : index
    %c0_5 = arith.constant 0 : index
    %5 = vector.load %arg2[%c0_4, %c0_5] : memref<384x128xbf16, #tpu.memory_space<vmem>>, vector<384x128xbf16>
    %cst = arith.constant dense<0.000000e+00> : vector<16x128xf32>
    %6 = tpu.matmul %4, %5, %cst {dimension_numbers = #tpu.dot_dimension_numbers<[1], [0], [0], [1], [0, 0, 1, 1], [], []>} : vector<16x384xbf16>, vector<384x128xbf16>, vector<16x128xf32> -> vector<16x128xf32>
    %7 = arith.addf %3, %6 : vector<16x128xf32>
    %c0_6 = arith.constant 0 : index
    %c0_7 = arith.constant 0 : index
    %8 = vector.load %arg7[%c0_6, %c0_7] : memref<16x128xf32, #tpu.memory_space<vmem>>, vector<16x128xf32>
    tpu.vector_store %arg7[%c0_6, %c0_7], %7 {strides = array<i32>} : memref<16x128xf32, #tpu.memory_space<vmem>>, vector<16x128xf32>,
    %c2_i32 = arith.constant 2 : i32
    %9 = arith.cmpi eq, %arg0, %c2_i32 : i32
    %10 = arith.extui %9 : i1 to i32
    %c0_i32_8 = arith.constant 0 : i32
    %11 = arith.cmpi ne, %10, %c0_i32_8 : i32
    scf.if %11 {
      %c0_9 = arith.constant 0 : index
      %c0_10 = arith.constant 0 : index
      %12 = vector.load %arg7[%c0_9, %c0_10] : memref<16x128xf32, #tpu.memory_space<vmem>>, vector<16x128xf32>
      %c0_11 = arith.constant 0 : index
      %c0_12 = arith.constant 0 : index
      %13 = vector.load %arg3[%c0_11, %c0_12] : memref<1x128xf32, #tpu.memory_space<vmem>>, vector<1x128xf32>
      %14 = vector.broadcast %13 : vector<1x128xf32> to vector<16x128xf32>
      %15 = arith.mulf %12, %14 : vector<16x128xf32>
      %c0_13 = arith.constant 0 : index
      %c0_14 = arith.constant 0 : index
      %16 = vector.load %arg4[%c0_13, %c0_14] : memref<1x128xf32, #tpu.memory_space<vmem>>, vector<1x128xf32>
      %17 = vector.broadcast %16 : vector<1x128xf32> to vector<16x128xf32>
      %18 = arith.addf %15, %17 : vector<16x128xf32>
      %c0_15 = arith.constant 0 : index
      %c0_16 = arith.constant 0 : index
      %19 = vector.load %arg5[%c0_15, %c0_16] : memref<16x128xbf16, #tpu.memory_space<vmem>>, vector<16x128xbf16>
      %20 = arith.extf %19 : vector<16x128xbf16> to vector<16x128xf32>
      %21 = arith.addf %18, %20 : vector<16x128xf32>
      %cst_17 = arith.constant 0.000000e+00 : f32
      %22 = vector.broadcast %cst_17 : f32 to vector<16x128xf32>
      %23 = arith.maximumf %21, %22 : vector<16x128xf32>
      %24 = arith.truncf %23 : vector<16x128xf32> to vector<16x128xbf16>
      %c0_18 = arith.constant 0 : index
      %c0_19 = arith.constant 0 : index
      %25 = vector.load %arg6[%c0_18, %c0_19] : memref<16x128xbf16, #tpu.memory_space<vmem>>, vector<16x128xbf16>
      tpu.vector_store %arg6[%c0_18, %c0_19], %24 {strides = array<i32>} : memref<16x128xbf16, #tpu.memory_space<vmem>>, vector<16x128xbf16>,
    } else {
    }
    return
  }
  func.func @transform_0(%arg0: i32) -> (i32, i32) {
    %c0_i32 = arith.constant 0 : i32
    %c0_i32_0 = arith.constant 0 : i32
    return %c0_i32, %arg0 : i32, i32
  }
  func.func @transform_1(%arg0: i32) -> (i32, i32) {
    %c0_i32 = arith.constant 0 : i32
    %c0_i32_0 = arith.constant 0 : i32
    return %arg0, %c0_i32 : i32, i32
  }
  func.func @transform_2(%arg0: i32) -> (i32, i32) {
    %c0_i32 = arith.constant 0 : i32
    %c0_i32_0 = arith.constant 0 : i32
    %c0_i32_1 = arith.constant 0 : i32
    return %c0_i32, %c0_i32_0 : i32, i32
  }
  func.func @transform_3(%arg0: i32) -> (i32, i32) {
    %c0_i32 = arith.constant 0 : i32
    %c0_i32_0 = arith.constant 0 : i32
    %c0_i32_1 = arith.constant 0 : i32
    return %c0_i32, %c0_i32_0 : i32, i32
  }
  func.func @transform_4(%arg0: i32) -> (i32, i32) {
    %c0_i32 = arith.constant 0 : i32
    %c0_i32_0 = arith.constant 0 : i32
    %c0_i32_1 = arith.constant 0 : i32
    return %c0_i32, %c0_i32_0 : i32, i32
  }
  func.func @transform_5(%arg0: i32) -> (i32, i32) {
    %c0_i32 = arith.constant 0 : i32
    %c0_i32_0 = arith.constant 0 : i32
    %c0_i32_1 = arith.constant 0 : i32
    return %c0_i32, %c0_i32_0 : i32, i32
  }
}

module attributes {stable_mosaic.version = 11 : i64} {
  func.func @_mm_bn_act_kernel(%arg0: i32, %arg1: memref<16x128xbf16, #tpu.memory_space<vmem>>, %arg2: memref<128x128xbf16, #tpu.memory_space<vmem>>, %arg3: memref<1x128xf32, #tpu.memory_space<vmem>>, %arg4: memref<1x128xf32, #tpu.memory_space<vmem>>, %arg5: memref<16x128xbf16, #tpu.memory_space<vmem>>, %arg6: memref<16x128xf32, #tpu.memory_space<vmem>>) attributes {dimension_semantics = [#tpu.dimension_semantics<arbitrary>], iteration_bounds = array<i64: 1>, scalar_prefetch = 0 : i64, scratch_operands = 1 : i64, tpu.core_type = #tpu.core_type<tc>, window_params = [{transform_indices = @transform_0, window_bounds = array<i64: 16, 128>}, {transform_indices = @transform_1, window_bounds = array<i64: 128, 128>}, {pipeline_mode = #tpu.pipeline_mode<synchronous>, transform_indices = @transform_2, window_bounds = array<i64: 1, 128>}, {pipeline_mode = #tpu.pipeline_mode<synchronous>, transform_indices = @transform_3, window_bounds = array<i64: 1, 128>}, {pipeline_mode = #tpu.pipeline_mode<synchronous>, transform_indices = @transform_4, window_bounds = array<i64: 16, 128>}]} {
    %c0_i32 = arith.constant 0 : i32
    %0 = arith.cmpi eq, %arg0, %c0_i32 : i32
    %1 = arith.extui %0 : i1 to i32
    %c0_i32_0 = arith.constant 0 : i32
    %2 = arith.cmpi ne, %1, %c0_i32_0 : i32
    scf.if %2 {
      %cst_10 = arith.constant 0.000000e+00 : f32
      %12 = vector.broadcast %cst_10 : f32 to vector<16x128xf32>
      %c0_11 = arith.constant 0 : index
      %c0_12 = arith.constant 0 : index
      %13 = vector.load %arg6[%c0_11, %c0_12] : memref<16x128xf32, #tpu.memory_space<vmem>>, vector<16x128xf32>
      tpu.vector_store %arg6[%c0_11, %c0_12], %12 {strides = array<i32>} : memref<16x128xf32, #tpu.memory_space<vmem>>, vector<16x128xf32>,
    } else {
    }
    %c0 = arith.constant 0 : index
    %c0_1 = arith.constant 0 : index
    %3 = vector.load %arg6[%c0, %c0_1] : memref<16x128xf32, #tpu.memory_space<vmem>>, vector<16x128xf32>
    %c0_2 = arith.constant 0 : index
    %c0_3 = arith.constant 0 : index
    %4 = vector.load %arg1[%c0_2, %c0_3] : memref<16x128xbf16, #tpu.memory_space<vmem>>, vector<16x128xbf16>
    %c0_4 = arith.constant 0 : index
    %c0_5 = arith.constant 0 : index
    %5 = vector.load %arg2[%c0_4, %c0_5] : memref<128x128xbf16, #tpu.memory_space<vmem>>, vector<128x128xbf16>
    %cst = arith.constant dense<0.000000e+00> : vector<16x128xf32>
    %6 = tpu.matmul %4, %5, %cst {dimension_numbers = #tpu.dot_dimension_numbers<[1], [0], [0], [1], [0, 0, 1, 1], [], []>} : vector<16x128xbf16>, vector<128x128xbf16>, vector<16x128xf32> -> vector<16x128xf32>
    %7 = arith.addf %3, %6 : vector<16x128xf32>
    %c0_6 = arith.constant 0 : index
    %c0_7 = arith.constant 0 : index
    %8 = vector.load %arg6[%c0_6, %c0_7] : memref<16x128xf32, #tpu.memory_space<vmem>>, vector<16x128xf32>
    tpu.vector_store %arg6[%c0_6, %c0_7], %7 {strides = array<i32>} : memref<16x128xf32, #tpu.memory_space<vmem>>, vector<16x128xf32>,
    %c0_i32_8 = arith.constant 0 : i32
    %9 = arith.cmpi eq, %arg0, %c0_i32_8 : i32
    %10 = arith.extui %9 : i1 to i32
    %c0_i32_9 = arith.constant 0 : i32
    %11 = arith.cmpi ne, %10, %c0_i32_9 : i32
    scf.if %11 {
      %c0_10 = arith.constant 0 : index
      %c0_11 = arith.constant 0 : index
      %12 = vector.load %arg6[%c0_10, %c0_11] : memref<16x128xf32, #tpu.memory_space<vmem>>, vector<16x128xf32>
      %c0_12 = arith.constant 0 : index
      %c0_13 = arith.constant 0 : index
      %13 = vector.load %arg3[%c0_12, %c0_13] : memref<1x128xf32, #tpu.memory_space<vmem>>, vector<1x128xf32>
      %14 = vector.broadcast %13 : vector<1x128xf32> to vector<16x128xf32>
      %15 = arith.mulf %12, %14 : vector<16x128xf32>
      %c0_14 = arith.constant 0 : index
      %c0_15 = arith.constant 0 : index
      %16 = vector.load %arg4[%c0_14, %c0_15] : memref<1x128xf32, #tpu.memory_space<vmem>>, vector<1x128xf32>
      %17 = vector.broadcast %16 : vector<1x128xf32> to vector<16x128xf32>
      %18 = arith.addf %15, %17 : vector<16x128xf32>
      %19 = arith.truncf %18 : vector<16x128xf32> to vector<16x128xbf16>
      %c0_16 = arith.constant 0 : index
      %c0_17 = arith.constant 0 : index
      %20 = vector.load %arg5[%c0_16, %c0_17] : memref<16x128xbf16, #tpu.memory_space<vmem>>, vector<16x128xbf16>
      tpu.vector_store %arg5[%c0_16, %c0_17], %19 {strides = array<i32>} : memref<16x128xbf16, #tpu.memory_space<vmem>>, vector<16x128xbf16>,
    } else {
    }
    return
  }
  func.func @transform_0(%arg0: i32) -> (i32, i32) {
    %c0_i32 = arith.constant 0 : i32
    %c0_i32_0 = arith.constant 0 : i32
    return %c0_i32, %arg0 : i32, i32
  }
  func.func @transform_1(%arg0: i32) -> (i32, i32) {
    %c0_i32 = arith.constant 0 : i32
    %c0_i32_0 = arith.constant 0 : i32
    return %arg0, %c0_i32 : i32, i32
  }
  func.func @transform_2(%arg0: i32) -> (i32, i32) {
    %c0_i32 = arith.constant 0 : i32
    %c0_i32_0 = arith.constant 0 : i32
    %c0_i32_1 = arith.constant 0 : i32
    return %c0_i32, %c0_i32_0 : i32, i32
  }
  func.func @transform_3(%arg0: i32) -> (i32, i32) {
    %c0_i32 = arith.constant 0 : i32
    %c0_i32_0 = arith.constant 0 : i32
    %c0_i32_1 = arith.constant 0 : i32
    return %c0_i32, %c0_i32_0 : i32, i32
  }
  func.func @transform_4(%arg0: i32) -> (i32, i32) {
    %c0_i32 = arith.constant 0 : i32
    %c0_i32_0 = arith.constant 0 : i32
    %c0_i32_1 = arith.constant 0 : i32
    return %c0_i32, %c0_i32_0 : i32, i32
  }
}

module attributes {stable_mosaic.version = 11 : i64} {
  func.func @_mm_bn_act_kernel(%arg0: i32, %arg1: memref<8x384xbf16, #tpu.memory_space<vmem>>, %arg2: memref<384x256xbf16, #tpu.memory_space<vmem>>, %arg3: memref<1x256xf32, #tpu.memory_space<vmem>>, %arg4: memref<1x256xf32, #tpu.memory_space<vmem>>, %arg5: memref<8x256xbf16, #tpu.memory_space<vmem>>, %arg6: memref<8x256xf32, #tpu.memory_space<vmem>>) attributes {dimension_semantics = [#tpu.dimension_semantics<arbitrary>], iteration_bounds = array<i64: 3>, scalar_prefetch = 0 : i64, scratch_operands = 1 : i64, tpu.core_type = #tpu.core_type<tc>, window_params = [{transform_indices = @transform_0, window_bounds = array<i64: 8, 384>}, {transform_indices = @transform_1, window_bounds = array<i64: 384, 256>}, {pipeline_mode = #tpu.pipeline_mode<synchronous>, transform_indices = @transform_2, window_bounds = array<i64: 1, 256>}, {pipeline_mode = #tpu.pipeline_mode<synchronous>, transform_indices = @transform_3, window_bounds = array<i64: 1, 256>}, {pipeline_mode = #tpu.pipeline_mode<synchronous>, transform_indices = @transform_4, window_bounds = array<i64: 8, 256>}]} {
    %c0_i32 = arith.constant 0 : i32
    %0 = arith.cmpi eq, %arg0, %c0_i32 : i32
    %1 = arith.extui %0 : i1 to i32
    %c0_i32_0 = arith.constant 0 : i32
    %2 = arith.cmpi ne, %1, %c0_i32_0 : i32
    scf.if %2 {
      %cst_9 = arith.constant 0.000000e+00 : f32
      %12 = vector.broadcast %cst_9 : f32 to vector<8x256xf32>
      %c0_10 = arith.constant 0 : index
      %c0_11 = arith.constant 0 : index
      %13 = vector.load %arg6[%c0_10, %c0_11] : memref<8x256xf32, #tpu.memory_space<vmem>>, vector<8x256xf32>
      tpu.vector_store %arg6[%c0_10, %c0_11], %12 {strides = array<i32>} : memref<8x256xf32, #tpu.memory_space<vmem>>, vector<8x256xf32>,
    } else {
    }
    %c0 = arith.constant 0 : index
    %c0_1 = arith.constant 0 : index
    %3 = vector.load %arg6[%c0, %c0_1] : memref<8x256xf32, #tpu.memory_space<vmem>>, vector<8x256xf32>
    %c0_2 = arith.constant 0 : index
    %c0_3 = arith.constant 0 : index
    %4 = vector.load %arg1[%c0_2, %c0_3] : memref<8x384xbf16, #tpu.memory_space<vmem>>, vector<8x384xbf16>
    %c0_4 = arith.constant 0 : index
    %c0_5 = arith.constant 0 : index
    %5 = vector.load %arg2[%c0_4, %c0_5] : memref<384x256xbf16, #tpu.memory_space<vmem>>, vector<384x256xbf16>
    %cst = arith.constant dense<0.000000e+00> : vector<8x256xf32>
    %6 = tpu.matmul %4, %5, %cst {dimension_numbers = #tpu.dot_dimension_numbers<[1], [0], [0], [1], [0, 0, 1, 1], [], []>} : vector<8x384xbf16>, vector<384x256xbf16>, vector<8x256xf32> -> vector<8x256xf32>
    %7 = arith.addf %3, %6 : vector<8x256xf32>
    %c0_6 = arith.constant 0 : index
    %c0_7 = arith.constant 0 : index
    %8 = vector.load %arg6[%c0_6, %c0_7] : memref<8x256xf32, #tpu.memory_space<vmem>>, vector<8x256xf32>
    tpu.vector_store %arg6[%c0_6, %c0_7], %7 {strides = array<i32>} : memref<8x256xf32, #tpu.memory_space<vmem>>, vector<8x256xf32>,
    %c2_i32 = arith.constant 2 : i32
    %9 = arith.cmpi eq, %arg0, %c2_i32 : i32
    %10 = arith.extui %9 : i1 to i32
    %c0_i32_8 = arith.constant 0 : i32
    %11 = arith.cmpi ne, %10, %c0_i32_8 : i32
    scf.if %11 {
      %c0_9 = arith.constant 0 : index
      %c0_10 = arith.constant 0 : index
      %12 = vector.load %arg6[%c0_9, %c0_10] : memref<8x256xf32, #tpu.memory_space<vmem>>, vector<8x256xf32>
      %c0_11 = arith.constant 0 : index
      %c0_12 = arith.constant 0 : index
      %13 = vector.load %arg3[%c0_11, %c0_12] : memref<1x256xf32, #tpu.memory_space<vmem>>, vector<1x256xf32>
      %14 = vector.broadcast %13 : vector<1x256xf32> to vector<8x256xf32>
      %15 = arith.mulf %12, %14 : vector<8x256xf32>
      %c0_13 = arith.constant 0 : index
      %c0_14 = arith.constant 0 : index
      %16 = vector.load %arg4[%c0_13, %c0_14] : memref<1x256xf32, #tpu.memory_space<vmem>>, vector<1x256xf32>
      %17 = vector.broadcast %16 : vector<1x256xf32> to vector<8x256xf32>
      %18 = arith.addf %15, %17 : vector<8x256xf32>
      %cst_15 = arith.constant 0.000000e+00 : f32
      %19 = vector.broadcast %cst_15 : f32 to vector<8x256xf32>
      %20 = arith.maximumf %18, %19 : vector<8x256xf32>
      %21 = arith.truncf %20 : vector<8x256xf32> to vector<8x256xbf16>
      %c0_16 = arith.constant 0 : index
      %c0_17 = arith.constant 0 : index
      %22 = vector.load %arg5[%c0_16, %c0_17] : memref<8x256xbf16, #tpu.memory_space<vmem>>, vector<8x256xbf16>
      tpu.vector_store %arg5[%c0_16, %c0_17], %21 {strides = array<i32>} : memref<8x256xbf16, #tpu.memory_space<vmem>>, vector<8x256xbf16>,
    } else {
    }
    return
  }
  func.func @transform_0(%arg0: i32) -> (i32, i32) {
    %c0_i32 = arith.constant 0 : i32
    %c0_i32_0 = arith.constant 0 : i32
    return %c0_i32, %arg0 : i32, i32
  }
  func.func @transform_1(%arg0: i32) -> (i32, i32) {
    %c0_i32 = arith.constant 0 : i32
    %c0_i32_0 = arith.constant 0 : i32
    return %arg0, %c0_i32 : i32, i32
  }
  func.func @transform_2(%arg0: i32) -> (i32, i32) {
    %c0_i32 = arith.constant 0 : i32
    %c0_i32_0 = arith.constant 0 : i32
    %c0_i32_1 = arith.constant 0 : i32
    return %c0_i32, %c0_i32_0 : i32, i32
  }
  func.func @transform_3(%arg0: i32) -> (i32, i32) {
    %c0_i32 = arith.constant 0 : i32
    %c0_i32_0 = arith.constant 0 : i32
    %c0_i32_1 = arith.constant 0 : i32
    return %c0_i32, %c0_i32_0 : i32, i32
  }
  func.func @transform_4(%arg0: i32) -> (i32, i32) {
    %c0_i32 = arith.constant 0 : i32
    %c0_i32_0 = arith.constant 0 : i32
    %c0_i32_1 = arith.constant 0 : i32
    return %c0_i32, %c0_i32_0 : i32, i32
  }
}

module attributes {stable_mosaic.version = 11 : i64} {
  func.func @_mm_bn_act_kernel(%arg0: i32, %arg1: memref<8x128xbf16, #tpu.memory_space<vmem>>, %arg2: memref<128x256xbf16, #tpu.memory_space<vmem>>, %arg3: memref<1x256xf32, #tpu.memory_space<vmem>>, %arg4: memref<1x256xf32, #tpu.memory_space<vmem>>, %arg5: memref<8x256xbf16, #tpu.memory_space<vmem>>, %arg6: memref<8x256xf32, #tpu.memory_space<vmem>>) attributes {dimension_semantics = [#tpu.dimension_semantics<arbitrary>], iteration_bounds = array<i64: 1>, scalar_prefetch = 0 : i64, scratch_operands = 1 : i64, tpu.core_type = #tpu.core_type<tc>, window_params = [{transform_indices = @transform_0, window_bounds = array<i64: 8, 128>}, {transform_indices = @transform_1, window_bounds = array<i64: 128, 256>}, {pipeline_mode = #tpu.pipeline_mode<synchronous>, transform_indices = @transform_2, window_bounds = array<i64: 1, 256>}, {pipeline_mode = #tpu.pipeline_mode<synchronous>, transform_indices = @transform_3, window_bounds = array<i64: 1, 256>}, {pipeline_mode = #tpu.pipeline_mode<synchronous>, transform_indices = @transform_4, window_bounds = array<i64: 8, 256>}]} {
    %c0_i32 = arith.constant 0 : i32
    %0 = arith.cmpi eq, %arg0, %c0_i32 : i32
    %1 = arith.extui %0 : i1 to i32
    %c0_i32_0 = arith.constant 0 : i32
    %2 = arith.cmpi ne, %1, %c0_i32_0 : i32
    scf.if %2 {
      %cst_10 = arith.constant 0.000000e+00 : f32
      %12 = vector.broadcast %cst_10 : f32 to vector<8x256xf32>
      %c0_11 = arith.constant 0 : index
      %c0_12 = arith.constant 0 : index
      %13 = vector.load %arg6[%c0_11, %c0_12] : memref<8x256xf32, #tpu.memory_space<vmem>>, vector<8x256xf32>
      tpu.vector_store %arg6[%c0_11, %c0_12], %12 {strides = array<i32>} : memref<8x256xf32, #tpu.memory_space<vmem>>, vector<8x256xf32>,
    } else {
    }
    %c0 = arith.constant 0 : index
    %c0_1 = arith.constant 0 : index
    %3 = vector.load %arg6[%c0, %c0_1] : memref<8x256xf32, #tpu.memory_space<vmem>>, vector<8x256xf32>
    %c0_2 = arith.constant 0 : index
    %c0_3 = arith.constant 0 : index
    %4 = vector.load %arg1[%c0_2, %c0_3] : memref<8x128xbf16, #tpu.memory_space<vmem>>, vector<8x128xbf16>
    %c0_4 = arith.constant 0 : index
    %c0_5 = arith.constant 0 : index
    %5 = vector.load %arg2[%c0_4, %c0_5] : memref<128x256xbf16, #tpu.memory_space<vmem>>, vector<128x256xbf16>
    %cst = arith.constant dense<0.000000e+00> : vector<8x256xf32>
    %6 = tpu.matmul %4, %5, %cst {dimension_numbers = #tpu.dot_dimension_numbers<[1], [0], [0], [1], [0, 0, 1, 1], [], []>} : vector<8x128xbf16>, vector<128x256xbf16>, vector<8x256xf32> -> vector<8x256xf32>
    %7 = arith.addf %3, %6 : vector<8x256xf32>
    %c0_6 = arith.constant 0 : index
    %c0_7 = arith.constant 0 : index
    %8 = vector.load %arg6[%c0_6, %c0_7] : memref<8x256xf32, #tpu.memory_space<vmem>>, vector<8x256xf32>
    tpu.vector_store %arg6[%c0_6, %c0_7], %7 {strides = array<i32>} : memref<8x256xf32, #tpu.memory_space<vmem>>, vector<8x256xf32>,
    %c0_i32_8 = arith.constant 0 : i32
    %9 = arith.cmpi eq, %arg0, %c0_i32_8 : i32
    %10 = arith.extui %9 : i1 to i32
    %c0_i32_9 = arith.constant 0 : i32
    %11 = arith.cmpi ne, %10, %c0_i32_9 : i32
    scf.if %11 {
      %c0_10 = arith.constant 0 : index
      %c0_11 = arith.constant 0 : index
      %12 = vector.load %arg6[%c0_10, %c0_11] : memref<8x256xf32, #tpu.memory_space<vmem>>, vector<8x256xf32>
      %c0_12 = arith.constant 0 : index
      %c0_13 = arith.constant 0 : index
      %13 = vector.load %arg3[%c0_12, %c0_13] : memref<1x256xf32, #tpu.memory_space<vmem>>, vector<1x256xf32>
      %14 = vector.broadcast %13 : vector<1x256xf32> to vector<8x256xf32>
      %15 = arith.mulf %12, %14 : vector<8x256xf32>
      %c0_14 = arith.constant 0 : index
      %c0_15 = arith.constant 0 : index
      %16 = vector.load %arg4[%c0_14, %c0_15] : memref<1x256xf32, #tpu.memory_space<vmem>>, vector<1x256xf32>
      %17 = vector.broadcast %16 : vector<1x256xf32> to vector<8x256xf32>
      %18 = arith.addf %15, %17 : vector<8x256xf32>
      %19 = arith.truncf %18 : vector<8x256xf32> to vector<8x256xbf16>
      %c0_16 = arith.constant 0 : index
      %c0_17 = arith.constant 0 : index
      %20 = vector.load %arg5[%c0_16, %c0_17] : memref<8x256xbf16, #tpu.memory_space<vmem>>, vector<8x256xbf16>
      tpu.vector_store %arg5[%c0_16, %c0_17], %19 {strides = array<i32>} : memref<8x256xbf16, #tpu.memory_space<vmem>>, vector<8x256xbf16>,
    } else {
    }
    return
  }
  func.func @transform_0(%arg0: i32) -> (i32, i32) {
    %c0_i32 = arith.constant 0 : i32
    %c0_i32_0 = arith.constant 0 : i32
    return %c0_i32, %arg0 : i32, i32
  }
  func.func @transform_1(%arg0: i32) -> (i32, i32) {
    %c0_i32 = arith.constant 0 : i32
    %c0_i32_0 = arith.constant 0 : i32
    return %arg0, %c0_i32 : i32, i32
  }
  func.func @transform_2(%arg0: i32) -> (i32, i32) {
    %c0_i32 = arith.constant 0 : i32
    %c0_i32_0 = arith.constant 0 : i32
    %c0_i32_1 = arith.constant 0 : i32
    return %c0_i32, %c0_i32_0 : i32, i32
  }
  func.func @transform_3(%arg0: i32) -> (i32, i32) {
    %c0_i32 = arith.constant 0 : i32
    %c0_i32_0 = arith.constant 0 : i32
    %c0_i32_1 = arith.constant 0 : i32
    return %c0_i32, %c0_i32_0 : i32, i32
  }
  func.func @transform_4(%arg0: i32) -> (i32, i32) {
    %c0_i32 = arith.constant 0 : i32
    %c0_i32_0 = arith.constant 0 : i32
    %c0_i32_1 = arith.constant 0 : i32
    return %c0_i32, %c0_i32_0 : i32, i32
  }
}

module attributes {stable_mosaic.version = 11 : i64} {
  func.func @_mm_bn_act_kernel(%arg0: i32, %arg1: memref<8x768xbf16, #tpu.memory_space<vmem>>, %arg2: memref<768x256xbf16, #tpu.memory_space<vmem>>, %arg3: memref<1x256xf32, #tpu.memory_space<vmem>>, %arg4: memref<1x256xf32, #tpu.memory_space<vmem>>, %arg5: memref<8x256xbf16, #tpu.memory_space<vmem>>, %arg6: memref<8x256xf32, #tpu.memory_space<vmem>>) attributes {dimension_semantics = [#tpu.dimension_semantics<arbitrary>], iteration_bounds = array<i64: 3>, scalar_prefetch = 0 : i64, scratch_operands = 1 : i64, tpu.core_type = #tpu.core_type<tc>, window_params = [{transform_indices = @transform_0, window_bounds = array<i64: 8, 768>}, {transform_indices = @transform_1, window_bounds = array<i64: 768, 256>}, {pipeline_mode = #tpu.pipeline_mode<synchronous>, transform_indices = @transform_2, window_bounds = array<i64: 1, 256>}, {pipeline_mode = #tpu.pipeline_mode<synchronous>, transform_indices = @transform_3, window_bounds = array<i64: 1, 256>}, {pipeline_mode = #tpu.pipeline_mode<synchronous>, transform_indices = @transform_4, window_bounds = array<i64: 8, 256>}]} {
    %c0_i32 = arith.constant 0 : i32
    %0 = arith.cmpi eq, %arg0, %c0_i32 : i32
    %1 = arith.extui %0 : i1 to i32
    %c0_i32_0 = arith.constant 0 : i32
    %2 = arith.cmpi ne, %1, %c0_i32_0 : i32
    scf.if %2 {
      %cst_9 = arith.constant 0.000000e+00 : f32
      %12 = vector.broadcast %cst_9 : f32 to vector<8x256xf32>
      %c0_10 = arith.constant 0 : index
      %c0_11 = arith.constant 0 : index
      %13 = vector.load %arg6[%c0_10, %c0_11] : memref<8x256xf32, #tpu.memory_space<vmem>>, vector<8x256xf32>
      tpu.vector_store %arg6[%c0_10, %c0_11], %12 {strides = array<i32>} : memref<8x256xf32, #tpu.memory_space<vmem>>, vector<8x256xf32>,
    } else {
    }
    %c0 = arith.constant 0 : index
    %c0_1 = arith.constant 0 : index
    %3 = vector.load %arg6[%c0, %c0_1] : memref<8x256xf32, #tpu.memory_space<vmem>>, vector<8x256xf32>
    %c0_2 = arith.constant 0 : index
    %c0_3 = arith.constant 0 : index
    %4 = vector.load %arg1[%c0_2, %c0_3] : memref<8x768xbf16, #tpu.memory_space<vmem>>, vector<8x768xbf16>
    %c0_4 = arith.constant 0 : index
    %c0_5 = arith.constant 0 : index
    %5 = vector.load %arg2[%c0_4, %c0_5] : memref<768x256xbf16, #tpu.memory_space<vmem>>, vector<768x256xbf16>
    %cst = arith.constant dense<0.000000e+00> : vector<8x256xf32>
    %6 = tpu.matmul %4, %5, %cst {dimension_numbers = #tpu.dot_dimension_numbers<[1], [0], [0], [1], [0, 0, 1, 1], [], []>} : vector<8x768xbf16>, vector<768x256xbf16>, vector<8x256xf32> -> vector<8x256xf32>
    %7 = arith.addf %3, %6 : vector<8x256xf32>
    %c0_6 = arith.constant 0 : index
    %c0_7 = arith.constant 0 : index
    %8 = vector.load %arg6[%c0_6, %c0_7] : memref<8x256xf32, #tpu.memory_space<vmem>>, vector<8x256xf32>
    tpu.vector_store %arg6[%c0_6, %c0_7], %7 {strides = array<i32>} : memref<8x256xf32, #tpu.memory_space<vmem>>, vector<8x256xf32>,
    %c2_i32 = arith.constant 2 : i32
    %9 = arith.cmpi eq, %arg0, %c2_i32 : i32
    %10 = arith.extui %9 : i1 to i32
    %c0_i32_8 = arith.constant 0 : i32
    %11 = arith.cmpi ne, %10, %c0_i32_8 : i32
    scf.if %11 {
      %c0_9 = arith.constant 0 : index
      %c0_10 = arith.constant 0 : index
      %12 = vector.load %arg6[%c0_9, %c0_10] : memref<8x256xf32, #tpu.memory_space<vmem>>, vector<8x256xf32>
      %c0_11 = arith.constant 0 : index
      %c0_12 = arith.constant 0 : index
      %13 = vector.load %arg3[%c0_11, %c0_12] : memref<1x256xf32, #tpu.memory_space<vmem>>, vector<1x256xf32>
      %14 = vector.broadcast %13 : vector<1x256xf32> to vector<8x256xf32>
      %15 = arith.mulf %12, %14 : vector<8x256xf32>
      %c0_13 = arith.constant 0 : index
      %c0_14 = arith.constant 0 : index
      %16 = vector.load %arg4[%c0_13, %c0_14] : memref<1x256xf32, #tpu.memory_space<vmem>>, vector<1x256xf32>
      %17 = vector.broadcast %16 : vector<1x256xf32> to vector<8x256xf32>
      %18 = arith.addf %15, %17 : vector<8x256xf32>
      %cst_15 = arith.constant 0.000000e+00 : f32
      %19 = vector.broadcast %cst_15 : f32 to vector<8x256xf32>
      %20 = arith.maximumf %18, %19 : vector<8x256xf32>
      %21 = arith.truncf %20 : vector<8x256xf32> to vector<8x256xbf16>
      %c0_16 = arith.constant 0 : index
      %c0_17 = arith.constant 0 : index
      %22 = vector.load %arg5[%c0_16, %c0_17] : memref<8x256xbf16, #tpu.memory_space<vmem>>, vector<8x256xbf16>
      tpu.vector_store %arg5[%c0_16, %c0_17], %21 {strides = array<i32>} : memref<8x256xbf16, #tpu.memory_space<vmem>>, vector<8x256xbf16>,
    } else {
    }
    return
  }
  func.func @transform_0(%arg0: i32) -> (i32, i32) {
    %c0_i32 = arith.constant 0 : i32
    %c0_i32_0 = arith.constant 0 : i32
    return %c0_i32, %arg0 : i32, i32
  }
  func.func @transform_1(%arg0: i32) -> (i32, i32) {
    %c0_i32 = arith.constant 0 : i32
    %c0_i32_0 = arith.constant 0 : i32
    return %arg0, %c0_i32 : i32, i32
  }
  func.func @transform_2(%arg0: i32) -> (i32, i32) {
    %c0_i32 = arith.constant 0 : i32
    %c0_i32_0 = arith.constant 0 : i32
    %c0_i32_1 = arith.constant 0 : i32
    return %c0_i32, %c0_i32_0 : i32, i32
  }
  func.func @transform_3(%arg0: i32) -> (i32, i32) {
    %c0_i32 = arith.constant 0 : i32
    %c0_i32_0 = arith.constant 0 : i32
    %c0_i32_1 = arith.constant 0 : i32
    return %c0_i32, %c0_i32_0 : i32, i32
  }
  func.func @transform_4(%arg0: i32) -> (i32, i32) {
    %c0_i32 = arith.constant 0 : i32
    %c0_i32_0 = arith.constant 0 : i32
    %c0_i32_1 = arith.constant 0 : i32
    return %c0_i32, %c0_i32_0 : i32, i32
  }
}

module attributes {stable_mosaic.version = 11 : i64} {
  func.func @_mm_bn_act_kernel(%arg0: i32, %arg1: memref<8x768xbf16, #tpu.memory_space<vmem>>, %arg2: memref<768x256xbf16, #tpu.memory_space<vmem>>, %arg3: memref<1x256xf32, #tpu.memory_space<vmem>>, %arg4: memref<1x256xf32, #tpu.memory_space<vmem>>, %arg5: memref<8x256xbf16, #tpu.memory_space<vmem>>, %arg6: memref<8x256xbf16, #tpu.memory_space<vmem>>, %arg7: memref<8x256xf32, #tpu.memory_space<vmem>>) attributes {dimension_semantics = [#tpu.dimension_semantics<arbitrary>], iteration_bounds = array<i64: 3>, scalar_prefetch = 0 : i64, scratch_operands = 1 : i64, tpu.core_type = #tpu.core_type<tc>, window_params = [{transform_indices = @transform_0, window_bounds = array<i64: 8, 768>}, {transform_indices = @transform_1, window_bounds = array<i64: 768, 256>}, {pipeline_mode = #tpu.pipeline_mode<synchronous>, transform_indices = @transform_2, window_bounds = array<i64: 1, 256>}, {pipeline_mode = #tpu.pipeline_mode<synchronous>, transform_indices = @transform_3, window_bounds = array<i64: 1, 256>}, {pipeline_mode = #tpu.pipeline_mode<synchronous>, transform_indices = @transform_4, window_bounds = array<i64: 8, 256>}, {pipeline_mode = #tpu.pipeline_mode<synchronous>, transform_indices = @transform_5, window_bounds = array<i64: 8, 256>}]} {
    %c0_i32 = arith.constant 0 : i32
    %0 = arith.cmpi eq, %arg0, %c0_i32 : i32
    %1 = arith.extui %0 : i1 to i32
    %c0_i32_0 = arith.constant 0 : i32
    %2 = arith.cmpi ne, %1, %c0_i32_0 : i32
    scf.if %2 {
      %cst_9 = arith.constant 0.000000e+00 : f32
      %12 = vector.broadcast %cst_9 : f32 to vector<8x256xf32>
      %c0_10 = arith.constant 0 : index
      %c0_11 = arith.constant 0 : index
      %13 = vector.load %arg7[%c0_10, %c0_11] : memref<8x256xf32, #tpu.memory_space<vmem>>, vector<8x256xf32>
      tpu.vector_store %arg7[%c0_10, %c0_11], %12 {strides = array<i32>} : memref<8x256xf32, #tpu.memory_space<vmem>>, vector<8x256xf32>,
    } else {
    }
    %c0 = arith.constant 0 : index
    %c0_1 = arith.constant 0 : index
    %3 = vector.load %arg7[%c0, %c0_1] : memref<8x256xf32, #tpu.memory_space<vmem>>, vector<8x256xf32>
    %c0_2 = arith.constant 0 : index
    %c0_3 = arith.constant 0 : index
    %4 = vector.load %arg1[%c0_2, %c0_3] : memref<8x768xbf16, #tpu.memory_space<vmem>>, vector<8x768xbf16>
    %c0_4 = arith.constant 0 : index
    %c0_5 = arith.constant 0 : index
    %5 = vector.load %arg2[%c0_4, %c0_5] : memref<768x256xbf16, #tpu.memory_space<vmem>>, vector<768x256xbf16>
    %cst = arith.constant dense<0.000000e+00> : vector<8x256xf32>
    %6 = tpu.matmul %4, %5, %cst {dimension_numbers = #tpu.dot_dimension_numbers<[1], [0], [0], [1], [0, 0, 1, 1], [], []>} : vector<8x768xbf16>, vector<768x256xbf16>, vector<8x256xf32> -> vector<8x256xf32>
    %7 = arith.addf %3, %6 : vector<8x256xf32>
    %c0_6 = arith.constant 0 : index
    %c0_7 = arith.constant 0 : index
    %8 = vector.load %arg7[%c0_6, %c0_7] : memref<8x256xf32, #tpu.memory_space<vmem>>, vector<8x256xf32>
    tpu.vector_store %arg7[%c0_6, %c0_7], %7 {strides = array<i32>} : memref<8x256xf32, #tpu.memory_space<vmem>>, vector<8x256xf32>,
    %c2_i32 = arith.constant 2 : i32
    %9 = arith.cmpi eq, %arg0, %c2_i32 : i32
    %10 = arith.extui %9 : i1 to i32
    %c0_i32_8 = arith.constant 0 : i32
    %11 = arith.cmpi ne, %10, %c0_i32_8 : i32
    scf.if %11 {
      %c0_9 = arith.constant 0 : index
      %c0_10 = arith.constant 0 : index
      %12 = vector.load %arg7[%c0_9, %c0_10] : memref<8x256xf32, #tpu.memory_space<vmem>>, vector<8x256xf32>
      %c0_11 = arith.constant 0 : index
      %c0_12 = arith.constant 0 : index
      %13 = vector.load %arg3[%c0_11, %c0_12] : memref<1x256xf32, #tpu.memory_space<vmem>>, vector<1x256xf32>
      %14 = vector.broadcast %13 : vector<1x256xf32> to vector<8x256xf32>
      %15 = arith.mulf %12, %14 : vector<8x256xf32>
      %c0_13 = arith.constant 0 : index
      %c0_14 = arith.constant 0 : index
      %16 = vector.load %arg4[%c0_13, %c0_14] : memref<1x256xf32, #tpu.memory_space<vmem>>, vector<1x256xf32>
      %17 = vector.broadcast %16 : vector<1x256xf32> to vector<8x256xf32>
      %18 = arith.addf %15, %17 : vector<8x256xf32>
      %c0_15 = arith.constant 0 : index
      %c0_16 = arith.constant 0 : index
      %19 = vector.load %arg5[%c0_15, %c0_16] : memref<8x256xbf16, #tpu.memory_space<vmem>>, vector<8x256xbf16>
      %20 = arith.extf %19 : vector<8x256xbf16> to vector<8x256xf32>
      %21 = arith.addf %18, %20 : vector<8x256xf32>
      %cst_17 = arith.constant 0.000000e+00 : f32
      %22 = vector.broadcast %cst_17 : f32 to vector<8x256xf32>
      %23 = arith.maximumf %21, %22 : vector<8x256xf32>
      %24 = arith.truncf %23 : vector<8x256xf32> to vector<8x256xbf16>
      %c0_18 = arith.constant 0 : index
      %c0_19 = arith.constant 0 : index
      %25 = vector.load %arg6[%c0_18, %c0_19] : memref<8x256xbf16, #tpu.memory_space<vmem>>, vector<8x256xbf16>
      tpu.vector_store %arg6[%c0_18, %c0_19], %24 {strides = array<i32>} : memref<8x256xbf16, #tpu.memory_space<vmem>>, vector<8x256xbf16>,
    } else {
    }
    return
  }
  func.func @transform_0(%arg0: i32) -> (i32, i32) {
    %c0_i32 = arith.constant 0 : i32
    %c0_i32_0 = arith.constant 0 : i32
    return %c0_i32, %arg0 : i32, i32
  }
  func.func @transform_1(%arg0: i32) -> (i32, i32) {
    %c0_i32 = arith.constant 0 : i32
    %c0_i32_0 = arith.constant 0 : i32
    return %arg0, %c0_i32 : i32, i32
  }
  func.func @transform_2(%arg0: i32) -> (i32, i32) {
    %c0_i32 = arith.constant 0 : i32
    %c0_i32_0 = arith.constant 0 : i32
    %c0_i32_1 = arith.constant 0 : i32
    return %c0_i32, %c0_i32_0 : i32, i32
  }
  func.func @transform_3(%arg0: i32) -> (i32, i32) {
    %c0_i32 = arith.constant 0 : i32
    %c0_i32_0 = arith.constant 0 : i32
    %c0_i32_1 = arith.constant 0 : i32
    return %c0_i32, %c0_i32_0 : i32, i32
  }
  func.func @transform_4(%arg0: i32) -> (i32, i32) {
    %c0_i32 = arith.constant 0 : i32
    %c0_i32_0 = arith.constant 0 : i32
    %c0_i32_1 = arith.constant 0 : i32
    return %c0_i32, %c0_i32_0 : i32, i32
  }
  func.func @transform_5(%arg0: i32) -> (i32, i32) {
    %c0_i32 = arith.constant 0 : i32
    %c0_i32_0 = arith.constant 0 : i32
    %c0_i32_1 = arith.constant 0 : i32
    return %c0_i32, %c0_i32_0 : i32, i32
  }
}

module attributes {stable_mosaic.version = 11 : i64} {
  func.func @_mm_bn_act_kernel(%arg0: i32, %arg1: memref<8x768xbf16, #tpu.memory_space<vmem>>, %arg2: memref<768x512xbf16, #tpu.memory_space<vmem>>, %arg3: memref<1x512xf32, #tpu.memory_space<vmem>>, %arg4: memref<1x512xf32, #tpu.memory_space<vmem>>, %arg5: memref<8x512xbf16, #tpu.memory_space<vmem>>, %arg6: memref<8x512xf32, #tpu.memory_space<vmem>>) attributes {dimension_semantics = [#tpu.dimension_semantics<arbitrary>], iteration_bounds = array<i64: 3>, scalar_prefetch = 0 : i64, scratch_operands = 1 : i64, tpu.core_type = #tpu.core_type<tc>, window_params = [{transform_indices = @transform_0, window_bounds = array<i64: 8, 768>}, {transform_indices = @transform_1, window_bounds = array<i64: 768, 512>}, {pipeline_mode = #tpu.pipeline_mode<synchronous>, transform_indices = @transform_2, window_bounds = array<i64: 1, 512>}, {pipeline_mode = #tpu.pipeline_mode<synchronous>, transform_indices = @transform_3, window_bounds = array<i64: 1, 512>}, {pipeline_mode = #tpu.pipeline_mode<synchronous>, transform_indices = @transform_4, window_bounds = array<i64: 8, 512>}]} {
    %c0_i32 = arith.constant 0 : i32
    %0 = arith.cmpi eq, %arg0, %c0_i32 : i32
    %1 = arith.extui %0 : i1 to i32
    %c0_i32_0 = arith.constant 0 : i32
    %2 = arith.cmpi ne, %1, %c0_i32_0 : i32
    scf.if %2 {
      %cst_9 = arith.constant 0.000000e+00 : f32
      %12 = vector.broadcast %cst_9 : f32 to vector<8x512xf32>
      %c0_10 = arith.constant 0 : index
      %c0_11 = arith.constant 0 : index
      %13 = vector.load %arg6[%c0_10, %c0_11] : memref<8x512xf32, #tpu.memory_space<vmem>>, vector<8x512xf32>
      tpu.vector_store %arg6[%c0_10, %c0_11], %12 {strides = array<i32>} : memref<8x512xf32, #tpu.memory_space<vmem>>, vector<8x512xf32>,
    } else {
    }
    %c0 = arith.constant 0 : index
    %c0_1 = arith.constant 0 : index
    %3 = vector.load %arg6[%c0, %c0_1] : memref<8x512xf32, #tpu.memory_space<vmem>>, vector<8x512xf32>
    %c0_2 = arith.constant 0 : index
    %c0_3 = arith.constant 0 : index
    %4 = vector.load %arg1[%c0_2, %c0_3] : memref<8x768xbf16, #tpu.memory_space<vmem>>, vector<8x768xbf16>
    %c0_4 = arith.constant 0 : index
    %c0_5 = arith.constant 0 : index
    %5 = vector.load %arg2[%c0_4, %c0_5] : memref<768x512xbf16, #tpu.memory_space<vmem>>, vector<768x512xbf16>
    %cst = arith.constant dense<0.000000e+00> : vector<8x512xf32>
    %6 = tpu.matmul %4, %5, %cst {dimension_numbers = #tpu.dot_dimension_numbers<[1], [0], [0], [1], [0, 0, 1, 1], [], []>} : vector<8x768xbf16>, vector<768x512xbf16>, vector<8x512xf32> -> vector<8x512xf32>
    %7 = arith.addf %3, %6 : vector<8x512xf32>
    %c0_6 = arith.constant 0 : index
    %c0_7 = arith.constant 0 : index
    %8 = vector.load %arg6[%c0_6, %c0_7] : memref<8x512xf32, #tpu.memory_space<vmem>>, vector<8x512xf32>
    tpu.vector_store %arg6[%c0_6, %c0_7], %7 {strides = array<i32>} : memref<8x512xf32, #tpu.memory_space<vmem>>, vector<8x512xf32>,
    %c2_i32 = arith.constant 2 : i32
    %9 = arith.cmpi eq, %arg0, %c2_i32 : i32
    %10 = arith.extui %9 : i1 to i32
    %c0_i32_8 = arith.constant 0 : i32
    %11 = arith.cmpi ne, %10, %c0_i32_8 : i32
    scf.if %11 {
      %c0_9 = arith.constant 0 : index
      %c0_10 = arith.constant 0 : index
      %12 = vector.load %arg6[%c0_9, %c0_10] : memref<8x512xf32, #tpu.memory_space<vmem>>, vector<8x512xf32>
      %c0_11 = arith.constant 0 : index
      %c0_12 = arith.constant 0 : index
      %13 = vector.load %arg3[%c0_11, %c0_12] : memref<1x512xf32, #tpu.memory_space<vmem>>, vector<1x512xf32>
      %14 = vector.broadcast %13 : vector<1x512xf32> to vector<8x512xf32>
      %15 = arith.mulf %12, %14 : vector<8x512xf32>
      %c0_13 = arith.constant 0 : index
      %c0_14 = arith.constant 0 : index
      %16 = vector.load %arg4[%c0_13, %c0_14] : memref<1x512xf32, #tpu.memory_space<vmem>>, vector<1x512xf32>
      %17 = vector.broadcast %16 : vector<1x512xf32> to vector<8x512xf32>
      %18 = arith.addf %15, %17 : vector<8x512xf32>
      %cst_15 = arith.constant 0.000000e+00 : f32
      %19 = vector.broadcast %cst_15 : f32 to vector<8x512xf32>
      %20 = arith.maximumf %18, %19 : vector<8x512xf32>
      %21 = arith.truncf %20 : vector<8x512xf32> to vector<8x512xbf16>
      %c0_16 = arith.constant 0 : index
      %c0_17 = arith.constant 0 : index
      %22 = vector.load %arg5[%c0_16, %c0_17] : memref<8x512xbf16, #tpu.memory_space<vmem>>, vector<8x512xbf16>
      tpu.vector_store %arg5[%c0_16, %c0_17], %21 {strides = array<i32>} : memref<8x512xbf16, #tpu.memory_space<vmem>>, vector<8x512xbf16>,
    } else {
    }
    return
  }
  func.func @transform_0(%arg0: i32) -> (i32, i32) {
    %c0_i32 = arith.constant 0 : i32
    %c0_i32_0 = arith.constant 0 : i32
    return %c0_i32, %arg0 : i32, i32
  }
  func.func @transform_1(%arg0: i32) -> (i32, i32) {
    %c0_i32 = arith.constant 0 : i32
    %c0_i32_0 = arith.constant 0 : i32
    return %arg0, %c0_i32 : i32, i32
  }
  func.func @transform_2(%arg0: i32) -> (i32, i32) {
    %c0_i32 = arith.constant 0 : i32
    %c0_i32_0 = arith.constant 0 : i32
    %c0_i32_1 = arith.constant 0 : i32
    return %c0_i32, %c0_i32_0 : i32, i32
  }
  func.func @transform_3(%arg0: i32) -> (i32, i32) {
    %c0_i32 = arith.constant 0 : i32
    %c0_i32_0 = arith.constant 0 : i32
    %c0_i32_1 = arith.constant 0 : i32
    return %c0_i32, %c0_i32_0 : i32, i32
  }
  func.func @transform_4(%arg0: i32) -> (i32, i32) {
    %c0_i32 = arith.constant 0 : i32
    %c0_i32_0 = arith.constant 0 : i32
    %c0_i32_1 = arith.constant 0 : i32
    return %c0_i32, %c0_i32_0 : i32, i32
  }
}

module attributes {stable_mosaic.version = 11 : i64} {
  func.func @_mm_bn_act_kernel(%arg0: i32, %arg1: memref<8x512xbf16, #tpu.memory_space<vmem>>, %arg2: memref<512x512xbf16, #tpu.memory_space<vmem>>, %arg3: memref<1x512xf32, #tpu.memory_space<vmem>>, %arg4: memref<1x512xf32, #tpu.memory_space<vmem>>, %arg5: memref<8x512xbf16, #tpu.memory_space<vmem>>, %arg6: memref<8x512xbf16, #tpu.memory_space<vmem>>, %arg7: memref<8x512xf32, #tpu.memory_space<vmem>>) attributes {dimension_semantics = [#tpu.dimension_semantics<arbitrary>], iteration_bounds = array<i64: 9>, scalar_prefetch = 0 : i64, scratch_operands = 1 : i64, tpu.core_type = #tpu.core_type<tc>, window_params = [{transform_indices = @transform_0, window_bounds = array<i64: 8, 512>}, {transform_indices = @transform_1, window_bounds = array<i64: 512, 512>}, {pipeline_mode = #tpu.pipeline_mode<synchronous>, transform_indices = @transform_2, window_bounds = array<i64: 1, 512>}, {pipeline_mode = #tpu.pipeline_mode<synchronous>, transform_indices = @transform_3, window_bounds = array<i64: 1, 512>}, {pipeline_mode = #tpu.pipeline_mode<synchronous>, transform_indices = @transform_4, window_bounds = array<i64: 8, 512>}, {pipeline_mode = #tpu.pipeline_mode<synchronous>, transform_indices = @transform_5, window_bounds = array<i64: 8, 512>}]} {
    %c0_i32 = arith.constant 0 : i32
    %0 = arith.cmpi eq, %arg0, %c0_i32 : i32
    %1 = arith.extui %0 : i1 to i32
    %c0_i32_0 = arith.constant 0 : i32
    %2 = arith.cmpi ne, %1, %c0_i32_0 : i32
    scf.if %2 {
      %cst_9 = arith.constant 0.000000e+00 : f32
      %12 = vector.broadcast %cst_9 : f32 to vector<8x512xf32>
      %c0_10 = arith.constant 0 : index
      %c0_11 = arith.constant 0 : index
      %13 = vector.load %arg7[%c0_10, %c0_11] : memref<8x512xf32, #tpu.memory_space<vmem>>, vector<8x512xf32>
      tpu.vector_store %arg7[%c0_10, %c0_11], %12 {strides = array<i32>} : memref<8x512xf32, #tpu.memory_space<vmem>>, vector<8x512xf32>,
    } else {
    }
    %c0 = arith.constant 0 : index
    %c0_1 = arith.constant 0 : index
    %3 = vector.load %arg7[%c0, %c0_1] : memref<8x512xf32, #tpu.memory_space<vmem>>, vector<8x512xf32>
    %c0_2 = arith.constant 0 : index
    %c0_3 = arith.constant 0 : index
    %4 = vector.load %arg1[%c0_2, %c0_3] : memref<8x512xbf16, #tpu.memory_space<vmem>>, vector<8x512xbf16>
    %c0_4 = arith.constant 0 : index
    %c0_5 = arith.constant 0 : index
    %5 = vector.load %arg2[%c0_4, %c0_5] : memref<512x512xbf16, #tpu.memory_space<vmem>>, vector<512x512xbf16>
    %cst = arith.constant dense<0.000000e+00> : vector<8x512xf32>
    %6 = tpu.matmul %4, %5, %cst {dimension_numbers = #tpu.dot_dimension_numbers<[1], [0], [0], [1], [0, 0, 1, 1], [], []>} : vector<8x512xbf16>, vector<512x512xbf16>, vector<8x512xf32> -> vector<8x512xf32>
    %7 = arith.addf %3, %6 : vector<8x512xf32>
    %c0_6 = arith.constant 0 : index
    %c0_7 = arith.constant 0 : index
    %8 = vector.load %arg7[%c0_6, %c0_7] : memref<8x512xf32, #tpu.memory_space<vmem>>, vector<8x512xf32>
    tpu.vector_store %arg7[%c0_6, %c0_7], %7 {strides = array<i32>} : memref<8x512xf32, #tpu.memory_space<vmem>>, vector<8x512xf32>,
    %c8_i32 = arith.constant 8 : i32
    %9 = arith.cmpi eq, %arg0, %c8_i32 : i32
    %10 = arith.extui %9 : i1 to i32
    %c0_i32_8 = arith.constant 0 : i32
    %11 = arith.cmpi ne, %10, %c0_i32_8 : i32
    scf.if %11 {
      %c0_9 = arith.constant 0 : index
      %c0_10 = arith.constant 0 : index
      %12 = vector.load %arg7[%c0_9, %c0_10] : memref<8x512xf32, #tpu.memory_space<vmem>>, vector<8x512xf32>
      %c0_11 = arith.constant 0 : index
      %c0_12 = arith.constant 0 : index
      %13 = vector.load %arg3[%c0_11, %c0_12] : memref<1x512xf32, #tpu.memory_space<vmem>>, vector<1x512xf32>
      %14 = vector.broadcast %13 : vector<1x512xf32> to vector<8x512xf32>
      %15 = arith.mulf %12, %14 : vector<8x512xf32>
      %c0_13 = arith.constant 0 : index
      %c0_14 = arith.constant 0 : index
      %16 = vector.load %arg4[%c0_13, %c0_14] : memref<1x512xf32, #tpu.memory_space<vmem>>, vector<1x512xf32>
      %17 = vector.broadcast %16 : vector<1x512xf32> to vector<8x512xf32>
      %18 = arith.addf %15, %17 : vector<8x512xf32>
      %c0_15 = arith.constant 0 : index
      %c0_16 = arith.constant 0 : index
      %19 = vector.load %arg5[%c0_15, %c0_16] : memref<8x512xbf16, #tpu.memory_space<vmem>>, vector<8x512xbf16>
      %20 = arith.extf %19 : vector<8x512xbf16> to vector<8x512xf32>
      %21 = arith.addf %18, %20 : vector<8x512xf32>
      %cst_17 = arith.constant 0.000000e+00 : f32
      %22 = vector.broadcast %cst_17 : f32 to vector<8x512xf32>
      %23 = arith.maximumf %21, %22 : vector<8x512xf32>
      %24 = arith.truncf %23 : vector<8x512xf32> to vector<8x512xbf16>
      %c0_18 = arith.constant 0 : index
      %c0_19 = arith.constant 0 : index
      %25 = vector.load %arg6[%c0_18, %c0_19] : memref<8x512xbf16, #tpu.memory_space<vmem>>, vector<8x512xbf16>
      tpu.vector_store %arg6[%c0_18, %c0_19], %24 {strides = array<i32>} : memref<8x512xbf16, #tpu.memory_space<vmem>>, vector<8x512xbf16>,
    } else {
    }
    return
  }
  func.func @transform_0(%arg0: i32) -> (i32, i32) {
    %c0_i32 = arith.constant 0 : i32
    %c0_i32_0 = arith.constant 0 : i32
    return %c0_i32, %arg0 : i32, i32
  }
  func.func @transform_1(%arg0: i32) -> (i32, i32) {
    %c0_i32 = arith.constant 0 : i32
    %c0_i32_0 = arith.constant 0 : i32
    return %arg0, %c0_i32 : i32, i32
  }
  func.func @transform_2(%arg0: i32) -> (i32, i32) {
    %c0_i32 = arith.constant 0 : i32
    %c0_i32_0 = arith.constant 0 : i32
    %c0_i32_1 = arith.constant 0 : i32
    return %c0_i32, %c0_i32_0 : i32, i32
  }
  func.func @transform_3(%arg0: i32) -> (i32, i32) {
    %c0_i32 = arith.constant 0 : i32
    %c0_i32_0 = arith.constant 0 : i32
    %c0_i32_1 = arith.constant 0 : i32
    return %c0_i32, %c0_i32_0 : i32, i32
  }
  func.func @transform_4(%arg0: i32) -> (i32, i32) {
    %c0_i32 = arith.constant 0 : i32
    %c0_i32_0 = arith.constant 0 : i32
    %c0_i32_1 = arith.constant 0 : i32
    return %c0_i32, %c0_i32_0 : i32, i32
  }
  func.func @transform_5(%arg0: i32) -> (i32, i32) {
    %c0_i32 = arith.constant 0 : i32
    %c0_i32_0 = arith.constant 0 : i32
    %c0_i32_1 = arith.constant 0 : i32
    return %c0_i32, %c0_i32_0 : i32, i32
  }
}

module attributes {stable_mosaic.version = 11 : i64} {
  func.func @_mm_bn_act_kernel(%arg0: i32, %arg1: memref<8x512xbf16, #tpu.memory_space<vmem>>, %arg2: memref<512x512xbf16, #tpu.memory_space<vmem>>, %arg3: memref<1x512xf32, #tpu.memory_space<vmem>>, %arg4: memref<1x512xf32, #tpu.memory_space<vmem>>, %arg5: memref<8x512xbf16, #tpu.memory_space<vmem>>, %arg6: memref<8x512xf32, #tpu.memory_space<vmem>>) attributes {dimension_semantics = [#tpu.dimension_semantics<arbitrary>], iteration_bounds = array<i64: 9>, scalar_prefetch = 0 : i64, scratch_operands = 1 : i64, tpu.core_type = #tpu.core_type<tc>, window_params = [{transform_indices = @transform_0, window_bounds = array<i64: 8, 512>}, {transform_indices = @transform_1, window_bounds = array<i64: 512, 512>}, {pipeline_mode = #tpu.pipeline_mode<synchronous>, transform_indices = @transform_2, window_bounds = array<i64: 1, 512>}, {pipeline_mode = #tpu.pipeline_mode<synchronous>, transform_indices = @transform_3, window_bounds = array<i64: 1, 512>}, {pipeline_mode = #tpu.pipeline_mode<synchronous>, transform_indices = @transform_4, window_bounds = array<i64: 8, 512>}]} {
    %c0_i32 = arith.constant 0 : i32
    %0 = arith.cmpi eq, %arg0, %c0_i32 : i32
    %1 = arith.extui %0 : i1 to i32
    %c0_i32_0 = arith.constant 0 : i32
    %2 = arith.cmpi ne, %1, %c0_i32_0 : i32
    scf.if %2 {
      %cst_9 = arith.constant 0.000000e+00 : f32
      %12 = vector.broadcast %cst_9 : f32 to vector<8x512xf32>
      %c0_10 = arith.constant 0 : index
      %c0_11 = arith.constant 0 : index
      %13 = vector.load %arg6[%c0_10, %c0_11] : memref<8x512xf32, #tpu.memory_space<vmem>>, vector<8x512xf32>
      tpu.vector_store %arg6[%c0_10, %c0_11], %12 {strides = array<i32>} : memref<8x512xf32, #tpu.memory_space<vmem>>, vector<8x512xf32>,
    } else {
    }
    %c0 = arith.constant 0 : index
    %c0_1 = arith.constant 0 : index
    %3 = vector.load %arg6[%c0, %c0_1] : memref<8x512xf32, #tpu.memory_space<vmem>>, vector<8x512xf32>
    %c0_2 = arith.constant 0 : index
    %c0_3 = arith.constant 0 : index
    %4 = vector.load %arg1[%c0_2, %c0_3] : memref<8x512xbf16, #tpu.memory_space<vmem>>, vector<8x512xbf16>
    %c0_4 = arith.constant 0 : index
    %c0_5 = arith.constant 0 : index
    %5 = vector.load %arg2[%c0_4, %c0_5] : memref<512x512xbf16, #tpu.memory_space<vmem>>, vector<512x512xbf16>
    %cst = arith.constant dense<0.000000e+00> : vector<8x512xf32>
    %6 = tpu.matmul %4, %5, %cst {dimension_numbers = #tpu.dot_dimension_numbers<[1], [0], [0], [1], [0, 0, 1, 1], [], []>} : vector<8x512xbf16>, vector<512x512xbf16>, vector<8x512xf32> -> vector<8x512xf32>
    %7 = arith.addf %3, %6 : vector<8x512xf32>
    %c0_6 = arith.constant 0 : index
    %c0_7 = arith.constant 0 : index
    %8 = vector.load %arg6[%c0_6, %c0_7] : memref<8x512xf32, #tpu.memory_space<vmem>>, vector<8x512xf32>
    tpu.vector_store %arg6[%c0_6, %c0_7], %7 {strides = array<i32>} : memref<8x512xf32, #tpu.memory_space<vmem>>, vector<8x512xf32>,
    %c8_i32 = arith.constant 8 : i32
    %9 = arith.cmpi eq, %arg0, %c8_i32 : i32
    %10 = arith.extui %9 : i1 to i32
    %c0_i32_8 = arith.constant 0 : i32
    %11 = arith.cmpi ne, %10, %c0_i32_8 : i32
    scf.if %11 {
      %c0_9 = arith.constant 0 : index
      %c0_10 = arith.constant 0 : index
      %12 = vector.load %arg6[%c0_9, %c0_10] : memref<8x512xf32, #tpu.memory_space<vmem>>, vector<8x512xf32>
      %c0_11 = arith.constant 0 : index
      %c0_12 = arith.constant 0 : index
      %13 = vector.load %arg3[%c0_11, %c0_12] : memref<1x512xf32, #tpu.memory_space<vmem>>, vector<1x512xf32>
      %14 = vector.broadcast %13 : vector<1x512xf32> to vector<8x512xf32>
      %15 = arith.mulf %12, %14 : vector<8x512xf32>
      %c0_13 = arith.constant 0 : index
      %c0_14 = arith.constant 0 : index
      %16 = vector.load %arg4[%c0_13, %c0_14] : memref<1x512xf32, #tpu.memory_space<vmem>>, vector<1x512xf32>
      %17 = vector.broadcast %16 : vector<1x512xf32> to vector<8x512xf32>
      %18 = arith.addf %15, %17 : vector<8x512xf32>
      %cst_15 = arith.constant 0.000000e+00 : f32
      %19 = vector.broadcast %cst_15 : f32 to vector<8x512xf32>
      %20 = arith.maximumf %18, %19 : vector<8x512xf32>
      %21 = arith.truncf %20 : vector<8x512xf32> to vector<8x512xbf16>
      %c0_16 = arith.constant 0 : index
      %c0_17 = arith.constant 0 : index
      %22 = vector.load %arg5[%c0_16, %c0_17] : memref<8x512xbf16, #tpu.memory_space<vmem>>, vector<8x512xbf16>
      tpu.vector_store %arg5[%c0_16, %c0_17], %21 {strides = array<i32>} : memref<8x512xbf16, #tpu.memory_space<vmem>>, vector<8x512xbf16>,
    } else {
    }
    return
  }
  func.func @transform_0(%arg0: i32) -> (i32, i32) {
    %c0_i32 = arith.constant 0 : i32
    %c0_i32_0 = arith.constant 0 : i32
    return %c0_i32, %arg0 : i32, i32
  }
  func.func @transform_1(%arg0: i32) -> (i32, i32) {
    %c0_i32 = arith.constant 0 : i32
    %c0_i32_0 = arith.constant 0 : i32
    return %arg0, %c0_i32 : i32, i32
  }
  func.func @transform_2(%arg0: i32) -> (i32, i32) {
    %c0_i32 = arith.constant 0 : i32
    %c0_i32_0 = arith.constant 0 : i32
    %c0_i32_1 = arith.constant 0 : i32
    return %c0_i32, %c0_i32_0 : i32, i32
  }
  func.func @transform_3(%arg0: i32) -> (i32, i32) {
    %c0_i32 = arith.constant 0 : i32
    %c0_i32_0 = arith.constant 0 : i32
    %c0_i32_1 = arith.constant 0 : i32
    return %c0_i32, %c0_i32_0 : i32, i32
  }
  func.func @transform_4(%arg0: i32) -> (i32, i32) {
    %c0_i32 = arith.constant 0 : i32
    %c0_i32_0 = arith.constant 0 : i32
    %c0_i32_1 = arith.constant 0 : i32
    return %c0_i32, %c0_i32_0 : i32, i32
  }
}

module attributes {stable_mosaic.version = 11 : i64} {
  func.func @_mm_bn_act_kernel(%arg0: i32, %arg1: memref<8x256xbf16, #tpu.memory_space<vmem>>, %arg2: memref<256x512xbf16, #tpu.memory_space<vmem>>, %arg3: memref<1x512xf32, #tpu.memory_space<vmem>>, %arg4: memref<1x512xf32, #tpu.memory_space<vmem>>, %arg5: memref<8x512xbf16, #tpu.memory_space<vmem>>, %arg6: memref<8x512xf32, #tpu.memory_space<vmem>>) attributes {dimension_semantics = [#tpu.dimension_semantics<arbitrary>], iteration_bounds = array<i64: 1>, scalar_prefetch = 0 : i64, scratch_operands = 1 : i64, tpu.core_type = #tpu.core_type<tc>, window_params = [{transform_indices = @transform_0, window_bounds = array<i64: 8, 256>}, {transform_indices = @transform_1, window_bounds = array<i64: 256, 512>}, {pipeline_mode = #tpu.pipeline_mode<synchronous>, transform_indices = @transform_2, window_bounds = array<i64: 1, 512>}, {pipeline_mode = #tpu.pipeline_mode<synchronous>, transform_indices = @transform_3, window_bounds = array<i64: 1, 512>}, {pipeline_mode = #tpu.pipeline_mode<synchronous>, transform_indices = @transform_4, window_bounds = array<i64: 8, 512>}]} {
    %c0_i32 = arith.constant 0 : i32
    %0 = arith.cmpi eq, %arg0, %c0_i32 : i32
    %1 = arith.extui %0 : i1 to i32
    %c0_i32_0 = arith.constant 0 : i32
    %2 = arith.cmpi ne, %1, %c0_i32_0 : i32
    scf.if %2 {
      %cst_10 = arith.constant 0.000000e+00 : f32
      %12 = vector.broadcast %cst_10 : f32 to vector<8x512xf32>
      %c0_11 = arith.constant 0 : index
      %c0_12 = arith.constant 0 : index
      %13 = vector.load %arg6[%c0_11, %c0_12] : memref<8x512xf32, #tpu.memory_space<vmem>>, vector<8x512xf32>
      tpu.vector_store %arg6[%c0_11, %c0_12], %12 {strides = array<i32>} : memref<8x512xf32, #tpu.memory_space<vmem>>, vector<8x512xf32>,
    } else {
    }
    %c0 = arith.constant 0 : index
    %c0_1 = arith.constant 0 : index
    %3 = vector.load %arg6[%c0, %c0_1] : memref<8x512xf32, #tpu.memory_space<vmem>>, vector<8x512xf32>
    %c0_2 = arith.constant 0 : index
    %c0_3 = arith.constant 0 : index
    %4 = vector.load %arg1[%c0_2, %c0_3] : memref<8x256xbf16, #tpu.memory_space<vmem>>, vector<8x256xbf16>
    %c0_4 = arith.constant 0 : index
    %c0_5 = arith.constant 0 : index
    %5 = vector.load %arg2[%c0_4, %c0_5] : memref<256x512xbf16, #tpu.memory_space<vmem>>, vector<256x512xbf16>
    %cst = arith.constant dense<0.000000e+00> : vector<8x512xf32>
    %6 = tpu.matmul %4, %5, %cst {dimension_numbers = #tpu.dot_dimension_numbers<[1], [0], [0], [1], [0, 0, 1, 1], [], []>} : vector<8x256xbf16>, vector<256x512xbf16>, vector<8x512xf32> -> vector<8x512xf32>
    %7 = arith.addf %3, %6 : vector<8x512xf32>
    %c0_6 = arith.constant 0 : index
    %c0_7 = arith.constant 0 : index
    %8 = vector.load %arg6[%c0_6, %c0_7] : memref<8x512xf32, #tpu.memory_space<vmem>>, vector<8x512xf32>
    tpu.vector_store %arg6[%c0_6, %c0_7], %7 {strides = array<i32>} : memref<8x512xf32, #tpu.memory_space<vmem>>, vector<8x512xf32>,
    %c0_i32_8 = arith.constant 0 : i32
    %9 = arith.cmpi eq, %arg0, %c0_i32_8 : i32
    %10 = arith.extui %9 : i1 to i32
    %c0_i32_9 = arith.constant 0 : i32
    %11 = arith.cmpi ne, %10, %c0_i32_9 : i32
    scf.if %11 {
      %c0_10 = arith.constant 0 : index
      %c0_11 = arith.constant 0 : index
      %12 = vector.load %arg6[%c0_10, %c0_11] : memref<8x512xf32, #tpu.memory_space<vmem>>, vector<8x512xf32>
      %c0_12 = arith.constant 0 : index
      %c0_13 = arith.constant 0 : index
      %13 = vector.load %arg3[%c0_12, %c0_13] : memref<1x512xf32, #tpu.memory_space<vmem>>, vector<1x512xf32>
      %14 = vector.broadcast %13 : vector<1x512xf32> to vector<8x512xf32>
      %15 = arith.mulf %12, %14 : vector<8x512xf32>
      %c0_14 = arith.constant 0 : index
      %c0_15 = arith.constant 0 : index
      %16 = vector.load %arg4[%c0_14, %c0_15] : memref<1x512xf32, #tpu.memory_space<vmem>>, vector<1x512xf32>
      %17 = vector.broadcast %16 : vector<1x512xf32> to vector<8x512xf32>
      %18 = arith.addf %15, %17 : vector<8x512xf32>
      %19 = arith.truncf %18 : vector<8x512xf32> to vector<8x512xbf16>
      %c0_16 = arith.constant 0 : index
      %c0_17 = arith.constant 0 : index
      %20 = vector.load %arg5[%c0_16, %c0_17] : memref<8x512xbf16, #tpu.memory_space<vmem>>, vector<8x512xbf16>
      tpu.vector_store %arg5[%c0_16, %c0_17], %19 {strides = array<i32>} : memref<8x512xbf16, #tpu.memory_space<vmem>>, vector<8x512xbf16>,
    } else {
    }
    return
  }
  func.func @transform_0(%arg0: i32) -> (i32, i32) {
    %c0_i32 = arith.constant 0 : i32
    %c0_i32_0 = arith.constant 0 : i32
    return %c0_i32, %arg0 : i32, i32
  }
  func.func @transform_1(%arg0: i32) -> (i32, i32) {
    %c0_i32 = arith.constant 0 : i32
    %c0_i32_0 = arith.constant 0 : i32
    return %arg0, %c0_i32 : i32, i32
  }
  func.func @transform_2(%arg0: i32) -> (i32, i32) {
    %c0_i32 = arith.constant 0 : i32
    %c0_i32_0 = arith.constant 0 : i32
    %c0_i32_1 = arith.constant 0 : i32
    return %c0_i32, %c0_i32_0 : i32, i32
  }
  func.func @transform_3(%arg0: i32) -> (i32, i32) {
    %c0_i32 = arith.constant 0 : i32
    %c0_i32_0 = arith.constant 0 : i32
    %c0_i32_1 = arith.constant 0 : i32
    return %c0_i32, %c0_i32_0 : i32, i32
  }
  func.func @transform_4(%arg0: i32) -> (i32, i32) {
    %c0_i32 = arith.constant 0 : i32
    %c0_i32_0 = arith.constant 0 : i32
    %c0_i32_1 = arith.constant 0 : i32
    return %c0_i32, %c0_i32_0 : i32, i32
  }
}

module attributes {stable_mosaic.version = 11 : i64} {
  func.func @_mm_bn_act_kernel(%arg0: i32, %arg1: memref<8x512xbf16, #tpu.memory_space<vmem>>, %arg2: memref<512x1024xbf16, #tpu.memory_space<vmem>>, %arg3: memref<1x1024xf32, #tpu.memory_space<vmem>>, %arg4: memref<1x1024xf32, #tpu.memory_space<vmem>>, %arg5: memref<8x1024xf32, #tpu.memory_space<vmem>>, %arg6: memref<8x1024xf32, #tpu.memory_space<vmem>>) attributes {dimension_semantics = [#tpu.dimension_semantics<arbitrary>], iteration_bounds = array<i64: 1>, scalar_prefetch = 0 : i64, scratch_operands = 1 : i64, tpu.core_type = #tpu.core_type<tc>, window_params = [{transform_indices = @transform_0, window_bounds = array<i64: 8, 512>}, {transform_indices = @transform_1, window_bounds = array<i64: 512, 1024>}, {pipeline_mode = #tpu.pipeline_mode<synchronous>, transform_indices = @transform_2, window_bounds = array<i64: 1, 1024>}, {pipeline_mode = #tpu.pipeline_mode<synchronous>, transform_indices = @transform_3, window_bounds = array<i64: 1, 1024>}, {pipeline_mode = #tpu.pipeline_mode<synchronous>, transform_indices = @transform_4, window_bounds = array<i64: 8, 1024>}]} {
    %c0_i32 = arith.constant 0 : i32
    %0 = arith.cmpi eq, %arg0, %c0_i32 : i32
    %1 = arith.extui %0 : i1 to i32
    %c0_i32_0 = arith.constant 0 : i32
    %2 = arith.cmpi ne, %1, %c0_i32_0 : i32
    scf.if %2 {
      %cst_10 = arith.constant 0.000000e+00 : f32
      %12 = vector.broadcast %cst_10 : f32 to vector<8x1024xf32>
      %c0_11 = arith.constant 0 : index
      %c0_12 = arith.constant 0 : index
      %13 = vector.load %arg6[%c0_11, %c0_12] : memref<8x1024xf32, #tpu.memory_space<vmem>>, vector<8x1024xf32>
      tpu.vector_store %arg6[%c0_11, %c0_12], %12 {strides = array<i32>} : memref<8x1024xf32, #tpu.memory_space<vmem>>, vector<8x1024xf32>,
    } else {
    }
    %c0 = arith.constant 0 : index
    %c0_1 = arith.constant 0 : index
    %3 = vector.load %arg6[%c0, %c0_1] : memref<8x1024xf32, #tpu.memory_space<vmem>>, vector<8x1024xf32>
    %c0_2 = arith.constant 0 : index
    %c0_3 = arith.constant 0 : index
    %4 = vector.load %arg1[%c0_2, %c0_3] : memref<8x512xbf16, #tpu.memory_space<vmem>>, vector<8x512xbf16>
    %c0_4 = arith.constant 0 : index
    %c0_5 = arith.constant 0 : index
    %5 = vector.load %arg2[%c0_4, %c0_5] : memref<512x1024xbf16, #tpu.memory_space<vmem>>, vector<512x1024xbf16>
    %cst = arith.constant dense<0.000000e+00> : vector<8x1024xf32>
    %6 = tpu.matmul %4, %5, %cst {dimension_numbers = #tpu.dot_dimension_numbers<[1], [0], [0], [1], [0, 0, 1, 1], [], []>} : vector<8x512xbf16>, vector<512x1024xbf16>, vector<8x1024xf32> -> vector<8x1024xf32>
    %7 = arith.addf %3, %6 : vector<8x1024xf32>
    %c0_6 = arith.constant 0 : index
    %c0_7 = arith.constant 0 : index
    %8 = vector.load %arg6[%c0_6, %c0_7] : memref<8x1024xf32, #tpu.memory_space<vmem>>, vector<8x1024xf32>
    tpu.vector_store %arg6[%c0_6, %c0_7], %7 {strides = array<i32>} : memref<8x1024xf32, #tpu.memory_space<vmem>>, vector<8x1024xf32>,
    %c0_i32_8 = arith.constant 0 : i32
    %9 = arith.cmpi eq, %arg0, %c0_i32_8 : i32
    %10 = arith.extui %9 : i1 to i32
    %c0_i32_9 = arith.constant 0 : i32
    %11 = arith.cmpi ne, %10, %c0_i32_9 : i32
    scf.if %11 {
      %c0_10 = arith.constant 0 : index
      %c0_11 = arith.constant 0 : index
      %12 = vector.load %arg6[%c0_10, %c0_11] : memref<8x1024xf32, #tpu.memory_space<vmem>>, vector<8x1024xf32>
      %c0_12 = arith.constant 0 : index
      %c0_13 = arith.constant 0 : index
      %13 = vector.load %arg3[%c0_12, %c0_13] : memref<1x1024xf32, #tpu.memory_space<vmem>>, vector<1x1024xf32>
      %14 = vector.broadcast %13 : vector<1x1024xf32> to vector<8x1024xf32>
      %15 = arith.mulf %12, %14 : vector<8x1024xf32>
      %c0_14 = arith.constant 0 : index
      %c0_15 = arith.constant 0 : index
      %16 = vector.load %arg4[%c0_14, %c0_15] : memref<1x1024xf32, #tpu.memory_space<vmem>>, vector<1x1024xf32>
      %17 = vector.broadcast %16 : vector<1x1024xf32> to vector<8x1024xf32>
      %18 = arith.addf %15, %17 : vector<8x1024xf32>
      %cst_16 = arith.constant 0.000000e+00 : f32
      %19 = vector.broadcast %cst_16 : f32 to vector<8x1024xf32>
      %20 = arith.subf %19, %18 : vector<8x1024xf32>
      %21 = math.exp %20 : vector<8x1024xf32>
      %cst_17 = arith.constant 1.000000e+00 : f32
      %22 = vector.broadcast %cst_17 : f32 to vector<8x1024xf32>
      %23 = arith.addf %22, %21 : vector<8x1024xf32>
      %cst_18 = arith.constant 1.000000e+00 : f32
      %24 = vector.broadcast %cst_18 : f32 to vector<8x1024xf32>
      %25 = arith.divf %24, %23 : vector<8x1024xf32>
      %c0_19 = arith.constant 0 : index
      %c0_20 = arith.constant 0 : index
      %26 = vector.load %arg5[%c0_19, %c0_20] : memref<8x1024xf32, #tpu.memory_space<vmem>>, vector<8x1024xf32>
      tpu.vector_store %arg5[%c0_19, %c0_20], %25 {strides = array<i32>} : memref<8x1024xf32, #tpu.memory_space<vmem>>, vector<8x1024xf32>,
    } else {
    }
    return
  }
  func.func @transform_0(%arg0: i32) -> (i32, i32) {
    %c0_i32 = arith.constant 0 : i32
    %c0_i32_0 = arith.constant 0 : i32
    return %c0_i32, %arg0 : i32, i32
  }
  func.func @transform_1(%arg0: i32) -> (i32, i32) {
    %c0_i32 = arith.constant 0 : i32
    %c0_i32_0 = arith.constant 0 : i32
    return %arg0, %c0_i32 : i32, i32
  }
  func.func @transform_2(%arg0: i32) -> (i32, i32) {
    %c0_i32 = arith.constant 0 : i32
    %c0_i32_0 = arith.constant 0 : i32
    %c0_i32_1 = arith.constant 0 : i32
    return %c0_i32, %c0_i32_0 : i32, i32
  }
  func.func @transform_3(%arg0: i32) -> (i32, i32) {
    %c0_i32 = arith.constant 0 : i32
    %c0_i32_0 = arith.constant 0 : i32
    %c0_i32_1 = arith.constant 0 : i32
    return %c0_i32, %c0_i32_0 : i32, i32
  }
  func.func @transform_4(%arg0: i32) -> (i32, i32) {
    %c0_i32 = arith.constant 0 : i32
    %c0_i32_0 = arith.constant 0 : i32
    %c0_i32_1 = arith.constant 0 : i32
    return %c0_i32, %c0_i32_0 : i32, i32
  }
}

</mosaic_0001>

<bundles_post_ra>
// kernel: resnet18_sigmoid_forward.21
= control target key start
LH: loop header
LB: loop body
LE: loop exit
PB: predicated region body
PF: predicated region fallthrough
CT: control target
= control target key end

     0   :  { %s1632_s1 = inlined_call_operand.vmem [shape: bf16[256,128], index: 1, kind: input, shape index: {}]   ;;  %s1633_s0 = inlined_call_operand.vmem [shape: bf16[256,256], index: 0, kind: input, shape index: {}]   ;;  %s1634_s2 = inlined_call_operand.vmem [shape: f32[1,128], index: 2, kind: input, shape index: {}]   ;;  %s1635_s3 = inlined_call_operand.vmem [shape: f32[1,128], index: 3, kind: input, shape index: {}]   ;;  %s1636_s4 = inlined_call_operand.vmem [shape: bf16[256,128], index: 4, kind: output, shape index: {}]  }
   0x1   :  { %v1277_v0 = vld [vmem:[%s1632_s1 + $0x78] sm:$0xff]   ;;  %v1279_v2 = vld [vmem:[%s1632_s1 + $0x70] sm:$0xff]   ;;  %v1281_v4 = vld [vmem:[%s1632_s1 + $0x68] sm:$0xff]  }
   0x2   :  { %v1278_v1 = vld [vmem:[%s1632_s1 + $0x38] sm:$0xff]   ;;  %1149 = vmatprep.subr.bf16.mxu0 %v1277_v0  ;;  %1261 = vmatprep.subr.bf16.mxu1 %v1277_v0  ;;  %v1280_v3 = vld [vmem:[%s1632_s1 + $0x30] sm:$0xff]   ;;  %v1282_v5 = vld [vmem:[%s1632_s1 + $0x28] sm:$0xff]  }
   0x3   :  { %1150 = vmatpush3.bf16.msra.mxu0 %v1278_v1  ;;  %1269 = vmatpush3.bf16.msra.mxu1 %v1278_v1  ;;  %v1283_v6 = vld [vmem:[%s1632_s1 + $0x60] sm:$0xff]   ;;  %v1285_v8 = vld [vmem:[%s1632_s1 + $0x58] sm:$0xff]   ;;  %v1287_v10 = vld [vmem:[%s1632_s1 + $0x50] sm:$0xff]  }
   0x4   :  { %1151 = vmatprep.subr.bf16.mxu0 %v1279_v2  ;;  %1262 = vmatprep.subr.bf16.mxu1 %v1279_v2  ;;  %v1284_v7 = vld [vmem:[%s1632_s1 + $0x20] sm:$0xff]   ;;  %v1286_v9 = vld [vmem:[%s1632_s1 + $0x18] sm:$0xff]   ;;  %v1288_v13 = vld [vmem:[%s1632_s1 + $0x10] sm:$0xff]  }
   0x5   :  { %v1295_v11 = vld [vmem:[%s1633_s0 + $0x4] ss:$8 sps:$4 sm:$0xff]   ;;  %v1293_v18 = vld [vmem:[%s1633_s0] ss:$8 sps:$4 sm:$0xff]   ;;  %v1299_v20 = vld [vmem:[%s1633_s0 + $0x14] ss:$8 sps:$4 sm:$0xff]  }
   0x6   :  { %v1298_v12 = vld [vmem:[%s1633_s0 + $0x84] ss:$8 sps:$4 sm:$0xff]   ;;  %438 = vmatprep.mubr.bf16.mxu0 %v1295_v11  ;;  %v1296_v19 = vld [vmem:[%s1633_s0 + $0x80] ss:$8 sps:$4 sm:$0xff]   ;;  %v1301_v21 = vld [vmem:[%s1633_s0 + $0x94] ss:$8 sps:$4 sm:$0xff]  }
   0x7   :  { %1152 = vmatpush3.bf16.msra.mxu0 %v1280_v3  ;;  %1270 = vmatpush3.bf16.msra.mxu1 %v1280_v3  ;;  %v1289_v14 = vld [vmem:[%s1632_s1 + $0x48] sm:$0xff]   ;;  %v1291_v16 = vld [vmem:[%s1632_s1 + $0x40] sm:$0xff]   ;;  %v1303_v22 = vld [vmem:[%s1633_s0 + $0x10] ss:$8 sps:$4 sm:$0xff]  }
   0x8   :  { %1153 = vmatprep.subr.bf16.mxu0 %v1281_v4  ;;  %1263 = vmatprep.subr.bf16.mxu1 %v1281_v4  ;;  %v1290_v15 = vld [vmem:[%s1632_s1 + $0x8] sm:$0xff]   ;;  %v1292_v17 = vld [vmem:[%s1632_s1] sm:$0xff]   ;;  %v1304_v23 = vld [vmem:[%s1633_s0 + $0x90] ss:$8 sps:$4 sm:$0xff]  }
   0x9   :  { %502 = vmatprep.mubr.bf16.mxu1 %v1298_v12  ;;  %v1305_v24 = vld [vmem:[%s1633_s0 + $0x24] ss:$8 sps:$4 sm:$0xff]   ;;  %v1309_v26 = vld [vmem:[%s1633_s0 + $0x20] ss:$8 sps:$4 sm:$0xff]   ;;  %v1311_v28 = vld [vmem:[%s1633_s0 + $0x34] ss:$8 sps:$4 sm:$0xff]  }
   0xa   :  { %v1307_v25 = vld [vmem:[%s1633_s0 + $0xa4] ss:$8 sps:$4 sm:$0xff]   ;;  %v1310_v27 = vld [vmem:[%s1633_s0 + $0xa0] ss:$8 sps:$4 sm:$0xff]   ;;  %v1313_v29 = vld [vmem:[%s1633_s0 + $0xb4] ss:$8 sps:$4 sm:$0xff]  }
   0xb   :  { %1154 = vmatpush3.bf16.msra.mxu0 %v1282_v5  ;;  %1271 = vmatpush3.bf16.msra.mxu1 %v1282_v5  ;;  %v1315_v30 = vld [vmem:[%s1633_s0 + $0x30] ss:$8 sps:$4 sm:$0xff]   ;;  %v1317_v32 = vld [vmem:[%s1633_s0 + $0x44] ss:$8 sps:$4 sm:$0xff]   ;;  %v1321_v34 = vld [vmem:[%s1633_s0 + $0x40] ss:$8 sps:$4 sm:$0xff]  }
   0xc   :  { %1155 = vmatprep.subr.bf16.mxu0 %v1283_v6  ;;  %1264 = vmatprep.subr.bf16.mxu1 %v1283_v6  ;;  %v1316_v31 = vld [vmem:[%s1633_s0 + $0xb0] ss:$8 sps:$4 sm:$0xff]   ;;  %v1319_v33 = vld [vmem:[%s1633_s0 + $0xc4] ss:$8 sps:$4 sm:$0xff]   ;;  %v1322_v35 = vld [vmem:[%s1633_s0 + $0xc0] ss:$8 sps:$4 sm:$0xff]  }
   0xd   :  { %v1323_v36 = vld [vmem:[%s1633_s0 + $0x54] ss:$8 sps:$4 sm:$0xff]   ;;  %v1327_v38 = vld [vmem:[%s1633_s0 + $0x50] ss:$8 sps:$4 sm:$0xff]   ;;  %v1329_v40 = vld [vmem:[%s1633_s0 + $0x64] ss:$8 sps:$4 sm:$0xff]  }
   0xe   :  { %v1325_v37 = vld [vmem:[%s1633_s0 + $0xd4] ss:$8 sps:$4 sm:$0xff]   ;;  %v1328_v39 = vld [vmem:[%s1633_s0 + $0xd0] ss:$8 sps:$4 sm:$0xff]   ;;  %v1331_v41 = vld [vmem:[%s1633_s0 + $0xe4] ss:$8 sps:$4 sm:$0xff]  }
   0xf   :  { %1156 = vmatpush3.bf16.msra.mxu0 %v1284_v7  ;;  %1272 = vmatpush3.bf16.msra.mxu1 %v1284_v7  ;;  %v1333_v42 = vld [vmem:[%s1633_s0 + $0x60] ss:$8 sps:$4 sm:$0xff]   ;;  %v1335_v44 = vld [vmem:[%s1633_s0 + $0x74] ss:$8 sps:$4 sm:$0xff]   ;;  %v1339_v46 = vld [vmem:[%s1633_s0 + $0x70] ss:$8 sps:$4 sm:$0xff]  }
  0x10   :  { %1157 = vmatprep.subr.bf16.mxu0 %v1285_v8  ;;  %1265 = vmatprep.subr.bf16.mxu1 %v1285_v8  ;;  %v1334_v43 = vld [vmem:[%s1633_s0 + $0xe0] ss:$8 sps:$4 sm:$0xff]   ;;  %v1337_v45 = vld [vmem:[%s1633_s0 + $0xf4] ss:$8 sps:$4 sm:$0xff]   ;;  %v1340_v47 = vld [vmem:[%s1633_s0 + $0xf0] ss:$8 sps:$4 sm:$0xff]  }
  0x11   :  { %v1513_v51 = vld [vmem:[%s1634_s2] ss:$0 sm:$0xff] }
  0x12   :  { %v1520_v59 = vld [vmem:[%s1635_s3] ss:$0 sm:$0xff] }
  0x13   :  { %1158 = vmatpush3.bf16.msra.mxu0 %v1286_v9  ;;  %1273 = vmatpush3.bf16.msra.mxu1 %v1286_v9 }
  0x14   :  { %1159 = vmatprep.subr.bf16.mxu0 %v1287_v10  ;;  %1266 = vmatprep.subr.bf16.mxu1 %v1287_v10 }
  0x17   :  { %1160 = vmatpush3.bf16.msra.mxu0 %v1288_v13  ;;  %1274 = vmatpush3.bf16.msra.mxu1 %v1288_v13 }
  0x18   :  { %1161 = vmatprep.subr.bf16.mxu0 %v1289_v14  ;;  %1267 = vmatprep.subr.bf16.mxu1 %v1289_v14 }
  0x1b   :  { %1162 = vmatpush3.bf16.msra.mxu0 %v1290_v15  ;;  %1275 = vmatpush3.bf16.msra.mxu1 %v1290_v15 }
  0x1c   :  { %1163 = vmatprep.subr.bf16.mxu0 %v1291_v16  ;;  %1268 = vmatprep.subr.bf16.mxu1 %v1291_v16 }
  0x1f   :  { %1164 = vmatpush3.bf16.msra.mxu0 %v1292_v17  ;;  %1276 = vmatpush3.bf16.msra.mxu1 %v1292_v17 }
  0x22   :  { %439 = vmatmul.mubr.bf16.vlgmr.msra.gmra.mxu0 %v1293_v18  ;;  %503 = vmatmul.mubr.bf16.vlgmr.msra.gmra.mxu1 %v1296_v19 }
  0x23   :  { %446 = vmatprep.mubr.bf16.mxu0 %v1299_v20  ;;  %510 = vmatprep.mubr.bf16.mxu1 %v1301_v21 }
  0x2a   :  { %447 = vmatmul.mubr.bf16.gmra.mxu0 %v1303_v22  ;;  %511 = vmatmul.mubr.bf16.gmra.mxu1 %v1304_v23 }
  0x2b   :  { %454 = vmatprep.mubr.bf16.mxu0 %v1305_v24  ;;  %518 = vmatprep.mubr.bf16.mxu1 %v1307_v25 }
  0x32   :  { %455 = vmatmul.mubr.bf16.gmra.mxu0 %v1309_v26  ;;  %519 = vmatmul.mubr.bf16.gmra.mxu1 %v1310_v27 }
  0x33   :  { %462 = vmatprep.mubr.bf16.mxu0 %v1311_v28  ;;  %526 = vmatprep.mubr.bf16.mxu1 %v1313_v29 }
  0x3a   :  { %463 = vmatmul.mubr.bf16.gmra.mxu0 %v1315_v30  ;;  %527 = vmatmul.mubr.bf16.gmra.mxu1 %v1316_v31 }
  0x3b   :  { %470 = vmatprep.mubr.bf16.mxu0 %v1317_v32  ;;  %534 = vmatprep.mubr.bf16.mxu1 %v1319_v33 }
  0x42   :  { %471 = vmatmul.mubr.bf16.gmra.mxu0 %v1321_v34  ;;  %535 = vmatmul.mubr.bf16.gmra.mxu1 %v1322_v35 }
  0x43   :  { %478 = vmatprep.mubr.bf16.mxu0 %v1323_v36  ;;  %542 = vmatprep.mubr.bf16.mxu1 %v1325_v37 }
  0x4a   :  { %479 = vmatmul.mubr.bf16.gmra.mxu0 %v1327_v38  ;;  %543 = vmatmul.mubr.bf16.gmra.mxu1 %v1328_v39 }
  0x4b   :  { %486 = vmatprep.mubr.bf16.mxu0 %v1329_v40  ;;  %550 = vmatprep.mubr.bf16.mxu1 %v1331_v41 }
  0x52   :  { %487 = vmatmul.mubr.bf16.gmra.mxu0 %v1333_v42  ;;  %551 = vmatmul.mubr.bf16.gmra.mxu1 %v1334_v43 }
  0x53   :  { %494 = vmatprep.mubr.bf16.mxu0 %v1335_v44  ;;  %558 = vmatprep.mubr.bf16.mxu1 %v1337_v45 }
  0x5a   :  { %495 = vmatmul.mubr.bf16.gmra.mxu0 %v1339_v46  ;;  %559 = vmatmul.mubr.bf16.gmra.mxu1 %v1340_v47 }
  0xe2   :  { %v1165_v48 = vpop.f32.mrf.mxu0  ;;  %v1213_v49 = vpop.f32.mrf.mxu1 }
  0xe4   :  { %v1166_v50 = vpop.f32.mrf.mxu0  ;;  %v1214_v52 = vpop.f32.mrf.mxu1 }
  0xe5   :  { %v1167_v53 = vadd.f32 %v1166_v50, %v1165_v48  ;;  %v1215_v54 = vadd.f32 %v1214_v52, %v1213_v49 }
  0xe6   :  { %v1168_v55 = vpop.f32.mrf.mxu0  ;;  %v1216_v56 = vpop.f32.mrf.mxu1 }
  0xe7   :  { %v673_v57 = vmul.f32 %v1167_v53, %v1513_v51  ;;  %v689_v58 = vmul.f32 %v1215_v54, %v1513_v51 }
  0xe8   :  { %v1169_v60 = vpop.f32.mrf.mxu0  ;;  %v1217_v61 = vpop.f32.mrf.mxu1 }
  0xe9   :  { %v1170_v62 = vadd.f32 %v1169_v60, %v1168_v55  ;;  %v1218_v63 = vadd.f32 %v1217_v61, %v1216_v56  ;;  %v712_v2 = vadd.f32 %v1520_v59, %v673_v57  ;;  %v728_v3 = vadd.f32 %v1520_v59, %v689_v58 }
  0xea   :  { %v1171_v0 = vpop.f32.mrf.mxu0  ;;  %v1219_v1 = vpop.f32.mrf.mxu1 }
  0xeb   :  { %v674_v4 = vmul.f32 %v1170_v62, %v1513_v51  ;;  %v690_v5 = vmul.f32 %v1218_v63, %v1513_v51  ;;  %v744_v14 = vmax.f32 %v712_v2, 0.0  ;;  %v760_v15 = vmax.f32 %v728_v3, 0.0 }
  0xec   :  { %v1172_v6 = vpop.f32.mrf.mxu0  ;;  %v1220_v7 = vpop.f32.mrf.mxu1 }
  0xed   :  { %v713_v8 = vadd.f32 %v1520_v59, %v674_v4  ;;  %v729_v9 = vadd.f32 %v1520_v59, %v690_v5  ;;  %v1173_v10 = vadd.f32 %v1172_v6, %v1171_v0  ;;  %v1221_v11 = vadd.f32 %v1220_v7, %v1219_v1 }
  0xee   :  { %v1174_v12 = vpop.f32.mrf.mxu0  ;;  %v1222_v13 = vpop.f32.mrf.mxu1 }
  0xef   :  { %v745_v16 = vmax.f32 %v713_v8, 0.0  ;;  %v761_v17 = vmax.f32 %v729_v9, 0.0  ;;  %v675_v18 = vmul.f32 %v1173_v10, %v1513_v51  ;;  %v691_v19 = vmul.f32 %v1221_v11, %v1513_v51 }
  0xf0   :  { %v1175_v20 = vpop.f32.mrf.mxu0  ;;  %v1223_v21 = vpop.f32.mrf.mxu1 }
  0xf1   :  { %v1057_v22 = vpack.c.bf16 %v745_v16, %v744_v14  ;;  %v1097_v23 = vpack.c.bf16 %v761_v17, %v760_v15  ;;  %v1176_v24 = vadd.f32 %v1175_v20, %v1174_v12  ;;  %v1224_v25 = vadd.f32 %v1223_v21, %v1222_v13 }
  0xf2   :  { %v1177_v26 = vpop.f32.mrf.mxu0  ;;  %v1225_v27 = vpop.f32.mrf.mxu1  ;;  %v714_v28 = vadd.f32 %v1520_v59, %v675_v18  ;;  %v730_v29 = vadd.f32 %v1520_v59, %v691_v19 }
  0xf3   :  { %1058 = vst [vmem:[%s1636_s4] sm:$0xff] %v1057_v22   ;;  %1141 = vst [vmem:[%s1636_s4 + $0x40] sm:$0xff] %v1097_v23   ;;  %v676_v30 = vmul.f32 %v1176_v24, %v1513_v51  ;;  %v692_v31 = vmul.f32 %v1224_v25, %v1513_v51 }
  0xf4   :  { %v1178_v32 = vpop.f32.mrf.mxu0  ;;  %v1226_v33 = vpop.f32.mrf.mxu1  ;;  %v746_v42 = vmax.f32 %v714_v28, 0.0  ;;  %v762_v43 = vmax.f32 %v730_v29, 0.0 }
  0xf5   :  { %v1179_v34 = vadd.f32 %v1178_v32, %v1177_v26  ;;  %v1227_v35 = vadd.f32 %v1226_v33, %v1225_v27  ;;  %v715_v36 = vadd.f32 %v1520_v59, %v676_v30  ;;  %v731_v37 = vadd.f32 %v1520_v59, %v692_v31 }
  0xf6   :  { %v1180_v38 = vpop.f32.mrf.mxu0  ;;  %v1228_v39 = vpop.f32.mrf.mxu1 }
  0xf7   :  { %v677_v40 = vmul.f32 %v1179_v34, %v1513_v51  ;;  %v693_v41 = vmul.f32 %v1227_v35, %v1513_v51  ;;  %v747_v44 = vmax.f32 %v715_v36, 0.0  ;;  %v763_v45 = vmax.f32 %v731_v37, 0.0 }
  0xf8   :  { %v1181_v46 = vpop.f32.mrf.mxu0  ;;  %v1229_v47 = vpop.f32.mrf.mxu1 }
  0xf9   :  { %v1182_v48 = vadd.f32 %v1181_v46, %v1180_v38  ;;  %v1230_v49 = vadd.f32 %v1229_v47, %v1228_v39  ;;  %v1062_v50 = vpack.c.bf16 %v747_v44, %v746_v42  ;;  %v1102_v52 = vpack.c.bf16 %v763_v45, %v762_v43 }
  0xfa   :  { %v1183_v53 = vpop.f32.mrf.mxu0  ;;  %v1231_v54 = vpop.f32.mrf.mxu1  ;;  %v716_v55 = vadd.f32 %v1520_v59, %v677_v40  ;;  %v732_v56 = vadd.f32 %v1520_v59, %v693_v41 }
  0xfb   :  { %v678_v57 = vmul.f32 %v1182_v48, %v1513_v51  ;;  %v694_v58 = vmul.f32 %v1230_v49, %v1513_v51  ;;  %1134 = vst [vmem:[%s1636_s4 + $0x8] sm:$0xff] %v1062_v50   ;;  %1142 = vst [vmem:[%s1636_s4 + $0x48] sm:$0xff] %v1102_v52  }
  0xfc   :  { %v1184_v60 = vpop.f32.mrf.mxu0  ;;  %v1232_v61 = vpop.f32.mrf.mxu1  ;;  %v748_v4 = vmax.f32 %v716_v55, 0.0  ;;  %v764_v5 = vmax.f32 %v732_v56, 0.0 }
  0xfd   :  { %v717_v62 = vadd.f32 %v1520_v59, %v678_v57  ;;  %v733_v63 = vadd.f32 %v1520_v59, %v694_v58  ;;  %v1185_v0 = vadd.f32 %v1184_v60, %v1183_v53  ;;  %v1233_v1 = vadd.f32 %v1232_v61, %v1231_v54 }
  0xfe   :  { %v1186_v2 = vpop.f32.mrf.mxu0  ;;  %v1234_v3 = vpop.f32.mrf.mxu1 }
  0xff   :  { %v749_v6 = vmax.f32 %v717_v62, 0.0  ;;  %v765_v7 = vmax.f32 %v733_v63, 0.0  ;;  %v679_v8 = vmul.f32 %v1185_v0, %v1513_v51  ;;  %v695_v9 = vmul.f32 %v1233_v1, %v1513_v51 }
 0x100   :  { %v1187_v10 = vpop.f32.mrf.mxu0  ;;  %v1235_v11 = vpop.f32.mrf.mxu1 }
 0x101   :  { %v1067_v12 = vpack.c.bf16 %v749_v6, %v748_v4  ;;  %v1107_v13 = vpack.c.bf16 %v765_v7, %v764_v5  ;;  %v1188_v14 = vadd.f32 %v1187_v10, %v1186_v2  ;;  %v1236_v15 = vadd.f32 %v1235_v11, %v1234_v3 }
 0x102   :  { %v1189_v16 = vpop.f32.mrf.mxu0  ;;  %v1237_v17 = vpop.f32.mrf.mxu1  ;;  %v718_v18 = vadd.f32 %v1520_v59, %v679_v8  ;;  %v734_v19 = vadd.f32 %v1520_v59, %v695_v9 }
 0x103   :  { %1135 = vst [vmem:[%s1636_s4 + $0x10] sm:$0xff] %v1067_v12   ;;  %1143 = vst [vmem:[%s1636_s4 + $0x50] sm:$0xff] %v1107_v13   ;;  %v680_v20 = vmul.f32 %v1188_v14, %v1513_v51  ;;  %v696_v21 = vmul.f32 %v1236_v15, %v1513_v51 }
 0x104   :  { %v1190_v22 = vpop.f32.mrf.mxu0  ;;  %v1238_v23 = vpop.f32.mrf.mxu1  ;;  %v750_v32 = vmax.f32 %v718_v18, 0.0  ;;  %v766_v33 = vmax.f32 %v734_v19, 0.0 }
 0x105   :  { %v1191_v24 = vadd.f32 %v1190_v22, %v1189_v16  ;;  %v1239_v25 = vadd.f32 %v1238_v23, %v1237_v17  ;;  %v719_v26 = vadd.f32 %v1520_v59, %v680_v20  ;;  %v735_v27 = vadd.f32 %v1520_v59, %v696_v21 }
 0x106   :  { %v1192_v28 = vpop.f32.mrf.mxu0  ;;  %v1240_v29 = vpop.f32.mrf.mxu1 }
 0x107   :  { %v681_v30 = vmul.f32 %v1191_v24, %v1513_v51  ;;  %v697_v31 = vmul.f32 %v1239_v25, %v1513_v51  ;;  %v751_v34 = vmax.f32 %v719_v26, 0.0  ;;  %v767_v35 = vmax.f32 %v735_v27, 0.0 }
 0x108   :  { %v1193_v36 = vpop.f32.mrf.mxu0  ;;  %v1241_v37 = vpop.f32.mrf.mxu1 }
 0x109   :  { %v1194_v38 = vadd.f32 %v1193_v36, %v1192_v28  ;;  %v1242_v39 = vadd.f32 %v1241_v37, %v1240_v29  ;;  %v1072_v40 = vpack.c.bf16 %v751_v34, %v750_v32  ;;  %v1112_v41 = vpack.c.bf16 %v767_v35, %v766_v33 }
 0x10a   :  { %v1195_v42 = vpop.f32.mrf.mxu0  ;;  %v1243_v43 = vpop.f32.mrf.mxu1  ;;  %v720_v44 = vadd.f32 %v1520_v59, %v681_v30  ;;  %v736_v45 = vadd.f32 %v1520_v59, %v697_v31 }
 0x10b   :  { %v682_v46 = vmul.f32 %v1194_v38, %v1513_v51  ;;  %v698_v47 = vmul.f32 %v1242_v39, %v1513_v51  ;;  %1136 = vst [vmem:[%s1636_s4 + $0x18] sm:$0xff] %v1072_v40   ;;  %1144 = vst [vmem:[%s1636_s4 + $0x58] sm:$0xff] %v1112_v41  }
 0x10c   :  { %v1196_v48 = vpop.f32.mrf.mxu0  ;;  %v1244_v49 = vpop.f32.mrf.mxu1  ;;  %v752_v57 = vmax.f32 %v720_v44, 0.0  ;;  %v768_v58 = vmax.f32 %v736_v45, 0.0 }
 0x10d   :  { %v721_v50 = vadd.f32 %v1520_v59, %v682_v46  ;;  %v737_v52 = vadd.f32 %v1520_v59, %v698_v47  ;;  %v1197_v53 = vadd.f32 %v1196_v48, %v1195_v42  ;;  %v1245_v54 = vadd.f32 %v1244_v49, %v1243_v43 }
 0x10e   :  { %v1198_v55 = vpop.f32.mrf.mxu0  ;;  %v1246_v56 = vpop.f32.mrf.mxu1 }
 0x10f   :  { %v753_v60 = vmax.f32 %v721_v50, 0.0  ;;  %v769_v61 = vmax.f32 %v737_v52, 0.0  ;;  %v683_v62 = vmul.f32 %v1197_v53, %v1513_v51  ;;  %v699_v63 = vmul.f32 %v1245_v54, %v1513_v51 }
 0x110   :  { %v1199_v0 = vpop.f32.mrf.mxu0  ;;  %v1247_v1 = vpop.f32.mrf.mxu1 }
 0x111   :  { %v1077_v2 = vpack.c.bf16 %v753_v60, %v752_v57  ;;  %v1117_v3 = vpack.c.bf16 %v769_v61, %v768_v58  ;;  %v1200_v4 = vadd.f32 %v1199_v0, %v1198_v55  ;;  %v1248_v5 = vadd.f32 %v1247_v1, %v1246_v56 }
 0x112   :  { %v1201_v6 = vpop.f32.mrf.mxu0  ;;  %v1249_v7 = vpop.f32.mrf.mxu1  ;;  %v722_v8 = vadd.f32 %v1520_v59, %v683_v62  ;;  %v738_v9 = vadd.f32 %v1520_v59, %v699_v63 }
 0x113   :  { %1137 = vst [vmem:[%s1636_s4 + $0x20] sm:$0xff] %v1077_v2   ;;  %1145 = vst [vmem:[%s1636_s4 + $0x60] sm:$0xff] %v1117_v3   ;;  %v684_v10 = vmul.f32 %v1200_v4, %v1513_v51  ;;  %v700_v11 = vmul.f32 %v1248_v5, %v1513_v51 }
 0x114   :  { %v1202_v12 = vpop.f32.mrf.mxu0  ;;  %v1250_v13 = vpop.f32.mrf.mxu1  ;;  %v754_v22 = vmax.f32 %v722_v8, 0.0  ;;  %v770_v23 = vmax.f32 %v738_v9, 0.0 }
 0x115   :  { %v1203_v14 = vadd.f32 %v1202_v12, %v1201_v6  ;;  %v1251_v15 = vadd.f32 %v1250_v13, %v1249_v7  ;;  %v723_v16 = vadd.f32 %v1520_v59, %v684_v10  ;;  %v739_v17 = vadd.f32 %v1520_v59, %v700_v11 }
 0x116   :  { %v1204_v18 = vpop.f32.mrf.mxu0  ;;  %v1252_v19 = vpop.f32.mrf.mxu1 }
 0x117   :  { %v685_v20 = vmul.f32 %v1203_v14, %v1513_v51  ;;  %v701_v21 = vmul.f32 %v1251_v15, %v1513_v51  ;;  %v755_v24 = vmax.f32 %v723_v16, 0.0  ;;  %v771_v25 = vmax.f32 %v739_v17, 0.0 }
 0x118   :  { %v1205_v26 = vpop.f32.mrf.mxu0  ;;  %v1253_v27 = vpop.f32.mrf.mxu1 }
 0x119   :  { %v1206_v28 = vadd.f32 %v1205_v26, %v1204_v18  ;;  %v1254_v29 = vadd.f32 %v1253_v27, %v1252_v19  ;;  %v1082_v30 = vpack.c.bf16 %v755_v24, %v754_v22  ;;  %v1122_v31 = vpack.c.bf16 %v771_v25, %v770_v23 }
 0x11a   :  { %v1207_v32 = vpop.f32.mrf.mxu0  ;;  %v1255_v33 = vpop.f32.mrf.mxu1  ;;  %v724_v34 = vadd.f32 %v1520_v59, %v685_v20  ;;  %v740_v35 = vadd.f32 %v1520_v59, %v701_v21 }
 0x11b   :  { %v686_v36 = vmul.f32 %v1206_v28, %v1513_v51  ;;  %v702_v37 = vmul.f32 %v1254_v29, %v1513_v51  ;;  %1138 = vst [vmem:[%s1636_s4 + $0x28] sm:$0xff] %v1082_v30   ;;  %1146 = vst [vmem:[%s1636_s4 + $0x68] sm:$0xff] %v1122_v31  }
 0x11c   :  { %v1208_v38 = vpop.f32.mrf.mxu0  ;;  %v1256_v39 = vpop.f32.mrf.mxu1  ;;  %v756_v46 = vmax.f32 %v724_v34, 0.0  ;;  %v772_v47 = vmax.f32 %v740_v35, 0.0 }
 0x11d   :  { %v725_v40 = vadd.f32 %v1520_v59, %v686_v36  ;;  %v741_v41 = vadd.f32 %v1520_v59, %v702_v37  ;;  %v1209_v42 = vadd.f32 %v1208_v38, %v1207_v32  ;;  %v1257_v43 = vadd.f32 %v1256_v39, %v1255_v33 }
 0x11e   :  { %v1210_v44 = vpop.f32.mrf.mxu0  ;;  %v1258_v45 = vpop.f32.mrf.mxu1 }
 0x11f   :  { %v757_v48 = vmax.f32 %v725_v40, 0.0  ;;  %v773_v49 = vmax.f32 %v741_v41, 0.0  ;;  %v687_v50 = vmul.f32 %v1209_v42, %v1513_v51  ;;  %v703_v52 = vmul.f32 %v1257_v43, %v1513_v51 }
 0x120   :  { %v1211_v53 = vpop.f32.mrf.mxu0  ;;  %v1259_v54 = vpop.f32.mrf.mxu1 }
 0x121   :  { %v1087_v55 = vpack.c.bf16 %v757_v48, %v756_v46  ;;  %v1127_v56 = vpack.c.bf16 %v773_v49, %v772_v47  ;;  %v1212_v57 = vadd.f32 %v1211_v53, %v1210_v44  ;;  %v1260_v58 = vadd.f32 %v1259_v54, %v1258_v45 }
 0x122   :  { %v726_v60 = vadd.f32 %v1520_v59, %v687_v50  ;;  %v742_v61 = vadd.f32 %v1520_v59, %v703_v52 }
 0x123   :  { %1139 = vst [vmem:[%s1636_s4 + $0x30] sm:$0xff] %v1087_v55   ;;  %1147 = vst [vmem:[%s1636_s4 + $0x70] sm:$0xff] %v1127_v56   ;;  %v688_v62 = vmul.f32 %v1212_v57, %v1513_v51  ;;  %v704_v63 = vmul.f32 %v1260_v58, %v1513_v51 }
 0x124   :  { %v758_v2 = vmax.f32 %v726_v60, 0.0  ;;  %v774_v3 = vmax.f32 %v742_v61, 0.0 }
 0x125   :  { %v727_v0 = vadd.f32 %v1520_v59, %v688_v62  ;;  %v743_v1 = vadd.f32 %v1520_v59, %v704_v63 }
 0x127   :  { %v759_v4 = vmax.f32 %v727_v0, 0.0  ;;  %v775_v5 = vmax.f32 %v743_v1, 0.0 }
 0x129   :  { %v1092_v6 = vpack.c.bf16 %v759_v4, %v758_v2  ;;  %v1132_v7 = vpack.c.bf16 %v775_v5, %v774_v3 }
 0x12b   :  { %1140 = vst [vmem:[%s1636_s4 + $0x38] sm:$0xff] %v1092_v6   ;;  %1148 = vst [vmem:[%s1636_s4 + $0x78] sm:$0xff] %v1132_v7  }

// kernel: resnet18_sigmoid_forward.22
= control target key start
LH: loop header
LB: loop body
LE: loop exit
PB: predicated region body
PF: predicated region fallthrough
CT: control target
= control target key end

     0   :  { %s1142_s15 = smov 0   ;;  %s1144_s16 = smov 0   ;;  %s1273_s0 = inlined_call_operand.vmem [shape: bf16[64,1152], index: 0, kind: input, shape index: {}]   ;;  %s1274_s1 = inlined_call_operand.vmem [shape: bf16[1152,128], index: 1, kind: input, shape index: {}]   ;;  %s1275_s2 = inlined_call_operand.vmem [shape: f32[1,128], index: 2, kind: input, shape index: {}]   ;;  %s1276_s3 = inlined_call_operand.vmem [shape: f32[1,128], index: 3, kind: input, shape index: {}]   ;;  %s1277_s4 = inlined_call_operand.vmem [shape: bf16[64,128], index: 4, kind: output, shape index: {}]  }
   0x1   :  { %s1146_s17 = smov 0  }
   0x2 LB: > { %s1158_s18 = sadd.s32 4294967295, %s1114_s17   ;;  %s1161_s19 = sadd.s32 1, %s1114_s17   ;;  %s1114_s17 = sphi %s1146_s17, %s1280_s17   ;;  %s1110_s16 = sphi %s1144_s16, %s1279_s16   ;;  %s1106_s15 = sphi %s1142_s15, %s1278_s15  }
   0x3   : > { %s18_s20 = ssub.s32 %s1114_s17, %s1161_s19  ;;  %s21_s21 = sadd.s32 1, %s1110_s16 }
   0x4   : > { %p19_p0 = scmp.eq.s32.totalorder %s18_s20, 0  ;;  %p28_p1 = scmp.ne.s32.totalorder %s1110_s16, %s1106_s15 }
   0x5   : > { %p29_p2 = scmp.eq.s32.totalorder %s1114_s17, 0  ;;  %p847_p4 = scmp.ge.s32.totalorder %s1114_s17, 3 }
   0x6   : > { %s1170_s22 = scalar_select %p19_p0, %s1110_s16, %s21_s21  }
   0x7   : > { %p30_p3 = por %p29_p2, %p28_p1  ;;  %149 = sbr.rel (%p847_p4) target bundleno = 26 (0x1a), region = 24 }
   0xc   : > { %152 = sbr.rel (!%p30_p3) target bundleno = 26 (0x1a), region = 28  ;;  %s154_s23 = sand.u32 (%p30_p3), 1, %s1110_s16  }
   0xd   : > { %s917_s24 = smul.u32 (%p30_p3), 12, %s1114_s17 }
   0xe   : > { %s1025_s25 = smul.u32 (%p30_p3), 96, %s154_s23 }
   0xf   : > { %s1178_s28 = scalar_lea.vmem (%p30_p3), %s1273_s0, %s917_s24 }
  0x10   : > { %v174_v0 = vld [vmem:[%s1178_s28] sm:$0xff] (%p30_p3)  ;;  %v178_v2 = vld [vmem:[%s1178_s28 + $0x48] sm:$0xff] (%p30_p3)  ;;  %s156_s29 = scalar_lea.vmem (%p30_p3), [#allocation3], %s1025_s25  ;;  %v182_v4 = vld [vmem:[%s1178_s28 + $0x90] sm:$0xff] (%p30_p3) }
  0x11   : > { %v176_v1 = vld [vmem:[%s1178_s28 + $0x24] sm:$0xff]  ;;  %175 = vst [vmem:[%s156_s29] sm:$0xff] %v174_v0  ;;  %179 = vst [vmem:[%s156_s29 + $0x18] sm:$0xff] %v178_v2  ;;  %v180_v3 = vld [vmem:[%s1178_s28 + $0x6c] sm:$0xff] }
  0x12   : > { %177 = vst [vmem:[%s156_s29 + $0xc] sm:$0xff] %v176_v1  ;;  %v184_v5 = vld [vmem:[%s1178_s28 + $0xb4] sm:$0xff]  ;;  %181 = vst [vmem:[%s156_s29 + $0x24] sm:$0xff] %v180_v3  ;;  %v188_v7 = vld [vmem:[%s1178_s28 + $0xfc] sm:$0xff] }
  0x13   : > { %183 = vst [vmem:[%s156_s29 + $0x30] sm:$0xff] %v182_v4  ;;  %185 = vst [vmem:[%s156_s29 + $0x3c] sm:$0xff] %v184_v5  ;;  %v186_v6 = vld [vmem:[%s1178_s28 + $0xd8] sm:$0xff]  ;;  %v849_v8 = vld [vmem:[%s1178_s28 + $0x8] sm:$0xf] }
  0x14   : > { %187 = vst [vmem:[%s156_s29 + $0x48] sm:$0xff] %v186_v6  ;;  %189 = vst [vmem:[%s156_s29 + $0x54] sm:$0xff] %v188_v7  ;;  %v851_v9 = vld [vmem:[%s1178_s28 + $0x2c] sm:$0xf]  ;;  %v853_v10 = vld [vmem:[%s1178_s28 + $0x50] sm:$0xf] }
  0x15   : > { %850 = vst [vmem:[%s156_s29 + $0x8] sm:$0xf] %v849_v8  ;;  %v855_v11 = vld [vmem:[%s1178_s28 + $0x74] sm:$0xf]  ;;  %852 = vst [vmem:[%s156_s29 + $0x14] sm:$0xf] %v851_v9 }
  0x16   : > { %854 = vst [vmem:[%s156_s29 + $0x20] sm:$0xf] %v853_v10  ;;  %856 = vst [vmem:[%s156_s29 + $0x2c] sm:$0xf] %v855_v11  ;;  %v857_v12 = vld [vmem:[%s1178_s28 + $0x98] sm:$0xf] }
  0x17   : > { %v859_v13 = vld [vmem:[%s1178_s28 + $0xbc] sm:$0xf]  ;;  %v861_v14 = vld [vmem:[%s1178_s28 + $0xe0] sm:$0xf]  ;;  %858 = vst [vmem:[%s156_s29 + $0x38] sm:$0xf] %v857_v12 }
  0x18   : > { %860 = vst [vmem:[%s156_s29 + $0x44] sm:$0xf] %v859_v13  ;;  %862 = vst [vmem:[%s156_s29 + $0x50] sm:$0xf] %v861_v14  ;;  %v863_v15 = vld [vmem:[%s1178_s28 + $0x104] sm:$0xf] }
  0x19   : > { %864 = vst [vmem:[%s156_s29 + $0x5c] sm:$0xf] %v863_v15 }
  0x1a PF: > { %p865_p5 = scmp.ge.s32.totalorder %s1114_s17, 1  ;;  %p227_p6 = scmp.lt.s32.totalorder %s1114_s17, 4 }
  0x1c   : > { %p228_p7 = pnand %p865_p5, %p227_p6 }
  0x1d   : > { %s234_s30 = sand.u32 (!%p228_p7), 1, %s1106_s15   ;;  %s260_s5 = smul.u32 (!%p228_p7), 48, %s1158_s18 }
  0x1e   : > { %231 = sbr.rel (%p228_p7) target bundleno = 324 (0x144), region = 58  ;;  %p867_p9 = scmp.ne.s32.totalorder (!%p228_p7), %s1158_s18, 0 }
  0x1f   : > { %s1026_s6 = smul.u32 (!%p228_p7), 96, %s234_s30  ;;  %p261_p8 = scmp.lt.s32.totalorder (!%p228_p7), %s260_s5, 143 }
  0x21   : > { %s1205_s11 = scalar_lea.vmem (!%p228_p7), [#allocation3], %s1026_s6 }
  0x23   : > { %s1282_s5 = smov (!%p261_p8, %s260_s5), 143  ;;  %270 = sbr.rel (%p867_p9) target bundleno = 45 (0x2d), region = 66 }
  0x24   : > { %s866_s7 = sshll.u32 %s1282_s5, 2 }
  0x25   : > { %s1203_s10 = scalar_lea.vmem %s1274_s1, %s866_s7 }
  0x28   : > { %v1116_v16 = vmov 0.0  }
  0x29   : > { %271 = vst [vmem:[#allocation2 + $0x30] sm:$0xff] %v1116_v16  ;;  %272 = vst [vmem:[#allocation2] sm:$0xff] %v1116_v16 }
  0x2a   : > { %273 = vst [vmem:[#allocation2 + $0x18] sm:$0xff] %v1116_v16  ;;  %274 = vst [vmem:[#allocation2 + $0x10] sm:$0xff] %v1116_v16 }
  0x2b   : > { %275 = vst [vmem:[#allocation2 + $0x8] sm:$0xff] %v1116_v16  ;;  %276 = vst [vmem:[#allocation2 + $0x20] sm:$0xff] %v1116_v16 }
  0x2c   : > { %277 = vst [vmem:[#allocation2 + $0x28] sm:$0xff] %v1116_v16  ;;  %278 = vst [vmem:[#allocation2 + $0x38] sm:$0xff] %v1116_v16 }
  0x2d PF: > { %v1052_v17 = vld [vmem:[%s1203_s10 + $0x78] sm:$0xff]   ;;  %v1055_v20 = vld [vmem:[%s1203_s10 + $0x70] sm:$0xff]   ;;  %v1058_v23 = vld [vmem:[%s1203_s10 + $0x68] sm:$0xff]   ;;  %p904_p10 = scmp.ne.s32.totalorder %s1158_s18, 2 }
  0x2e   : > { %v1053_v18 = vld [vmem:[%s1203_s10 + $0x38] sm:$0xff]   ;;  %949 = vmatprep.subr.bf16.mxu0 %v1052_v17  ;;  %v1056_v21 = vld [vmem:[%s1203_s10 + $0x30] sm:$0xff]   ;;  %v1059_v24 = vld [vmem:[%s1203_s10 + $0x28] sm:$0xff]  }
  0x2f   : > { %v1054_v19 = vld [vmem:[%s1203_s10 + $0xb8] sm:$0xff]   ;;  %950 = vmatpush3.bf16.msra.mxu0 %v1053_v18  ;;  %v1057_v22 = vld [vmem:[%s1203_s10 + $0xb0] sm:$0xff]   ;;  %v1060_v25 = vld [vmem:[%s1203_s10 + $0xa8] sm:$0xff]  }
  0x30   : > { %1001 = vmatprep.subr.bf16.mxu1 %v1054_v19  ;;  %951 = vmatprep.subr.bf16.mxu0 %v1055_v20  ;;  %v1061_v26 = vld [vmem:[%s1203_s10 + $0x60] sm:$0xff]   ;;  %v1064_v29 = vld [vmem:[%s1203_s10 + $0x58] sm:$0xff]   ;;  %v1067_v32 = vld [vmem:[%s1203_s10 + $0x50] sm:$0xff]  }
  0x31   : > { %1002 = vmatpush3.bf16.msra.mxu1 %v1054_v19  ;;  %v1062_v27 = vld [vmem:[%s1203_s10 + $0x20] sm:$0xff]   ;;  %v1066_v30 = vld [vmem:[%s1203_s10 + $0x98] sm:$0xff]   ;;  %v1069_v33 = vld [vmem:[%s1203_s10 + $0x90] sm:$0xff]  }
  0x32   : > { %1003 = vmatprep.subr.bf16.mxu1 %v1057_v22  ;;  %v1063_v28 = vld [vmem:[%s1203_s10 + $0xa0] sm:$0xff]   ;;  %v1065_v31 = vld [vmem:[%s1203_s10 + $0x18] sm:$0xff]   ;;  %v1068_v34 = vld [vmem:[%s1203_s10 + $0x10] sm:$0xff]  }
  0x33   : > { %952 = vmatpush3.bf16.msra.mxu0 %v1056_v21  ;;  %v1070_v35 = vld [vmem:[%s1203_s10 + $0x48] sm:$0xff]   ;;  %v1073_v38 = vld [vmem:[%s1203_s10 + $0x40] sm:$0xff]   ;;  %v1088_v49 = vld [vmem:[%s1205_s11 + $0x50] ss:$12 sps:$4 sm:$0xff]  }
  0x34   : > { %953 = vmatprep.subr.bf16.mxu0 %v1058_v23  ;;  %v1071_v36 = vld [vmem:[%s1203_s10 + $0x8] sm:$0xff]   ;;  %v1075_v39 = vld [vmem:[%s1203_s10 + $0x80] sm:$0xff]   ;;  %v1086_v50 = vld [vmem:[%s1205_s11 + $0x30] ss:$12 sps:$4 sm:$0xff]  }
  0x35   : > { %1004 = vmatpush3.bf16.msra.mxu1 %v1057_v22  ;;  %v1072_v37 = vld [vmem:[%s1203_s10 + $0x88] sm:$0xff]   ;;  %v1078_v40 = vld [vmem:[%s1205_s11 + $0x4] ss:$12 sps:$4 sm:$0xff]   ;;  %v1084_v48 = vld [vmem:[%s1205_s11 + $0x34] ss:$12 sps:$4 sm:$0xff]  }
  0x36   : > { %1005 = vmatprep.subr.bf16.mxu1 %v1060_v25  ;;  %v1079_v41 = vld [vmem:[%s1205_s11 + $0x8] ss:$12 sps:$4 sm:$0xff]   ;;  %v1074_v42 = vld [vmem:[%s1203_s10] sm:$0xff]   ;;  %591 = vmatprep.mubr.bf16.mxu0 %v1078_v40  ;;  %v1089_v51 = vld [vmem:[%s1205_s11 + $0x4c] ss:$12 sps:$4 sm:$0xff]  }
  0x37   : > { %954 = vmatpush3.bf16.msra.mxu0 %v1059_v24  ;;  %1017 = vmatprep.mubr.bf16.mxu1 %v1079_v41  ;;  %v1076_v43 = vld [vmem:[%s1205_s11] ss:$12 sps:$4 sm:$0xff]   ;;  %v1081_v44 = vld [vmem:[%s1205_s11 + $0x1c] ss:$12 sps:$4 sm:$0xff]   ;;  %v1087_v46 = vld [vmem:[%s1205_s11 + $0x38] ss:$12 sps:$4 sm:$0xff]  }
  0x38   : > { %955 = vmatprep.subr.bf16.mxu0 %v1061_v26  ;;  %v1080_v45 = vld [vmem:[%s1205_s11 + $0x20] ss:$12 sps:$4 sm:$0xff]   ;;  %v1083_v47 = vld [vmem:[%s1205_s11 + $0x18] ss:$12 sps:$4 sm:$0xff]   ;;  %v1091_v52 = vld [vmem:[%s1205_s11 + $0x48] ss:$12 sps:$4 sm:$0xff]  }
  0x39   : > { %1006 = vmatpush3.bf16.msra.mxu1 %v1060_v25  ;;  %v279_v58 = vld [vmem:[#allocation2 + $0x30] sm:$0xff]  ;;  %v280_v2 = vld [vmem:[#allocation2] sm:$0xff]  ;;  %v281_v9 = vld [vmem:[#allocation2 + $0x18] sm:$0xff] }
  0x3a   : > { %1007 = vmatprep.subr.bf16.mxu1 %v1063_v28  ;;  %v282_v16 = vld [vmem:[#allocation2 + $0x10] sm:$0xff]  ;;  %v283_v24 = vld [vmem:[#allocation2 + $0x8] sm:$0xff] }
  0x3b   : > { %956 = vmatpush3.bf16.msra.mxu0 %v1062_v27 }
  0x3c   : > { %957 = vmatprep.subr.bf16.mxu0 %v1064_v29 }
  0x3d   : > { %1008 = vmatpush3.bf16.msra.mxu1 %v1063_v28 }
  0x3e   : > { %1009 = vmatprep.subr.bf16.mxu1 %v1066_v30 }
  0x3f   : > { %958 = vmatpush3.bf16.msra.mxu0 %v1065_v31  ;;  %v284_v31 = vld [vmem:[#allocation2 + $0x20] sm:$0xff] }
  0x40   : > { %959 = vmatprep.subr.bf16.mxu0 %v1067_v32 }
  0x41   : > { %1010 = vmatpush3.bf16.msra.mxu1 %v1066_v30 }
  0x42   : > { %1011 = vmatprep.subr.bf16.mxu1 %v1069_v33 }
  0x43   : > { %960 = vmatpush3.bf16.msra.mxu0 %v1068_v34 }
  0x44   : > { %961 = vmatprep.subr.bf16.mxu0 %v1070_v35 }
  0x45   : > { %1012 = vmatpush3.bf16.msra.mxu1 %v1069_v33 }
  0x46   : > { %1013 = vmatprep.subr.bf16.mxu1 %v1072_v37 }
  0x47   : > { %962 = vmatpush3.bf16.msra.mxu0 %v1071_v36  ;;  %v285_v36 = vld [vmem:[#allocation2 + $0x28] sm:$0xff] }
  0x48   : > { %963 = vmatprep.subr.bf16.mxu0 %v1073_v38 }
  0x49   : > { %1014 = vmatpush3.bf16.msra.mxu1 %v1072_v37 }
  0x4a   : > { %1015 = vmatprep.subr.bf16.mxu1 %v1075_v39 }
  0x4b   : > { %964 = vmatpush3.bf16.msra.mxu0 %v1074_v42  ;;  %v286_v42 = vld [vmem:[#allocation2 + $0x38] sm:$0xff] }
  0x4d   : > { %1016 = vmatpush3.bf16.msra.mxu1 %v1075_v39 }
  0x4e   : > { %592 = vmatmul.mubr.bf16.vlgmr.msra.gmra.mxu0 %v1076_v43 }
  0x4f   : > { %599 = vmatprep.mubr.bf16.mxu0 %v1081_v44 }
  0x50   : > { %1018 = vmatmul.mubr.bf16.vlgmr.msra.gmra.mxu1 %v1080_v45 }
  0x51   : > { %1021 = vmatprep.mubr.bf16.mxu1 %v1087_v46 }
  0x56   : > { %600 = vmatmul.mubr.bf16.gmra.mxu0 %v1083_v47 }
  0x57   : > { %607 = vmatprep.mubr.bf16.mxu0 %v1084_v48 }
  0x58   : > { %1022 = vmatmul.mubr.bf16.gmra.mxu1 %v1088_v49 }
  0x5e   : > { %608 = vmatmul.mubr.bf16.gmra.mxu0 %v1086_v50 }
  0x5f   : > { %615 = vmatprep.mubr.bf16.mxu0 %v1089_v51 }
  0x66   : > { %616 = vmatmul.mubr.bf16.gmra.mxu0 %v1091_v52 }
 0x10e   : > { %v965_v53 = vpop.f32.mrf.mxu0 }
 0x110   : > { %v966_v54 = vpop.f32.mrf.mxu0  ;;  %v1019_v55 = vpop.f32.mrf.mxu1 }
 0x111   : > { %v967_v56 = vadd.f32 %v966_v54, %v965_v53 }
 0x112   : > { %v968_v57 = vpop.f32.mrf.mxu0  ;;  %v658_v59 = vpop.f32.mrf.mxu1 }
 0x113   : > { %v659_v60 = vadd.f32 %v967_v56, %v658_v59 }
 0x114   : > { %v969_v61 = vpop.f32.mrf.mxu0  ;;  %v1020_v62 = vpop.f32.mrf.mxu1 }
 0x115   : > { %v689_v63 = vadd.f32 %v659_v60, %v279_v58  ;;  %v970_v0 = vadd.f32 %v969_v61, %v968_v57 }
 0x116   : > { %v971_v1 = vpop.f32.mrf.mxu0  ;;  %v661_v3 = vpop.f32.mrf.mxu1 }
 0x117   : > { %697 = vst [vmem:[#allocation2 + $0x30] sm:$0xff] %v689_v63  ;;  %v662_v4 = vadd.f32 %v970_v0, %v661_v3 }
 0x118   : > { %v972_v5 = vpop.f32.mrf.mxu0  ;;  %v1023_v6 = vpop.f32.mrf.mxu1 }
 0x119   : > { %v690_v7 = vadd.f32 %v662_v4, %v280_v2  ;;  %v973_v8 = vadd.f32 %v972_v5, %v971_v1 }
 0x11a   : > { %v974_v10 = vpop.f32.mrf.mxu0  ;;  %v674_v13 = vpop.f32.mrf.mxu1 }
 0x11b   : > { %698 = vst [vmem:[#allocation2] sm:$0xff] %v690_v7  ;;  %v667_v11 = vadd.f32 %v1019_v55, %v973_v8 }
 0x11c   : > { %v975_v12 = vpop.f32.mrf.mxu0  ;;  %v1024_v20 = vpop.f32.mrf.mxu1 }
 0x11d   : > { %v691_v14 = vadd.f32 %v667_v11, %v281_v9  ;;  %v976_v15 = vadd.f32 %v975_v12, %v974_v10 }
 0x11e   : > { %v977_v17 = vpop.f32.mrf.mxu0  ;;  %v677_v27 = vpop.f32.mrf.mxu1 }
 0x11f   : > { %699 = vst [vmem:[#allocation2 + $0x18] sm:$0xff] %v691_v14  ;;  %v670_v18 = vadd.f32 %v1020_v62, %v976_v15 }
 0x120   : > { %v978_v19 = vpop.f32.mrf.mxu0 }
 0x121   : > { %v692_v21 = vadd.f32 %v670_v18, %v282_v16  ;;  %v979_v22 = vadd.f32 %v978_v19, %v977_v17 }
 0x122   : > { %v980_v23 = vpop.f32.mrf.mxu0 }
 0x123   : > { %700 = vst [vmem:[#allocation2 + $0x10] sm:$0xff] %v692_v21  ;;  %v675_v25 = vadd.f32 %v979_v22, %v674_v13 }
 0x124   : > { %v981_v26 = vpop.f32.mrf.mxu0 }
 0x125   : > { %v693_v28 = vadd.f32 %v675_v25, %v283_v24  ;;  %v982_v29 = vadd.f32 %v981_v26, %v980_v23 }
 0x126   : > { %v983_v30 = vpop.f32.mrf.mxu0 }
 0x127   : > { %701 = vst [vmem:[#allocation2 + $0x8] sm:$0xff] %v693_v28  ;;  %v678_v32 = vadd.f32 %v982_v29, %v677_v27 }
 0x128   : > { %v984_v33 = vpop.f32.mrf.mxu0 }
 0x129   : > { %v694_v34 = vadd.f32 %v678_v32, %v284_v31  ;;  %v985_v35 = vadd.f32 %v984_v33, %v983_v30 }
 0x12a   : > { %v986_v37 = vpop.f32.mrf.mxu0 }
 0x12b   : > { %702 = vst [vmem:[#allocation2 + $0x20] sm:$0xff] %v694_v34  ;;  %v683_v38 = vadd.f32 %v1023_v6, %v985_v35 }
 0x12c   : > { %v987_v39 = vpop.f32.mrf.mxu0 }
 0x12d   : > { %v695_v40 = vadd.f32 %v683_v38, %v285_v36  ;;  %v988_v41 = vadd.f32 %v987_v39, %v986_v37 }
 0x12f   : > { %703 = vst [vmem:[#allocation2 + $0x28] sm:$0xff] %v695_v40  ;;  %v686_v43 = vadd.f32 %v1024_v20, %v988_v41  ;;  %708 = sbr.rel (%p904_p10) target bundleno = 324 (0x144), region = 70 }
 0x131   : > { %v696_v44 = vadd.f32 %v686_v43, %v286_v42 }
 0x133   : > { %704 = vst [vmem:[#allocation2 + $0x38] sm:$0xff] %v696_v44 }
 0x134   : > { %v709_v45 = vld [vmem:[#allocation2 + $0x30] sm:$0xff]  ;;  %v710_v46 = vld [vmem:[#allocation2] sm:$0xff]  ;;  %v711_v51 = vld [vmem:[#allocation2 + $0x18] sm:$0xff] }
 0x135   : > { %v905_v47 = vld [vmem:[%s1275_s2] ss:$0 sm:$0xff]  ;;  %v712_v52 = vld [vmem:[#allocation2 + $0x10] sm:$0xff]  ;;  %v713_v55 = vld [vmem:[#allocation2 + $0x8] sm:$0xff] }
 0x136   : > { %v724_v48 = vmul.f32 %v905_v47, %v709_v45  ;;  %v725_v49 = vmul.f32 %v905_v47, %v710_v46  ;;  %v906_v50 = vld [vmem:[%s1276_s3] ss:$0 sm:$0xff]  ;;  %v726_v53 = vmul.f32 %v905_v47, %v711_v51  ;;  %v727_v54 = vmul.f32 %v905_v47, %v712_v52  ;;  %v715_v57 = vld [vmem:[#allocation2 + $0x28] sm:$0xff] }
 0x137   : > { %v714_v56 = vld [vmem:[#allocation2 + $0x20] sm:$0xff]  ;;  %v728_v60 = vmul.f32 %v905_v47, %v713_v55  ;;  %v730_v1 = vmul.f32 %v905_v47, %v715_v57 }
 0x138   : > { %v739_v58 = vadd.f32 %v906_v50, %v724_v48  ;;  %v740_v59 = vadd.f32 %v906_v50, %v725_v49  ;;  %v729_v61 = vmul.f32 %v905_v47, %v714_v56  ;;  %v741_v63 = vadd.f32 %v906_v50, %v726_v53 }
 0x139   : > { %v742_v0 = vadd.f32 %v906_v50, %v727_v54  ;;  %v743_v5 = vadd.f32 %v906_v50, %v728_v60  ;;  %v745_v9 = vadd.f32 %v906_v50, %v730_v1 }
 0x13a   : > { %v716_v62 = vld [vmem:[#allocation2 + $0x38] sm:$0xff]  ;;  %v747_v3 = vmax.f32 %v739_v58, 0.0  ;;  %v748_v4 = vmax.f32 %v740_v59, 0.0  ;;  %v744_v6 = vadd.f32 %v906_v50, %v729_v61  ;;  %v749_v7 = vmax.f32 %v741_v63, 0.0 }
 0x13b   : > { %v731_v2 = vmul.f32 %v905_v47, %v716_v62  ;;  %v750_v8 = vmax.f32 %v742_v0, 0.0  ;;  %v751_v12 = vmax.f32 %v743_v5, 0.0  ;;  %v753_v15 = vmax.f32 %v745_v9, 0.0 }
 0x13c   : > { %v929_v11 = vpack.c.bf16 %v748_v4, %v747_v3  ;;  %v752_v13 = vmax.f32 %v744_v6, 0.0 }
 0x13d   : > { %v746_v10 = vadd.f32 %v906_v50, %v731_v2  ;;  %v934_v14 = vpack.c.bf16 %v750_v8, %v749_v7 }
 0x13e   : > { %930 = vst [vmem:[%s1277_s4] sm:$0xff] %v929_v11   ;;  %v939_v17 = vpack.c.bf16 %v752_v13, %v751_v12 }
 0x13f   : > { %v754_v16 = vmax.f32 %v746_v10, 0.0  ;;  %946 = vst [vmem:[%s1277_s4 + $0x8] sm:$0xff] %v934_v14  }
 0x140   : > { %947 = vst [vmem:[%s1277_s4 + $0x10] sm:$0xff] %v939_v17  }
 0x141   : > { %v944_v18 = vpack.c.bf16 %v754_v16, %v753_v15 }
 0x143   : > { %948 = vst [vmem:[%s1277_s4 + $0x18] sm:$0xff] %v944_v18  }
 0x144 PF: > { %p11_p11 = scmp.ge.s32.totalorder %s1161_s19, 5   ;;  %s1278_s15 = smov %s1110_s16 }
 0x145   : > { %s1279_s16 = smov %s1170_s22  ;;  %s1280_s17 = smov %s1161_s19 }
 0x146   :  { %13 = sbr.rel (!%p11_p11) target bundleno = 2 (0x2), region = 110 }

// kernel: resnet18_sigmoid_forward.23
= control target key start
LH: loop header
LB: loop body
LE: loop exit
PB: predicated region body
PF: predicated region fallthrough
CT: control target
= control target key end

     0   :  { %s1217_s18 = smov 0   ;;  %s1219_s19 = smov 0   ;;  %s1360_s0 = inlined_call_operand.vmem [shape: bf16[64,1152], index: 0, kind: input, shape index: {}]   ;;  %s1361_s1 = inlined_call_operand.vmem [shape: bf16[1152,128], index: 1, kind: input, shape index: {}]   ;;  %s1362_s2 = inlined_call_operand.vmem [shape: f32[1,128], index: 2, kind: input, shape index: {}]   ;;  %s1363_s3 = inlined_call_operand.vmem [shape: f32[1,128], index: 3, kind: input, shape index: {}]   ;;  %s1364_s4 = inlined_call_operand.vmem [shape: bf16[64,128], index: 4, kind: input, shape index: {}]   ;;  %s1365_s5 = inlined_call_operand.vmem [shape: bf16[64,128], index: 5, kind: output, shape index: {}]  }
   0x1   :  { %s1221_s20 = smov 0  }
   0x2 LB: > { %s1233_s21 = sadd.s32 4294967295, %s1184_s20   ;;  %s1236_s22 = sadd.s32 1, %s1184_s20   ;;  %s1184_s20 = sphi %s1221_s20, %s1368_s20   ;;  %s1180_s19 = sphi %s1219_s19, %s1367_s19   ;;  %s1176_s18 = sphi %s1217_s18, %s1366_s18  }
   0x3   : > { %s19_s23 = ssub.s32 %s1184_s20, %s1236_s22  ;;  %s22_s24 = sadd.s32 1, %s1180_s19 }
   0x4   : > { %p20_p0 = scmp.eq.s32.totalorder %s19_s23, 0  ;;  %p29_p1 = scmp.ne.s32.totalorder %s1180_s19, %s1176_s18 }
   0x5   : > { %p30_p2 = scmp.eq.s32.totalorder %s1184_s20, 0  ;;  %p898_p4 = scmp.ge.s32.totalorder %s1184_s20, 3 }
   0x6   : > { %s1245_s25 = scalar_select %p20_p0, %s1180_s19, %s22_s24  }
   0x7   : > { %p31_p3 = por %p30_p2, %p29_p1  ;;  %174 = sbr.rel (%p898_p4) target bundleno = 26 (0x1a), region = 28 }
   0xc   : > { %177 = sbr.rel (!%p31_p3) target bundleno = 26 (0x1a), region = 32  ;;  %s179_s26 = sand.u32 (%p31_p3), 1, %s1180_s19  }
   0xd   : > { %s968_s27 = smul.u32 (%p31_p3), 12, %s1184_s20 }
   0xe   : > { %s1095_s28 = smul.u32 (%p31_p3), 96, %s179_s26 }
   0xf   : > { %s1253_s6 = scalar_lea.vmem (%p31_p3), %s1360_s0, %s968_s27 }
  0x10   : > { %v199_v0 = vld [vmem:[%s1253_s6] sm:$0xff] (%p31_p3)  ;;  %v203_v2 = vld [vmem:[%s1253_s6 + $0x48] sm:$0xff] (%p31_p3)  ;;  %s181_s7 = scalar_lea.vmem (%p31_p3), [#allocation3], %s1095_s28  ;;  %v207_v4 = vld [vmem:[%s1253_s6 + $0x90] sm:$0xff] (%p31_p3) }
  0x11   : > { %v201_v1 = vld [vmem:[%s1253_s6 + $0x24] sm:$0xff]  ;;  %200 = vst [vmem:[%s181_s7] sm:$0xff] %v199_v0  ;;  %204 = vst [vmem:[%s181_s7 + $0x18] sm:$0xff] %v203_v2  ;;  %v205_v3 = vld [vmem:[%s1253_s6 + $0x6c] sm:$0xff] }
  0x12   : > { %202 = vst [vmem:[%s181_s7 + $0xc] sm:$0xff] %v201_v1  ;;  %v209_v5 = vld [vmem:[%s1253_s6 + $0xb4] sm:$0xff]  ;;  %206 = vst [vmem:[%s181_s7 + $0x24] sm:$0xff] %v205_v3  ;;  %v213_v7 = vld [vmem:[%s1253_s6 + $0xfc] sm:$0xff] }
  0x13   : > { %208 = vst [vmem:[%s181_s7 + $0x30] sm:$0xff] %v207_v4  ;;  %210 = vst [vmem:[%s181_s7 + $0x3c] sm:$0xff] %v209_v5  ;;  %v211_v6 = vld [vmem:[%s1253_s6 + $0xd8] sm:$0xff]  ;;  %v900_v8 = vld [vmem:[%s1253_s6 + $0x8] sm:$0xf] }
  0x14   : > { %212 = vst [vmem:[%s181_s7 + $0x48] sm:$0xff] %v211_v6  ;;  %214 = vst [vmem:[%s181_s7 + $0x54] sm:$0xff] %v213_v7  ;;  %v902_v9 = vld [vmem:[%s1253_s6 + $0x2c] sm:$0xf]  ;;  %v904_v10 = vld [vmem:[%s1253_s6 + $0x50] sm:$0xf] }
  0x15   : > { %901 = vst [vmem:[%s181_s7 + $0x8] sm:$0xf] %v900_v8  ;;  %v906_v11 = vld [vmem:[%s1253_s6 + $0x74] sm:$0xf]  ;;  %903 = vst [vmem:[%s181_s7 + $0x14] sm:$0xf] %v902_v9 }
  0x16   : > { %905 = vst [vmem:[%s181_s7 + $0x20] sm:$0xf] %v904_v10  ;;  %907 = vst [vmem:[%s181_s7 + $0x2c] sm:$0xf] %v906_v11  ;;  %v908_v12 = vld [vmem:[%s1253_s6 + $0x98] sm:$0xf] }
  0x17   : > { %v910_v13 = vld [vmem:[%s1253_s6 + $0xbc] sm:$0xf]  ;;  %v912_v14 = vld [vmem:[%s1253_s6 + $0xe0] sm:$0xf]  ;;  %909 = vst [vmem:[%s181_s7 + $0x38] sm:$0xf] %v908_v12 }
  0x18   : > { %911 = vst [vmem:[%s181_s7 + $0x44] sm:$0xf] %v910_v13  ;;  %913 = vst [vmem:[%s181_s7 + $0x50] sm:$0xf] %v912_v14  ;;  %v914_v15 = vld [vmem:[%s1253_s6 + $0x104] sm:$0xf] }
  0x19   : > { %915 = vst [vmem:[%s181_s7 + $0x5c] sm:$0xf] %v914_v15 }
  0x1a PF: > { %p916_p5 = scmp.ge.s32.totalorder %s1184_s20, 1  ;;  %p252_p6 = scmp.lt.s32.totalorder %s1184_s20, 4 }
  0x1c   : > { %p253_p7 = pnand %p916_p5, %p252_p6 }
  0x1d   : > { %s259_s8 = sand.u32 (!%p253_p7), 1, %s1176_s18   ;;  %s287_s9 = smul.u32 (!%p253_p7), 48, %s1233_s21 }
  0x1e   : > { %256 = sbr.rel (%p253_p7) target bundleno = 327 (0x147), region = 62  ;;  %p918_p9 = scmp.ne.s32.totalorder (!%p253_p7), %s1233_s21, 0 }
  0x1f   : > { %s1096_s10 = smul.u32 (!%p253_p7), 96, %s259_s8  ;;  %p288_p8 = scmp.lt.s32.totalorder (!%p253_p7), %s287_s9, 143 }
  0x21   : > { %s1280_s15 = scalar_lea.vmem (!%p253_p7), [#allocation3], %s1096_s10 }
  0x23   : > { %s1370_s9 = smov (!%p288_p8, %s287_s9), 143  ;;  %297 = sbr.rel (%p918_p9) target bundleno = 45 (0x2d), region = 70 }
  0x24   : > { %s917_s11 = sshll.u32 %s1370_s9, 2 }
  0x25   : > { %s1278_s14 = scalar_lea.vmem %s1361_s1, %s917_s11 }
  0x28   : > { %v1186_v16 = vmov 0.0  }
  0x29   : > { %298 = vst [vmem:[#allocation2 + $0x30] sm:$0xff] %v1186_v16  ;;  %299 = vst [vmem:[#allocation2] sm:$0xff] %v1186_v16 }
  0x2a   : > { %300 = vst [vmem:[#allocation2 + $0x18] sm:$0xff] %v1186_v16  ;;  %301 = vst [vmem:[#allocation2 + $0x10] sm:$0xff] %v1186_v16 }
  0x2b   : > { %302 = vst [vmem:[#allocation2 + $0x8] sm:$0xff] %v1186_v16  ;;  %303 = vst [vmem:[#allocation2 + $0x20] sm:$0xff] %v1186_v16 }
  0x2c   : > { %304 = vst [vmem:[#allocation2 + $0x28] sm:$0xff] %v1186_v16  ;;  %305 = vst [vmem:[#allocation2 + $0x38] sm:$0xff] %v1186_v16 }
  0x2d PF: > { %v1122_v17 = vld [vmem:[%s1278_s14 + $0x78] sm:$0xff]   ;;  %v1125_v20 = vld [vmem:[%s1278_s14 + $0x70] sm:$0xff]   ;;  %v1128_v23 = vld [vmem:[%s1278_s14 + $0x68] sm:$0xff]   ;;  %p955_p10 = scmp.ne.s32.totalorder %s1233_s21, 2 }
  0x2e   : > { %v1123_v18 = vld [vmem:[%s1278_s14 + $0x38] sm:$0xff]   ;;  %1019 = vmatprep.subr.bf16.mxu0 %v1122_v17  ;;  %v1126_v21 = vld [vmem:[%s1278_s14 + $0x30] sm:$0xff]   ;;  %v1129_v24 = vld [vmem:[%s1278_s14 + $0x28] sm:$0xff]  }
  0x2f   : > { %v1124_v19 = vld [vmem:[%s1278_s14 + $0xb8] sm:$0xff]   ;;  %1020 = vmatpush3.bf16.msra.mxu0 %v1123_v18  ;;  %v1127_v22 = vld [vmem:[%s1278_s14 + $0xb0] sm:$0xff]   ;;  %v1130_v25 = vld [vmem:[%s1278_s14 + $0xa8] sm:$0xff]  }
  0x30   : > { %1071 = vmatprep.subr.bf16.mxu1 %v1124_v19  ;;  %1021 = vmatprep.subr.bf16.mxu0 %v1125_v20  ;;  %v1131_v26 = vld [vmem:[%s1278_s14 + $0x60] sm:$0xff]   ;;  %v1134_v29 = vld [vmem:[%s1278_s14 + $0x58] sm:$0xff]   ;;  %v1137_v32 = vld [vmem:[%s1278_s14 + $0x50] sm:$0xff]  }
  0x31   : > { %1072 = vmatpush3.bf16.msra.mxu1 %v1124_v19  ;;  %v1132_v27 = vld [vmem:[%s1278_s14 + $0x20] sm:$0xff]   ;;  %v1136_v30 = vld [vmem:[%s1278_s14 + $0x98] sm:$0xff]   ;;  %v1139_v33 = vld [vmem:[%s1278_s14 + $0x90] sm:$0xff]  }
  0x32   : > { %1073 = vmatprep.subr.bf16.mxu1 %v1127_v22  ;;  %v1133_v28 = vld [vmem:[%s1278_s14 + $0xa0] sm:$0xff]   ;;  %v1135_v31 = vld [vmem:[%s1278_s14 + $0x18] sm:$0xff]   ;;  %v1138_v34 = vld [vmem:[%s1278_s14 + $0x10] sm:$0xff]  }
  0x33   : > { %1022 = vmatpush3.bf16.msra.mxu0 %v1126_v21  ;;  %v1140_v35 = vld [vmem:[%s1278_s14 + $0x48] sm:$0xff]   ;;  %v1143_v38 = vld [vmem:[%s1278_s14 + $0x40] sm:$0xff]   ;;  %v1158_v49 = vld [vmem:[%s1280_s15 + $0x50] ss:$12 sps:$4 sm:$0xff]  }
  0x34   : > { %1023 = vmatprep.subr.bf16.mxu0 %v1128_v23  ;;  %v1141_v36 = vld [vmem:[%s1278_s14 + $0x8] sm:$0xff]   ;;  %v1145_v39 = vld [vmem:[%s1278_s14 + $0x80] sm:$0xff]   ;;  %v1156_v50 = vld [vmem:[%s1280_s15 + $0x30] ss:$12 sps:$4 sm:$0xff]  }
  0x35   : > { %1074 = vmatpush3.bf16.msra.mxu1 %v1127_v22  ;;  %v1142_v37 = vld [vmem:[%s1278_s14 + $0x88] sm:$0xff]   ;;  %v1148_v40 = vld [vmem:[%s1280_s15 + $0x4] ss:$12 sps:$4 sm:$0xff]   ;;  %v1154_v48 = vld [vmem:[%s1280_s15 + $0x34] ss:$12 sps:$4 sm:$0xff]  }
  0x36   : > { %1075 = vmatprep.subr.bf16.mxu1 %v1130_v25  ;;  %v1149_v41 = vld [vmem:[%s1280_s15 + $0x8] ss:$12 sps:$4 sm:$0xff]   ;;  %v1144_v42 = vld [vmem:[%s1278_s14] sm:$0xff]   ;;  %618 = vmatprep.mubr.bf16.mxu0 %v1148_v40  ;;  %v1159_v51 = vld [vmem:[%s1280_s15 + $0x4c] ss:$12 sps:$4 sm:$0xff]  }
  0x37   : > { %1024 = vmatpush3.bf16.msra.mxu0 %v1129_v24  ;;  %1087 = vmatprep.mubr.bf16.mxu1 %v1149_v41  ;;  %v1146_v43 = vld [vmem:[%s1280_s15] ss:$12 sps:$4 sm:$0xff]   ;;  %v1151_v44 = vld [vmem:[%s1280_s15 + $0x1c] ss:$12 sps:$4 sm:$0xff]   ;;  %v1157_v46 = vld [vmem:[%s1280_s15 + $0x38] ss:$12 sps:$4 sm:$0xff]  }
  0x38   : > { %1025 = vmatprep.subr.bf16.mxu0 %v1131_v26  ;;  %v1150_v45 = vld [vmem:[%s1280_s15 + $0x20] ss:$12 sps:$4 sm:$0xff]   ;;  %v1153_v47 = vld [vmem:[%s1280_s15 + $0x18] ss:$12 sps:$4 sm:$0xff]   ;;  %v1161_v52 = vld [vmem:[%s1280_s15 + $0x48] ss:$12 sps:$4 sm:$0xff]  }
  0x39   : > { %1076 = vmatpush3.bf16.msra.mxu1 %v1130_v25  ;;  %v306_v58 = vld [vmem:[#allocation2 + $0x30] sm:$0xff]  ;;  %v307_v2 = vld [vmem:[#allocation2] sm:$0xff]  ;;  %v308_v9 = vld [vmem:[#allocation2 + $0x18] sm:$0xff] }
  0x3a   : > { %1077 = vmatprep.subr.bf16.mxu1 %v1133_v28  ;;  %v309_v16 = vld [vmem:[#allocation2 + $0x10] sm:$0xff]  ;;  %v310_v24 = vld [vmem:[#allocation2 + $0x8] sm:$0xff] }
  0x3b   : > { %1026 = vmatpush3.bf16.msra.mxu0 %v1132_v27 }
  0x3c   : > { %1027 = vmatprep.subr.bf16.mxu0 %v1134_v29 }
  0x3d   : > { %1078 = vmatpush3.bf16.msra.mxu1 %v1133_v28 }
  0x3e   : > { %1079 = vmatprep.subr.bf16.mxu1 %v1136_v30 }
  0x3f   : > { %1028 = vmatpush3.bf16.msra.mxu0 %v1135_v31  ;;  %v311_v31 = vld [vmem:[#allocation2 + $0x20] sm:$0xff] }
  0x40   : > { %1029 = vmatprep.subr.bf16.mxu0 %v1137_v32 }
  0x41   : > { %1080 = vmatpush3.bf16.msra.mxu1 %v1136_v30 }
  0x42   : > { %1081 = vmatprep.subr.bf16.mxu1 %v1139_v33 }
  0x43   : > { %1030 = vmatpush3.bf16.msra.mxu0 %v1138_v34 }
  0x44   : > { %1031 = vmatprep.subr.bf16.mxu0 %v1140_v35 }
  0x45   : > { %1082 = vmatpush3.bf16.msra.mxu1 %v1139_v33 }
  0x46   : > { %1083 = vmatprep.subr.bf16.mxu1 %v1142_v37 }
  0x47   : > { %1032 = vmatpush3.bf16.msra.mxu0 %v1141_v36  ;;  %v312_v36 = vld [vmem:[#allocation2 + $0x28] sm:$0xff] }
  0x48   : > { %1033 = vmatprep.subr.bf16.mxu0 %v1143_v38 }
  0x49   : > { %1084 = vmatpush3.bf16.msra.mxu1 %v1142_v37 }
  0x4a   : > { %1085 = vmatprep.subr.bf16.mxu1 %v1145_v39 }
  0x4b   : > { %1034 = vmatpush3.bf16.msra.mxu0 %v1144_v42  ;;  %v313_v42 = vld [vmem:[#allocation2 + $0x38] sm:$0xff] }
  0x4d   : > { %1086 = vmatpush3.bf16.msra.mxu1 %v1145_v39 }
  0x4e   : > { %619 = vmatmul.mubr.bf16.vlgmr.msra.gmra.mxu0 %v1146_v43 }
  0x4f   : > { %626 = vmatprep.mubr.bf16.mxu0 %v1151_v44 }
  0x50   : > { %1088 = vmatmul.mubr.bf16.vlgmr.msra.gmra.mxu1 %v1150_v45 }
  0x51   : > { %1091 = vmatprep.mubr.bf16.mxu1 %v1157_v46 }
  0x56   : > { %627 = vmatmul.mubr.bf16.gmra.mxu0 %v1153_v47 }
  0x57   : > { %634 = vmatprep.mubr.bf16.mxu0 %v1154_v48 }
  0x58   : > { %1092 = vmatmul.mubr.bf16.gmra.mxu1 %v1158_v49 }
  0x5e   : > { %635 = vmatmul.mubr.bf16.gmra.mxu0 %v1156_v50 }
  0x5f   : > { %642 = vmatprep.mubr.bf16.mxu0 %v1159_v51 }
  0x66   : > { %643 = vmatmul.mubr.bf16.gmra.mxu0 %v1161_v52 }
 0x10e   : > { %v1035_v53 = vpop.f32.mrf.mxu0 }
 0x110   : > { %v1036_v54 = vpop.f32.mrf.mxu0  ;;  %v1089_v55 = vpop.f32.mrf.mxu1 }
 0x111   : > { %v1037_v56 = vadd.f32 %v1036_v54, %v1035_v53 }
 0x112   : > { %v1038_v57 = vpop.f32.mrf.mxu0  ;;  %v685_v59 = vpop.f32.mrf.mxu1 }
 0x113   : > { %v686_v60 = vadd.f32 %v1037_v56, %v685_v59 }
 0x114   : > { %v1039_v61 = vpop.f32.mrf.mxu0  ;;  %v1090_v62 = vpop.f32.mrf.mxu1 }
 0x115   : > { %v716_v63 = vadd.f32 %v686_v60, %v306_v58  ;;  %v1040_v0 = vadd.f32 %v1039_v61, %v1038_v57 }
 0x116   : > { %v1041_v1 = vpop.f32.mrf.mxu0  ;;  %v688_v3 = vpop.f32.mrf.mxu1 }
 0x117   : > { %724 = vst [vmem:[#allocation2 + $0x30] sm:$0xff] %v716_v63  ;;  %v689_v4 = vadd.f32 %v1040_v0, %v688_v3 }
 0x118   : > { %v1042_v5 = vpop.f32.mrf.mxu0  ;;  %v1093_v6 = vpop.f32.mrf.mxu1 }
 0x119   : > { %v717_v7 = vadd.f32 %v689_v4, %v307_v2  ;;  %v1043_v8 = vadd.f32 %v1042_v5, %v1041_v1 }
 0x11a   : > { %v1044_v10 = vpop.f32.mrf.mxu0  ;;  %v701_v13 = vpop.f32.mrf.mxu1 }
 0x11b   : > { %725 = vst [vmem:[#allocation2] sm:$0xff] %v717_v7  ;;  %v694_v11 = vadd.f32 %v1089_v55, %v1043_v8 }
 0x11c   : > { %v1045_v12 = vpop.f32.mrf.mxu0  ;;  %v1094_v20 = vpop.f32.mrf.mxu1 }
 0x11d   : > { %v718_v14 = vadd.f32 %v694_v11, %v308_v9  ;;  %v1046_v15 = vadd.f32 %v1045_v12, %v1044_v10 }
 0x11e   : > { %v1047_v17 = vpop.f32.mrf.mxu0  ;;  %v704_v27 = vpop.f32.mrf.mxu1 }
 0x11f   : > { %726 = vst [vmem:[#allocation2 + $0x18] sm:$0xff] %v718_v14  ;;  %v697_v18 = vadd.f32 %v1090_v62, %v1046_v15 }
 0x120   : > { %v1048_v19 = vpop.f32.mrf.mxu0 }
 0x121   : > { %v719_v21 = vadd.f32 %v697_v18, %v309_v16  ;;  %v1049_v22 = vadd.f32 %v1048_v19, %v1047_v17 }
 0x122   : > { %v1050_v23 = vpop.f32.mrf.mxu0 }
 0x123   : > { %727 = vst [vmem:[#allocation2 + $0x10] sm:$0xff] %v719_v21  ;;  %v702_v25 = vadd.f32 %v1049_v22, %v701_v13 }
 0x124   : > { %v1051_v26 = vpop.f32.mrf.mxu0 }
 0x125   : > { %v720_v28 = vadd.f32 %v702_v25, %v310_v24  ;;  %v1052_v29 = vadd.f32 %v1051_v26, %v1050_v23 }
 0x126   : > { %v1053_v30 = vpop.f32.mrf.mxu0 }
 0x127   : > { %728 = vst [vmem:[#allocation2 + $0x8] sm:$0xff] %v720_v28  ;;  %v705_v32 = vadd.f32 %v1052_v29, %v704_v27 }
 0x128   : > { %v1054_v33 = vpop.f32.mrf.mxu0 }
 0x129   : > { %v721_v34 = vadd.f32 %v705_v32, %v311_v31  ;;  %v1055_v35 = vadd.f32 %v1054_v33, %v1053_v30 }
 0x12a   : > { %v1056_v37 = vpop.f32.mrf.mxu0 }
 0x12b   : > { %729 = vst [vmem:[#allocation2 + $0x20] sm:$0xff] %v721_v34  ;;  %v710_v38 = vadd.f32 %v1093_v6, %v1055_v35 }
 0x12c   : > { %v1057_v39 = vpop.f32.mrf.mxu0 }
 0x12d   : > { %v722_v40 = vadd.f32 %v710_v38, %v312_v36  ;;  %v1058_v41 = vadd.f32 %v1057_v39, %v1056_v37 }
 0x12f   : > { %730 = vst [vmem:[#allocation2 + $0x28] sm:$0xff] %v722_v40  ;;  %v713_v43 = vadd.f32 %v1094_v20, %v1058_v41  ;;  %735 = sbr.rel (%p955_p10) target bundleno = 327 (0x147), region = 74 }
 0x131   : > { %v723_v44 = vadd.f32 %v713_v43, %v313_v42 }
 0x133   : > { %731 = vst [vmem:[#allocation2 + $0x38] sm:$0xff] %v723_v44 }
 0x134   : > { %v736_v45 = vld [vmem:[#allocation2 + $0x30] sm:$0xff]  ;;  %v737_v46 = vld [vmem:[#allocation2] sm:$0xff]  ;;  %v738_v52 = vld [vmem:[#allocation2 + $0x18] sm:$0xff] }
 0x135   : > { %v956_v47 = vld [vmem:[%s1362_s2] ss:$0 sm:$0xff]  ;;  %v739_v55 = vld [vmem:[#allocation2 + $0x10] sm:$0xff]  ;;  %v1013_v57 = vld [vmem:[%s1364_s4 + $0x8] sm:$0xff]  }
 0x136   : > { %v751_v48 = vmul.f32 %v956_v47, %v736_v45  ;;  %v752_v49 = vmul.f32 %v956_v47, %v737_v46  ;;  %v957_v50 = vld [vmem:[%s1363_s3] ss:$0 sm:$0xff]  ;;  %v753_v56 = vmul.f32 %v956_v47, %v738_v52  ;;  %v740_v58 = vld [vmem:[#allocation2 + $0x8] sm:$0xff]  ;;  %v754_v61 = vmul.f32 %v956_v47, %v739_v55  ;;  %v1014_v0 = vld [vmem:[%s1364_s4 + $0x10] sm:$0xff]  }
 0x137   : > { %v978_v51 = vld [vmem:[%s1364_s4] sm:$0xff]   ;;  %v983_v62 = vunpack.c.l.bf16 %v1013_v57  ;;  %v984_v2 = vunpack.c.h.bf16 %v1013_v57  ;;  %v755_v3 = vmul.f32 %v956_v47, %v740_v58  ;;  %v742_v5 = vld [vmem:[#allocation2 + $0x28] sm:$0xff]  ;;  %v987_v9 = vunpack.c.l.bf16 %v1014_v0  ;;  %v1015_v15 = vld [vmem:[%s1364_s4 + $0x18] sm:$0xff]  }
 0x138   : > { %v979_v53 = vunpack.c.l.bf16 %v978_v51  ;;  %v980_v54 = vunpack.c.h.bf16 %v978_v51  ;;  %v766_v59 = vadd.f32 %v957_v50, %v751_v48  ;;  %v767_v60 = vadd.f32 %v957_v50, %v752_v49  ;;  %v741_v63 = vld [vmem:[#allocation2 + $0x20] sm:$0xff] }
 0x139   : > { %v768_v1 = vadd.f32 %v957_v50, %v753_v56  ;;  %v756_v4 = vmul.f32 %v956_v47, %v741_v63  ;;  %v769_v8 = vadd.f32 %v957_v50, %v754_v61  ;;  %v770_v12 = vadd.f32 %v957_v50, %v755_v3 }
 0x13a   : > { %v790_v6 = vadd.f32 %v979_v53, %v766_v59  ;;  %v791_v7 = vadd.f32 %v980_v54, %v767_v60  ;;  %v743_v10 = vld [vmem:[#allocation2 + $0x38] sm:$0xff]  ;;  %v988_v14 = vunpack.c.h.bf16 %v1014_v0  ;;  %v757_v19 = vmul.f32 %v956_v47, %v742_v5 }
 0x13b   : > { %v792_v11 = vadd.f32 %v983_v62, %v768_v1  ;;  %v771_v13 = vadd.f32 %v957_v50, %v756_v4  ;;  %v793_v18 = vadd.f32 %v984_v2, %v769_v8  ;;  %v794_v21 = vadd.f32 %v987_v9, %v770_v12 }
 0x13c   : > { %v798_v16 = vmax.f32 %v790_v6, 0.0  ;;  %v799_v17 = vmax.f32 %v791_v7, 0.0  ;;  %v758_v23 = vmul.f32 %v956_v47, %v743_v10  ;;  %v772_v26 = vadd.f32 %v957_v50, %v757_v19 }
 0x13d   : > { %v800_v20 = vmax.f32 %v792_v11, 0.0  ;;  %v795_v22 = vadd.f32 %v988_v14, %v771_v13  ;;  %v801_v25 = vmax.f32 %v793_v18, 0.0  ;;  %v991_v27 = vunpack.c.l.bf16 %v1015_v15 }
 0x13e   : > { %v996_v24 = vpack.c.bf16 %v799_v17, %v798_v16  ;;  %v802_v28 = vmax.f32 %v794_v21, 0.0  ;;  %v773_v30 = vadd.f32 %v957_v50, %v758_v23  ;;  %v992_v31 = vunpack.c.h.bf16 %v1015_v15 }
 0x13f   : > { %v803_v29 = vmax.f32 %v795_v22, 0.0  ;;  %v1001_v32 = vpack.c.bf16 %v801_v25, %v800_v20  ;;  %v796_v33 = vadd.f32 %v991_v27, %v772_v26 }
 0x140   : > { %997 = vst [vmem:[%s1365_s5] sm:$0xff] %v996_v24   ;;  %v797_v35 = vadd.f32 %v992_v31, %v773_v30 }
 0x141   : > { %v1006_v34 = vpack.c.bf16 %v803_v29, %v802_v28  ;;  %1016 = vst [vmem:[%s1365_s5 + $0x8] sm:$0xff] %v1001_v32   ;;  %v804_v36 = vmax.f32 %v796_v33, 0.0 }
 0x142   : > { %v805_v37 = vmax.f32 %v797_v35, 0.0 }
 0x143   : > { %1017 = vst [vmem:[%s1365_s5 + $0x10] sm:$0xff] %v1006_v34  }
 0x144   : > { %v1011_v38 = vpack.c.bf16 %v805_v37, %v804_v36 }
 0x146   : > { %1018 = vst [vmem:[%s1365_s5 + $0x18] sm:$0xff] %v1011_v38  }
 0x147 PF: > { %p12_p11 = scmp.ge.s32.totalorder %s1236_s22, 5   ;;  %s1366_s18 = smov %s1180_s19 }
 0x148   : > { %s1367_s19 = smov %s1245_s25  ;;  %s1368_s20 = smov %s1236_s22 }
 0x149   :  { %14 = sbr.rel (!%p12_p11) target bundleno = 2 (0x2), region = 114 }

// kernel: resnet18_sigmoid_forward.27
= control target key start
LH: loop header
LB: loop body
LE: loop exit
PB: predicated region body
PF: predicated region fallthrough
CT: control target
= control target key end

     0   :  { %s848_s15 = smov 0   ;;  %s850_s16 = smov 0   ;;  %s943_s0 = inlined_call_operand.vmem [shape: bf16[16,1152], index: 0, kind: input, shape index: {}]   ;;  %s944_s1 = inlined_call_operand.vmem [shape: bf16[1152,128], index: 1, kind: input, shape index: {}]   ;;  %s945_s2 = inlined_call_operand.vmem [shape: f32[1,128], index: 2, kind: input, shape index: {}]   ;;  %s946_s3 = inlined_call_operand.vmem [shape: f32[1,128], index: 3, kind: input, shape index: {}]   ;;  %s947_s4 = inlined_call_operand.vmem [shape: bf16[16,128], index: 4, kind: output, shape index: {}]  }
   0x1   :  { %s852_s17 = smov 0  }
   0x2 LB: > { %s864_s18 = sadd.s32 4294967295, %s818_s17   ;;  %s867_s19 = sadd.s32 1, %s818_s17   ;;  %s818_s17 = sphi %s852_s17, %s950_s17   ;;  %s814_s16 = sphi %s850_s16, %s949_s16   ;;  %s810_s15 = sphi %s848_s15, %s948_s15  }
   0x3   : > { %s18_s20 = ssub.s32 %s818_s17, %s867_s19  ;;  %s21_s21 = sadd.s32 1, %s814_s16 }
   0x4   : > { %p19_p0 = scmp.eq.s32.totalorder %s18_s20, 0  ;;  %p28_p1 = scmp.ne.s32.totalorder %s814_s16, %s810_s15 }
   0x5   : > { %p29_p2 = scmp.eq.s32.totalorder %s818_s17, 0  ;;  %p637_p4 = scmp.ge.s32.totalorder %s818_s17, 3 }
   0x6   : > { %s876_s22 = scalar_select %p19_p0, %s814_s16, %s21_s21  }
   0x7   : > { %p30_p3 = por %p29_p2, %p28_p1  ;;  %149 = sbr.rel (%p637_p4) target bundleno = 19 (0x13), region = 24 }
   0xc   : > { %152 = sbr.rel (!%p30_p3) target bundleno = 19 (0x13), region = 28  ;;  %s154_s23 = sand.u32 (%p30_p3), 1, %s814_s16  }
   0xd   : > { %s680_s24 = smul.u32 (%p30_p3), 12, %s818_s17 }
   0xe   : > { %s739_s25 = smul.u32 (%p30_p3), 24, %s154_s23 }
   0xf   : > { %s159_s28 = scalar_lea.vmem (%p30_p3), %s943_s0, %s680_s24 }
  0x10   : > { %v174_v0 = vld [vmem:[%s159_s28] sm:$0xff] (%p30_p3)  ;;  %v639_v2 = vld [vmem:[%s159_s28 + $0x8] sm:$0xf] (%p30_p3)  ;;  %s156_s29 = scalar_lea.vmem (%p30_p3), [#allocation3], %s739_s25  ;;  %v641_v3 = vld [vmem:[%s159_s28 + $0x2c] sm:$0xf] (%p30_p3) }
  0x11   : > { %v176_v1 = vld [vmem:[%s159_s28 + $0x24] sm:$0xff]  ;;  %175 = vst [vmem:[%s156_s29] sm:$0xff] %v174_v0  ;;  %640 = vst [vmem:[%s156_s29 + $0x8] sm:$0xf] %v639_v2 }
  0x12   : > { %177 = vst [vmem:[%s156_s29 + $0xc] sm:$0xff] %v176_v1  ;;  %642 = vst [vmem:[%s156_s29 + $0x14] sm:$0xf] %v641_v3 }
  0x13 PF: > { %p643_p5 = scmp.ge.s32.totalorder %s818_s17, 1  ;;  %p203_p6 = scmp.lt.s32.totalorder %s818_s17, 4 }
  0x15   : > { %p204_p7 = pnand %p643_p5, %p203_p6 }
  0x16   : > { %s210_s30 = sand.u32 (!%p204_p7), 1, %s810_s15   ;;  %s236_s5 = smul.u32 (!%p204_p7), 48, %s864_s18 }
  0x17   : > { %207 = sbr.rel (%p204_p7) target bundleno = 291 (0x123), region = 58  ;;  %p645_p9 = scmp.ne.s32.totalorder (!%p204_p7), %s864_s18, 0 }
  0x18   : > { %s740_s6 = smul.u32 (!%p204_p7), 24, %s210_s30  ;;  %p237_p8 = scmp.lt.s32.totalorder (!%p204_p7), %s236_s5, 143 }
  0x1a   : > { %s893_s11 = scalar_lea.vmem (!%p204_p7), [#allocation3], %s740_s6 }
  0x1c   : > { %s952_s5 = smov (!%p237_p8, %s236_s5), 143  ;;  %246 = sbr.rel (%p645_p9) target bundleno = 35 (0x23), region = 66 }
  0x1d   : > { %s644_s7 = sshll.u32 %s952_s5, 2 }
  0x1e   : > { %s891_s10 = scalar_lea.vmem %s944_s1, %s644_s7 }
  0x21   : > { %v820_v4 = vmov 0.0  }
  0x22   : > { %247 = vst [vmem:[#allocation2] sm:$0xff] %v820_v4  ;;  %248 = vst [vmem:[#allocation2 + $0x8] sm:$0xff] %v820_v4 }
  0x23 PF: > { %v768_v5 = vld [vmem:[%s891_s10 + $0x78] sm:$0xff]   ;;  %v821_v6 = vmov 0.0   ;;  %vm822_vm0 = vmmov 0   ;;  %v771_v9 = vld [vmem:[%s891_s10 + $0x70] sm:$0xff]   ;;  %v774_v12 = vld [vmem:[%s891_s10 + $0x68] sm:$0xff]   ;;  %p673_p10 = scmp.ne.s32.totalorder %s864_s18, 2 }
  0x24   : > { %719 = vmatprep.subr.bf16.mxu1 %v821_v6  ;;  %v769_v7 = vld [vmem:[%s891_s10 + $0xb8] sm:$0xff]   ;;  %688 = vmatprep.subr.bf16.mxu0 %v768_v5  ;;  %v772_v10 = vld [vmem:[%s891_s10 + $0xb0] sm:$0xff]   ;;  %v775_v13 = vld [vmem:[%s891_s10 + $0xa8] sm:$0xff]  }
  0x25   : > { %v770_v8 = vld [vmem:[%s891_s10 + $0x38] sm:$0xff]   ;;  %735 = vmatprep.mubr.msk.bf16.mxu1 %vm822_vm0, %v821_v6  ;;  %720 = vmatpush3.bf16.msra.mxu1 %v769_v7  ;;  %v773_v11 = vld [vmem:[%s891_s10 + $0x30] sm:$0xff]   ;;  %v776_v14 = vld [vmem:[%s891_s10 + $0x28] sm:$0xff]  }
  0x26   : > { %689 = vmatpush3.bf16.msra.mxu0 %v770_v8  ;;  %721 = vmatprep.subr.bf16.mxu1 %v821_v6  ;;  %v777_v15 = vld [vmem:[%s891_s10 + $0x60] sm:$0xff]   ;;  %v780_v18 = vld [vmem:[%s891_s10 + $0x58] sm:$0xff]   ;;  %v783_v21 = vld [vmem:[%s891_s10 + $0x50] sm:$0xff]  }
  0x27   : > { %690 = vmatprep.subr.bf16.mxu0 %v771_v9  ;;  %v778_v16 = vld [vmem:[%s891_s10 + $0xa0] sm:$0xff]   ;;  %v781_v19 = vld [vmem:[%s891_s10 + $0x98] sm:$0xff]   ;;  %v784_v22 = vld [vmem:[%s891_s10 + $0x90] sm:$0xff]  }
  0x28   : > { %v779_v17 = vld [vmem:[%s891_s10 + $0x20] sm:$0xff]   ;;  %v782_v20 = vld [vmem:[%s891_s10 + $0x18] sm:$0xff]   ;;  %v785_v23 = vld [vmem:[%s891_s10 + $0x10] sm:$0xff]  }
  0x29   : > { %722 = vmatpush3.bf16.msra.mxu1 %v772_v10  ;;  %v786_v24 = vld [vmem:[%s891_s10 + $0x48] sm:$0xff]   ;;  %v789_v27 = vld [vmem:[%s891_s10 + $0x40] sm:$0xff]  }
  0x2a   : > { %691 = vmatpush3.bf16.msra.mxu0 %v773_v11  ;;  %723 = vmatprep.subr.bf16.mxu1 %v821_v6  ;;  %v787_v25 = vld [vmem:[%s891_s10 + $0x88] sm:$0xff]   ;;  %v790_v29 = vld [vmem:[%s891_s10 + $0x80] sm:$0xff]  }
  0x2b   : > { %692 = vmatprep.subr.bf16.mxu0 %v774_v12  ;;  %v788_v26 = vld [vmem:[%s891_s10 + $0x8] sm:$0xff]   ;;  %v791_v30 = vld [vmem:[%s891_s10] sm:$0xff]  }
  0x2c   : > { %v794_v28 = vld [vmem:[%s893_s11 + $0x4] ss:$12 sps:$4 sm:$0xff]   ;;  %v795_v31 = vld [vmem:[%s893_s11 + $0x8] ss:$12 sps:$4 sm:$0xff]   ;;  %v792_v32 = vld [vmem:[%s893_s11] ss:$12 sps:$4 sm:$0xff]  }
  0x2d   : > { %724 = vmatpush3.bf16.msra.mxu1 %v775_v13  ;;  %495 = vmatprep.mubr.bf16.mxu0 %v794_v28  ;;  %v249_v39 = vld [vmem:[#allocation2] sm:$0xff]  ;;  %v250_v46 = vld [vmem:[#allocation2 + $0x8] sm:$0xff] }
  0x2e   : > { %693 = vmatpush3.bf16.msra.mxu0 %v776_v14  ;;  %725 = vmatprep.subr.bf16.mxu1 %v821_v6 }
  0x2f   : > { %694 = vmatprep.subr.bf16.mxu0 %v777_v15 }
  0x31   : > { %726 = vmatpush3.bf16.msra.mxu1 %v778_v16 }
  0x32   : > { %695 = vmatpush3.bf16.msra.mxu0 %v779_v17  ;;  %727 = vmatprep.subr.bf16.mxu1 %v821_v6 }
  0x33   : > { %696 = vmatprep.subr.bf16.mxu0 %v780_v18 }
  0x35   : > { %728 = vmatpush3.bf16.msra.mxu1 %v781_v19 }
  0x36   : > { %697 = vmatpush3.bf16.msra.mxu0 %v782_v20  ;;  %729 = vmatprep.subr.bf16.mxu1 %v821_v6 }
  0x37   : > { %698 = vmatprep.subr.bf16.mxu0 %v783_v21 }
  0x39   : > { %730 = vmatpush3.bf16.msra.mxu1 %v784_v22 }
  0x3a   : > { %699 = vmatpush3.bf16.msra.mxu0 %v785_v23  ;;  %731 = vmatprep.subr.bf16.mxu1 %v821_v6 }
  0x3b   : > { %700 = vmatprep.subr.bf16.mxu0 %v786_v24 }
  0x3d   : > { %732 = vmatpush3.bf16.msra.mxu1 %v787_v25 }
  0x3e   : > { %701 = vmatpush3.bf16.msra.mxu0 %v788_v26  ;;  %733 = vmatprep.subr.bf16.mxu1 %v821_v6 }
  0x3f   : > { %702 = vmatprep.subr.bf16.mxu0 %v789_v27 }
  0x41   : > { %734 = vmatpush3.bf16.msra.mxu1 %v790_v29 }
  0x42   : > { %703 = vmatpush3.bf16.msra.mxu0 %v791_v30 }
  0x44   : > { %736 = vmatmul.mubr.bf16.vlgmr.msra.gmra.mxu1 %v795_v31 }
  0x45   : > { %496 = vmatmul.mubr.bf16.vlgmr.msra.gmra.mxu0 %v792_v32 }
 0x104   : > { %v538_v33 = vpop.f32.mrf.mxu1 }
 0x105   : > { %v704_v34 = vpop.f32.mrf.mxu0 }
 0x106   : > { %v737_v35 = vpop.f32.mrf.mxu1 }
 0x107   : > { %v705_v36 = vpop.f32.mrf.mxu0 }
 0x108   : > { %v706_v37 = vadd.f32 %v705_v36, %v704_v34  ;;  %v541_v38 = vpop.f32.mrf.mxu1 }
 0x109   : > { %v707_v40 = vpop.f32.mrf.mxu0 }
 0x10a   : > { %v539_v41 = vadd.f32 %v706_v37, %v538_v33  ;;  %v738_v42 = vpop.f32.mrf.mxu1 }
 0x10b   : > { %v708_v43 = vpop.f32.mrf.mxu0 }
 0x10c   : > { %v545_v44 = vadd.f32 %v539_v41, %v249_v39  ;;  %v709_v45 = vadd.f32 %v708_v43, %v707_v40 }
 0x10e   : > { %547 = vst [vmem:[#allocation2] sm:$0xff] %v545_v44  ;;  %v542_v47 = vadd.f32 %v709_v45, %v541_v38  ;;  %552 = sbr.rel (%p673_p10) target bundleno = 291 (0x123), region = 70 }
 0x110   : > { %v546_v48 = vadd.f32 %v542_v47, %v250_v46 }
 0x112   : > { %548 = vst [vmem:[#allocation2 + $0x8] sm:$0xff] %v546_v48 }
 0x113   : > { %v674_v51 = vld [vmem:[%s945_s2] ss:$0 sm:$0xff] }
 0x114   : > { %v675_v54 = vld [vmem:[%s946_s3] ss:$0 sm:$0xff] }
 0x115   : > { %v553_v49 = vld [vmem:[#allocation2] sm:$0xff] }
 0x116   : > { %v562_v52 = vmul.f32 %v674_v51, %v553_v49 }
 0x118   : > { %v571_v55 = vadd.f32 %v675_v54, %v562_v52 }
 0x119   : > { %v554_v50 = vld [vmem:[#allocation2 + $0x8] sm:$0xff] }
 0x11a   : > { %v563_v53 = vmul.f32 %v674_v51, %v554_v50  ;;  %v573_v57 = vmax.f32 %v571_v55, 0.0 }
 0x11c   : > { %v572_v56 = vadd.f32 %v675_v54, %v563_v53 }
 0x11e   : > { %v574_v58 = vmax.f32 %v572_v56, 0.0 }
 0x120   : > { %v686_v59 = vpack.c.bf16 %v574_v58, %v573_v57 }
 0x122   : > { %687 = vst [vmem:[%s947_s4] sm:$0xff] %v686_v59  }
 0x123 PF: > { %p11_p11 = scmp.ge.s32.totalorder %s867_s19, 5   ;;  %s948_s15 = smov %s814_s16 }
 0x124   : > { %s949_s16 = smov %s876_s22  ;;  %s950_s17 = smov %s867_s19 }
 0x125   :  { %13 = sbr.rel (!%p11_p11) target bundleno = 2 (0x2), region = 110 }

// kernel: resnet18_sigmoid_forward.26
= control target key start
LH: loop header
LB: loop body
LE: loop exit
PB: predicated region body
PF: predicated region fallthrough
CT: control target
= control target key end

     0   :  { %v240_v0 = vmov 0.0   ;;  %vm241_vm0 = vmmov 0   ;;  %s303_s1 = inlined_call_operand.vmem [shape: bf16[128,128], index: 1, kind: input, shape index: {}]   ;;  %s304_s0 = inlined_call_operand.vmem [shape: bf16[16,128], index: 0, kind: input, shape index: {}]   ;;  %s305_s2 = inlined_call_operand.vmem [shape: f32[1,128], index: 2, kind: input, shape index: {}]   ;;  %s306_s3 = inlined_call_operand.vmem [shape: f32[1,128], index: 3, kind: input, shape index: {}]   ;;  %s307_s4 = inlined_call_operand.vmem [shape: bf16[16,128], index: 4, kind: output, shape index: {}]  }
   0x1   :  { %209 = vmatprep.subr.bf16.mxu0 %v240_v0  ;;  %v231_v1 = vld [vmem:[%s303_s1 + $0x38] sm:$0xff]   ;;  %225 = vmatprep.mubr.msk.bf16.mxu0 %vm241_vm0, %v240_v0  ;;  %v232_v2 = vld [vmem:[%s303_s1 + $0x30] sm:$0xff]   ;;  %v233_v3 = vld [vmem:[%s303_s1 + $0x28] sm:$0xff]  }
   0x2   :  { %210 = vmatpush3.bf16.msra.mxu0 %v231_v1  ;;  %v234_v4 = vld [vmem:[%s303_s1 + $0x20] sm:$0xff]   ;;  %v235_v5 = vld [vmem:[%s303_s1 + $0x18] sm:$0xff]   ;;  %v236_v6 = vld [vmem:[%s303_s1 + $0x10] sm:$0xff]  }
   0x3   :  { %211 = vmatprep.subr.bf16.mxu0 %v240_v0  ;;  %v237_v7 = vld [vmem:[%s303_s1 + $0x8] sm:$0xff]   ;;  %v238_v8 = vld [vmem:[%s303_s1] sm:$0xff]  }
   0x4   :  { %v239_v9 = vld [vmem:[%s304_s0] sm:$0xff]  }
   0x5   :  { %v189_v11 = vld [vmem:[%s305_s2] ss:$0 sm:$0xff] }
   0x6   :  { %212 = vmatpush3.bf16.msra.mxu0 %v232_v2  ;;  %v190_v14 = vld [vmem:[%s306_s3] ss:$0 sm:$0xff] }
   0x7   :  { %213 = vmatprep.subr.bf16.mxu0 %v240_v0 }
   0xa   :  { %214 = vmatpush3.bf16.msra.mxu0 %v233_v3 }
   0xb   :  { %215 = vmatprep.subr.bf16.mxu0 %v240_v0 }
   0xe   :  { %216 = vmatpush3.bf16.msra.mxu0 %v234_v4 }
   0xf   :  { %217 = vmatprep.subr.bf16.mxu0 %v240_v0 }
  0x12   :  { %218 = vmatpush3.bf16.msra.mxu0 %v235_v5 }
  0x13   :  { %219 = vmatprep.subr.bf16.mxu0 %v240_v0 }
  0x16   :  { %220 = vmatpush3.bf16.msra.mxu0 %v236_v6 }
  0x17   :  { %221 = vmatprep.subr.bf16.mxu0 %v240_v0 }
  0x1a   :  { %222 = vmatpush3.bf16.msra.mxu0 %v237_v7 }
  0x1b   :  { %223 = vmatprep.subr.bf16.mxu0 %v240_v0 }
  0x1e   :  { %224 = vmatpush3.bf16.msra.mxu0 %v238_v8 }
  0x21   :  { %226 = vmatmul.mubr.bf16.vlgmr.msra.gmra.mxu0 %v239_v9 }
  0xe1   :  { %v132_v10 = vpop.f32.mrf.mxu0 }
  0xe2   :  { %v155_v13 = vmul.f32 %v189_v11, %v132_v10 }
  0xe3   :  { %v227_v12 = vpop.f32.mrf.mxu0 }
  0xe4   :  { %v164_v18 = vadd.f32 %v190_v14, %v155_v13 }
  0xe5   :  { %v135_v15 = vpop.f32.mrf.mxu0 }
  0xe6   :  { %v156_v16 = vmul.f32 %v189_v11, %v135_v15 }
  0xe7   :  { %v228_v17 = vpop.f32.mrf.mxu0 }
  0xe8   :  { %v165_v19 = vadd.f32 %v190_v14, %v156_v16 }
  0xea   :  { %v198_v20 = vpack.c.bf16 %v165_v19, %v164_v18 }
  0xec   :  { %199 = vst [vmem:[%s307_s4] sm:$0xff] %v198_v20  }

// kernel: resnet18_sigmoid_forward.28
= control target key start
LH: loop header
LB: loop body
LE: loop exit
PB: predicated region body
PF: predicated region fallthrough
CT: control target
= control target key end

     0   :  { %s890_s18 = smov 0   ;;  %s892_s19 = smov 0   ;;  %s988_s0 = inlined_call_operand.vmem [shape: bf16[16,1152], index: 0, kind: input, shape index: {}]   ;;  %s989_s1 = inlined_call_operand.vmem [shape: bf16[1152,128], index: 1, kind: input, shape index: {}]   ;;  %s990_s2 = inlined_call_operand.vmem [shape: f32[1,128], index: 2, kind: input, shape index: {}]   ;;  %s991_s3 = inlined_call_operand.vmem [shape: f32[1,128], index: 3, kind: input, shape index: {}]   ;;  %s992_s4 = inlined_call_operand.vmem [shape: bf16[16,128], index: 4, kind: input, shape index: {}]   ;;  %s993_s5 = inlined_call_operand.vmem [shape: bf16[16,128], index: 5, kind: output, shape index: {}]  }
   0x1   :  { %s894_s20 = smov 0  }
   0x2 LB: > { %s906_s21 = sadd.s32 4294967295, %s855_s20   ;;  %s909_s22 = sadd.s32 1, %s855_s20   ;;  %s855_s20 = sphi %s894_s20, %s996_s20   ;;  %s851_s19 = sphi %s892_s19, %s995_s19   ;;  %s847_s18 = sphi %s890_s18, %s994_s18  }
   0x3   : > { %s19_s23 = ssub.s32 %s855_s20, %s909_s22  ;;  %s22_s24 = sadd.s32 1, %s851_s19 }
   0x4   : > { %p20_p0 = scmp.eq.s32.totalorder %s19_s23, 0  ;;  %p29_p1 = scmp.ne.s32.totalorder %s851_s19, %s847_s18 }
   0x5   : > { %p30_p2 = scmp.eq.s32.totalorder %s855_s20, 0  ;;  %p670_p4 = scmp.ge.s32.totalorder %s855_s20, 3 }
   0x6   : > { %s918_s25 = scalar_select %p20_p0, %s851_s19, %s22_s24  }
   0x7   : > { %p31_p3 = por %p30_p2, %p29_p1  ;;  %174 = sbr.rel (%p670_p4) target bundleno = 19 (0x13), region = 28 }
   0xc   : > { %177 = sbr.rel (!%p31_p3) target bundleno = 19 (0x13), region = 32  ;;  %s179_s26 = sand.u32 (%p31_p3), 1, %s851_s19  }
   0xd   : > { %s713_s27 = smul.u32 (%p31_p3), 12, %s855_s20 }
   0xe   : > { %s776_s28 = smul.u32 (%p31_p3), 24, %s179_s26 }
   0xf   : > { %s184_s6 = scalar_lea.vmem (%p31_p3), %s988_s0, %s713_s27 }
  0x10   : > { %v199_v0 = vld [vmem:[%s184_s6] sm:$0xff] (%p31_p3)  ;;  %v672_v2 = vld [vmem:[%s184_s6 + $0x8] sm:$0xf] (%p31_p3)  ;;  %s181_s7 = scalar_lea.vmem (%p31_p3), [#allocation3], %s776_s28  ;;  %v674_v3 = vld [vmem:[%s184_s6 + $0x2c] sm:$0xf] (%p31_p3) }
  0x11   : > { %v201_v1 = vld [vmem:[%s184_s6 + $0x24] sm:$0xff]  ;;  %200 = vst [vmem:[%s181_s7] sm:$0xff] %v199_v0  ;;  %673 = vst [vmem:[%s181_s7 + $0x8] sm:$0xf] %v672_v2 }
  0x12   : > { %202 = vst [vmem:[%s181_s7 + $0xc] sm:$0xff] %v201_v1  ;;  %675 = vst [vmem:[%s181_s7 + $0x14] sm:$0xf] %v674_v3 }
  0x13 PF: > { %p676_p5 = scmp.ge.s32.totalorder %s855_s20, 1  ;;  %p228_p6 = scmp.lt.s32.totalorder %s855_s20, 4 }
  0x15   : > { %p229_p7 = pnand %p676_p5, %p228_p6 }
  0x16   : > { %s235_s8 = sand.u32 (!%p229_p7), 1, %s847_s18   ;;  %s263_s9 = smul.u32 (!%p229_p7), 48, %s906_s21 }
  0x17   : > { %232 = sbr.rel (%p229_p7) target bundleno = 293 (0x125), region = 62  ;;  %p678_p9 = scmp.ne.s32.totalorder (!%p229_p7), %s906_s21, 0 }
  0x18   : > { %s777_s10 = smul.u32 (!%p229_p7), 24, %s235_s8  ;;  %p264_p8 = scmp.lt.s32.totalorder (!%p229_p7), %s263_s9, 143 }
  0x1a   : > { %s935_s15 = scalar_lea.vmem (!%p229_p7), [#allocation3], %s777_s10 }
  0x1c   : > { %s998_s9 = smov (!%p264_p8, %s263_s9), 143  ;;  %273 = sbr.rel (%p678_p9) target bundleno = 35 (0x23), region = 70 }
  0x1d   : > { %s677_s11 = sshll.u32 %s998_s9, 2 }
  0x1e   : > { %s933_s14 = scalar_lea.vmem %s989_s1, %s677_s11 }
  0x21   : > { %v857_v4 = vmov 0.0  }
  0x22   : > { %274 = vst [vmem:[#allocation2] sm:$0xff] %v857_v4  ;;  %275 = vst [vmem:[#allocation2 + $0x8] sm:$0xff] %v857_v4 }
  0x23 PF: > { %v805_v5 = vld [vmem:[%s933_s14 + $0x78] sm:$0xff]   ;;  %v858_v6 = vmov 0.0   ;;  %vm859_vm0 = vmmov 0   ;;  %v808_v9 = vld [vmem:[%s933_s14 + $0x70] sm:$0xff]   ;;  %v811_v12 = vld [vmem:[%s933_s14 + $0x68] sm:$0xff]   ;;  %p706_p10 = scmp.ne.s32.totalorder %s906_s21, 2 }
  0x24   : > { %756 = vmatprep.subr.bf16.mxu1 %v858_v6  ;;  %v806_v7 = vld [vmem:[%s933_s14 + $0xb8] sm:$0xff]   ;;  %725 = vmatprep.subr.bf16.mxu0 %v805_v5  ;;  %v809_v10 = vld [vmem:[%s933_s14 + $0xb0] sm:$0xff]   ;;  %v812_v13 = vld [vmem:[%s933_s14 + $0xa8] sm:$0xff]  }
  0x25   : > { %v807_v8 = vld [vmem:[%s933_s14 + $0x38] sm:$0xff]   ;;  %772 = vmatprep.mubr.msk.bf16.mxu1 %vm859_vm0, %v858_v6  ;;  %757 = vmatpush3.bf16.msra.mxu1 %v806_v7  ;;  %v810_v11 = vld [vmem:[%s933_s14 + $0x30] sm:$0xff]   ;;  %v813_v14 = vld [vmem:[%s933_s14 + $0x28] sm:$0xff]  }
  0x26   : > { %726 = vmatpush3.bf16.msra.mxu0 %v807_v8  ;;  %758 = vmatprep.subr.bf16.mxu1 %v858_v6  ;;  %v814_v15 = vld [vmem:[%s933_s14 + $0x60] sm:$0xff]   ;;  %v817_v18 = vld [vmem:[%s933_s14 + $0x58] sm:$0xff]   ;;  %v820_v21 = vld [vmem:[%s933_s14 + $0x50] sm:$0xff]  }
  0x27   : > { %727 = vmatprep.subr.bf16.mxu0 %v808_v9  ;;  %v815_v16 = vld [vmem:[%s933_s14 + $0xa0] sm:$0xff]   ;;  %v818_v19 = vld [vmem:[%s933_s14 + $0x98] sm:$0xff]   ;;  %v821_v22 = vld [vmem:[%s933_s14 + $0x90] sm:$0xff]  }
  0x28   : > { %v816_v17 = vld [vmem:[%s933_s14 + $0x20] sm:$0xff]   ;;  %v819_v20 = vld [vmem:[%s933_s14 + $0x18] sm:$0xff]   ;;  %v822_v23 = vld [vmem:[%s933_s14 + $0x10] sm:$0xff]  }
  0x29   : > { %759 = vmatpush3.bf16.msra.mxu1 %v809_v10  ;;  %v823_v24 = vld [vmem:[%s933_s14 + $0x48] sm:$0xff]   ;;  %v826_v27 = vld [vmem:[%s933_s14 + $0x40] sm:$0xff]  }
  0x2a   : > { %728 = vmatpush3.bf16.msra.mxu0 %v810_v11  ;;  %760 = vmatprep.subr.bf16.mxu1 %v858_v6  ;;  %v824_v25 = vld [vmem:[%s933_s14 + $0x88] sm:$0xff]   ;;  %v827_v29 = vld [vmem:[%s933_s14 + $0x80] sm:$0xff]  }
  0x2b   : > { %729 = vmatprep.subr.bf16.mxu0 %v811_v12  ;;  %v825_v26 = vld [vmem:[%s933_s14 + $0x8] sm:$0xff]   ;;  %v828_v30 = vld [vmem:[%s933_s14] sm:$0xff]  }
  0x2c   : > { %v831_v28 = vld [vmem:[%s935_s15 + $0x4] ss:$12 sps:$4 sm:$0xff]   ;;  %v832_v31 = vld [vmem:[%s935_s15 + $0x8] ss:$12 sps:$4 sm:$0xff]   ;;  %v829_v32 = vld [vmem:[%s935_s15] ss:$12 sps:$4 sm:$0xff]  }
  0x2d   : > { %761 = vmatpush3.bf16.msra.mxu1 %v812_v13  ;;  %522 = vmatprep.mubr.bf16.mxu0 %v831_v28  ;;  %v276_v39 = vld [vmem:[#allocation2] sm:$0xff]  ;;  %v277_v46 = vld [vmem:[#allocation2 + $0x8] sm:$0xff] }
  0x2e   : > { %730 = vmatpush3.bf16.msra.mxu0 %v813_v14  ;;  %762 = vmatprep.subr.bf16.mxu1 %v858_v6 }
  0x2f   : > { %731 = vmatprep.subr.bf16.mxu0 %v814_v15 }
  0x31   : > { %763 = vmatpush3.bf16.msra.mxu1 %v815_v16 }
  0x32   : > { %732 = vmatpush3.bf16.msra.mxu0 %v816_v17  ;;  %764 = vmatprep.subr.bf16.mxu1 %v858_v6 }
  0x33   : > { %733 = vmatprep.subr.bf16.mxu0 %v817_v18 }
  0x35   : > { %765 = vmatpush3.bf16.msra.mxu1 %v818_v19 }
  0x36   : > { %734 = vmatpush3.bf16.msra.mxu0 %v819_v20  ;;  %766 = vmatprep.subr.bf16.mxu1 %v858_v6 }
  0x37   : > { %735 = vmatprep.subr.bf16.mxu0 %v820_v21 }
  0x39   : > { %767 = vmatpush3.bf16.msra.mxu1 %v821_v22 }
  0x3a   : > { %736 = vmatpush3.bf16.msra.mxu0 %v822_v23  ;;  %768 = vmatprep.subr.bf16.mxu1 %v858_v6 }
  0x3b   : > { %737 = vmatprep.subr.bf16.mxu0 %v823_v24 }
  0x3d   : > { %769 = vmatpush3.bf16.msra.mxu1 %v824_v25 }
  0x3e   : > { %738 = vmatpush3.bf16.msra.mxu0 %v825_v26  ;;  %770 = vmatprep.subr.bf16.mxu1 %v858_v6 }
  0x3f   : > { %739 = vmatprep.subr.bf16.mxu0 %v826_v27 }
  0x41   : > { %771 = vmatpush3.bf16.msra.mxu1 %v827_v29 }
  0x42   : > { %740 = vmatpush3.bf16.msra.mxu0 %v828_v30 }
  0x44   : > { %773 = vmatmul.mubr.bf16.vlgmr.msra.gmra.mxu1 %v832_v31 }
  0x45   : > { %523 = vmatmul.mubr.bf16.vlgmr.msra.gmra.mxu0 %v829_v32 }
 0x104   : > { %v565_v33 = vpop.f32.mrf.mxu1 }
 0x105   : > { %v741_v34 = vpop.f32.mrf.mxu0 }
 0x106   : > { %v774_v35 = vpop.f32.mrf.mxu1 }
 0x107   : > { %v742_v36 = vpop.f32.mrf.mxu0 }
 0x108   : > { %v743_v37 = vadd.f32 %v742_v36, %v741_v34  ;;  %v568_v38 = vpop.f32.mrf.mxu1 }
 0x109   : > { %v744_v40 = vpop.f32.mrf.mxu0 }
 0x10a   : > { %v566_v41 = vadd.f32 %v743_v37, %v565_v33  ;;  %v775_v42 = vpop.f32.mrf.mxu1 }
 0x10b   : > { %v745_v43 = vpop.f32.mrf.mxu0 }
 0x10c   : > { %v572_v44 = vadd.f32 %v566_v41, %v276_v39  ;;  %v746_v45 = vadd.f32 %v745_v43, %v744_v40 }
 0x10e   : > { %574 = vst [vmem:[#allocation2] sm:$0xff] %v572_v44  ;;  %v569_v47 = vadd.f32 %v746_v45, %v568_v38  ;;  %579 = sbr.rel (%p706_p10) target bundleno = 293 (0x125), region = 74 }
 0x110   : > { %v573_v48 = vadd.f32 %v569_v47, %v277_v46 }
 0x112   : > { %575 = vst [vmem:[#allocation2 + $0x8] sm:$0xff] %v573_v48 }
 0x113   : > { %v707_v51 = vld [vmem:[%s990_s2] ss:$0 sm:$0xff] }
 0x114   : > { %v708_v54 = vld [vmem:[%s991_s3] ss:$0 sm:$0xff] }
 0x115   : > { %v580_v49 = vld [vmem:[#allocation2] sm:$0xff] }
 0x116   : > { %v589_v52 = vmul.f32 %v707_v51, %v580_v49  ;;  %v717_v55 = vld [vmem:[%s992_s4] sm:$0xff]  }
 0x117   : > { %v718_v56 = vunpack.c.l.bf16 %v717_v55  ;;  %v719_v57 = vunpack.c.h.bf16 %v717_v55 }
 0x118   : > { %v598_v58 = vadd.f32 %v708_v54, %v589_v52 }
 0x119   : > { %v581_v50 = vld [vmem:[#allocation2 + $0x8] sm:$0xff] }
 0x11a   : > { %v590_v53 = vmul.f32 %v707_v51, %v581_v50  ;;  %v604_v60 = vadd.f32 %v718_v56, %v598_v58 }
 0x11c   : > { %v599_v59 = vadd.f32 %v708_v54, %v590_v53  ;;  %v606_v62 = vmax.f32 %v604_v60, 0.0 }
 0x11e   : > { %v605_v61 = vadd.f32 %v719_v57, %v599_v59 }
 0x120   : > { %v607_v63 = vmax.f32 %v605_v61, 0.0 }
 0x122   : > { %v723_v0 = vpack.c.bf16 %v607_v63, %v606_v62 }
 0x124   : > { %724 = vst [vmem:[%s993_s5] sm:$0xff] %v723_v0  }
 0x125 PF: > { %p12_p11 = scmp.ge.s32.totalorder %s909_s22, 5   ;;  %s994_s18 = smov %s851_s19 }
 0x126   : > { %s995_s19 = smov %s918_s25  ;;  %s996_s20 = smov %s909_s22 }
 0x127   :  { %14 = sbr.rel (!%p12_p11) target bundleno = 2 (0x2), region = 114 }

// kernel: resnet18_sigmoid_forward.32
= control target key start
LH: loop header
LB: loop body
LE: loop exit
PB: predicated region body
PF: predicated region fallthrough
CT: control target
= control target key end

     0   :  { %s876_s15 = smov 0   ;;  %s962_s0 = inlined_call_operand.vmem [shape: bf16[8,1152], index: 0, kind: input, shape index: {}]   ;;  %s963_s1 = inlined_call_operand.vmem [shape: bf16[1152,256], index: 1, kind: input, shape index: {}]   ;;  %s964_s2 = inlined_call_operand.vmem [shape: f32[1,256], index: 2, kind: input, shape index: {}]   ;;  %s965_s3 = inlined_call_operand.vmem [shape: f32[1,256], index: 3, kind: input, shape index: {}]   ;;  %s966_s4 = inlined_call_operand.vmem [shape: bf16[8,256], index: 4, kind: output, shape index: {}]  }
   0x1 LB: > { %s882_s16 = sadd.s32 4294967295, %s847_s15   ;;  %p694_p0 = scmp.ge.s32.totalorder %s847_s15, 1  ;;  %s847_s15 = sphi %s876_s15, %s14_s15  }
   0x2   : > { %p170_p1 = scmp.lt.s32.totalorder %s847_s15, 4 }
   0x4   : > { %p171_p2 = pnand %p694_p0, %p170_p1 }
   0x5   : > { %s197_s17 = smul.u32 (!%p171_p2), 3, %s882_s16  ;;  %p698_p5 = scmp.ne.s32.totalorder (!%p171_p2), %s882_s16, 0 }
   0x6   : > { %174 = sbr.rel (%p171_p2) target bundleno = 303 (0x12f), region = 36 }
   0x7   : > { %s203_s18 = smul.u32 (!%p171_p2), 48, %s882_s16  ;;  %p198_p3 = scmp.lt.s32.totalorder (!%p171_p2), %s197_s17, 8 }
   0x9   : > { %p204_p4 = scmp.lt.s32.totalorder (!%p171_p2), %s203_s18, 143 }
   0xb   : > { %s968_s17 = smov (!%p198_p3, %s197_s17), 8  ;;  %s970_s18 = smov (!%p204_p4, %s203_s18), 143 }
   0xc   : > { %s695_s19 = sshll.u32 %s968_s17, 2  ;;  %s754_s23 = sshll.u32 %s970_s18, 3 }
   0xd   : > { %s891_s22 = scalar_lea.vmem %s962_s0, %s695_s19  ;;  %s896_s26 = scalar_lea.vmem %s963_s1, %s754_s23 }
   0xe   : > { %214 = sbr.rel (%p698_p5) target bundleno = 21 (0x15), region = 40 }
  0x13   : > { %v849_v0 = vmov 0.0  }
  0x14   : > { %215 = vst [vmem:[#allocation2] sm:$0xff] %v849_v0  ;;  %216 = vst [vmem:[#allocation2 + $0x8] sm:$0xff] %v849_v0 }
  0x15 PF: > { %v766_v1 = vld [vmem:[%s896_s26 + $0x74] ss:$8 sps:$4 sm:$0xff]   ;;  %v768_v2 = vld [vmem:[%s896_s26 + $0x70] ss:$8 sps:$4 sm:$0xff]   ;;  %v850_v3 = vmov 0   ;;  %v219_v34 = vld [vmem:[%s891_s22] sm:$0xff] }
  0x16   : > { %593 = vmatprep.mubr.bf16.mxu1 %v850_v3  ;;  %520 = vmatprep.subr.bf16.mxu0 %v766_v1  ;;  %v769_v4 = vld [vmem:[%s896_s26 + $0x64] ss:$8 sps:$4 sm:$0xff]   ;;  %v771_v5 = vld [vmem:[%s896_s26 + $0x60] ss:$8 sps:$4 sm:$0xff]   ;;  %v772_v6 = vld [vmem:[%s896_s26 + $0x54] ss:$8 sps:$4 sm:$0xff]   ;;  %v700_v36 = vcombine.high %v219_v34, %v219_v34  ;;  %v699_v53 = vcombine.low %v219_v34, %v219_v34 }
  0x17   : > { %521 = vmatpush1.bf16.msra.mxu0 %v768_v2  ;;  %v774_v7 = vld [vmem:[%s896_s26 + $0x50] ss:$8 sps:$4 sm:$0xff]   ;;  %v775_v8 = vld [vmem:[%s896_s26 + $0x44] ss:$8 sps:$4 sm:$0xff]   ;;  %v787_v9 = vld [vmem:[%s896_s26 + $0x174] ss:$8 sps:$4 sm:$0xff]  }
  0x18   : > { %522 = vmatprep.subr.bf16.mxu0 %v769_v4  ;;  %v789_v10 = vld [vmem:[%s896_s26 + $0x170] ss:$8 sps:$4 sm:$0xff]   ;;  %v777_v11 = vld [vmem:[%s896_s26 + $0x40] ss:$8 sps:$4 sm:$0xff]   ;;  %v778_v12 = vld [vmem:[%s896_s26 + $0x34] ss:$8 sps:$4 sm:$0xff]   ;;  %561 = vmatprep.subr.bf16.mxu1 %v787_v9 }
  0x19   : > { %v793_v13 = vld [vmem:[%s896_s26 + $0x164] ss:$8 sps:$4 sm:$0xff]   ;;  %562 = vmatpush1.bf16.msra.mxu1 %v789_v10  ;;  %v795_v14 = vld [vmem:[%s896_s26 + $0x160] ss:$8 sps:$4 sm:$0xff]   ;;  %v780_v15 = vld [vmem:[%s896_s26 + $0x30] ss:$8 sps:$4 sm:$0xff]   ;;  %552 = vmatprep.mubr.bf16.mxu0 %v700_v36 }
  0x1a   : > { %563 = vmatprep.subr.bf16.mxu1 %v793_v13  ;;  %v799_v16 = vld [vmem:[%s896_s26 + $0x154] ss:$8 sps:$4 sm:$0xff]   ;;  %v781_v17 = vld [vmem:[%s896_s26 + $0x24] ss:$8 sps:$4 sm:$0xff]   ;;  %v801_v18 = vld [vmem:[%s896_s26 + $0x150] ss:$8 sps:$4 sm:$0xff]  }
  0x1b   : > { %523 = vmatpush1.bf16.msra.mxu0 %v771_v5  ;;  %v805_v19 = vld [vmem:[%s896_s26 + $0x144] ss:$8 sps:$4 sm:$0xff]   ;;  %v783_v20 = vld [vmem:[%s896_s26 + $0x20] ss:$8 sps:$4 sm:$0xff]   ;;  %v784_v21 = vld [vmem:[%s896_s26 + $0x14] ss:$8 sps:$4 sm:$0xff]  }
  0x1c   : > { %524 = vmatprep.subr.bf16.mxu0 %v772_v6  ;;  %v807_v22 = vld [vmem:[%s896_s26 + $0x140] ss:$8 sps:$4 sm:$0xff]   ;;  %v811_v23 = vld [vmem:[%s896_s26 + $0x134] ss:$8 sps:$4 sm:$0xff]   ;;  %v786_v24 = vld [vmem:[%s896_s26 + $0x10] ss:$8 sps:$4 sm:$0xff]  }
  0x1d   : > { %564 = vmatpush1.bf16.msra.mxu1 %v795_v14  ;;  %v790_v25 = vld [vmem:[%s896_s26 + $0x4] ss:$8 sps:$4 sm:$0xff]   ;;  %v813_v26 = vld [vmem:[%s896_s26 + $0x130] ss:$8 sps:$4 sm:$0xff]   ;;  %v792_v28 = vld [vmem:[%s896_s26] ss:$8 sps:$4 sm:$0xff]  }
  0x1e   : > { %565 = vmatprep.subr.bf16.mxu1 %v799_v16  ;;  %v817_v27 = vld [vmem:[%s896_s26 + $0x124] ss:$8 sps:$4 sm:$0xff]   ;;  %v796_v29 = vld [vmem:[%s896_s26 + $0xf4] ss:$8 sps:$4 sm:$0xff]   ;;  %v819_v30 = vld [vmem:[%s896_s26 + $0x120] ss:$8 sps:$4 sm:$0xff]  }
  0x1f   : > { %525 = vmatpush1.bf16.msra.mxu0 %v774_v7  ;;  %v823_v31 = vld [vmem:[%s896_s26 + $0x114] ss:$8 sps:$4 sm:$0xff]   ;;  %v798_v32 = vld [vmem:[%s896_s26 + $0xf0] ss:$8 sps:$4 sm:$0xff]   ;;  %v802_v33 = vld [vmem:[%s896_s26 + $0xe4] ss:$8 sps:$4 sm:$0xff]  }
  0x20   : > { %526 = vmatprep.subr.bf16.mxu0 %v775_v8  ;;  %v825_v35 = vld [vmem:[%s896_s26 + $0x110] ss:$8 sps:$4 sm:$0xff]   ;;  %v829_v37 = vld [vmem:[%s896_s26 + $0x104] ss:$8 sps:$4 sm:$0xff]   ;;  %v804_v38 = vld [vmem:[%s896_s26 + $0xe0] ss:$8 sps:$4 sm:$0xff]  }
  0x21   : > { %566 = vmatpush1.bf16.msra.mxu1 %v801_v18  ;;  %v808_v39 = vld [vmem:[%s896_s26 + $0xd4] ss:$8 sps:$4 sm:$0xff]   ;;  %v831_v40 = vld [vmem:[%s896_s26 + $0x100] ss:$8 sps:$4 sm:$0xff]   ;;  %v810_v41 = vld [vmem:[%s896_s26 + $0xd0] ss:$8 sps:$4 sm:$0xff]  }
  0x22   : > { %567 = vmatprep.subr.bf16.mxu1 %v805_v19  ;;  %v814_v42 = vld [vmem:[%s896_s26 + $0xc4] ss:$8 sps:$4 sm:$0xff]   ;;  %v835_v43 = vld [vmem:[%s891_s22 + $0x8] ss:$0 sps:$4 sm:$0xff]   ;;  %v820_v45 = vld [vmem:[%s896_s26 + $0xb4] ss:$8 sps:$4 sm:$0xff]  }
  0x23   : > { %527 = vmatpush1.bf16.msra.mxu0 %v777_v11  ;;  %v816_v44 = vld [vmem:[%s896_s26 + $0xc0] ss:$8 sps:$4 sm:$0xff]   ;;  %v822_v46 = vld [vmem:[%s896_s26 + $0xb0] ss:$8 sps:$4 sm:$0xff]   ;;  %v826_v47 = vld [vmem:[%s896_s26 + $0xa4] ss:$8 sps:$4 sm:$0xff]  }
  0x24   : > { %528 = vmatprep.subr.bf16.mxu0 %v778_v12  ;;  %v828_v48 = vld [vmem:[%s896_s26 + $0xa0] ss:$8 sps:$4 sm:$0xff]   ;;  %v832_v49 = vld [vmem:[%s896_s26 + $0x94] ss:$8 sps:$4 sm:$0xff]   ;;  %v834_v50 = vld [vmem:[%s896_s26 + $0x90] ss:$8 sps:$4 sm:$0xff]  }
  0x25   : > { %568 = vmatpush1.bf16.msra.mxu1 %v807_v22  ;;  %v836_v51 = vld [vmem:[%s896_s26 + $0x84] ss:$8 sps:$4 sm:$0xff]   ;;  %v838_v52 = vld [vmem:[%s896_s26 + $0x80] ss:$8 sps:$4 sm:$0xff]   ;;  %p750_p6 = scmp.ne.s32.totalorder %s882_s16, 2 }
  0x26   : > { %569 = vmatprep.subr.bf16.mxu1 %v811_v23  ;;  %v217_v58 = vld [vmem:[#allocation2] sm:$0xff]  ;;  %v218_v61 = vld [vmem:[#allocation2 + $0x8] sm:$0xff] }
  0x27   : > { %529 = vmatpush1.bf16.msra.mxu0 %v780_v15 }
  0x28   : > { %530 = vmatprep.subr.bf16.mxu0 %v781_v17 }
  0x29   : > { %570 = vmatpush1.bf16.msra.mxu1 %v813_v26 }
  0x2a   : > { %571 = vmatprep.subr.bf16.mxu1 %v817_v27 }
  0x2b   : > { %531 = vmatpush1.bf16.msra.mxu0 %v783_v20 }
  0x2c   : > { %532 = vmatprep.subr.bf16.mxu0 %v784_v21 }
  0x2d   : > { %572 = vmatpush1.bf16.msra.mxu1 %v819_v30 }
  0x2e   : > { %573 = vmatprep.subr.bf16.mxu1 %v823_v31 }
  0x2f   : > { %533 = vmatpush1.bf16.msra.mxu0 %v786_v24 }
  0x30   : > { %534 = vmatprep.subr.bf16.mxu0 %v790_v25 }
  0x31   : > { %574 = vmatpush1.bf16.msra.mxu1 %v825_v35 }
  0x32   : > { %575 = vmatprep.subr.bf16.mxu1 %v829_v37 }
  0x33   : > { %535 = vmatpush1.bf16.msra.mxu0 %v792_v28 }
  0x34   : > { %536 = vmatprep.subr.bf16.mxu0 %v796_v29 }
  0x35   : > { %576 = vmatpush1.bf16.msra.mxu1 %v831_v40 }
  0x37   : > { %537 = vmatpush2.bf16.msra.mxu0 %v798_v32 }
  0x38   : > { %538 = vmatprep.subr.bf16.mxu0 %v802_v33  ;;  %594 = vmatmul.mubr.bf16.vlgmr.msra.gmra.mxu1 %v835_v43 }
  0x3b   : > { %539 = vmatpush2.bf16.msra.mxu0 %v804_v38 }
  0x3c   : > { %540 = vmatprep.subr.bf16.mxu0 %v808_v39 }
  0x3f   : > { %541 = vmatpush2.bf16.msra.mxu0 %v810_v41 }
  0x40   : > { %542 = vmatprep.subr.bf16.mxu0 %v814_v42 }
  0x43   : > { %543 = vmatpush2.bf16.msra.mxu0 %v816_v44 }
  0x44   : > { %544 = vmatprep.subr.bf16.mxu0 %v820_v45 }
  0x47   : > { %545 = vmatpush2.bf16.msra.mxu0 %v822_v46 }
  0x48   : > { %546 = vmatprep.subr.bf16.mxu0 %v826_v47 }
  0x4b   : > { %547 = vmatpush2.bf16.msra.mxu0 %v828_v48 }
  0x4c   : > { %548 = vmatprep.subr.bf16.mxu0 %v832_v49 }
  0x4f   : > { %549 = vmatpush2.bf16.msra.mxu0 %v834_v50 }
  0x50   : > { %550 = vmatprep.subr.bf16.mxu0 %v836_v51 }
  0x53   : > { %551 = vmatpush2.bf16.msra.mxu0 %v838_v52 }
  0x56   : > { %553 = vmatmul.mubr.bf16.vlgmr.msra.gmra.mxu0 %v699_v53 }
  0xf8   : > { %v595_v54 = vpop.f32.mrf.mxu1 }
  0xfa   : > { %v597_v55 = vpop.f32.mrf.mxu1 }
  0xfc   : > { %v599_v56 = vpop.f32.mrf.mxu1 }
  0xfe   : > { %v600_v57 = vpop.f32.mrf.mxu1 }
 0x116   : > { %v554_v59 = vpop.f32.mrf.mxu0 }
 0x117   : > { %v596_v60 = vadd.f32 %v595_v54, %v554_v59 }
 0x118   : > { %v556_v62 = vpop.f32.mrf.mxu0 }
 0x119   : > { %v602_v63 = vadd.f32 %v596_v60, %v217_v58  ;;  %v598_v0 = vadd.f32 %v597_v55, %v556_v62  ;;  %609 = sbr.rel (%p750_p6) target bundleno = 303 (0x12f), region = 44 }
 0x11a   : > { %v558_v1 = vpop.f32.mrf.mxu0 }
 0x11b   : > { %604 = vst [vmem:[#allocation2] sm:$0xff] %v602_v63  ;;  %v603_v2 = vadd.f32 %v598_v0, %v218_v61 }
 0x11c   : > { %v559_v3 = vpop.f32.mrf.mxu0 }
 0x11d   : > { %605 = vst [vmem:[#allocation2 + $0x8] sm:$0xff] %v603_v2 }
 0x11e   : > { %v614_v4 = vlaneseq  ;;  %v612_v6 = vld [vmem:[%s964_s2] sm:$0x3] }
 0x11f   : > { %v626_v7 = vld [vmem:[%s965_s3] sm:$0x3] }
 0x120   : > { %v615_v5 = vshrl.u32 %v614_v4, 7 }
 0x122   : > { %v616_v8 = vsub.s32 0, %v615_v5  ;;  %v620_v9 = vsub.s32 1, %v615_v5  ;;  %v610_v10 = vld [vmem:[#allocation2] sm:$0xff] }
 0x124   : > { %v611_v11 = vld [vmem:[#allocation2 + $0x8] sm:$0xff]  ;;  %v617_v12 = vrot.slane %v612_v6, %v616_v8  ;;  %v621_v13 = vrot.slane %v612_v6, %v620_v9  ;;  %v631_v14 = vrot.slane %v626_v7, %v616_v8  ;;  %v635_v15 = vrot.slane %v626_v7, %v620_v9 }
 0x126   : > { %v624_v16 = vmul.f32 %v617_v12, %v610_v10  ;;  %v625_v17 = vmul.f32 %v621_v13, %v611_v11 }
 0x128   : > { %v638_v18 = vadd.f32 %v631_v14, %v624_v16  ;;  %v639_v19 = vadd.f32 %v635_v15, %v625_v17 }
 0x12a   : > { %v640_v20 = vmax.f32 %v638_v18, 0.0  ;;  %v641_v21 = vmax.f32 %v639_v19, 0.0 }
 0x12c   : > { %v755_v22 = vpack.c.bf16 %v641_v21, %v640_v20 }
 0x12e   : > { %650 = vst [vmem:[%s966_s4] sm:$0xff] %v755_v22 }
 0x12f PF: > { %s14_s15 = sadd.s32 1, %s847_s15  }
 0x130   : > { %p11_p7 = scmp.ge.s32.totalorder %s14_s15, 5  }
 0x132   :  { %13 = sbr.rel (!%p11_p7) target bundleno = 1 (0x1), region = 73 }

// kernel: resnet18_sigmoid_forward.31
= control target key start
LH: loop header
LB: loop body
LE: loop exit
PB: predicated region body
PF: predicated region fallthrough
CT: control target
= control target key end

     0   :  { %v257_v1 = vmov 0   ;;  %v175_v18 = vlaneseq  ;;  %s343_s1 = inlined_call_operand.vmem [shape: bf16[128,256], index: 1, kind: input, shape index: {}]   ;;  %s344_s0 = inlined_call_operand.vmem [shape: bf16[8,128], index: 0, kind: input, shape index: {}]   ;;  %s345_s2 = inlined_call_operand.vmem [shape: f32[1,256], index: 2, kind: input, shape index: {}]   ;;  %s346_s3 = inlined_call_operand.vmem [shape: f32[1,256], index: 3, kind: input, shape index: {}]   ;;  %s347_s4 = inlined_call_operand.vmem [shape: bf16[8,256], index: 4, kind: output, shape index: {}]  }
   0x1   :  { %v233_v0 = vld [vmem:[%s343_s1 + $0x74] ss:$8 sps:$4 sm:$0xff]   ;;  %155 = vmatprep.mubr.bf16.mxu0 %v257_v1  ;;  %v235_v2 = vld [vmem:[%s343_s1 + $0x70] ss:$8 sps:$4 sm:$0xff]   ;;  %v236_v3 = vld [vmem:[%s343_s1 + $0x64] ss:$8 sps:$4 sm:$0xff]  }
   0x2   :  { %123 = vmatprep.subr.bf16.mxu0 %v233_v0  ;;  %v238_v4 = vld [vmem:[%s343_s1 + $0x60] ss:$8 sps:$4 sm:$0xff]   ;;  %v239_v5 = vld [vmem:[%s343_s1 + $0x54] ss:$8 sps:$4 sm:$0xff]   ;;  %v241_v6 = vld [vmem:[%s343_s1 + $0x50] ss:$8 sps:$4 sm:$0xff]  }
   0x3   :  { %124 = vmatpush1.bf16.msra.mxu0 %v235_v2  ;;  %v242_v7 = vld [vmem:[%s343_s1 + $0x44] ss:$8 sps:$4 sm:$0xff]   ;;  %v244_v8 = vld [vmem:[%s343_s1 + $0x40] ss:$8 sps:$4 sm:$0xff]   ;;  %v245_v9 = vld [vmem:[%s343_s1 + $0x34] ss:$8 sps:$4 sm:$0xff]  }
   0x4   :  { %125 = vmatprep.subr.bf16.mxu0 %v236_v3  ;;  %v247_v10 = vld [vmem:[%s343_s1 + $0x30] ss:$8 sps:$4 sm:$0xff]   ;;  %v248_v11 = vld [vmem:[%s343_s1 + $0x24] ss:$8 sps:$4 sm:$0xff]   ;;  %v250_v12 = vld [vmem:[%s343_s1 + $0x20] ss:$8 sps:$4 sm:$0xff]  }
   0x5   :  { %v251_v13 = vld [vmem:[%s343_s1 + $0x14] ss:$8 sps:$4 sm:$0xff]   ;;  %v253_v14 = vld [vmem:[%s343_s1 + $0x10] ss:$8 sps:$4 sm:$0xff]   ;;  %v254_v15 = vld [vmem:[%s343_s1 + $0x4] ss:$8 sps:$4 sm:$0xff]  }
   0x6   :  { %v256_v16 = vld [vmem:[%s343_s1] ss:$8 sps:$4 sm:$0xff]   ;;  %v176_v19 = vshrl.u32 %v175_v18, 7 }
   0x7   :  { %126 = vmatpush1.bf16.msra.mxu0 %v238_v4  ;;  %v26_v17 = vld [vmem:[%s344_s0] sm:$0xf] }
   0x8   :  { %127 = vmatprep.subr.bf16.mxu0 %v239_v5  ;;  %v177_v20 = vsub.s32 0, %v176_v19  ;;  %v173_v21 = vld [vmem:[%s345_s2] sm:$0x3]  ;;  %v181_v22 = vsub.s32 1, %v176_v19 }
   0x9   :  { %v187_v24 = vld [vmem:[%s346_s3] sm:$0x3] }
   0xa   :  { %v178_v23 = vrot.slane %v173_v21, %v177_v20  ;;  %v182_v25 = vrot.slane %v173_v21, %v181_v22  ;;  %v192_v28 = vrot.slane %v187_v24, %v177_v20  ;;  %v196_v29 = vrot.slane %v187_v24, %v181_v22 }
   0xb   :  { %128 = vmatpush1.bf16.msra.mxu0 %v241_v6 }
   0xc   :  { %129 = vmatprep.subr.bf16.mxu0 %v242_v7 }
   0xf   :  { %130 = vmatpush1.bf16.msra.mxu0 %v244_v8 }
  0x10   :  { %131 = vmatprep.subr.bf16.mxu0 %v245_v9 }
  0x13   :  { %132 = vmatpush1.bf16.msra.mxu0 %v247_v10 }
  0x14   :  { %133 = vmatprep.subr.bf16.mxu0 %v248_v11 }
  0x17   :  { %134 = vmatpush1.bf16.msra.mxu0 %v250_v12 }
  0x18   :  { %135 = vmatprep.subr.bf16.mxu0 %v251_v13 }
  0x1b   :  { %136 = vmatpush1.bf16.msra.mxu0 %v253_v14 }
  0x1c   :  { %137 = vmatprep.subr.bf16.mxu0 %v254_v15 }
  0x1f   :  { %138 = vmatpush1.bf16.msra.mxu0 %v256_v16 }
  0x22   :  { %156 = vmatmul.mubr.bf16.vlgmr.msra.gmra.mxu0 %v26_v17 }
  0xe2   :  { %v157_v26 = vpop.f32.mrf.mxu0 }
  0xe3   :  { %v185_v27 = vmul.f32 %v178_v23, %v157_v26 }
  0xe4   :  { %v159_v30 = vpop.f32.mrf.mxu0 }
  0xe5   :  { %v186_v31 = vmul.f32 %v182_v25, %v159_v30  ;;  %v199_v33 = vadd.f32 %v192_v28, %v185_v27 }
  0xe6   :  { %v161_v32 = vpop.f32.mrf.mxu0 }
  0xe7   :  { %v200_v34 = vadd.f32 %v196_v29, %v186_v31 }
  0xe8   :  { %v162_v35 = vpop.f32.mrf.mxu0 }
  0xe9   :  { %v231_v36 = vpack.c.bf16 %v200_v34, %v199_v33 }
  0xeb   :  { %209 = vst [vmem:[%s347_s4] sm:$0xff] %v231_v36 }

// kernel: resnet18_sigmoid_forward.34
= control target key start
LH: loop header
LB: loop body
LE: loop exit
PB: predicated region body
PF: predicated region fallthrough
CT: control target
= control target key end

     0   :  { %s1339_s15 = smov 0   ;;  %s1480_s0 = inlined_call_operand.vmem [shape: bf16[8,2304], index: 0, kind: input, shape index: {}]   ;;  %s1481_s1 = inlined_call_operand.vmem [shape: bf16[2304,256], index: 1, kind: input, shape index: {}]   ;;  %s1482_s2 = inlined_call_operand.vmem [shape: f32[1,256], index: 2, kind: input, shape index: {}]   ;;  %s1483_s3 = inlined_call_operand.vmem [shape: f32[1,256], index: 3, kind: input, shape index: {}]   ;;  %s1484_s4 = inlined_call_operand.vmem [shape: bf16[8,256], index: 4, kind: output, shape index: {}]  }
   0x1 LB: > { %s1345_s16 = sadd.s32 4294967295, %s1311_s15   ;;  %p1033_p0 = scmp.ge.s32.totalorder %s1311_s15, 1  ;;  %s1311_s15 = sphi %s1339_s15, %s14_s15  }
   0x2   : > { %p170_p1 = scmp.lt.s32.totalorder %s1311_s15, 4 }
   0x4   : > { %p171_p2 = pnand %p1033_p0, %p170_p1 }
   0x5   : > { %s197_s17 = smul.u32 (!%p171_p2), 6, %s1345_s16  ;;  %p1037_p5 = scmp.ne.s32.totalorder (!%p171_p2), %s1345_s16, 0 }
   0x6   : > { %174 = sbr.rel (%p171_p2) target bundleno = 367 (0x16f), region = 36 }
   0x7   : > { %s203_s18 = smul.u32 (!%p171_p2), 96, %s1345_s16  ;;  %p198_p3 = scmp.lt.s32.totalorder (!%p171_p2), %s197_s17, 17 }
   0x9   : > { %p204_p4 = scmp.lt.s32.totalorder (!%p171_p2), %s203_s18, 287 }
   0xb   : > { %s1486_s17 = smov (!%p198_p3, %s197_s17), 17  ;;  %s1488_s18 = smov (!%p204_p4, %s203_s18), 287 }
   0xc   : > { %s1034_s19 = sshll.u32 %s1486_s17, 2  ;;  %s1144_s23 = sshll.u32 %s1488_s18, 3 }
   0xd   : > { %s1354_s22 = scalar_lea.vmem %s1480_s0, %s1034_s19  ;;  %s1359_s26 = scalar_lea.vmem %s1481_s1, %s1144_s23 }
   0xe   : > { %213 = sbr.rel (%p1037_p5) target bundleno = 21 (0x15), region = 40 }
  0x13   : > { %v1313_v0 = vmov 0.0  }
  0x14   : > { %214 = vst [vmem:[#allocation2] sm:$0xff] %v1313_v0  ;;  %215 = vst [vmem:[#allocation2 + $0x8] sm:$0xff] %v1313_v0 }
  0x15 PF: > { %v1155_v1 = vld [vmem:[%s1359_s26 + $0x74] ss:$8 sps:$4 sm:$0xff]   ;;  %v1159_v3 = vld [vmem:[%s1359_s26 + $0x70] ss:$8 sps:$4 sm:$0xff]   ;;  %v1161_v5 = vld [vmem:[%s1359_s26 + $0x64] ss:$8 sps:$4 sm:$0xff]  }
  0x16   : > { %v1157_v2 = vld [vmem:[%s1359_s26 + $0x174] ss:$8 sps:$4 sm:$0xff]   ;;  %818 = vmatprep.subr.bf16.mxu0 %v1155_v1  ;;  %v1160_v4 = vld [vmem:[%s1359_s26 + $0x170] ss:$8 sps:$4 sm:$0xff]   ;;  %v1163_v6 = vld [vmem:[%s1359_s26 + $0x164] ss:$8 sps:$4 sm:$0xff]  }
  0x17   : > { %859 = vmatprep.subr.bf16.mxu1 %v1157_v2  ;;  %819 = vmatpush1.bf16.msra.mxu0 %v1159_v3  ;;  %v1165_v7 = vld [vmem:[%s1359_s26 + $0x60] ss:$8 sps:$4 sm:$0xff]   ;;  %v1167_v9 = vld [vmem:[%s1359_s26 + $0x54] ss:$8 sps:$4 sm:$0xff]   ;;  %v1171_v11 = vld [vmem:[%s1359_s26 + $0x50] ss:$8 sps:$4 sm:$0xff]  }
  0x18   : > { %860 = vmatpush1.bf16.msra.mxu1 %v1160_v4  ;;  %820 = vmatprep.subr.bf16.mxu0 %v1161_v5  ;;  %v1166_v8 = vld [vmem:[%s1359_s26 + $0x160] ss:$8 sps:$4 sm:$0xff]   ;;  %v1169_v10 = vld [vmem:[%s1359_s26 + $0x154] ss:$8 sps:$4 sm:$0xff]   ;;  %v1172_v12 = vld [vmem:[%s1359_s26 + $0x150] ss:$8 sps:$4 sm:$0xff]  }
  0x19   : > { %861 = vmatprep.subr.bf16.mxu1 %v1163_v6  ;;  %v1173_v13 = vld [vmem:[%s1359_s26 + $0x44] ss:$8 sps:$4 sm:$0xff]   ;;  %v1177_v15 = vld [vmem:[%s1359_s26 + $0x40] ss:$8 sps:$4 sm:$0xff]   ;;  %v1179_v17 = vld [vmem:[%s1359_s26 + $0x34] ss:$8 sps:$4 sm:$0xff]  }
  0x1a   : > { %v1175_v14 = vld [vmem:[%s1359_s26 + $0x144] ss:$8 sps:$4 sm:$0xff]   ;;  %v1178_v16 = vld [vmem:[%s1359_s26 + $0x140] ss:$8 sps:$4 sm:$0xff]   ;;  %v1181_v18 = vld [vmem:[%s1359_s26 + $0x134] ss:$8 sps:$4 sm:$0xff]  }
  0x1b   : > { %821 = vmatpush1.bf16.msra.mxu0 %v1165_v7  ;;  %v1183_v19 = vld [vmem:[%s1359_s26 + $0x30] ss:$8 sps:$4 sm:$0xff]   ;;  %v1185_v21 = vld [vmem:[%s1359_s26 + $0x24] ss:$8 sps:$4 sm:$0xff]   ;;  %v1189_v23 = vld [vmem:[%s1359_s26 + $0x20] ss:$8 sps:$4 sm:$0xff]  }
  0x1c   : > { %862 = vmatpush1.bf16.msra.mxu1 %v1166_v8  ;;  %822 = vmatprep.subr.bf16.mxu0 %v1167_v9  ;;  %v1184_v20 = vld [vmem:[%s1359_s26 + $0x130] ss:$8 sps:$4 sm:$0xff]   ;;  %v1187_v22 = vld [vmem:[%s1359_s26 + $0x124] ss:$8 sps:$4 sm:$0xff]   ;;  %v1190_v24 = vld [vmem:[%s1359_s26 + $0x120] ss:$8 sps:$4 sm:$0xff]  }
  0x1d   : > { %863 = vmatprep.subr.bf16.mxu1 %v1169_v10  ;;  %v1191_v25 = vld [vmem:[%s1359_s26 + $0x14] ss:$8 sps:$4 sm:$0xff]   ;;  %v1195_v27 = vld [vmem:[%s1359_s26 + $0x10] ss:$8 sps:$4 sm:$0xff]   ;;  %v1197_v29 = vld [vmem:[%s1359_s26 + $0x4] ss:$8 sps:$4 sm:$0xff]  }
  0x1e   : > { %v1193_v26 = vld [vmem:[%s1359_s26 + $0x114] ss:$8 sps:$4 sm:$0xff]   ;;  %v1196_v28 = vld [vmem:[%s1359_s26 + $0x110] ss:$8 sps:$4 sm:$0xff]   ;;  %v1199_v30 = vld [vmem:[%s1359_s26 + $0x104] ss:$8 sps:$4 sm:$0xff]  }
  0x1f   : > { %823 = vmatpush1.bf16.msra.mxu0 %v1171_v11  ;;  %v1201_v31 = vld [vmem:[%s1359_s26] ss:$8 sps:$4 sm:$0xff]   ;;  %v1203_v33 = vld [vmem:[%s1359_s26 + $0xf4] ss:$8 sps:$4 sm:$0xff]   ;;  %v1207_v35 = vld [vmem:[%s1359_s26 + $0xf0] ss:$8 sps:$4 sm:$0xff]  }
  0x20   : > { %864 = vmatpush1.bf16.msra.mxu1 %v1172_v12  ;;  %824 = vmatprep.subr.bf16.mxu0 %v1173_v13  ;;  %v1202_v32 = vld [vmem:[%s1359_s26 + $0x100] ss:$8 sps:$4 sm:$0xff]   ;;  %v1205_v34 = vld [vmem:[%s1359_s26 + $0x1f4] ss:$8 sps:$4 sm:$0xff]   ;;  %v1208_v36 = vld [vmem:[%s1359_s26 + $0x1f0] ss:$8 sps:$4 sm:$0xff]  }
  0x21   : > { %865 = vmatprep.subr.bf16.mxu1 %v1175_v14  ;;  %v1209_v37 = vld [vmem:[%s1359_s26 + $0xe4] ss:$8 sps:$4 sm:$0xff]   ;;  %v1213_v39 = vld [vmem:[%s1359_s26 + $0xe0] ss:$8 sps:$4 sm:$0xff]   ;;  %v1215_v41 = vld [vmem:[%s1359_s26 + $0xd4] ss:$8 sps:$4 sm:$0xff]  }
  0x22   : > { %v1211_v38 = vld [vmem:[%s1359_s26 + $0x1e4] ss:$8 sps:$4 sm:$0xff]   ;;  %v1214_v40 = vld [vmem:[%s1359_s26 + $0x1e0] ss:$8 sps:$4 sm:$0xff]   ;;  %v1217_v42 = vld [vmem:[%s1359_s26 + $0x1d4] ss:$8 sps:$4 sm:$0xff]  }
  0x23   : > { %825 = vmatpush1.bf16.msra.mxu0 %v1177_v15  ;;  %v1219_v43 = vld [vmem:[%s1359_s26 + $0xd0] ss:$8 sps:$4 sm:$0xff]   ;;  %v1221_v45 = vld [vmem:[%s1359_s26 + $0xc4] ss:$8 sps:$4 sm:$0xff]   ;;  %v1225_v50 = vld [vmem:[%s1359_s26 + $0xc0] ss:$8 sps:$4 sm:$0xff]  }
  0x24   : > { %866 = vmatpush1.bf16.msra.mxu1 %v1178_v16  ;;  %826 = vmatprep.subr.bf16.mxu0 %v1179_v17  ;;  %v1220_v44 = vld [vmem:[%s1359_s26 + $0x1d0] ss:$8 sps:$4 sm:$0xff]   ;;  %v1223_v46 = vld [vmem:[%s1359_s26 + $0x1c4] ss:$8 sps:$4 sm:$0xff]   ;;  %v1226_v51 = vld [vmem:[%s1359_s26 + $0x1c0] ss:$8 sps:$4 sm:$0xff]  }
  0x25   : > { %867 = vmatprep.subr.bf16.mxu1 %v1181_v18  ;;  %v218_v47 = vld [vmem:[%s1354_s22] sm:$0xff]  ;;  %v219_v49 = vld [vmem:[%s1354_s22 + $0x8] sm:$0xff]  ;;  %v1227_v53 = vld [vmem:[%s1359_s26 + $0xb4] ss:$8 sps:$4 sm:$0xff]   ;;  %p1140_p6 = scmp.ne.s32.totalorder %s1345_s16, 2 }
  0x26   : > { %v1039_v48 = vcombine.high %v218_v47, %v218_v47  ;;  %v1041_v52 = vcombine.high %v219_v49, %v219_v49  ;;  %v1229_v54 = vld [vmem:[%s1359_s26 + $0x1b4] ss:$8 sps:$4 sm:$0xff]   ;;  %v1231_v55 = vld [vmem:[%s1359_s26 + $0xb0] ss:$8 sps:$4 sm:$0xff]   ;;  %v1233_v57 = vld [vmem:[%s1359_s26 + $0xa4] ss:$8 sps:$4 sm:$0xff]   ;;  %v1038_v6 = vcombine.low %v218_v47, %v218_v47  ;;  %v1040_v7 = vcombine.low %v219_v49, %v219_v49 }
  0x27   : > { %827 = vmatpush1.bf16.msra.mxu0 %v1183_v19  ;;  %v1232_v56 = vld [vmem:[%s1359_s26 + $0x1b0] ss:$8 sps:$4 sm:$0xff]   ;;  %v1235_v58 = vld [vmem:[%s1359_s26 + $0x1a4] ss:$8 sps:$4 sm:$0xff]   ;;  %v1237_v59 = vld [vmem:[%s1359_s26 + $0xa0] ss:$8 sps:$4 sm:$0xff]  }
  0x28   : > { %868 = vmatpush1.bf16.msra.mxu1 %v1184_v20  ;;  %828 = vmatprep.subr.bf16.mxu0 %v1185_v21  ;;  %v1238_v60 = vld [vmem:[%s1359_s26 + $0x1a0] ss:$8 sps:$4 sm:$0xff]   ;;  %v1239_v61 = vld [vmem:[%s1359_s26 + $0x94] ss:$8 sps:$4 sm:$0xff]   ;;  %v1243_v63 = vld [vmem:[%s1359_s26 + $0x90] ss:$8 sps:$4 sm:$0xff]  }
  0x29   : > { %869 = vmatprep.subr.bf16.mxu1 %v1187_v22  ;;  %850 = vmatprep.mubr.bf16.mxu0 %v1039_v48  ;;  %v1241_v62 = vld [vmem:[%s1359_s26 + $0x194] ss:$8 sps:$4 sm:$0xff]   ;;  %v1244_v0 = vld [vmem:[%s1359_s26 + $0x190] ss:$8 sps:$4 sm:$0xff]   ;;  %v1245_v1 = vld [vmem:[%s1359_s26 + $0x84] ss:$8 sps:$4 sm:$0xff]  }
  0x2a   : > { %891 = vmatprep.mubr.bf16.mxu1 %v1041_v52  ;;  %v1247_v2 = vld [vmem:[%s1359_s26 + $0x184] ss:$8 sps:$4 sm:$0xff]   ;;  %v1249_v3 = vld [vmem:[%s1359_s26 + $0x80] ss:$8 sps:$4 sm:$0xff]   ;;  %v1257_v5 = vld [vmem:[%s1359_s26 + $0x274] ss:$8 sps:$4 sm:$0xff]  }
  0x2b   : > { %829 = vmatpush1.bf16.msra.mxu0 %v1189_v23  ;;  %v1250_v4 = vld [vmem:[%s1359_s26 + $0x180] ss:$8 sps:$4 sm:$0xff]   ;;  %v1255_v8 = vld [vmem:[%s1359_s26 + $0x270] ss:$8 sps:$4 sm:$0xff]   ;;  %v1260_v10 = vld [vmem:[%s1359_s26 + $0x264] ss:$8 sps:$4 sm:$0xff]  }
  0x2c   : > { %870 = vmatpush1.bf16.msra.mxu1 %v1190_v24  ;;  %830 = vmatprep.subr.bf16.mxu0 %v1191_v25  ;;  %v1431_v9 = vld [vmem:[%s1354_s22 + $0x10] sm:$0xff]  ;;  %v1258_v12 = vld [vmem:[%s1359_s26 + $0x260] ss:$8 sps:$4 sm:$0xff]   ;;  %v1266_v15 = vld [vmem:[%s1359_s26 + $0x244] ss:$8 sps:$4 sm:$0xff]  }
  0x2d   : > { %871 = vmatprep.subr.bf16.mxu1 %v1193_v26  ;;  %v1043_v11 = vcombine.high %v1431_v9, %v1431_v9  ;;  %v1263_v13 = vld [vmem:[%s1359_s26 + $0x254] ss:$8 sps:$4 sm:$0xff]   ;;  %v1261_v14 = vld [vmem:[%s1359_s26 + $0x250] ss:$8 sps:$4 sm:$0xff]   ;;  %v1264_v16 = vld [vmem:[%s1359_s26 + $0x240] ss:$8 sps:$4 sm:$0xff]  }
  0x2e   : > { %v1269_v17 = vld [vmem:[%s1359_s26 + $0x234] ss:$8 sps:$4 sm:$0xff]   ;;  %v1267_v18 = vld [vmem:[%s1359_s26 + $0x230] ss:$8 sps:$4 sm:$0xff]   ;;  %v1272_v19 = vld [vmem:[%s1359_s26 + $0x224] ss:$8 sps:$4 sm:$0xff]  }
  0x2f   : > { %831 = vmatpush1.bf16.msra.mxu0 %v1195_v27  ;;  %v1270_v20 = vld [vmem:[%s1359_s26 + $0x220] ss:$8 sps:$4 sm:$0xff]   ;;  %v1275_v21 = vld [vmem:[%s1359_s26 + $0x214] ss:$8 sps:$4 sm:$0xff]   ;;  %v1273_v22 = vld [vmem:[%s1359_s26 + $0x210] ss:$8 sps:$4 sm:$0xff]  }
  0x30   : > { %872 = vmatpush1.bf16.msra.mxu1 %v1196_v28  ;;  %832 = vmatprep.subr.bf16.mxu0 %v1197_v29  ;;  %v1278_v23 = vld [vmem:[%s1359_s26 + $0x204] ss:$8 sps:$4 sm:$0xff]   ;;  %v1276_v24 = vld [vmem:[%s1359_s26 + $0x200] ss:$8 sps:$4 sm:$0xff]   ;;  %v1281_v25 = vld [vmem:[%s1359_s26 + $0x2f4] ss:$8 sps:$4 sm:$0xff]  }
  0x31   : > { %873 = vmatprep.subr.bf16.mxu1 %v1199_v30  ;;  %v1279_v26 = vld [vmem:[%s1359_s26 + $0x2f0] ss:$8 sps:$4 sm:$0xff]   ;;  %v1284_v27 = vld [vmem:[%s1359_s26 + $0x2e4] ss:$8 sps:$4 sm:$0xff]   ;;  %v1282_v28 = vld [vmem:[%s1359_s26 + $0x2e0] ss:$8 sps:$4 sm:$0xff]  }
  0x32   : > { %v1287_v29 = vld [vmem:[%s1359_s26 + $0x2d4] ss:$8 sps:$4 sm:$0xff]   ;;  %v1285_v30 = vld [vmem:[%s1359_s26 + $0x2d0] ss:$8 sps:$4 sm:$0xff]  }
  0x33   : > { %833 = vmatpush1.bf16.msra.mxu0 %v1201_v31  ;;  %v1290_v31 = vld [vmem:[%s1359_s26 + $0x2c4] ss:$8 sps:$4 sm:$0xff]  }
  0x34   : > { %874 = vmatpush1.bf16.msra.mxu1 %v1202_v32  ;;  %834 = vmatprep.subr.bf16.mxu0 %v1203_v33  ;;  %v1288_v32 = vld [vmem:[%s1359_s26 + $0x2c0] ss:$8 sps:$4 sm:$0xff]   ;;  %v1293_v33 = vld [vmem:[%s1359_s26 + $0x2b4] ss:$8 sps:$4 sm:$0xff]  }
  0x35   : > { %875 = vmatprep.subr.bf16.mxu1 %v1205_v34  ;;  %v1291_v34 = vld [vmem:[%s1359_s26 + $0x2b0] ss:$8 sps:$4 sm:$0xff]  }
  0x37   : > { %835 = vmatpush2.bf16.msra.mxu0 %v1207_v35  ;;  %v1296_v35 = vld [vmem:[%s1359_s26 + $0x2a4] ss:$8 sps:$4 sm:$0xff]  }
  0x38   : > { %876 = vmatpush2.bf16.msra.mxu1 %v1208_v36  ;;  %836 = vmatprep.subr.bf16.mxu0 %v1209_v37  ;;  %v1294_v36 = vld [vmem:[%s1359_s26 + $0x2a0] ss:$8 sps:$4 sm:$0xff]   ;;  %v1299_v37 = vld [vmem:[%s1359_s26 + $0x294] ss:$8 sps:$4 sm:$0xff]  }
  0x39   : > { %877 = vmatprep.subr.bf16.mxu1 %v1211_v38  ;;  %v1297_v38 = vld [vmem:[%s1359_s26 + $0x290] ss:$8 sps:$4 sm:$0xff]  }
  0x3b   : > { %837 = vmatpush2.bf16.msra.mxu0 %v1213_v39  ;;  %v1302_v39 = vld [vmem:[%s1359_s26 + $0x284] ss:$8 sps:$4 sm:$0xff]  }
  0x3c   : > { %878 = vmatpush2.bf16.msra.mxu1 %v1214_v40  ;;  %838 = vmatprep.subr.bf16.mxu0 %v1215_v41  ;;  %v1300_v40 = vld [vmem:[%s1359_s26 + $0x280] ss:$8 sps:$4 sm:$0xff]   ;;  %v1042_v41 = vcombine.low %v1431_v9, %v1431_v9 }
  0x3d   : > { %879 = vmatprep.subr.bf16.mxu1 %v1217_v42 }
  0x3f   : > { %839 = vmatpush2.bf16.msra.mxu0 %v1219_v43 }
  0x40   : > { %880 = vmatpush2.bf16.msra.mxu1 %v1220_v44  ;;  %840 = vmatprep.subr.bf16.mxu0 %v1221_v45 }
  0x41   : > { %881 = vmatprep.subr.bf16.mxu1 %v1223_v46 }
  0x43   : > { %841 = vmatpush2.bf16.msra.mxu0 %v1225_v50 }
  0x44   : > { %882 = vmatpush2.bf16.msra.mxu1 %v1226_v51  ;;  %842 = vmatprep.subr.bf16.mxu0 %v1227_v53  ;;  %v216_v51 = vld [vmem:[#allocation2] sm:$0xff] }
  0x45   : > { %883 = vmatprep.subr.bf16.mxu1 %v1229_v54 }
  0x47   : > { %843 = vmatpush2.bf16.msra.mxu0 %v1231_v55  ;;  %v217_v55 = vld [vmem:[#allocation2 + $0x8] sm:$0xff] }
  0x48   : > { %884 = vmatpush2.bf16.msra.mxu1 %v1232_v56  ;;  %844 = vmatprep.subr.bf16.mxu0 %v1233_v57 }
  0x49   : > { %885 = vmatprep.subr.bf16.mxu1 %v1235_v58 }
  0x4b   : > { %845 = vmatpush2.bf16.msra.mxu0 %v1237_v59 }
  0x4c   : > { %886 = vmatpush2.bf16.msra.mxu1 %v1238_v60  ;;  %846 = vmatprep.subr.bf16.mxu0 %v1239_v61 }
  0x4d   : > { %887 = vmatprep.subr.bf16.mxu1 %v1241_v62 }
  0x4f   : > { %847 = vmatpush2.bf16.msra.mxu0 %v1243_v63 }
  0x50   : > { %888 = vmatpush2.bf16.msra.mxu1 %v1244_v0  ;;  %848 = vmatprep.subr.bf16.mxu0 %v1245_v1 }
  0x51   : > { %889 = vmatprep.subr.bf16.mxu1 %v1247_v2 }
  0x53   : > { %849 = vmatpush2.bf16.msra.mxu0 %v1249_v3 }
  0x54   : > { %890 = vmatpush2.bf16.msra.mxu1 %v1250_v4  ;;  %900 = vmatprep.subr.bf16.mxu0 %v1257_v5 }
  0x56   : > { %851 = vmatmul.mubr.bf16.vlgmr.msra.gmra.mxu0 %v1038_v6 }
  0x57   : > { %892 = vmatmul.mubr.bf16.vlgmr.msra.gmra.mxu1 %v1040_v7  ;;  %901 = vmatpush1.bf16.msra.mxu0 %v1255_v8 }
  0x58   : > { %932 = vmatprep.mubr.bf16.mxu0 %v1043_v11  ;;  %902 = vmatprep.subr.bf16.mxu0 %v1260_v10 }
  0x5b   : > { %903 = vmatpush1.bf16.msra.mxu0 %v1258_v12 }
  0x5c   : > { %904 = vmatprep.subr.bf16.mxu0 %v1263_v13 }
  0x5f   : > { %905 = vmatpush1.bf16.msra.mxu0 %v1261_v14 }
  0x60   : > { %906 = vmatprep.subr.bf16.mxu0 %v1266_v15 }
  0x63   : > { %907 = vmatpush1.bf16.msra.mxu0 %v1264_v16 }
  0x64   : > { %908 = vmatprep.subr.bf16.mxu0 %v1269_v17 }
  0x67   : > { %909 = vmatpush1.bf16.msra.mxu0 %v1267_v18 }
  0x68   : > { %910 = vmatprep.subr.bf16.mxu0 %v1272_v19 }
  0x6b   : > { %911 = vmatpush1.bf16.msra.mxu0 %v1270_v20 }
  0x6c   : > { %912 = vmatprep.subr.bf16.mxu0 %v1275_v21 }
  0x6f   : > { %913 = vmatpush1.bf16.msra.mxu0 %v1273_v22 }
  0x70   : > { %914 = vmatprep.subr.bf16.mxu0 %v1278_v23 }
  0x73   : > { %915 = vmatpush1.bf16.msra.mxu0 %v1276_v24 }
  0x74   : > { %916 = vmatprep.subr.bf16.mxu0 %v1281_v25 }
  0x77   : > { %917 = vmatpush2.bf16.msra.mxu0 %v1279_v26 }
  0x78   : > { %918 = vmatprep.subr.bf16.mxu0 %v1284_v27 }
  0x7b   : > { %919 = vmatpush2.bf16.msra.mxu0 %v1282_v28 }
  0x7c   : > { %920 = vmatprep.subr.bf16.mxu0 %v1287_v29 }
  0x7f   : > { %921 = vmatpush2.bf16.msra.mxu0 %v1285_v30 }
  0x80   : > { %922 = vmatprep.subr.bf16.mxu0 %v1290_v31 }
  0x83   : > { %923 = vmatpush2.bf16.msra.mxu0 %v1288_v32 }
  0x84   : > { %924 = vmatprep.subr.bf16.mxu0 %v1293_v33 }
  0x87   : > { %925 = vmatpush2.bf16.msra.mxu0 %v1291_v34 }
  0x88   : > { %926 = vmatprep.subr.bf16.mxu0 %v1296_v35 }
  0x8b   : > { %927 = vmatpush2.bf16.msra.mxu0 %v1294_v36 }
  0x8c   : > { %928 = vmatprep.subr.bf16.mxu0 %v1299_v37 }
  0x8f   : > { %929 = vmatpush2.bf16.msra.mxu0 %v1297_v38 }
  0x90   : > { %930 = vmatprep.subr.bf16.mxu0 %v1302_v39 }
  0x93   : > { %931 = vmatpush2.bf16.msra.mxu0 %v1300_v40 }
  0x96   : > { %933 = vmatmul.mubr.bf16.vlgmr.msra.gmra.mxu0 %v1042_v41 }
 0x116   : > { %v852_v42 = vpop.f32.mrf.mxu0 }
 0x117   : > { %v893_v43 = vpop.f32.mrf.mxu1 }
 0x118   : > { %v854_v44 = vpop.f32.mrf.mxu0  ;;  %v894_v50 = vadd.f32 %v893_v43, %v852_v42 }
 0x119   : > { %v895_v45 = vpop.f32.mrf.mxu1 }
 0x11a   : > { %v856_v46 = vpop.f32.mrf.mxu0  ;;  %v896_v53 = vadd.f32 %v895_v45, %v854_v44 }
 0x11b   : > { %v897_v47 = vpop.f32.mrf.mxu1 }
 0x11c   : > { %v857_v48 = vpop.f32.mrf.mxu0 }
 0x11d   : > { %v898_v49 = vpop.f32.mrf.mxu1 }
 0x156   : > { %v934_v52 = vpop.f32.mrf.mxu0 }
 0x157   : > { %v935_v54 = vadd.f32 %v934_v52, %v894_v50 }
 0x158   : > { %v936_v56 = vpop.f32.mrf.mxu0 }
 0x159   : > { %v941_v57 = vadd.f32 %v935_v54, %v216_v51  ;;  %v937_v58 = vadd.f32 %v936_v56, %v896_v53  ;;  %948 = sbr.rel (%p1140_p6) target bundleno = 367 (0x16f), region = 44 }
 0x15a   : > { %v938_v59 = vpop.f32.mrf.mxu0 }
 0x15b   : > { %943 = vst [vmem:[#allocation2] sm:$0xff] %v941_v57  ;;  %v942_v60 = vadd.f32 %v937_v58, %v217_v55 }
 0x15c   : > { %v939_v61 = vpop.f32.mrf.mxu0 }
 0x15d   : > { %944 = vst [vmem:[#allocation2 + $0x8] sm:$0xff] %v942_v60 }
 0x15e   : > { %v953_v62 = vlaneseq  ;;  %v951_v0 = vld [vmem:[%s1482_s2] sm:$0x3] }
 0x15f   : > { %v965_v1 = vld [vmem:[%s1483_s3] sm:$0x3] }
 0x160   : > { %v954_v63 = vshrl.u32 %v953_v62, 7 }
 0x162   : > { %v955_v2 = vsub.s32 0, %v954_v63  ;;  %v959_v3 = vsub.s32 1, %v954_v63  ;;  %v949_v4 = vld [vmem:[#allocation2] sm:$0xff] }
 0x164   : > { %v950_v5 = vld [vmem:[#allocation2 + $0x8] sm:$0xff]  ;;  %v956_v6 = vrot.slane %v951_v0, %v955_v2  ;;  %v960_v7 = vrot.slane %v951_v0, %v959_v3  ;;  %v970_v8 = vrot.slane %v965_v1, %v955_v2  ;;  %v974_v9 = vrot.slane %v965_v1, %v959_v3 }
 0x166   : > { %v963_v10 = vmul.f32 %v956_v6, %v949_v4  ;;  %v964_v11 = vmul.f32 %v960_v7, %v950_v5 }
 0x168   : > { %v977_v12 = vadd.f32 %v970_v8, %v963_v10  ;;  %v978_v13 = vadd.f32 %v974_v9, %v964_v11 }
 0x16a   : > { %v979_v14 = vmax.f32 %v977_v12, 0.0  ;;  %v980_v15 = vmax.f32 %v978_v13, 0.0 }
 0x16c   : > { %v1145_v16 = vpack.c.bf16 %v980_v15, %v979_v14 }
 0x16e   : > { %989 = vst [vmem:[%s1484_s4] sm:$0xff] %v1145_v16 }
 0x16f PF: > { %s14_s15 = sadd.s32 1, %s1311_s15  }
 0x170   : > { %p11_p7 = scmp.ge.s32.totalorder %s14_s15, 5  }
 0x172   :  { %13 = sbr.rel (!%p11_p7) target bundleno = 1 (0x1), region = 73 }

// kernel: resnet18_sigmoid_forward.33
= control target key start
LH: loop header
LB: loop body
LE: loop exit
PB: predicated region body
PF: predicated region fallthrough
CT: control target
= control target key end

     0   :  { %s1376_s18 = smov 0   ;;  %s1520_s0 = inlined_call_operand.vmem [shape: bf16[8,2304], index: 0, kind: input, shape index: {}]   ;;  %s1521_s1 = inlined_call_operand.vmem [shape: bf16[2304,256], index: 1, kind: input, shape index: {}]   ;;  %s1522_s2 = inlined_call_operand.vmem [shape: f32[1,256], index: 2, kind: input, shape index: {}]   ;;  %s1523_s3 = inlined_call_operand.vmem [shape: f32[1,256], index: 3, kind: input, shape index: {}]   ;;  %s1524_s4 = inlined_call_operand.vmem [shape: bf16[8,256], index: 4, kind: input, shape index: {}]   ;;  %s1525_s5 = inlined_call_operand.vmem [shape: bf16[8,256], index: 5, kind: output, shape index: {}]  }
   0x1 LB: > { %s1382_s19 = sadd.s32 4294967295, %s1343_s18   ;;  %p1065_p0 = scmp.ge.s32.totalorder %s1343_s18, 1  ;;  %s1343_s18 = sphi %s1376_s18, %s15_s18  }
   0x2   : > { %p195_p1 = scmp.lt.s32.totalorder %s1343_s18, 4 }
   0x4   : > { %p196_p2 = pnand %p1065_p0, %p195_p1 }
   0x5   : > { %s224_s20 = smul.u32 (!%p196_p2), 6, %s1382_s19  ;;  %p1069_p5 = scmp.ne.s32.totalorder (!%p196_p2), %s1382_s19, 0 }
   0x6   : > { %199 = sbr.rel (%p196_p2) target bundleno = 369 (0x171), region = 40 }
   0x7   : > { %s230_s21 = smul.u32 (!%p196_p2), 96, %s1382_s19  ;;  %p225_p3 = scmp.lt.s32.totalorder (!%p196_p2), %s224_s20, 17 }
   0x9   : > { %p231_p4 = scmp.lt.s32.totalorder (!%p196_p2), %s230_s21, 287 }
   0xb   : > { %s1527_s20 = smov (!%p225_p3, %s224_s20), 17  ;;  %s1529_s21 = smov (!%p231_p4, %s230_s21), 287 }
   0xc   : > { %s1066_s22 = sshll.u32 %s1527_s20, 2  ;;  %s1176_s26 = sshll.u32 %s1529_s21, 3 }
   0xd   : > { %s1391_s25 = scalar_lea.vmem %s1520_s0, %s1066_s22  ;;  %s1396_s29 = scalar_lea.vmem %s1521_s1, %s1176_s26 }
   0xe   : > { %240 = sbr.rel (%p1069_p5) target bundleno = 21 (0x15), region = 44 }
  0x13   : > { %v1345_v0 = vmov 0.0  }
  0x14   : > { %241 = vst [vmem:[#allocation2] sm:$0xff] %v1345_v0  ;;  %242 = vst [vmem:[#allocation2 + $0x8] sm:$0xff] %v1345_v0 }
  0x15 PF: > { %v1187_v1 = vld [vmem:[%s1396_s29 + $0x74] ss:$8 sps:$4 sm:$0xff]   ;;  %v1191_v3 = vld [vmem:[%s1396_s29 + $0x70] ss:$8 sps:$4 sm:$0xff]   ;;  %v1193_v5 = vld [vmem:[%s1396_s29 + $0x64] ss:$8 sps:$4 sm:$0xff]  }
  0x16   : > { %v1189_v2 = vld [vmem:[%s1396_s29 + $0x174] ss:$8 sps:$4 sm:$0xff]   ;;  %845 = vmatprep.subr.bf16.mxu0 %v1187_v1  ;;  %v1192_v4 = vld [vmem:[%s1396_s29 + $0x170] ss:$8 sps:$4 sm:$0xff]   ;;  %v1195_v6 = vld [vmem:[%s1396_s29 + $0x164] ss:$8 sps:$4 sm:$0xff]  }
  0x17   : > { %886 = vmatprep.subr.bf16.mxu1 %v1189_v2  ;;  %846 = vmatpush1.bf16.msra.mxu0 %v1191_v3  ;;  %v1197_v7 = vld [vmem:[%s1396_s29 + $0x60] ss:$8 sps:$4 sm:$0xff]   ;;  %v1199_v9 = vld [vmem:[%s1396_s29 + $0x54] ss:$8 sps:$4 sm:$0xff]   ;;  %v1203_v11 = vld [vmem:[%s1396_s29 + $0x50] ss:$8 sps:$4 sm:$0xff]  }
  0x18   : > { %887 = vmatpush1.bf16.msra.mxu1 %v1192_v4  ;;  %847 = vmatprep.subr.bf16.mxu0 %v1193_v5  ;;  %v1198_v8 = vld [vmem:[%s1396_s29 + $0x160] ss:$8 sps:$4 sm:$0xff]   ;;  %v1201_v10 = vld [vmem:[%s1396_s29 + $0x154] ss:$8 sps:$4 sm:$0xff]   ;;  %v1204_v12 = vld [vmem:[%s1396_s29 + $0x150] ss:$8 sps:$4 sm:$0xff]  }
  0x19   : > { %888 = vmatprep.subr.bf16.mxu1 %v1195_v6  ;;  %v1205_v13 = vld [vmem:[%s1396_s29 + $0x44] ss:$8 sps:$4 sm:$0xff]   ;;  %v1209_v15 = vld [vmem:[%s1396_s29 + $0x40] ss:$8 sps:$4 sm:$0xff]   ;;  %v1211_v17 = vld [vmem:[%s1396_s29 + $0x34] ss:$8 sps:$4 sm:$0xff]  }
  0x1a   : > { %v1207_v14 = vld [vmem:[%s1396_s29 + $0x144] ss:$8 sps:$4 sm:$0xff]   ;;  %v1210_v16 = vld [vmem:[%s1396_s29 + $0x140] ss:$8 sps:$4 sm:$0xff]   ;;  %v1213_v18 = vld [vmem:[%s1396_s29 + $0x134] ss:$8 sps:$4 sm:$0xff]  }
  0x1b   : > { %848 = vmatpush1.bf16.msra.mxu0 %v1197_v7  ;;  %v1215_v19 = vld [vmem:[%s1396_s29 + $0x30] ss:$8 sps:$4 sm:$0xff]   ;;  %v1217_v21 = vld [vmem:[%s1396_s29 + $0x24] ss:$8 sps:$4 sm:$0xff]   ;;  %v1221_v23 = vld [vmem:[%s1396_s29 + $0x20] ss:$8 sps:$4 sm:$0xff]  }
  0x1c   : > { %889 = vmatpush1.bf16.msra.mxu1 %v1198_v8  ;;  %849 = vmatprep.subr.bf16.mxu0 %v1199_v9  ;;  %v1216_v20 = vld [vmem:[%s1396_s29 + $0x130] ss:$8 sps:$4 sm:$0xff]   ;;  %v1219_v22 = vld [vmem:[%s1396_s29 + $0x124] ss:$8 sps:$4 sm:$0xff]   ;;  %v1222_v24 = vld [vmem:[%s1396_s29 + $0x120] ss:$8 sps:$4 sm:$0xff]  }
  0x1d   : > { %890 = vmatprep.subr.bf16.mxu1 %v1201_v10  ;;  %v1223_v25 = vld [vmem:[%s1396_s29 + $0x14] ss:$8 sps:$4 sm:$0xff]   ;;  %v1227_v27 = vld [vmem:[%s1396_s29 + $0x10] ss:$8 sps:$4 sm:$0xff]   ;;  %v1229_v29 = vld [vmem:[%s1396_s29 + $0x4] ss:$8 sps:$4 sm:$0xff]  }
  0x1e   : > { %v1225_v26 = vld [vmem:[%s1396_s29 + $0x114] ss:$8 sps:$4 sm:$0xff]   ;;  %v1228_v28 = vld [vmem:[%s1396_s29 + $0x110] ss:$8 sps:$4 sm:$0xff]   ;;  %v1231_v30 = vld [vmem:[%s1396_s29 + $0x104] ss:$8 sps:$4 sm:$0xff]  }
  0x1f   : > { %850 = vmatpush1.bf16.msra.mxu0 %v1203_v11  ;;  %v1233_v31 = vld [vmem:[%s1396_s29] ss:$8 sps:$4 sm:$0xff]   ;;  %v1235_v33 = vld [vmem:[%s1396_s29 + $0xf4] ss:$8 sps:$4 sm:$0xff]   ;;  %v1239_v35 = vld [vmem:[%s1396_s29 + $0xf0] ss:$8 sps:$4 sm:$0xff]  }
  0x20   : > { %891 = vmatpush1.bf16.msra.mxu1 %v1204_v12  ;;  %851 = vmatprep.subr.bf16.mxu0 %v1205_v13  ;;  %v1234_v32 = vld [vmem:[%s1396_s29 + $0x100] ss:$8 sps:$4 sm:$0xff]   ;;  %v1237_v34 = vld [vmem:[%s1396_s29 + $0x1f4] ss:$8 sps:$4 sm:$0xff]   ;;  %v1240_v36 = vld [vmem:[%s1396_s29 + $0x1f0] ss:$8 sps:$4 sm:$0xff]  }
  0x21   : > { %892 = vmatprep.subr.bf16.mxu1 %v1207_v14  ;;  %v1241_v37 = vld [vmem:[%s1396_s29 + $0xe4] ss:$8 sps:$4 sm:$0xff]   ;;  %v1245_v39 = vld [vmem:[%s1396_s29 + $0xe0] ss:$8 sps:$4 sm:$0xff]   ;;  %v1247_v41 = vld [vmem:[%s1396_s29 + $0xd4] ss:$8 sps:$4 sm:$0xff]  }
  0x22   : > { %v1243_v38 = vld [vmem:[%s1396_s29 + $0x1e4] ss:$8 sps:$4 sm:$0xff]   ;;  %v1246_v40 = vld [vmem:[%s1396_s29 + $0x1e0] ss:$8 sps:$4 sm:$0xff]   ;;  %v1249_v42 = vld [vmem:[%s1396_s29 + $0x1d4] ss:$8 sps:$4 sm:$0xff]  }
  0x23   : > { %852 = vmatpush1.bf16.msra.mxu0 %v1209_v15  ;;  %v1251_v43 = vld [vmem:[%s1396_s29 + $0xd0] ss:$8 sps:$4 sm:$0xff]   ;;  %v1253_v45 = vld [vmem:[%s1396_s29 + $0xc4] ss:$8 sps:$4 sm:$0xff]   ;;  %v1257_v50 = vld [vmem:[%s1396_s29 + $0xc0] ss:$8 sps:$4 sm:$0xff]  }
  0x24   : > { %893 = vmatpush1.bf16.msra.mxu1 %v1210_v16  ;;  %853 = vmatprep.subr.bf16.mxu0 %v1211_v17  ;;  %v1252_v44 = vld [vmem:[%s1396_s29 + $0x1d0] ss:$8 sps:$4 sm:$0xff]   ;;  %v1255_v46 = vld [vmem:[%s1396_s29 + $0x1c4] ss:$8 sps:$4 sm:$0xff]   ;;  %v1258_v51 = vld [vmem:[%s1396_s29 + $0x1c0] ss:$8 sps:$4 sm:$0xff]  }
  0x25   : > { %894 = vmatprep.subr.bf16.mxu1 %v1213_v18  ;;  %v245_v47 = vld [vmem:[%s1391_s25] sm:$0xff]  ;;  %v246_v49 = vld [vmem:[%s1391_s25 + $0x8] sm:$0xff]  ;;  %v1259_v53 = vld [vmem:[%s1396_s29 + $0xb4] ss:$8 sps:$4 sm:$0xff]   ;;  %p1172_p6 = scmp.ne.s32.totalorder %s1382_s19, 2 }
  0x26   : > { %v1071_v48 = vcombine.high %v245_v47, %v245_v47  ;;  %v1073_v52 = vcombine.high %v246_v49, %v246_v49  ;;  %v1261_v54 = vld [vmem:[%s1396_s29 + $0x1b4] ss:$8 sps:$4 sm:$0xff]   ;;  %v1263_v55 = vld [vmem:[%s1396_s29 + $0xb0] ss:$8 sps:$4 sm:$0xff]   ;;  %v1265_v57 = vld [vmem:[%s1396_s29 + $0xa4] ss:$8 sps:$4 sm:$0xff]   ;;  %v1070_v6 = vcombine.low %v245_v47, %v245_v47  ;;  %v1072_v7 = vcombine.low %v246_v49, %v246_v49 }
  0x27   : > { %854 = vmatpush1.bf16.msra.mxu0 %v1215_v19  ;;  %v1264_v56 = vld [vmem:[%s1396_s29 + $0x1b0] ss:$8 sps:$4 sm:$0xff]   ;;  %v1267_v58 = vld [vmem:[%s1396_s29 + $0x1a4] ss:$8 sps:$4 sm:$0xff]   ;;  %v1269_v59 = vld [vmem:[%s1396_s29 + $0xa0] ss:$8 sps:$4 sm:$0xff]  }
  0x28   : > { %895 = vmatpush1.bf16.msra.mxu1 %v1216_v20  ;;  %855 = vmatprep.subr.bf16.mxu0 %v1217_v21  ;;  %v1270_v60 = vld [vmem:[%s1396_s29 + $0x1a0] ss:$8 sps:$4 sm:$0xff]   ;;  %v1271_v61 = vld [vmem:[%s1396_s29 + $0x94] ss:$8 sps:$4 sm:$0xff]   ;;  %v1275_v63 = vld [vmem:[%s1396_s29 + $0x90] ss:$8 sps:$4 sm:$0xff]  }
  0x29   : > { %896 = vmatprep.subr.bf16.mxu1 %v1219_v22  ;;  %877 = vmatprep.mubr.bf16.mxu0 %v1071_v48  ;;  %v1273_v62 = vld [vmem:[%s1396_s29 + $0x194] ss:$8 sps:$4 sm:$0xff]   ;;  %v1276_v0 = vld [vmem:[%s1396_s29 + $0x190] ss:$8 sps:$4 sm:$0xff]   ;;  %v1277_v1 = vld [vmem:[%s1396_s29 + $0x84] ss:$8 sps:$4 sm:$0xff]  }
  0x2a   : > { %918 = vmatprep.mubr.bf16.mxu1 %v1073_v52  ;;  %v1279_v2 = vld [vmem:[%s1396_s29 + $0x184] ss:$8 sps:$4 sm:$0xff]   ;;  %v1281_v3 = vld [vmem:[%s1396_s29 + $0x80] ss:$8 sps:$4 sm:$0xff]   ;;  %v1289_v5 = vld [vmem:[%s1396_s29 + $0x274] ss:$8 sps:$4 sm:$0xff]  }
  0x2b   : > { %856 = vmatpush1.bf16.msra.mxu0 %v1221_v23  ;;  %v1282_v4 = vld [vmem:[%s1396_s29 + $0x180] ss:$8 sps:$4 sm:$0xff]   ;;  %v1287_v8 = vld [vmem:[%s1396_s29 + $0x270] ss:$8 sps:$4 sm:$0xff]   ;;  %v1292_v10 = vld [vmem:[%s1396_s29 + $0x264] ss:$8 sps:$4 sm:$0xff]  }
  0x2c   : > { %897 = vmatpush1.bf16.msra.mxu1 %v1222_v24  ;;  %857 = vmatprep.subr.bf16.mxu0 %v1223_v25  ;;  %v1468_v9 = vld [vmem:[%s1391_s25 + $0x10] sm:$0xff]  ;;  %v1290_v12 = vld [vmem:[%s1396_s29 + $0x260] ss:$8 sps:$4 sm:$0xff]   ;;  %v1298_v15 = vld [vmem:[%s1396_s29 + $0x244] ss:$8 sps:$4 sm:$0xff]  }
  0x2d   : > { %898 = vmatprep.subr.bf16.mxu1 %v1225_v26  ;;  %v1075_v11 = vcombine.high %v1468_v9, %v1468_v9  ;;  %v1295_v13 = vld [vmem:[%s1396_s29 + $0x254] ss:$8 sps:$4 sm:$0xff]   ;;  %v1293_v14 = vld [vmem:[%s1396_s29 + $0x250] ss:$8 sps:$4 sm:$0xff]   ;;  %v1296_v16 = vld [vmem:[%s1396_s29 + $0x240] ss:$8 sps:$4 sm:$0xff]  }
  0x2e   : > { %v1301_v17 = vld [vmem:[%s1396_s29 + $0x234] ss:$8 sps:$4 sm:$0xff]   ;;  %v1299_v18 = vld [vmem:[%s1396_s29 + $0x230] ss:$8 sps:$4 sm:$0xff]   ;;  %v1304_v19 = vld [vmem:[%s1396_s29 + $0x224] ss:$8 sps:$4 sm:$0xff]  }
  0x2f   : > { %858 = vmatpush1.bf16.msra.mxu0 %v1227_v27  ;;  %v1302_v20 = vld [vmem:[%s1396_s29 + $0x220] ss:$8 sps:$4 sm:$0xff]   ;;  %v1307_v21 = vld [vmem:[%s1396_s29 + $0x214] ss:$8 sps:$4 sm:$0xff]   ;;  %v1305_v22 = vld [vmem:[%s1396_s29 + $0x210] ss:$8 sps:$4 sm:$0xff]  }
  0x30   : > { %899 = vmatpush1.bf16.msra.mxu1 %v1228_v28  ;;  %859 = vmatprep.subr.bf16.mxu0 %v1229_v29  ;;  %v1310_v23 = vld [vmem:[%s1396_s29 + $0x204] ss:$8 sps:$4 sm:$0xff]   ;;  %v1308_v24 = vld [vmem:[%s1396_s29 + $0x200] ss:$8 sps:$4 sm:$0xff]   ;;  %v1313_v25 = vld [vmem:[%s1396_s29 + $0x2f4] ss:$8 sps:$4 sm:$0xff]  }
  0x31   : > { %900 = vmatprep.subr.bf16.mxu1 %v1231_v30  ;;  %v1311_v26 = vld [vmem:[%s1396_s29 + $0x2f0] ss:$8 sps:$4 sm:$0xff]   ;;  %v1316_v27 = vld [vmem:[%s1396_s29 + $0x2e4] ss:$8 sps:$4 sm:$0xff]   ;;  %v1314_v28 = vld [vmem:[%s1396_s29 + $0x2e0] ss:$8 sps:$4 sm:$0xff]  }
  0x32   : > { %v1319_v29 = vld [vmem:[%s1396_s29 + $0x2d4] ss:$8 sps:$4 sm:$0xff]   ;;  %v1317_v30 = vld [vmem:[%s1396_s29 + $0x2d0] ss:$8 sps:$4 sm:$0xff]  }
  0x33   : > { %860 = vmatpush1.bf16.msra.mxu0 %v1233_v31  ;;  %v1322_v31 = vld [vmem:[%s1396_s29 + $0x2c4] ss:$8 sps:$4 sm:$0xff]  }
  0x34   : > { %901 = vmatpush1.bf16.msra.mxu1 %v1234_v32  ;;  %861 = vmatprep.subr.bf16.mxu0 %v1235_v33  ;;  %v1320_v32 = vld [vmem:[%s1396_s29 + $0x2c0] ss:$8 sps:$4 sm:$0xff]   ;;  %v1325_v33 = vld [vmem:[%s1396_s29 + $0x2b4] ss:$8 sps:$4 sm:$0xff]  }
  0x35   : > { %902 = vmatprep.subr.bf16.mxu1 %v1237_v34  ;;  %v1323_v34 = vld [vmem:[%s1396_s29 + $0x2b0] ss:$8 sps:$4 sm:$0xff]  }
  0x37   : > { %862 = vmatpush2.bf16.msra.mxu0 %v1239_v35  ;;  %v1328_v35 = vld [vmem:[%s1396_s29 + $0x2a4] ss:$8 sps:$4 sm:$0xff]  }
  0x38   : > { %903 = vmatpush2.bf16.msra.mxu1 %v1240_v36  ;;  %863 = vmatprep.subr.bf16.mxu0 %v1241_v37  ;;  %v1326_v36 = vld [vmem:[%s1396_s29 + $0x2a0] ss:$8 sps:$4 sm:$0xff]   ;;  %v1331_v37 = vld [vmem:[%s1396_s29 + $0x294] ss:$8 sps:$4 sm:$0xff]  }
  0x39   : > { %904 = vmatprep.subr.bf16.mxu1 %v1243_v38  ;;  %v1329_v38 = vld [vmem:[%s1396_s29 + $0x290] ss:$8 sps:$4 sm:$0xff]  }
  0x3b   : > { %864 = vmatpush2.bf16.msra.mxu0 %v1245_v39  ;;  %v1334_v39 = vld [vmem:[%s1396_s29 + $0x284] ss:$8 sps:$4 sm:$0xff]  }
  0x3c   : > { %905 = vmatpush2.bf16.msra.mxu1 %v1246_v40  ;;  %865 = vmatprep.subr.bf16.mxu0 %v1247_v41  ;;  %v1332_v40 = vld [vmem:[%s1396_s29 + $0x280] ss:$8 sps:$4 sm:$0xff]   ;;  %v1074_v41 = vcombine.low %v1468_v9, %v1468_v9 }
  0x3d   : > { %906 = vmatprep.subr.bf16.mxu1 %v1249_v42 }
  0x3f   : > { %866 = vmatpush2.bf16.msra.mxu0 %v1251_v43 }
  0x40   : > { %907 = vmatpush2.bf16.msra.mxu1 %v1252_v44  ;;  %867 = vmatprep.subr.bf16.mxu0 %v1253_v45 }
  0x41   : > { %908 = vmatprep.subr.bf16.mxu1 %v1255_v46 }
  0x43   : > { %868 = vmatpush2.bf16.msra.mxu0 %v1257_v50 }
  0x44   : > { %909 = vmatpush2.bf16.msra.mxu1 %v1258_v51  ;;  %869 = vmatprep.subr.bf16.mxu0 %v1259_v53  ;;  %v243_v51 = vld [vmem:[#allocation2] sm:$0xff] }
  0x45   : > { %910 = vmatprep.subr.bf16.mxu1 %v1261_v54 }
  0x47   : > { %870 = vmatpush2.bf16.msra.mxu0 %v1263_v55  ;;  %v244_v55 = vld [vmem:[#allocation2 + $0x8] sm:$0xff] }
  0x48   : > { %911 = vmatpush2.bf16.msra.mxu1 %v1264_v56  ;;  %871 = vmatprep.subr.bf16.mxu0 %v1265_v57 }
  0x49   : > { %912 = vmatprep.subr.bf16.mxu1 %v1267_v58 }
  0x4b   : > { %872 = vmatpush2.bf16.msra.mxu0 %v1269_v59 }
  0x4c   : > { %913 = vmatpush2.bf16.msra.mxu1 %v1270_v60  ;;  %873 = vmatprep.subr.bf16.mxu0 %v1271_v61 }
  0x4d   : > { %914 = vmatprep.subr.bf16.mxu1 %v1273_v62 }
  0x4f   : > { %874 = vmatpush2.bf16.msra.mxu0 %v1275_v63 }
  0x50   : > { %915 = vmatpush2.bf16.msra.mxu1 %v1276_v0  ;;  %875 = vmatprep.subr.bf16.mxu0 %v1277_v1 }
  0x51   : > { %916 = vmatprep.subr.bf16.mxu1 %v1279_v2 }
  0x53   : > { %876 = vmatpush2.bf16.msra.mxu0 %v1281_v3 }
  0x54   : > { %917 = vmatpush2.bf16.msra.mxu1 %v1282_v4  ;;  %927 = vmatprep.subr.bf16.mxu0 %v1289_v5 }
  0x56   : > { %878 = vmatmul.mubr.bf16.vlgmr.msra.gmra.mxu0 %v1070_v6 }
  0x57   : > { %919 = vmatmul.mubr.bf16.vlgmr.msra.gmra.mxu1 %v1072_v7  ;;  %928 = vmatpush1.bf16.msra.mxu0 %v1287_v8 }
  0x58   : > { %959 = vmatprep.mubr.bf16.mxu0 %v1075_v11  ;;  %929 = vmatprep.subr.bf16.mxu0 %v1292_v10 }
  0x5b   : > { %930 = vmatpush1.bf16.msra.mxu0 %v1290_v12 }
  0x5c   : > { %931 = vmatprep.subr.bf16.mxu0 %v1295_v13 }
  0x5f   : > { %932 = vmatpush1.bf16.msra.mxu0 %v1293_v14 }
  0x60   : > { %933 = vmatprep.subr.bf16.mxu0 %v1298_v15 }
  0x63   : > { %934 = vmatpush1.bf16.msra.mxu0 %v1296_v16 }
  0x64   : > { %935 = vmatprep.subr.bf16.mxu0 %v1301_v17 }
  0x67   : > { %936 = vmatpush1.bf16.msra.mxu0 %v1299_v18 }
  0x68   : > { %937 = vmatprep.subr.bf16.mxu0 %v1304_v19 }
  0x6b   : > { %938 = vmatpush1.bf16.msra.mxu0 %v1302_v20 }
  0x6c   : > { %939 = vmatprep.subr.bf16.mxu0 %v1307_v21 }
  0x6f   : > { %940 = vmatpush1.bf16.msra.mxu0 %v1305_v22 }
  0x70   : > { %941 = vmatprep.subr.bf16.mxu0 %v1310_v23 }
  0x73   : > { %942 = vmatpush1.bf16.msra.mxu0 %v1308_v24 }
  0x74   : > { %943 = vmatprep.subr.bf16.mxu0 %v1313_v25 }
  0x77   : > { %944 = vmatpush2.bf16.msra.mxu0 %v1311_v26 }
  0x78   : > { %945 = vmatprep.subr.bf16.mxu0 %v1316_v27 }
  0x7b   : > { %946 = vmatpush2.bf16.msra.mxu0 %v1314_v28 }
  0x7c   : > { %947 = vmatprep.subr.bf16.mxu0 %v1319_v29 }
  0x7f   : > { %948 = vmatpush2.bf16.msra.mxu0 %v1317_v30 }
  0x80   : > { %949 = vmatprep.subr.bf16.mxu0 %v1322_v31 }
  0x83   : > { %950 = vmatpush2.bf16.msra.mxu0 %v1320_v32 }
  0x84   : > { %951 = vmatprep.subr.bf16.mxu0 %v1325_v33 }
  0x87   : > { %952 = vmatpush2.bf16.msra.mxu0 %v1323_v34 }
  0x88   : > { %953 = vmatprep.subr.bf16.mxu0 %v1328_v35 }
  0x8b   : > { %954 = vmatpush2.bf16.msra.mxu0 %v1326_v36 }
  0x8c   : > { %955 = vmatprep.subr.bf16.mxu0 %v1331_v37 }
  0x8f   : > { %956 = vmatpush2.bf16.msra.mxu0 %v1329_v38 }
  0x90   : > { %957 = vmatprep.subr.bf16.mxu0 %v1334_v39 }
  0x93   : > { %958 = vmatpush2.bf16.msra.mxu0 %v1332_v40 }
  0x96   : > { %960 = vmatmul.mubr.bf16.vlgmr.msra.gmra.mxu0 %v1074_v41 }
 0x116   : > { %v879_v42 = vpop.f32.mrf.mxu0 }
 0x117   : > { %v920_v43 = vpop.f32.mrf.mxu1 }
 0x118   : > { %v881_v44 = vpop.f32.mrf.mxu0  ;;  %v921_v50 = vadd.f32 %v920_v43, %v879_v42 }
 0x119   : > { %v922_v45 = vpop.f32.mrf.mxu1 }
 0x11a   : > { %v883_v46 = vpop.f32.mrf.mxu0  ;;  %v923_v53 = vadd.f32 %v922_v45, %v881_v44 }
 0x11b   : > { %v924_v47 = vpop.f32.mrf.mxu1 }
 0x11c   : > { %v884_v48 = vpop.f32.mrf.mxu0 }
 0x11d   : > { %v925_v49 = vpop.f32.mrf.mxu1 }
 0x156   : > { %v961_v52 = vpop.f32.mrf.mxu0 }
 0x157   : > { %v962_v54 = vadd.f32 %v961_v52, %v921_v50 }
 0x158   : > { %v963_v56 = vpop.f32.mrf.mxu0 }
 0x159   : > { %v968_v57 = vadd.f32 %v962_v54, %v243_v51  ;;  %v964_v58 = vadd.f32 %v963_v56, %v923_v53  ;;  %975 = sbr.rel (%p1172_p6) target bundleno = 369 (0x171), region = 48 }
 0x15a   : > { %v965_v59 = vpop.f32.mrf.mxu0 }
 0x15b   : > { %970 = vst [vmem:[#allocation2] sm:$0xff] %v968_v57  ;;  %v969_v60 = vadd.f32 %v964_v58, %v244_v55 }
 0x15c   : > { %v966_v61 = vpop.f32.mrf.mxu0 }
 0x15d   : > { %971 = vst [vmem:[#allocation2 + $0x8] sm:$0xff] %v969_v60 }
 0x15e   : > { %v980_v62 = vlaneseq  ;;  %v978_v0 = vld [vmem:[%s1522_s2] sm:$0x3] }
 0x15f   : > { %v992_v1 = vld [vmem:[%s1523_s3] sm:$0x3] }
 0x160   : > { %v981_v63 = vshrl.u32 %v980_v62, 7  ;;  %v1006_v6 = vld [vmem:[%s1524_s4] sm:$0xff] }
 0x161   : > { %v1007_v13 = vunpack.c.l.bf16 %v1006_v6  ;;  %v1008_v14 = vunpack.c.h.bf16 %v1006_v6 }
 0x162   : > { %v982_v2 = vsub.s32 0, %v981_v63  ;;  %v986_v3 = vsub.s32 1, %v981_v63  ;;  %v976_v4 = vld [vmem:[#allocation2] sm:$0xff] }
 0x164   : > { %v977_v5 = vld [vmem:[#allocation2 + $0x8] sm:$0xff]  ;;  %v983_v7 = vrot.slane %v978_v0, %v982_v2  ;;  %v987_v8 = vrot.slane %v978_v0, %v986_v3  ;;  %v997_v9 = vrot.slane %v992_v1, %v982_v2  ;;  %v1001_v10 = vrot.slane %v992_v1, %v986_v3 }
 0x166   : > { %v990_v11 = vmul.f32 %v983_v7, %v976_v4  ;;  %v991_v12 = vmul.f32 %v987_v8, %v977_v5 }
 0x168   : > { %v1004_v15 = vadd.f32 %v997_v9, %v990_v11  ;;  %v1005_v16 = vadd.f32 %v1001_v10, %v991_v12 }
 0x16a   : > { %v1009_v17 = vadd.f32 %v1007_v13, %v1004_v15  ;;  %v1010_v18 = vadd.f32 %v1008_v14, %v1005_v16 }
 0x16c   : > { %v1011_v19 = vmax.f32 %v1009_v17, 0.0  ;;  %v1012_v20 = vmax.f32 %v1010_v18, 0.0 }
 0x16e   : > { %v1177_v21 = vpack.c.bf16 %v1012_v20, %v1011_v19 }
 0x170   : > { %1021 = vst [vmem:[%s1525_s5] sm:$0xff] %v1177_v21 }
 0x171 PF: > { %s15_s18 = sadd.s32 1, %s1343_s18  }
 0x172   : > { %p12_p7 = scmp.ge.s32.totalorder %s15_s18, 5  }
 0x174   :  { %14 = sbr.rel (!%p12_p7) target bundleno = 1 (0x1), region = 77 }

// kernel: resnet18_sigmoid_forward.36
= control target key start
LH: loop header
LB: loop body
LE: loop exit
PB: predicated region body
PF: predicated region fallthrough
CT: control target
= control target key end

     0   :  { %s992_s1 = inlined_call_operand.vmem [shape: bf16[256,512], index: 1, kind: input, shape index: {}]   ;;  %s993_s0 = inlined_call_operand.vmem [shape: bf16[8,256], index: 0, kind: input, shape index: {}]   ;;  %s994_s2 = inlined_call_operand.vmem [shape: f32[1,512], index: 2, kind: input, shape index: {}]   ;;  %s995_s3 = inlined_call_operand.vmem [shape: f32[1,512], index: 3, kind: input, shape index: {}]   ;;  %s996_s4 = inlined_call_operand.vmem [shape: bf16[8,512], index: 4, kind: output, shape index: {}]  }
   0x1   :  { %v662_v0 = vld [vmem:[%s992_s1 + $0xe4] ss:$16 sps:$4 sm:$0xff]   ;;  %v664_v1 = vld [vmem:[%s992_s1 + $0xec] ss:$16 sps:$4 sm:$0xff]   ;;  %v666_v2 = vld [vmem:[%s992_s1 + $0xe0] ss:$16 sps:$4 sm:$0xff]  }
   0x2   :  { %421 = vmatprep.subr.bf16.mxu0 %v662_v0  ;;  %v667_v3 = vld [vmem:[%s992_s1 + $0xe8] ss:$16 sps:$4 sm:$0xff]   ;;  %462 = vmatprep.subr.bf16.mxu1 %v664_v1  ;;  %v668_v4 = vld [vmem:[%s992_s1 + $0xc4] ss:$16 sps:$4 sm:$0xff]   ;;  %v670_v5 = vld [vmem:[%s992_s1 + $0xcc] ss:$16 sps:$4 sm:$0xff]  }
   0x3   :  { %422 = vmatpush1.bf16.msra.mxu0 %v666_v2  ;;  %463 = vmatpush1.bf16.msra.mxu1 %v667_v3  ;;  %v672_v6 = vld [vmem:[%s992_s1 + $0xc0] ss:$16 sps:$4 sm:$0xff]   ;;  %v673_v7 = vld [vmem:[%s992_s1 + $0xc8] ss:$16 sps:$4 sm:$0xff]   ;;  %v674_v8 = vld [vmem:[%s992_s1 + $0xa4] ss:$16 sps:$4 sm:$0xff]   ;;  %v520_v3 = vlaneseq }
   0x4   :  { %423 = vmatprep.subr.bf16.mxu0 %v668_v4  ;;  %464 = vmatprep.subr.bf16.mxu1 %v670_v5  ;;  %v676_v9 = vld [vmem:[%s992_s1 + $0xac] ss:$16 sps:$4 sm:$0xff]   ;;  %v678_v10 = vld [vmem:[%s992_s1 + $0xa0] ss:$16 sps:$4 sm:$0xff]   ;;  %v679_v11 = vld [vmem:[%s992_s1 + $0xa8] ss:$16 sps:$4 sm:$0xff]  }
   0x5   :  { %v680_v12 = vld [vmem:[%s992_s1 + $0x84] ss:$16 sps:$4 sm:$0xff]   ;;  %v682_v13 = vld [vmem:[%s992_s1 + $0x8c] ss:$16 sps:$4 sm:$0xff]   ;;  %v684_v14 = vld [vmem:[%s992_s1 + $0x80] ss:$16 sps:$4 sm:$0xff]  }
   0x6   :  { %v685_v15 = vld [vmem:[%s992_s1 + $0x88] ss:$16 sps:$4 sm:$0xff]   ;;  %v686_v16 = vld [vmem:[%s992_s1 + $0x64] ss:$16 sps:$4 sm:$0xff]   ;;  %v688_v17 = vld [vmem:[%s992_s1 + $0x6c] ss:$16 sps:$4 sm:$0xff]  }
   0x7   :  { %424 = vmatpush1.bf16.msra.mxu0 %v672_v6  ;;  %465 = vmatpush1.bf16.msra.mxu1 %v673_v7  ;;  %v690_v18 = vld [vmem:[%s992_s1 + $0x60] ss:$16 sps:$4 sm:$0xff]   ;;  %v691_v19 = vld [vmem:[%s992_s1 + $0x68] ss:$16 sps:$4 sm:$0xff]   ;;  %v692_v20 = vld [vmem:[%s992_s1 + $0x44] ss:$16 sps:$4 sm:$0xff]  }
   0x8   :  { %425 = vmatprep.subr.bf16.mxu0 %v674_v8  ;;  %466 = vmatprep.subr.bf16.mxu1 %v676_v9  ;;  %v694_v21 = vld [vmem:[%s992_s1 + $0x4c] ss:$16 sps:$4 sm:$0xff]   ;;  %v696_v22 = vld [vmem:[%s992_s1 + $0x40] ss:$16 sps:$4 sm:$0xff]   ;;  %v697_v23 = vld [vmem:[%s992_s1 + $0x48] ss:$16 sps:$4 sm:$0xff]  }
   0x9   :  { %v698_v24 = vld [vmem:[%s992_s1 + $0x24] ss:$16 sps:$4 sm:$0xff]   ;;  %v700_v25 = vld [vmem:[%s992_s1 + $0x2c] ss:$16 sps:$4 sm:$0xff]   ;;  %v702_v26 = vld [vmem:[%s992_s1 + $0x20] ss:$16 sps:$4 sm:$0xff]  }
   0xa   :  { %v703_v27 = vld [vmem:[%s992_s1 + $0x28] ss:$16 sps:$4 sm:$0xff]   ;;  %v704_v28 = vld [vmem:[%s992_s1 + $0x4] ss:$16 sps:$4 sm:$0xff]   ;;  %v706_v29 = vld [vmem:[%s992_s1 + $0xc] ss:$16 sps:$4 sm:$0xff]  }
   0xb   :  { %426 = vmatpush1.bf16.msra.mxu0 %v678_v10  ;;  %467 = vmatpush1.bf16.msra.mxu1 %v679_v11  ;;  %v708_v30 = vld [vmem:[%s992_s1] ss:$16 sps:$4 sm:$0xff]   ;;  %v709_v31 = vld [vmem:[%s992_s1 + $0x8] ss:$16 sps:$4 sm:$0xff]   ;;  %v710_v32 = vld [vmem:[%s992_s1 + $0x1e4] ss:$16 sps:$4 sm:$0xff]  }
   0xc   :  { %427 = vmatprep.subr.bf16.mxu0 %v680_v12  ;;  %468 = vmatprep.subr.bf16.mxu1 %v682_v13  ;;  %v712_v33 = vld [vmem:[%s992_s1 + $0x1ec] ss:$16 sps:$4 sm:$0xff]   ;;  %v714_v34 = vld [vmem:[%s992_s1 + $0x1e0] ss:$16 sps:$4 sm:$0xff]   ;;  %v715_v35 = vld [vmem:[%s992_s1 + $0x1e8] ss:$16 sps:$4 sm:$0xff]  }
   0xd   :  { %v716_v36 = vld [vmem:[%s992_s1 + $0x1c4] ss:$16 sps:$4 sm:$0xff]   ;;  %v718_v37 = vld [vmem:[%s992_s1 + $0x1cc] ss:$16 sps:$4 sm:$0xff]   ;;  %v720_v38 = vld [vmem:[%s992_s1 + $0x1c0] ss:$16 sps:$4 sm:$0xff]  }
   0xe   :  { %v721_v39 = vld [vmem:[%s992_s1 + $0x1c8] ss:$16 sps:$4 sm:$0xff]   ;;  %v722_v40 = vld [vmem:[%s992_s1 + $0x1a4] ss:$16 sps:$4 sm:$0xff]   ;;  %v724_v41 = vld [vmem:[%s992_s1 + $0x1ac] ss:$16 sps:$4 sm:$0xff]  }
   0xf   :  { %428 = vmatpush1.bf16.msra.mxu0 %v684_v14  ;;  %469 = vmatpush1.bf16.msra.mxu1 %v685_v15  ;;  %v726_v42 = vld [vmem:[%s992_s1 + $0x1a0] ss:$16 sps:$4 sm:$0xff]   ;;  %v727_v43 = vld [vmem:[%s992_s1 + $0x1a8] ss:$16 sps:$4 sm:$0xff]   ;;  %v728_v44 = vld [vmem:[%s992_s1 + $0x184] ss:$16 sps:$4 sm:$0xff]  }
  0x10   :  { %429 = vmatprep.subr.bf16.mxu0 %v686_v16  ;;  %470 = vmatprep.subr.bf16.mxu1 %v688_v17  ;;  %v730_v45 = vld [vmem:[%s992_s1 + $0x18c] ss:$16 sps:$4 sm:$0xff]   ;;  %v29_v46 = vld [vmem:[%s993_s0] sm:$0xff]  ;;  %v733_v49 = vld [vmem:[%s992_s1 + $0x188] ss:$16 sps:$4 sm:$0xff]   ;;  %v521_v4 = vshrl.u32 %v520_v3, 7 }
  0x11   :  { %v593_v47 = vcombine.high %v29_v46, %v29_v46  ;;  %v732_v48 = vld [vmem:[%s992_s1 + $0x180] ss:$16 sps:$4 sm:$0xff]   ;;  %v734_v50 = vld [vmem:[%s992_s1 + $0x164] ss:$16 sps:$4 sm:$0xff]   ;;  %v736_v51 = vld [vmem:[%s992_s1 + $0x16c] ss:$16 sps:$4 sm:$0xff]   ;;  %v592_v2 = vcombine.low %v29_v46, %v29_v46 }
  0x12   :  { %v738_v52 = vld [vmem:[%s992_s1 + $0x160] ss:$16 sps:$4 sm:$0xff]   ;;  %v739_v53 = vld [vmem:[%s992_s1 + $0x168] ss:$16 sps:$4 sm:$0xff]   ;;  %v740_v54 = vld [vmem:[%s992_s1 + $0x144] ss:$16 sps:$4 sm:$0xff]  }
  0x13   :  { %430 = vmatpush1.bf16.msra.mxu0 %v690_v18  ;;  %471 = vmatpush1.bf16.msra.mxu1 %v691_v19  ;;  %v742_v55 = vld [vmem:[%s992_s1 + $0x14c] ss:$16 sps:$4 sm:$0xff]   ;;  %v744_v56 = vld [vmem:[%s992_s1 + $0x140] ss:$16 sps:$4 sm:$0xff]   ;;  %v745_v57 = vld [vmem:[%s992_s1 + $0x148] ss:$16 sps:$4 sm:$0xff]  }
  0x14   :  { %431 = vmatprep.subr.bf16.mxu0 %v692_v20  ;;  %472 = vmatprep.subr.bf16.mxu1 %v694_v21  ;;  %v746_v58 = vld [vmem:[%s992_s1 + $0x124] ss:$16 sps:$4 sm:$0xff]   ;;  %v748_v59 = vld [vmem:[%s992_s1 + $0x12c] ss:$16 sps:$4 sm:$0xff]   ;;  %v750_v60 = vld [vmem:[%s992_s1 + $0x120] ss:$16 sps:$4 sm:$0xff]  }
  0x15   :  { %453 = vmatprep.mubr.bf16.mxu0 %v593_v47  ;;  %494 = vmatprep.mubr.bf16.mxu1 %v593_v47  ;;  %v751_v61 = vld [vmem:[%s992_s1 + $0x128] ss:$16 sps:$4 sm:$0xff]   ;;  %v752_v62 = vld [vmem:[%s992_s1 + $0x104] ss:$16 sps:$4 sm:$0xff]   ;;  %v754_v63 = vld [vmem:[%s992_s1 + $0x10c] ss:$16 sps:$4 sm:$0xff]  }
  0x16   :  { %v756_v0 = vld [vmem:[%s992_s1 + $0x100] ss:$16 sps:$4 sm:$0xff]   ;;  %v757_v1 = vld [vmem:[%s992_s1 + $0x108] ss:$16 sps:$4 sm:$0xff]   ;;  %v522_v5 = vsub.s32 0, %v521_v4  ;;  %v530_v6 = vsub.s32 2, %v521_v4 }
  0x17   :  { %432 = vmatpush1.bf16.msra.mxu0 %v696_v22  ;;  %473 = vmatpush1.bf16.msra.mxu1 %v697_v23  ;;  %v518_v7 = vld [vmem:[%s994_s2] sm:$0xf]  ;;  %v526_v8 = vsub.s32 1, %v521_v4  ;;  %v534_v9 = vsub.s32 3, %v521_v4 }
  0x18   :  { %433 = vmatprep.subr.bf16.mxu0 %v698_v24  ;;  %474 = vmatprep.subr.bf16.mxu1 %v700_v25  ;;  %v523_v10 = vrot.slane %v518_v7, %v522_v5  ;;  %v544_v11 = vld [vmem:[%s995_s3] sm:$0xf]  ;;  %v531_v12 = vrot.slane %v518_v7, %v530_v6 }
  0x19   :  { %v527_v13 = vrot.slane %v518_v7, %v526_v8  ;;  %v535_v14 = vrot.slane %v518_v7, %v534_v9  ;;  %v549_v16 = vrot.slane %v544_v11, %v522_v5  ;;  %v557_v18 = vrot.slane %v544_v11, %v530_v6 }
  0x1a   :  { %v553_v21 = vrot.slane %v544_v11, %v526_v8  ;;  %v561_v22 = vrot.slane %v544_v11, %v534_v9 }
  0x1b   :  { %434 = vmatpush1.bf16.msra.mxu0 %v702_v26  ;;  %475 = vmatpush1.bf16.msra.mxu1 %v703_v27 }
  0x1c   :  { %435 = vmatprep.subr.bf16.mxu0 %v704_v28  ;;  %476 = vmatprep.subr.bf16.mxu1 %v706_v29 }
  0x1f   :  { %436 = vmatpush1.bf16.msra.mxu0 %v708_v30  ;;  %477 = vmatpush1.bf16.msra.mxu1 %v709_v31 }
  0x20   :  { %437 = vmatprep.subr.bf16.mxu0 %v710_v32  ;;  %478 = vmatprep.subr.bf16.mxu1 %v712_v33 }
  0x23   :  { %438 = vmatpush2.bf16.msra.mxu0 %v714_v34  ;;  %479 = vmatpush2.bf16.msra.mxu1 %v715_v35 }
  0x24   :  { %439 = vmatprep.subr.bf16.mxu0 %v716_v36  ;;  %480 = vmatprep.subr.bf16.mxu1 %v718_v37 }
  0x27   :  { %440 = vmatpush2.bf16.msra.mxu0 %v720_v38  ;;  %481 = vmatpush2.bf16.msra.mxu1 %v721_v39 }
  0x28   :  { %441 = vmatprep.subr.bf16.mxu0 %v722_v40  ;;  %482 = vmatprep.subr.bf16.mxu1 %v724_v41 }
  0x2b   :  { %442 = vmatpush2.bf16.msra.mxu0 %v726_v42  ;;  %483 = vmatpush2.bf16.msra.mxu1 %v727_v43 }
  0x2c   :  { %443 = vmatprep.subr.bf16.mxu0 %v728_v44  ;;  %484 = vmatprep.subr.bf16.mxu1 %v730_v45 }
  0x2f   :  { %444 = vmatpush2.bf16.msra.mxu0 %v732_v48  ;;  %485 = vmatpush2.bf16.msra.mxu1 %v733_v49 }
  0x30   :  { %445 = vmatprep.subr.bf16.mxu0 %v734_v50  ;;  %486 = vmatprep.subr.bf16.mxu1 %v736_v51 }
  0x33   :  { %446 = vmatpush2.bf16.msra.mxu0 %v738_v52  ;;  %487 = vmatpush2.bf16.msra.mxu1 %v739_v53 }
  0x34   :  { %447 = vmatprep.subr.bf16.mxu0 %v740_v54  ;;  %488 = vmatprep.subr.bf16.mxu1 %v742_v55 }
  0x37   :  { %448 = vmatpush2.bf16.msra.mxu0 %v744_v56  ;;  %489 = vmatpush2.bf16.msra.mxu1 %v745_v57 }
  0x38   :  { %449 = vmatprep.subr.bf16.mxu0 %v746_v58  ;;  %490 = vmatprep.subr.bf16.mxu1 %v748_v59 }
  0x3b   :  { %450 = vmatpush2.bf16.msra.mxu0 %v750_v60  ;;  %491 = vmatpush2.bf16.msra.mxu1 %v751_v61 }
  0x3c   :  { %451 = vmatprep.subr.bf16.mxu0 %v752_v62  ;;  %492 = vmatprep.subr.bf16.mxu1 %v754_v63 }
  0x3f   :  { %452 = vmatpush2.bf16.msra.mxu0 %v756_v0  ;;  %493 = vmatpush2.bf16.msra.mxu1 %v757_v1 }
  0x42   :  { %454 = vmatmul.mubr.bf16.vlgmr.msra.gmra.mxu0 %v592_v2  ;;  %495 = vmatmul.mubr.bf16.vlgmr.msra.gmra.mxu1 %v592_v2 }
 0x102   :  { %v455_v15 = vpop.f32.mrf.mxu0  ;;  %v496_v17 = vpop.f32.mrf.mxu1 }
 0x103   :  { %v540_v19 = vmul.f32 %v523_v10, %v455_v15  ;;  %v542_v20 = vmul.f32 %v531_v12, %v496_v17 }
 0x104   :  { %v457_v23 = vpop.f32.mrf.mxu0  ;;  %v498_v24 = vpop.f32.mrf.mxu1 }
 0x105   :  { %v541_v25 = vmul.f32 %v527_v13, %v457_v23  ;;  %v543_v26 = vmul.f32 %v535_v14, %v498_v24  ;;  %v566_v29 = vadd.f32 %v549_v16, %v540_v19  ;;  %v568_v30 = vadd.f32 %v557_v18, %v542_v20 }
 0x106   :  { %v459_v27 = vpop.f32.mrf.mxu0  ;;  %v500_v28 = vpop.f32.mrf.mxu1 }
 0x107   :  { %v567_v31 = vadd.f32 %v553_v21, %v541_v25  ;;  %v569_v32 = vadd.f32 %v561_v22, %v543_v26 }
 0x108   :  { %v460_v33 = vpop.f32.mrf.mxu0  ;;  %v501_v34 = vpop.f32.mrf.mxu1 }
 0x109   :  { %v660_v35 = vpack.c.bf16 %v567_v31, %v566_v29  ;;  %v661_v36 = vpack.c.bf16 %v569_v32, %v568_v30 }
 0x10b   :  { %586 = vst [vmem:[%s996_s4] sm:$0xff] %v660_v35  ;;  %587 = vst [vmem:[%s996_s4 + $0x8] sm:$0xff] %v661_v36 }

// kernel: resnet18_sigmoid_forward.37
= control target key start
LH: loop header
LB: loop body
LE: loop exit
PB: predicated region body
PF: predicated region fallthrough
CT: control target
= control target key end

     0   :  { %s2325_s15 = smov 0   ;;  %s2589_s0 = inlined_call_operand.vmem [shape: bf16[8,2304], index: 0, kind: input, shape index: {}]   ;;  %s2590_s1 = inlined_call_operand.vmem [shape: bf16[2304,512], index: 1, kind: input, shape index: {}]   ;;  %s2591_s2 = inlined_call_operand.vmem [shape: f32[1,512], index: 2, kind: input, shape index: {}]   ;;  %s2592_s3 = inlined_call_operand.vmem [shape: f32[1,512], index: 3, kind: input, shape index: {}]   ;;  %s2593_s4 = inlined_call_operand.vmem [shape: bf16[8,512], index: 4, kind: output, shape index: {}]  }
   0x1 LB: > { %s2331_s16 = sadd.s32 4294967295, %s2297_s15   ;;  %p1777_p0 = scmp.ge.s32.totalorder %s2297_s15, 1  ;;  %s2297_s15 = sphi %s2325_s15, %s14_s15  }
   0x2   : > { %p170_p1 = scmp.lt.s32.totalorder %s2297_s15, 4 }
   0x4   : > { %p171_p2 = pnand %p1777_p0, %p170_p1 }
   0x5   : > { %s197_s17 = smul.u32 (!%p171_p2), 6, %s2331_s16  ;;  %p1781_p5 = scmp.ne.s32.totalorder (!%p171_p2), %s2331_s16, 0 }
   0x6   : > { %174 = sbr.rel (%p171_p2) target bundleno = 435 (0x1b3), region = 36 }
   0x7   : > { %s203_s18 = smul.u32 (!%p171_p2), 96, %s2331_s16  ;;  %p198_p3 = scmp.lt.s32.totalorder (!%p171_p2), %s197_s17, 17 }
   0x9   : > { %p204_p4 = scmp.lt.s32.totalorder (!%p171_p2), %s203_s18, 287 }
   0xb   : > { %s2595_s17 = smov (!%p198_p3, %s197_s17), 17  ;;  %s2597_s18 = smov (!%p204_p4, %s203_s18), 287 }
   0xc   : > { %s1778_s19 = sshll.u32 %s2595_s17, 2  ;;  %s1985_s23 = sshll.u32 %s2597_s18, 4 }
   0xd   : > { %s2340_s22 = scalar_lea.vmem %s2589_s0, %s1778_s19  ;;  %s2345_s26 = scalar_lea.vmem %s2590_s1, %s1985_s23 }
   0xe   : > { %213 = sbr.rel (%p1781_p5) target bundleno = 22 (0x16), region = 40 }
  0x13   : > { %v2299_v0 = vmov 0.0  }
  0x14   : > { %214 = vst [vmem:[#allocation2 + $0x10] sm:$0xff] %v2299_v0  ;;  %215 = vst [vmem:[#allocation2] sm:$0xff] %v2299_v0 }
  0x15   : > { %216 = vst [vmem:[#allocation2 + $0x18] sm:$0xff] %v2299_v0  ;;  %217 = vst [vmem:[#allocation2 + $0x8] sm:$0xff] %v2299_v0 }
  0x16 PF: > { %v1997_v1 = vld [vmem:[%s2345_s26 + $0xe4] ss:$16 sps:$4 sm:$0xff]   ;;  %v2001_v3 = vld [vmem:[%s2345_s26 + $0xe0] ss:$16 sps:$4 sm:$0xff]   ;;  %v223_v49 = vld [vmem:[%s2340_s22 + $0x8] sm:$0xff]  ;;  %p1980_p6 = scmp.ne.s32.totalorder %s2331_s16, 2 }
  0x17   : > { %v1999_v2 = vld [vmem:[%s2345_s26 + $0x2e4] ss:$16 sps:$4 sm:$0xff]   ;;  %1398 = vmatprep.subr.bf16.mxu0 %v1997_v1  ;;  %v2002_v4 = vld [vmem:[%s2345_s26 + $0x2e0] ss:$16 sps:$4 sm:$0xff]   ;;  %v2400_v52 = vcombine.high %v223_v49, %v223_v49 }
  0x18   : > { %1439 = vmatprep.subr.bf16.mxu1 %v1999_v2  ;;  %v2003_v5 = vld [vmem:[%s2345_s26 + $0xc4] ss:$16 sps:$4 sm:$0xff]   ;;  %1399 = vmatpush1.bf16.msra.mxu0 %v2001_v3  ;;  %v2007_v7 = vld [vmem:[%s2345_s26 + $0xc0] ss:$16 sps:$4 sm:$0xff]  }
  0x19   : > { %1440 = vmatpush1.bf16.msra.mxu1 %v2002_v4  ;;  %v2005_v6 = vld [vmem:[%s2345_s26 + $0x2c4] ss:$16 sps:$4 sm:$0xff]   ;;  %1400 = vmatprep.subr.bf16.mxu0 %v2003_v5  ;;  %v2008_v8 = vld [vmem:[%s2345_s26 + $0x2c0] ss:$16 sps:$4 sm:$0xff]  }
  0x1a   : > { %1441 = vmatprep.subr.bf16.mxu1 %v2005_v6  ;;  %v2009_v9 = vld [vmem:[%s2345_s26 + $0xa4] ss:$16 sps:$4 sm:$0xff]   ;;  %v2013_v11 = vld [vmem:[%s2345_s26 + $0xa0] ss:$16 sps:$4 sm:$0xff]   ;;  %1471 = vmatprep.mubr.bf16.mxu1 %v2400_v52  ;;  %v2102_v6 = vld [vmem:[%s2345_s26 + $0xec] ss:$16 sps:$4 sm:$0xff]  }
  0x1b   : > { %v2011_v10 = vld [vmem:[%s2345_s26 + $0x2a4] ss:$16 sps:$4 sm:$0xff]   ;;  %v2014_v12 = vld [vmem:[%s2345_s26 + $0x2a0] ss:$16 sps:$4 sm:$0xff]  }
  0x1c   : > { %1401 = vmatpush1.bf16.msra.mxu0 %v2007_v7  ;;  %v2015_v13 = vld [vmem:[%s2345_s26 + $0x84] ss:$16 sps:$4 sm:$0xff]   ;;  %v2019_v15 = vld [vmem:[%s2345_s26 + $0x80] ss:$16 sps:$4 sm:$0xff]  }
  0x1d   : > { %1442 = vmatpush1.bf16.msra.mxu1 %v2008_v8  ;;  %1402 = vmatprep.subr.bf16.mxu0 %v2009_v9  ;;  %v2017_v14 = vld [vmem:[%s2345_s26 + $0x284] ss:$16 sps:$4 sm:$0xff]   ;;  %v2020_v16 = vld [vmem:[%s2345_s26 + $0x280] ss:$16 sps:$4 sm:$0xff]   ;;  %v2424_v8 = vcombine.low %v223_v49, %v223_v49 }
  0x1e   : > { %1443 = vmatprep.subr.bf16.mxu1 %v2011_v10  ;;  %v2021_v17 = vld [vmem:[%s2345_s26 + $0x64] ss:$16 sps:$4 sm:$0xff]   ;;  %v2025_v19 = vld [vmem:[%s2345_s26 + $0x60] ss:$16 sps:$4 sm:$0xff]   ;;  %v2100_v10 = vld [vmem:[%s2345_s26 + $0xe8] ss:$16 sps:$4 sm:$0xff]  }
  0x1f   : > { %v2023_v18 = vld [vmem:[%s2345_s26 + $0x264] ss:$16 sps:$4 sm:$0xff]   ;;  %v2026_v20 = vld [vmem:[%s2345_s26 + $0x260] ss:$16 sps:$4 sm:$0xff]  }
  0x20   : > { %1403 = vmatpush1.bf16.msra.mxu0 %v2013_v11  ;;  %v2027_v21 = vld [vmem:[%s2345_s26 + $0x44] ss:$16 sps:$4 sm:$0xff]   ;;  %v2031_v23 = vld [vmem:[%s2345_s26 + $0x40] ss:$16 sps:$4 sm:$0xff]  }
  0x21   : > { %1444 = vmatpush1.bf16.msra.mxu1 %v2014_v12  ;;  %1404 = vmatprep.subr.bf16.mxu0 %v2015_v13  ;;  %v2029_v22 = vld [vmem:[%s2345_s26 + $0x244] ss:$16 sps:$4 sm:$0xff]   ;;  %v2032_v24 = vld [vmem:[%s2345_s26 + $0x240] ss:$16 sps:$4 sm:$0xff]   ;;  %v2108_v12 = vld [vmem:[%s2345_s26 + $0xcc] ss:$16 sps:$4 sm:$0xff]  }
  0x22   : > { %1445 = vmatprep.subr.bf16.mxu1 %v2017_v14  ;;  %v2033_v25 = vld [vmem:[%s2345_s26 + $0x24] ss:$16 sps:$4 sm:$0xff]   ;;  %v2037_v27 = vld [vmem:[%s2345_s26 + $0x20] ss:$16 sps:$4 sm:$0xff]   ;;  %v2106_v14 = vld [vmem:[%s2345_s26 + $0xc8] ss:$16 sps:$4 sm:$0xff]  }
  0x23   : > { %v2035_v26 = vld [vmem:[%s2345_s26 + $0x224] ss:$16 sps:$4 sm:$0xff]   ;;  %v2038_v28 = vld [vmem:[%s2345_s26 + $0x220] ss:$16 sps:$4 sm:$0xff]  }
  0x24   : > { %1405 = vmatpush1.bf16.msra.mxu0 %v2019_v15  ;;  %v2039_v29 = vld [vmem:[%s2345_s26 + $0x4] ss:$16 sps:$4 sm:$0xff]   ;;  %v2043_v31 = vld [vmem:[%s2345_s26] ss:$16 sps:$4 sm:$0xff]  }
  0x25   : > { %1446 = vmatpush1.bf16.msra.mxu1 %v2020_v16  ;;  %1406 = vmatprep.subr.bf16.mxu0 %v2021_v17  ;;  %v2041_v30 = vld [vmem:[%s2345_s26 + $0x204] ss:$16 sps:$4 sm:$0xff]   ;;  %v2044_v32 = vld [vmem:[%s2345_s26 + $0x200] ss:$16 sps:$4 sm:$0xff]   ;;  %v2114_v16 = vld [vmem:[%s2345_s26 + $0xac] ss:$16 sps:$4 sm:$0xff]  }
  0x26   : > { %1447 = vmatprep.subr.bf16.mxu1 %v2023_v18  ;;  %v2045_v33 = vld [vmem:[%s2345_s26 + $0x1e4] ss:$16 sps:$4 sm:$0xff]   ;;  %v2049_v35 = vld [vmem:[%s2345_s26 + $0x1e0] ss:$16 sps:$4 sm:$0xff]   ;;  %v2112_v18 = vld [vmem:[%s2345_s26 + $0xa8] ss:$16 sps:$4 sm:$0xff]  }
  0x27   : > { %v2047_v34 = vld [vmem:[%s2345_s26 + $0x3e4] ss:$16 sps:$4 sm:$0xff]   ;;  %v2050_v36 = vld [vmem:[%s2345_s26 + $0x3e0] ss:$16 sps:$4 sm:$0xff]  }
  0x28   : > { %1407 = vmatpush1.bf16.msra.mxu0 %v2025_v19  ;;  %v2051_v37 = vld [vmem:[%s2345_s26 + $0x1c4] ss:$16 sps:$4 sm:$0xff]   ;;  %v2055_v39 = vld [vmem:[%s2345_s26 + $0x1c0] ss:$16 sps:$4 sm:$0xff]  }
  0x29   : > { %1448 = vmatpush1.bf16.msra.mxu1 %v2026_v20  ;;  %1408 = vmatprep.subr.bf16.mxu0 %v2027_v21  ;;  %v2053_v38 = vld [vmem:[%s2345_s26 + $0x3c4] ss:$16 sps:$4 sm:$0xff]   ;;  %v2056_v40 = vld [vmem:[%s2345_s26 + $0x3c0] ss:$16 sps:$4 sm:$0xff]   ;;  %v2120_v20 = vld [vmem:[%s2345_s26 + $0x8c] ss:$16 sps:$4 sm:$0xff]  }
  0x2a   : > { %1449 = vmatprep.subr.bf16.mxu1 %v2029_v22  ;;  %v2057_v41 = vld [vmem:[%s2345_s26 + $0x1a4] ss:$16 sps:$4 sm:$0xff]   ;;  %v2061_v43 = vld [vmem:[%s2345_s26 + $0x1a0] ss:$16 sps:$4 sm:$0xff]   ;;  %v2118_v22 = vld [vmem:[%s2345_s26 + $0x88] ss:$16 sps:$4 sm:$0xff]  }
  0x2b   : > { %v2059_v42 = vld [vmem:[%s2345_s26 + $0x3a4] ss:$16 sps:$4 sm:$0xff]   ;;  %v2062_v44 = vld [vmem:[%s2345_s26 + $0x3a0] ss:$16 sps:$4 sm:$0xff]  }
  0x2c   : > { %1409 = vmatpush1.bf16.msra.mxu0 %v2031_v23  ;;  %v2063_v45 = vld [vmem:[%s2345_s26 + $0x184] ss:$16 sps:$4 sm:$0xff]   ;;  %v2067_v50 = vld [vmem:[%s2345_s26 + $0x180] ss:$16 sps:$4 sm:$0xff]  }
  0x2d   : > { %1450 = vmatpush1.bf16.msra.mxu1 %v2032_v24  ;;  %1410 = vmatprep.subr.bf16.mxu0 %v2033_v25  ;;  %v2065_v46 = vld [vmem:[%s2345_s26 + $0x384] ss:$16 sps:$4 sm:$0xff]   ;;  %v2068_v51 = vld [vmem:[%s2345_s26 + $0x380] ss:$16 sps:$4 sm:$0xff]   ;;  %v2126_v24 = vld [vmem:[%s2345_s26 + $0x6c] ss:$16 sps:$4 sm:$0xff]  }
  0x2e   : > { %1451 = vmatprep.subr.bf16.mxu1 %v2035_v26  ;;  %v222_v47 = vld [vmem:[%s2340_s22] sm:$0xff]  ;;  %v2124_v26 = vld [vmem:[%s2345_s26 + $0x68] ss:$16 sps:$4 sm:$0xff]  }
  0x2f   : > { %v2395_v48 = vcombine.high %v222_v47, %v222_v47  ;;  %v2069_v53 = vld [vmem:[%s2345_s26 + $0x164] ss:$16 sps:$4 sm:$0xff]   ;;  %v2073_v55 = vld [vmem:[%s2345_s26 + $0x160] ss:$16 sps:$4 sm:$0xff]   ;;  %v2422_v7 = vcombine.low %v222_v47, %v222_v47 }
  0x30   : > { %1411 = vmatpush1.bf16.msra.mxu0 %v2037_v27  ;;  %v2071_v54 = vld [vmem:[%s2345_s26 + $0x364] ss:$16 sps:$4 sm:$0xff]   ;;  %v2074_v56 = vld [vmem:[%s2345_s26 + $0x360] ss:$16 sps:$4 sm:$0xff]  }
  0x31   : > { %1452 = vmatpush1.bf16.msra.mxu1 %v2038_v28  ;;  %1412 = vmatprep.subr.bf16.mxu0 %v2039_v29  ;;  %v2075_v57 = vld [vmem:[%s2345_s26 + $0x144] ss:$16 sps:$4 sm:$0xff]   ;;  %v2079_v59 = vld [vmem:[%s2345_s26 + $0x140] ss:$16 sps:$4 sm:$0xff]   ;;  %v2132_v28 = vld [vmem:[%s2345_s26 + $0x4c] ss:$16 sps:$4 sm:$0xff]  }
  0x32   : > { %1453 = vmatprep.subr.bf16.mxu1 %v2041_v30  ;;  %1430 = vmatprep.mubr.bf16.mxu0 %v2395_v48  ;;  %v2077_v58 = vld [vmem:[%s2345_s26 + $0x344] ss:$16 sps:$4 sm:$0xff]   ;;  %v2080_v60 = vld [vmem:[%s2345_s26 + $0x340] ss:$16 sps:$4 sm:$0xff]   ;;  %v2130_v30 = vld [vmem:[%s2345_s26 + $0x48] ss:$16 sps:$4 sm:$0xff]  }
  0x33   : > { %v2081_v61 = vld [vmem:[%s2345_s26 + $0x124] ss:$16 sps:$4 sm:$0xff]   ;;  %v2085_v63 = vld [vmem:[%s2345_s26 + $0x120] ss:$16 sps:$4 sm:$0xff]  }
  0x34   : > { %1413 = vmatpush1.bf16.msra.mxu0 %v2043_v31  ;;  %v2083_v62 = vld [vmem:[%s2345_s26 + $0x324] ss:$16 sps:$4 sm:$0xff]   ;;  %v2086_v0 = vld [vmem:[%s2345_s26 + $0x320] ss:$16 sps:$4 sm:$0xff]  }
  0x35   : > { %1454 = vmatpush1.bf16.msra.mxu1 %v2044_v32  ;;  %1414 = vmatprep.subr.bf16.mxu0 %v2045_v33  ;;  %v2087_v1 = vld [vmem:[%s2345_s26 + $0x104] ss:$16 sps:$4 sm:$0xff]   ;;  %v2091_v3 = vld [vmem:[%s2345_s26 + $0x100] ss:$16 sps:$4 sm:$0xff]   ;;  %v2138_v32 = vld [vmem:[%s2345_s26 + $0x2c] ss:$16 sps:$4 sm:$0xff]  }
  0x36   : > { %1455 = vmatprep.subr.bf16.mxu1 %v2047_v34  ;;  %v2089_v2 = vld [vmem:[%s2345_s26 + $0x304] ss:$16 sps:$4 sm:$0xff]   ;;  %v2092_v4 = vld [vmem:[%s2345_s26 + $0x300] ss:$16 sps:$4 sm:$0xff]  }
  0x37   : > { %v2099_v5 = vld [vmem:[%s2345_s26 + $0x4e4] ss:$16 sps:$4 sm:$0xff]   ;;  %v2097_v9 = vld [vmem:[%s2345_s26 + $0x4e0] ss:$16 sps:$4 sm:$0xff]  }
  0x38   : > { %1415 = vmatpush2.bf16.msra.mxu0 %v2049_v35  ;;  %v2105_v11 = vld [vmem:[%s2345_s26 + $0x4c4] ss:$16 sps:$4 sm:$0xff]   ;;  %v2103_v13 = vld [vmem:[%s2345_s26 + $0x4c0] ss:$16 sps:$4 sm:$0xff]  }
  0x39   : > { %1456 = vmatpush2.bf16.msra.mxu1 %v2050_v36  ;;  %1416 = vmatprep.subr.bf16.mxu0 %v2051_v37  ;;  %v2111_v15 = vld [vmem:[%s2345_s26 + $0x4a4] ss:$16 sps:$4 sm:$0xff]   ;;  %v2109_v17 = vld [vmem:[%s2345_s26 + $0x4a0] ss:$16 sps:$4 sm:$0xff]   ;;  %v2136_v36 = vld [vmem:[%s2345_s26 + $0x28] ss:$16 sps:$4 sm:$0xff]  }
  0x3a   : > { %1457 = vmatprep.subr.bf16.mxu1 %v2053_v38  ;;  %v2117_v19 = vld [vmem:[%s2345_s26 + $0x484] ss:$16 sps:$4 sm:$0xff]   ;;  %v2115_v21 = vld [vmem:[%s2345_s26 + $0x480] ss:$16 sps:$4 sm:$0xff]   ;;  %v2144_v38 = vld [vmem:[%s2345_s26 + $0xc] ss:$16 sps:$4 sm:$0xff]  }
  0x3b   : > { %v2123_v23 = vld [vmem:[%s2345_s26 + $0x464] ss:$16 sps:$4 sm:$0xff]   ;;  %v2121_v25 = vld [vmem:[%s2345_s26 + $0x460] ss:$16 sps:$4 sm:$0xff]  }
  0x3c   : > { %1417 = vmatpush2.bf16.msra.mxu0 %v2055_v39  ;;  %v2129_v27 = vld [vmem:[%s2345_s26 + $0x444] ss:$16 sps:$4 sm:$0xff]   ;;  %v2127_v29 = vld [vmem:[%s2345_s26 + $0x440] ss:$16 sps:$4 sm:$0xff]  }
  0x3d   : > { %1458 = vmatpush2.bf16.msra.mxu1 %v2056_v40  ;;  %1418 = vmatprep.subr.bf16.mxu0 %v2057_v41  ;;  %v2135_v31 = vld [vmem:[%s2345_s26 + $0x424] ss:$16 sps:$4 sm:$0xff]   ;;  %v2133_v34 = vld [vmem:[%s2345_s26 + $0x420] ss:$16 sps:$4 sm:$0xff]   ;;  %v2142_v40 = vld [vmem:[%s2345_s26 + $0x8] ss:$16 sps:$4 sm:$0xff]  }
  0x3e   : > { %1459 = vmatprep.subr.bf16.mxu1 %v2059_v42  ;;  %v2454_v33 = vld [vmem:[%s2340_s22 + $0x10] sm:$0xff]  ;;  %v2150_v42 = vld [vmem:[%s2345_s26 + $0x1ec] ss:$16 sps:$4 sm:$0xff]  }
  0x3f   : > { %v2459_v35 = vcombine.high %v2454_v33, %v2454_v33  ;;  %v2141_v37 = vld [vmem:[%s2345_s26 + $0x404] ss:$16 sps:$4 sm:$0xff]   ;;  %v2139_v39 = vld [vmem:[%s2345_s26 + $0x400] ss:$16 sps:$4 sm:$0xff]  }
  0x40   : > { %1419 = vmatpush2.bf16.msra.mxu0 %v2061_v43  ;;  %v2147_v41 = vld [vmem:[%s2345_s26 + $0x5e4] ss:$16 sps:$4 sm:$0xff]   ;;  %v2145_v43 = vld [vmem:[%s2345_s26 + $0x5e0] ss:$16 sps:$4 sm:$0xff]  }
  0x41   : > { %1460 = vmatpush2.bf16.msra.mxu1 %v2062_v44  ;;  %1420 = vmatprep.subr.bf16.mxu0 %v2063_v45  ;;  %v2148_v44 = vld [vmem:[%s2345_s26 + $0x1e8] ss:$16 sps:$4 sm:$0xff]   ;;  %v2153_v45 = vld [vmem:[%s2345_s26 + $0x5c4] ss:$16 sps:$4 sm:$0xff]   ;;  %v2151_v47 = vld [vmem:[%s2345_s26 + $0x5c0] ss:$16 sps:$4 sm:$0xff]  }
  0x42   : > { %1461 = vmatprep.subr.bf16.mxu1 %v2065_v46  ;;  %v2156_v46 = vld [vmem:[%s2345_s26 + $0x1cc] ss:$16 sps:$4 sm:$0xff]   ;;  %v2159_v49 = vld [vmem:[%s2345_s26 + $0x5a4] ss:$16 sps:$4 sm:$0xff]  }
  0x44   : > { %1421 = vmatpush2.bf16.msra.mxu0 %v2067_v50  ;;  %v2162_v50 = vld [vmem:[%s2345_s26 + $0x1ac] ss:$16 sps:$4 sm:$0xff]  }
  0x45   : > { %1462 = vmatpush2.bf16.msra.mxu1 %v2068_v51  ;;  %1422 = vmatprep.subr.bf16.mxu0 %v2069_v53  ;;  %v2157_v51 = vld [vmem:[%s2345_s26 + $0x5a0] ss:$16 sps:$4 sm:$0xff]   ;;  %v2160_v53 = vld [vmem:[%s2345_s26 + $0x1a8] ss:$16 sps:$4 sm:$0xff]  }
  0x46   : > { %1463 = vmatprep.subr.bf16.mxu1 %v2071_v54  ;;  %v2165_v54 = vld [vmem:[%s2345_s26 + $0x584] ss:$16 sps:$4 sm:$0xff]  }
  0x48   : > { %1423 = vmatpush2.bf16.msra.mxu0 %v2073_v55  ;;  %v2168_v55 = vld [vmem:[%s2345_s26 + $0x18c] ss:$16 sps:$4 sm:$0xff]  }
  0x49   : > { %1464 = vmatpush2.bf16.msra.mxu1 %v2074_v56  ;;  %1424 = vmatprep.subr.bf16.mxu0 %v2075_v57  ;;  %v2163_v56 = vld [vmem:[%s2345_s26 + $0x580] ss:$16 sps:$4 sm:$0xff]   ;;  %v2166_v57 = vld [vmem:[%s2345_s26 + $0x188] ss:$16 sps:$4 sm:$0xff]  }
  0x4a   : > { %1465 = vmatprep.subr.bf16.mxu1 %v2077_v58  ;;  %v2171_v58 = vld [vmem:[%s2345_s26 + $0x564] ss:$16 sps:$4 sm:$0xff]  }
  0x4c   : > { %1425 = vmatpush2.bf16.msra.mxu0 %v2079_v59  ;;  %v2174_v59 = vld [vmem:[%s2345_s26 + $0x16c] ss:$16 sps:$4 sm:$0xff]  }
  0x4d   : > { %1466 = vmatpush2.bf16.msra.mxu1 %v2080_v60  ;;  %1426 = vmatprep.subr.bf16.mxu0 %v2081_v61  ;;  %v2169_v60 = vld [vmem:[%s2345_s26 + $0x560] ss:$16 sps:$4 sm:$0xff]   ;;  %v2172_v61 = vld [vmem:[%s2345_s26 + $0x168] ss:$16 sps:$4 sm:$0xff]  }
  0x4e   : > { %1467 = vmatprep.subr.bf16.mxu1 %v2083_v62  ;;  %v2177_v62 = vld [vmem:[%s2345_s26 + $0x544] ss:$16 sps:$4 sm:$0xff]  }
  0x50   : > { %1427 = vmatpush2.bf16.msra.mxu0 %v2085_v63  ;;  %v2180_v63 = vld [vmem:[%s2345_s26 + $0x14c] ss:$16 sps:$4 sm:$0xff]  }
  0x51   : > { %1468 = vmatpush2.bf16.msra.mxu1 %v2086_v0  ;;  %1428 = vmatprep.subr.bf16.mxu0 %v2087_v1  ;;  %v2175_v0 = vld [vmem:[%s2345_s26 + $0x540] ss:$16 sps:$4 sm:$0xff]   ;;  %v2178_v1 = vld [vmem:[%s2345_s26 + $0x148] ss:$16 sps:$4 sm:$0xff]  }
  0x52   : > { %1469 = vmatprep.subr.bf16.mxu1 %v2089_v2  ;;  %v2183_v2 = vld [vmem:[%s2345_s26 + $0x524] ss:$16 sps:$4 sm:$0xff]  }
  0x54   : > { %1429 = vmatpush2.bf16.msra.mxu0 %v2091_v3  ;;  %v2186_v3 = vld [vmem:[%s2345_s26 + $0x12c] ss:$16 sps:$4 sm:$0xff]  }
  0x55   : > { %1470 = vmatpush2.bf16.msra.mxu1 %v2092_v4  ;;  %1480 = vmatprep.subr.bf16.mxu0 %v2099_v5  ;;  %v2181_v4 = vld [vmem:[%s2345_s26 + $0x520] ss:$16 sps:$4 sm:$0xff]   ;;  %v2184_v5 = vld [vmem:[%s2345_s26 + $0x128] ss:$16 sps:$4 sm:$0xff]  }
  0x56   : > { %1521 = vmatprep.subr.bf16.mxu1 %v2102_v6  ;;  %v2189_v6 = vld [vmem:[%s2345_s26 + $0x504] ss:$16 sps:$4 sm:$0xff]  }
  0x57   : > { %1431 = vmatmul.mubr.bf16.vlgmr.msra.gmra.mxu0 %v2422_v7 }
  0x58   : > { %1472 = vmatmul.mubr.bf16.vlgmr.msra.gmra.mxu1 %v2424_v8  ;;  %1481 = vmatpush1.bf16.msra.mxu0 %v2097_v9  ;;  %v2192_v9 = vld [vmem:[%s2345_s26 + $0x10c] ss:$16 sps:$4 sm:$0xff]  }
  0x59   : > { %1522 = vmatpush1.bf16.msra.mxu1 %v2100_v10  ;;  %1482 = vmatprep.subr.bf16.mxu0 %v2105_v11  ;;  %v2187_v10 = vld [vmem:[%s2345_s26 + $0x500] ss:$16 sps:$4 sm:$0xff]   ;;  %v2190_v11 = vld [vmem:[%s2345_s26 + $0x108] ss:$16 sps:$4 sm:$0xff]  }
  0x5a   : > { %1523 = vmatprep.subr.bf16.mxu1 %v2108_v12  ;;  %1553 = vmatprep.mubr.bf16.mxu1 %v2395_v48  ;;  %v2154_v48 = vld [vmem:[%s2345_s26 + $0x1c8] ss:$16 sps:$4 sm:$0xff]   ;;  %v2197_v12 = vld [vmem:[%s2345_s26 + $0x2ec] ss:$16 sps:$4 sm:$0xff]  }
  0x5b   : > { %1512 = vmatprep.mubr.bf16.mxu0 %v2459_v35 }
  0x5c   : > { %1483 = vmatpush1.bf16.msra.mxu0 %v2103_v13  ;;  %v2200_v13 = vld [vmem:[%s2345_s26 + $0x4ec] ss:$16 sps:$4 sm:$0xff]  }
  0x5d   : > { %1524 = vmatpush1.bf16.msra.mxu1 %v2106_v14  ;;  %1484 = vmatprep.subr.bf16.mxu0 %v2111_v15  ;;  %v2503_v14 = vcombine.low %v2454_v33, %v2454_v33  ;;  %v2195_v15 = vld [vmem:[%s2345_s26 + $0x2e8] ss:$16 sps:$4 sm:$0xff]  }
  0x5e   : > { %1525 = vmatprep.subr.bf16.mxu1 %v2114_v16  ;;  %v2198_v16 = vld [vmem:[%s2345_s26 + $0x4e8] ss:$16 sps:$4 sm:$0xff]  }
  0x5f   : > { %v2225_v33 = vld [vmem:[%s2345_s26 + $0x248] ss:$16 sps:$4 sm:$0xff]  }
  0x60   : > { %1485 = vmatpush1.bf16.msra.mxu0 %v2109_v17  ;;  %v2203_v17 = vld [vmem:[%s2345_s26 + $0x2cc] ss:$16 sps:$4 sm:$0xff]  }
  0x61   : > { %1526 = vmatpush1.bf16.msra.mxu1 %v2112_v18  ;;  %1486 = vmatprep.subr.bf16.mxu0 %v2117_v19  ;;  %v2206_v18 = vld [vmem:[%s2345_s26 + $0x4cc] ss:$16 sps:$4 sm:$0xff]   ;;  %v2201_v19 = vld [vmem:[%s2345_s26 + $0x2c8] ss:$16 sps:$4 sm:$0xff]  }
  0x62   : > { %1527 = vmatprep.subr.bf16.mxu1 %v2120_v20  ;;  %v2204_v20 = vld [vmem:[%s2345_s26 + $0x4c8] ss:$16 sps:$4 sm:$0xff]  }
  0x64   : > { %1487 = vmatpush1.bf16.msra.mxu0 %v2115_v21  ;;  %v2209_v21 = vld [vmem:[%s2345_s26 + $0x2ac] ss:$16 sps:$4 sm:$0xff]  }
  0x65   : > { %1528 = vmatpush1.bf16.msra.mxu1 %v2118_v22  ;;  %1488 = vmatprep.subr.bf16.mxu0 %v2123_v23  ;;  %v2212_v22 = vld [vmem:[%s2345_s26 + $0x4ac] ss:$16 sps:$4 sm:$0xff]   ;;  %v2210_v23 = vld [vmem:[%s2345_s26 + $0x4a8] ss:$16 sps:$4 sm:$0xff]  }
  0x66   : > { %1529 = vmatprep.subr.bf16.mxu1 %v2126_v24  ;;  %v2215_v24 = vld [vmem:[%s2345_s26 + $0x28c] ss:$16 sps:$4 sm:$0xff]  }
  0x68   : > { %1489 = vmatpush1.bf16.msra.mxu0 %v2121_v25  ;;  %v2218_v25 = vld [vmem:[%s2345_s26 + $0x48c] ss:$16 sps:$4 sm:$0xff]  }
  0x69   : > { %1530 = vmatpush1.bf16.msra.mxu1 %v2124_v26  ;;  %1490 = vmatprep.subr.bf16.mxu0 %v2129_v27  ;;  %v2213_v26 = vld [vmem:[%s2345_s26 + $0x288] ss:$16 sps:$4 sm:$0xff]   ;;  %v2221_v27 = vld [vmem:[%s2345_s26 + $0x26c] ss:$16 sps:$4 sm:$0xff]  }
  0x6a   : > { %1531 = vmatprep.subr.bf16.mxu1 %v2132_v28  ;;  %v2224_v28 = vld [vmem:[%s2345_s26 + $0x46c] ss:$16 sps:$4 sm:$0xff]  }
  0x6c   : > { %1491 = vmatpush1.bf16.msra.mxu0 %v2127_v29  ;;  %v2219_v29 = vld [vmem:[%s2345_s26 + $0x268] ss:$16 sps:$4 sm:$0xff]  }
  0x6d   : > { %1532 = vmatpush1.bf16.msra.mxu1 %v2130_v30  ;;  %1492 = vmatprep.subr.bf16.mxu0 %v2135_v31  ;;  %v2222_v30 = vld [vmem:[%s2345_s26 + $0x468] ss:$16 sps:$4 sm:$0xff]   ;;  %v2227_v31 = vld [vmem:[%s2345_s26 + $0x24c] ss:$16 sps:$4 sm:$0xff]  }
  0x6e   : > { %1533 = vmatprep.subr.bf16.mxu1 %v2138_v32  ;;  %v2230_v32 = vld [vmem:[%s2345_s26 + $0x44c] ss:$16 sps:$4 sm:$0xff]  }
  0x70   : > { %1493 = vmatpush1.bf16.msra.mxu0 %v2133_v34  ;;  %v2228_v34 = vld [vmem:[%s2345_s26 + $0x448] ss:$16 sps:$4 sm:$0xff]  }
  0x71   : > { %1534 = vmatpush1.bf16.msra.mxu1 %v2136_v36  ;;  %1494 = vmatprep.subr.bf16.mxu0 %v2141_v37  ;;  %v2236_v36 = vld [vmem:[%s2345_s26 + $0x42c] ss:$16 sps:$4 sm:$0xff]   ;;  %v2231_v37 = vld [vmem:[%s2345_s26 + $0x228] ss:$16 sps:$4 sm:$0xff]  }
  0x72   : > { %1535 = vmatprep.subr.bf16.mxu1 %v2144_v38  ;;  %v2234_v38 = vld [vmem:[%s2345_s26 + $0x428] ss:$16 sps:$4 sm:$0xff]  }
  0x74   : > { %1495 = vmatpush1.bf16.msra.mxu0 %v2139_v39  ;;  %v2239_v39 = vld [vmem:[%s2345_s26 + $0x20c] ss:$16 sps:$4 sm:$0xff]  }
  0x75   : > { %1536 = vmatpush1.bf16.msra.mxu1 %v2142_v40  ;;  %1496 = vmatprep.subr.bf16.mxu0 %v2147_v41  ;;  %v2242_v40 = vld [vmem:[%s2345_s26 + $0x40c] ss:$16 sps:$4 sm:$0xff]   ;;  %v2237_v41 = vld [vmem:[%s2345_s26 + $0x208] ss:$16 sps:$4 sm:$0xff]  }
  0x76   : > { %1537 = vmatprep.subr.bf16.mxu1 %v2150_v42  ;;  %v2240_v42 = vld [vmem:[%s2345_s26 + $0x408] ss:$16 sps:$4 sm:$0xff]  }
  0x78   : > { %1497 = vmatpush2.bf16.msra.mxu0 %v2145_v43  ;;  %v2245_v43 = vld [vmem:[%s2345_s26 + $0x3ec] ss:$16 sps:$4 sm:$0xff]  }
  0x79   : > { %1538 = vmatpush2.bf16.msra.mxu1 %v2148_v44  ;;  %1498 = vmatprep.subr.bf16.mxu0 %v2153_v45  ;;  %v2248_v44 = vld [vmem:[%s2345_s26 + $0x5ec] ss:$16 sps:$4 sm:$0xff]   ;;  %v2243_v45 = vld [vmem:[%s2345_s26 + $0x3e8] ss:$16 sps:$4 sm:$0xff]  }
  0x7a   : > { %1539 = vmatprep.subr.bf16.mxu1 %v2156_v46  ;;  %v2246_v46 = vld [vmem:[%s2345_s26 + $0x5e8] ss:$16 sps:$4 sm:$0xff]  }
  0x7c   : > { %1499 = vmatpush2.bf16.msra.mxu0 %v2151_v47  ;;  %v2251_v47 = vld [vmem:[%s2345_s26 + $0x3cc] ss:$16 sps:$4 sm:$0xff]  }
  0x7d   : > { %1540 = vmatpush2.bf16.msra.mxu1 %v2154_v48  ;;  %1500 = vmatprep.subr.bf16.mxu0 %v2159_v49  ;;  %v2254_v48 = vld [vmem:[%s2345_s26 + $0x5cc] ss:$16 sps:$4 sm:$0xff]   ;;  %v2249_v49 = vld [vmem:[%s2345_s26 + $0x3c8] ss:$16 sps:$4 sm:$0xff]  }
  0x7e   : > { %1541 = vmatprep.subr.bf16.mxu1 %v2162_v50  ;;  %v2252_v50 = vld [vmem:[%s2345_s26 + $0x5c8] ss:$16 sps:$4 sm:$0xff]  }
  0x80   : > { %1501 = vmatpush2.bf16.msra.mxu0 %v2157_v51  ;;  %v2257_v51 = vld [vmem:[%s2345_s26 + $0x3ac] ss:$16 sps:$4 sm:$0xff]  }
  0x81   : > { %1542 = vmatpush2.bf16.msra.mxu1 %v2160_v53  ;;  %1502 = vmatprep.subr.bf16.mxu0 %v2165_v54  ;;  %v2260_v53 = vld [vmem:[%s2345_s26 + $0x5ac] ss:$16 sps:$4 sm:$0xff]   ;;  %v2255_v54 = vld [vmem:[%s2345_s26 + $0x3a8] ss:$16 sps:$4 sm:$0xff]  }
  0x82   : > { %1543 = vmatprep.subr.bf16.mxu1 %v2168_v55  ;;  %v2258_v55 = vld [vmem:[%s2345_s26 + $0x5a8] ss:$16 sps:$4 sm:$0xff]  }
  0x84   : > { %1503 = vmatpush2.bf16.msra.mxu0 %v2163_v56  ;;  %v2263_v56 = vld [vmem:[%s2345_s26 + $0x38c] ss:$16 sps:$4 sm:$0xff]  }
  0x85   : > { %1544 = vmatpush2.bf16.msra.mxu1 %v2166_v57  ;;  %1504 = vmatprep.subr.bf16.mxu0 %v2171_v58  ;;  %v2266_v57 = vld [vmem:[%s2345_s26 + $0x58c] ss:$16 sps:$4 sm:$0xff]   ;;  %v2261_v58 = vld [vmem:[%s2345_s26 + $0x388] ss:$16 sps:$4 sm:$0xff]  }
  0x86   : > { %1545 = vmatprep.subr.bf16.mxu1 %v2174_v59  ;;  %v2264_v59 = vld [vmem:[%s2345_s26 + $0x588] ss:$16 sps:$4 sm:$0xff]  }
  0x88   : > { %1505 = vmatpush2.bf16.msra.mxu0 %v2169_v60  ;;  %v2269_v60 = vld [vmem:[%s2345_s26 + $0x36c] ss:$16 sps:$4 sm:$0xff]  }
  0x89   : > { %1546 = vmatpush2.bf16.msra.mxu1 %v2172_v61  ;;  %1506 = vmatprep.subr.bf16.mxu0 %v2177_v62  ;;  %v2272_v61 = vld [vmem:[%s2345_s26 + $0x56c] ss:$16 sps:$4 sm:$0xff]   ;;  %v2267_v62 = vld [vmem:[%s2345_s26 + $0x368] ss:$16 sps:$4 sm:$0xff]  }
  0x8a   : > { %1547 = vmatprep.subr.bf16.mxu1 %v2180_v63  ;;  %v2270_v63 = vld [vmem:[%s2345_s26 + $0x568] ss:$16 sps:$4 sm:$0xff]  }
  0x8c   : > { %1507 = vmatpush2.bf16.msra.mxu0 %v2175_v0  ;;  %v2275_v0 = vld [vmem:[%s2345_s26 + $0x34c] ss:$16 sps:$4 sm:$0xff]  }
  0x8d   : > { %1548 = vmatpush2.bf16.msra.mxu1 %v2178_v1  ;;  %1508 = vmatprep.subr.bf16.mxu0 %v2183_v2  ;;  %v2278_v1 = vld [vmem:[%s2345_s26 + $0x54c] ss:$16 sps:$4 sm:$0xff]   ;;  %v2273_v2 = vld [vmem:[%s2345_s26 + $0x348] ss:$16 sps:$4 sm:$0xff]  }
  0x8e   : > { %1549 = vmatprep.subr.bf16.mxu1 %v2186_v3  ;;  %v2276_v3 = vld [vmem:[%s2345_s26 + $0x548] ss:$16 sps:$4 sm:$0xff]  }
  0x90   : > { %1509 = vmatpush2.bf16.msra.mxu0 %v2181_v4  ;;  %v2281_v4 = vld [vmem:[%s2345_s26 + $0x32c] ss:$16 sps:$4 sm:$0xff]  }
  0x91   : > { %1550 = vmatpush2.bf16.msra.mxu1 %v2184_v5  ;;  %1510 = vmatprep.subr.bf16.mxu0 %v2189_v6  ;;  %v2284_v5 = vld [vmem:[%s2345_s26 + $0x52c] ss:$16 sps:$4 sm:$0xff]   ;;  %v2279_v6 = vld [vmem:[%s2345_s26 + $0x328] ss:$16 sps:$4 sm:$0xff]  }
  0x92   : > { %1551 = vmatprep.subr.bf16.mxu1 %v2192_v9  ;;  %v2282_v9 = vld [vmem:[%s2345_s26 + $0x528] ss:$16 sps:$4 sm:$0xff]  }
  0x94   : > { %1511 = vmatpush2.bf16.msra.mxu0 %v2187_v10  ;;  %v2287_v10 = vld [vmem:[%s2345_s26 + $0x30c] ss:$16 sps:$4 sm:$0xff]  }
  0x95   : > { %1552 = vmatpush2.bf16.msra.mxu1 %v2190_v11  ;;  %1562 = vmatprep.subr.bf16.mxu0 %v2197_v12  ;;  %v2290_v11 = vld [vmem:[%s2345_s26 + $0x50c] ss:$16 sps:$4 sm:$0xff]   ;;  %v2285_v12 = vld [vmem:[%s2345_s26 + $0x308] ss:$16 sps:$4 sm:$0xff]  }
  0x96   : > { %1603 = vmatprep.subr.bf16.mxu1 %v2200_v13  ;;  %v2288_v13 = vld [vmem:[%s2345_s26 + $0x508] ss:$16 sps:$4 sm:$0xff]  }
  0x97   : > { %1513 = vmatmul.mubr.bf16.vlgmr.msra.gmra.mxu0 %v2503_v14 }
  0x98   : > { %1554 = vmatmul.mubr.bf16.vlgmr.msra.gmra.mxu1 %v2422_v7  ;;  %1563 = vmatpush1.bf16.msra.mxu0 %v2195_v15  ;;  %v2207_v7 = vld [vmem:[%s2345_s26 + $0x2a8] ss:$16 sps:$4 sm:$0xff]  }
  0x99   : > { %1604 = vmatpush1.bf16.msra.mxu1 %v2198_v16  ;;  %1564 = vmatprep.subr.bf16.mxu0 %v2203_v17 }
  0x9a   : > { %1605 = vmatprep.subr.bf16.mxu1 %v2206_v18  ;;  %1594 = vmatprep.mubr.bf16.mxu0 %v2400_v52  ;;  %v2216_v52 = vld [vmem:[%s2345_s26 + $0x488] ss:$16 sps:$4 sm:$0xff]  }
  0x9b   : > { %1635 = vmatprep.mubr.bf16.mxu1 %v2459_v35  ;;  %v2233_v35 = vld [vmem:[%s2345_s26 + $0x22c] ss:$16 sps:$4 sm:$0xff]  }
  0x9c   : > { %1565 = vmatpush1.bf16.msra.mxu0 %v2201_v19 }
  0x9d   : > { %1606 = vmatpush1.bf16.msra.mxu1 %v2204_v20  ;;  %1566 = vmatprep.subr.bf16.mxu0 %v2209_v21 }
  0x9e   : > { %1607 = vmatprep.subr.bf16.mxu1 %v2212_v22 }
  0xa0   : > { %1567 = vmatpush1.bf16.msra.mxu0 %v2207_v7 }
  0xa1   : > { %1608 = vmatpush1.bf16.msra.mxu1 %v2210_v23  ;;  %1568 = vmatprep.subr.bf16.mxu0 %v2215_v24  ;;  %v218_v23 = vld [vmem:[#allocation2 + $0x10] sm:$0xff] }
  0xa2   : > { %1609 = vmatprep.subr.bf16.mxu1 %v2218_v25 }
  0xa4   : > { %1569 = vmatpush1.bf16.msra.mxu0 %v2213_v26 }
  0xa5   : > { %1610 = vmatpush1.bf16.msra.mxu1 %v2216_v52  ;;  %1570 = vmatprep.subr.bf16.mxu0 %v2221_v27  ;;  %v219_v27 = vld [vmem:[#allocation2] sm:$0xff] }
  0xa6   : > { %1611 = vmatprep.subr.bf16.mxu1 %v2224_v28 }
  0xa8   : > { %1571 = vmatpush1.bf16.msra.mxu0 %v2219_v29 }
  0xa9   : > { %1612 = vmatpush1.bf16.msra.mxu1 %v2222_v30  ;;  %1572 = vmatprep.subr.bf16.mxu0 %v2227_v31 }
  0xaa   : > { %1613 = vmatprep.subr.bf16.mxu1 %v2230_v32 }
  0xac   : > { %1573 = vmatpush1.bf16.msra.mxu0 %v2225_v33 }
  0xad   : > { %1614 = vmatpush1.bf16.msra.mxu1 %v2228_v34  ;;  %1574 = vmatprep.subr.bf16.mxu0 %v2233_v35 }
  0xae   : > { %1615 = vmatprep.subr.bf16.mxu1 %v2236_v36 }
  0xb0   : > { %1575 = vmatpush1.bf16.msra.mxu0 %v2231_v37 }
  0xb1   : > { %1616 = vmatpush1.bf16.msra.mxu1 %v2234_v38  ;;  %1576 = vmatprep.subr.bf16.mxu0 %v2239_v39  ;;  %v220_v38 = vld [vmem:[#allocation2 + $0x18] sm:$0xff] }
  0xb2   : > { %1617 = vmatprep.subr.bf16.mxu1 %v2242_v40 }
  0xb4   : > { %1577 = vmatpush1.bf16.msra.mxu0 %v2237_v41 }
  0xb5   : > { %1618 = vmatpush1.bf16.msra.mxu1 %v2240_v42  ;;  %1578 = vmatprep.subr.bf16.mxu0 %v2245_v43  ;;  %v221_v43 = vld [vmem:[#allocation2 + $0x8] sm:$0xff] }
  0xb6   : > { %1619 = vmatprep.subr.bf16.mxu1 %v2248_v44 }
  0xb8   : > { %1579 = vmatpush2.bf16.msra.mxu0 %v2243_v45 }
  0xb9   : > { %1620 = vmatpush2.bf16.msra.mxu1 %v2246_v46  ;;  %1580 = vmatprep.subr.bf16.mxu0 %v2251_v47 }
  0xba   : > { %1621 = vmatprep.subr.bf16.mxu1 %v2254_v48 }
  0xbc   : > { %1581 = vmatpush2.bf16.msra.mxu0 %v2249_v49 }
  0xbd   : > { %1622 = vmatpush2.bf16.msra.mxu1 %v2252_v50  ;;  %1582 = vmatprep.subr.bf16.mxu0 %v2257_v51 }
  0xbe   : > { %1623 = vmatprep.subr.bf16.mxu1 %v2260_v53 }
  0xc0   : > { %1583 = vmatpush2.bf16.msra.mxu0 %v2255_v54 }
  0xc1   : > { %1624 = vmatpush2.bf16.msra.mxu1 %v2258_v55  ;;  %1584 = vmatprep.subr.bf16.mxu0 %v2263_v56 }
  0xc2   : > { %1625 = vmatprep.subr.bf16.mxu1 %v2266_v57 }
  0xc4   : > { %1585 = vmatpush2.bf16.msra.mxu0 %v2261_v58 }
  0xc5   : > { %1626 = vmatpush2.bf16.msra.mxu1 %v2264_v59  ;;  %1586 = vmatprep.subr.bf16.mxu0 %v2269_v60 }
  0xc6   : > { %1627 = vmatprep.subr.bf16.mxu1 %v2272_v61 }
  0xc8   : > { %1587 = vmatpush2.bf16.msra.mxu0 %v2267_v62 }
  0xc9   : > { %1628 = vmatpush2.bf16.msra.mxu1 %v2270_v63  ;;  %1588 = vmatprep.subr.bf16.mxu0 %v2275_v0 }
  0xca   : > { %1629 = vmatprep.subr.bf16.mxu1 %v2278_v1 }
  0xcc   : > { %1589 = vmatpush2.bf16.msra.mxu0 %v2273_v2 }
  0xcd   : > { %1630 = vmatpush2.bf16.msra.mxu1 %v2276_v3  ;;  %1590 = vmatprep.subr.bf16.mxu0 %v2281_v4 }
  0xce   : > { %1631 = vmatprep.subr.bf16.mxu1 %v2284_v5 }
  0xd0   : > { %1591 = vmatpush2.bf16.msra.mxu0 %v2279_v6 }
  0xd1   : > { %1632 = vmatpush2.bf16.msra.mxu1 %v2282_v9  ;;  %1592 = vmatprep.subr.bf16.mxu0 %v2287_v10 }
  0xd2   : > { %1633 = vmatprep.subr.bf16.mxu1 %v2290_v11 }
  0xd4   : > { %1593 = vmatpush2.bf16.msra.mxu0 %v2285_v12 }
  0xd5   : > { %1634 = vmatpush2.bf16.msra.mxu1 %v2288_v13 }
  0xd7   : > { %1595 = vmatmul.mubr.bf16.vlgmr.msra.gmra.mxu0 %v2424_v8 }
  0xd8   : > { %1636 = vmatmul.mubr.bf16.vlgmr.msra.gmra.mxu1 %v2503_v14 }
 0x117   : > { %v1432_v15 = vpop.f32.mrf.mxu0 }
 0x118   : > { %v1473_v16 = vpop.f32.mrf.mxu1 }
 0x119   : > { %v1434_v17 = vpop.f32.mrf.mxu0  ;;  %v1474_v7 = vadd.f32 %v1473_v16, %v1432_v15 }
 0x11a   : > { %v1475_v18 = vpop.f32.mrf.mxu1 }
 0x11b   : > { %v1436_v19 = vpop.f32.mrf.mxu0  ;;  %v1476_v26 = vadd.f32 %v1475_v18, %v1434_v17 }
 0x11c   : > { %v1477_v20 = vpop.f32.mrf.mxu1 }
 0x11d   : > { %v1437_v21 = vpop.f32.mrf.mxu0 }
 0x11e   : > { %v1478_v22 = vpop.f32.mrf.mxu1 }
 0x157   : > { %v1514_v24 = vpop.f32.mrf.mxu0 }
 0x158   : > { %v1555_v25 = vpop.f32.mrf.mxu1  ;;  %v1515_v52 = vadd.f32 %v1514_v24, %v1474_v7 }
 0x159   : > { %v1516_v28 = vpop.f32.mrf.mxu0 }
 0x15a   : > { %v1557_v29 = vpop.f32.mrf.mxu1  ;;  %v1644_v8 = vadd.f32 %v1515_v52, %v218_v23  ;;  %v1517_v30 = vadd.f32 %v1516_v28, %v1476_v26 }
 0x15b   : > { %v1518_v14 = vpop.f32.mrf.mxu0 }
 0x15c   : > { %v1559_v31 = vpop.f32.mrf.mxu1  ;;  %1648 = vst [vmem:[#allocation2 + $0x10] sm:$0xff] %v1644_v8  ;;  %v1645_v32 = vadd.f32 %v1517_v30, %v219_v27 }
 0x15d   : > { %v1519_v33 = vpop.f32.mrf.mxu0 }
 0x15e   : > { %v1560_v34 = vpop.f32.mrf.mxu1  ;;  %1649 = vst [vmem:[#allocation2] sm:$0xff] %v1645_v32 }
 0x197   : > { %v1596_v35 = vpop.f32.mrf.mxu0 }
 0x198   : > { %v1637_v36 = vpop.f32.mrf.mxu1  ;;  %v1597_v37 = vadd.f32 %v1596_v35, %v1555_v25 }
 0x199   : > { %v1598_v39 = vpop.f32.mrf.mxu0 }
 0x19a   : > { %v1639_v40 = vpop.f32.mrf.mxu1  ;;  %v1638_v41 = vadd.f32 %v1637_v36, %v1597_v37  ;;  %v1599_v42 = vadd.f32 %v1598_v39, %v1557_v29 }
 0x19b   : > { %v1600_v44 = vpop.f32.mrf.mxu0 }
 0x19c   : > { %v1641_v45 = vpop.f32.mrf.mxu1  ;;  %v1646_v46 = vadd.f32 %v1638_v41, %v220_v38  ;;  %v1640_v47 = vadd.f32 %v1639_v40, %v1599_v42  ;;  %1655 = sbr.rel (%p1980_p6) target bundleno = 435 (0x1b3), region = 44 }
 0x19d   : > { %v1601_v48 = vpop.f32.mrf.mxu0 }
 0x19e   : > { %v1642_v49 = vpop.f32.mrf.mxu1  ;;  %1650 = vst [vmem:[#allocation2 + $0x18] sm:$0xff] %v1646_v46  ;;  %v1647_v50 = vadd.f32 %v1640_v47, %v221_v43 }
 0x1a0   : > { %1651 = vst [vmem:[#allocation2 + $0x8] sm:$0xff] %v1647_v50 }
 0x1a1   : > { %v1662_v51 = vlaneseq  ;;  %v1660_v54 = vld [vmem:[%s2591_s2] sm:$0xf]  ;;  %v1656_v60 = vld [vmem:[#allocation2 + $0x10] sm:$0xff] }
 0x1a2   : > { %v1686_v55 = vld [vmem:[%s2592_s3] sm:$0xf] }
 0x1a3   : > { %v1663_v53 = vshrl.u32 %v1662_v51, 7  ;;  %v1657_v61 = vld [vmem:[#allocation2] sm:$0xff] }
 0x1a5   : > { %v1664_v56 = vsub.s32 0, %v1663_v53  ;;  %v1668_v57 = vsub.s32 1, %v1663_v53  ;;  %v1672_v58 = vsub.s32 2, %v1663_v53  ;;  %v1676_v59 = vsub.s32 3, %v1663_v53  ;;  %v1658_v2 = vld [vmem:[#allocation2 + $0x18] sm:$0xff] }
 0x1a7   : > { %v1665_v62 = vrot.slane %v1660_v54, %v1664_v56  ;;  %v1669_v63 = vrot.slane %v1660_v54, %v1668_v57  ;;  %v1691_v0 = vrot.slane %v1686_v55, %v1664_v56  ;;  %v1695_v1 = vrot.slane %v1686_v55, %v1668_v57  ;;  %v1659_v3 = vld [vmem:[#allocation2 + $0x8] sm:$0xff] }
 0x1a8   : > { %v1673_v4 = vrot.slane %v1660_v54, %v1672_v58  ;;  %v1677_v5 = vrot.slane %v1660_v54, %v1676_v59  ;;  %v1699_v6 = vrot.slane %v1686_v55, %v1672_v58  ;;  %v1703_v9 = vrot.slane %v1686_v55, %v1676_v59 }
 0x1a9   : > { %v1682_v10 = vmul.f32 %v1665_v62, %v1656_v60  ;;  %v1683_v11 = vmul.f32 %v1669_v63, %v1657_v61 }
 0x1aa   : > { %v1684_v12 = vmul.f32 %v1673_v4, %v1658_v2  ;;  %v1685_v13 = vmul.f32 %v1677_v5, %v1659_v3 }
 0x1ab   : > { %v1708_v15 = vadd.f32 %v1691_v0, %v1682_v10  ;;  %v1709_v16 = vadd.f32 %v1695_v1, %v1683_v11 }
 0x1ac   : > { %v1710_v17 = vadd.f32 %v1699_v6, %v1684_v12  ;;  %v1711_v18 = vadd.f32 %v1703_v9, %v1685_v13 }
 0x1ad   : > { %v1712_v19 = vmax.f32 %v1708_v15, 0.0  ;;  %v1713_v20 = vmax.f32 %v1709_v16, 0.0 }
 0x1ae   : > { %v1714_v21 = vmax.f32 %v1710_v17, 0.0  ;;  %v1715_v22 = vmax.f32 %v1711_v18, 0.0 }
 0x1af   : > { %v1986_v7 = vpack.c.bf16 %v1713_v20, %v1712_v19 }
 0x1b0   : > { %v1987_v23 = vpack.c.bf16 %v1715_v22, %v1714_v21 }
 0x1b1   : > { %1732 = vst [vmem:[%s2593_s4] sm:$0xff] %v1986_v7 }
 0x1b2   : > { %1733 = vst [vmem:[%s2593_s4 + $0x8] sm:$0xff] %v1987_v23 }
 0x1b3 PF: > { %s14_s15 = sadd.s32 1, %s2297_s15  }
 0x1b4   : > { %p11_p7 = scmp.ge.s32.totalorder %s14_s15, 5  }
 0x1b6   :  { %13 = sbr.rel (!%p11_p7) target bundleno = 1 (0x1), region = 73 }

// kernel: resnet18_sigmoid_forward.38
= control target key start
LH: loop header
LB: loop body
LE: loop exit
PB: predicated region body
PF: predicated region fallthrough
CT: control target
= control target key end

     0   :  { %s1731_s18 = smov 0   ;;  %s1918_s0 = inlined_call_operand.vmem [shape: bf16[8,4608], index: 0, kind: input, shape index: {}]   ;;  %s1919_s1 = inlined_call_operand.vmem [shape: bf16[4608,512], index: 1, kind: input, shape index: {}]   ;;  %s1920_s2 = inlined_call_operand.vmem [shape: f32[1,512], index: 2, kind: input, shape index: {}]   ;;  %s1921_s3 = inlined_call_operand.vmem [shape: f32[1,512], index: 3, kind: input, shape index: {}]   ;;  %s1922_s4 = inlined_call_operand.vmem [shape: bf16[8,512], index: 4, kind: input, shape index: {}]   ;;  %s1923_s5 = inlined_call_operand.vmem [shape: bf16[8,512], index: 5, kind: output, shape index: {}]  }
   0x1 LB: > { %s1737_s19 = sadd.s32 4294967295, %s1698_s18   ;;  %p1340_p0 = scmp.ge.s32.totalorder %s1698_s18, 1  ;;  %s1698_s18 = sphi %s1731_s18, %s15_s18  }
   0x2   : > { %p195_p1 = scmp.lt.s32.totalorder %s1698_s18, 10 }
   0x4   : > { %p196_p2 = pnand %p1340_p0, %p195_p1 }
   0x5   : > { %s1341_s20 = sshll.u32 (!%p196_p2), %s1737_s19, 2  ;;  %s1343_s21 = sshll.u32 (!%p196_p2), %s1737_s19, 6 }
   0x6   : > { %199 = sbr.rel (%p196_p2) target bundleno = 372 (0x174), region = 40  ;;  %p225_p3 = scmp.lt.s32.totalorder (!%p196_p2), %s1341_s20, 35 }
   0x7   : > { %p231_p4 = scmp.lt.s32.totalorder (!%p196_p2), %s1343_s21, 575  ;;  %p1346_p5 = scmp.ne.s32.totalorder (!%p196_p2), %s1737_s19, 0 }
   0xb   : > { %s1925_s20 = smov (!%p225_p3, %s1341_s20), 35  ;;  %s1927_s21 = smov (!%p231_p4, %s1343_s21), 575 }
   0xc   : > { %s1342_s22 = sshll.u32 %s1925_s20, 2  ;;  %s1484_s26 = sshll.u32 %s1927_s21, 4 }
   0xd   : > { %s1746_s25 = scalar_lea.vmem %s1918_s0, %s1342_s22  ;;  %s1751_s29 = scalar_lea.vmem %s1919_s1, %s1484_s26 }
   0xe   : > { %240 = sbr.rel (%p1346_p5) target bundleno = 22 (0x16), region = 44 }
  0x13   : > { %v1700_v0 = vmov 0.0  }
  0x14   : > { %241 = vst [vmem:[#allocation2 + $0x10] sm:$0xff] %v1700_v0  ;;  %242 = vst [vmem:[#allocation2] sm:$0xff] %v1700_v0 }
  0x15   : > { %243 = vst [vmem:[#allocation2 + $0x18] sm:$0xff] %v1700_v0  ;;  %244 = vst [vmem:[#allocation2 + $0x8] sm:$0xff] %v1700_v0 }
  0x16 PF: > { %v1496_v1 = vld [vmem:[%s1751_s29 + $0xe4] ss:$16 sps:$4 sm:$0xff]   ;;  %v1500_v3 = vld [vmem:[%s1751_s29 + $0xe0] ss:$16 sps:$4 sm:$0xff]   ;;  %v250_v49 = vld [vmem:[%s1746_s25 + $0x8] sm:$0xff]  ;;  %p1479_p6 = scmp.ne.s32.totalorder %s1737_s19, 8 }
  0x17   : > { %v1498_v2 = vld [vmem:[%s1751_s29 + $0x2e4] ss:$16 sps:$4 sm:$0xff]   ;;  %1033 = vmatprep.subr.bf16.mxu0 %v1496_v1  ;;  %v1501_v4 = vld [vmem:[%s1751_s29 + $0x2e0] ss:$16 sps:$4 sm:$0xff]   ;;  %v1350_v52 = vcombine.high %v250_v49, %v250_v49 }
  0x18   : > { %1074 = vmatprep.subr.bf16.mxu1 %v1498_v2  ;;  %v1502_v5 = vld [vmem:[%s1751_s29 + $0xc4] ss:$16 sps:$4 sm:$0xff]   ;;  %1034 = vmatpush1.bf16.msra.mxu0 %v1500_v3  ;;  %v1506_v7 = vld [vmem:[%s1751_s29 + $0xc0] ss:$16 sps:$4 sm:$0xff]  }
  0x19   : > { %1075 = vmatpush1.bf16.msra.mxu1 %v1501_v4  ;;  %v1504_v6 = vld [vmem:[%s1751_s29 + $0x2c4] ss:$16 sps:$4 sm:$0xff]   ;;  %1035 = vmatprep.subr.bf16.mxu0 %v1502_v5  ;;  %v1507_v8 = vld [vmem:[%s1751_s29 + $0x2c0] ss:$16 sps:$4 sm:$0xff]   ;;  %v1598_v5 = vld [vmem:[%s1751_s29 + $0xec] ss:$16 sps:$4 sm:$0xff]  }
  0x1a   : > { %1076 = vmatprep.subr.bf16.mxu1 %v1504_v6  ;;  %v1508_v9 = vld [vmem:[%s1751_s29 + $0xa4] ss:$16 sps:$4 sm:$0xff]   ;;  %v1512_v11 = vld [vmem:[%s1751_s29 + $0xa0] ss:$16 sps:$4 sm:$0xff]   ;;  %1106 = vmatprep.mubr.bf16.mxu1 %v1350_v52  ;;  %v1601_v6 = vld [vmem:[%s1751_s29 + $0x2ec] ss:$16 sps:$4 sm:$0xff]  }
  0x1b   : > { %v1510_v10 = vld [vmem:[%s1751_s29 + $0x2a4] ss:$16 sps:$4 sm:$0xff]   ;;  %v1513_v12 = vld [vmem:[%s1751_s29 + $0x2a0] ss:$16 sps:$4 sm:$0xff]  }
  0x1c   : > { %1036 = vmatpush1.bf16.msra.mxu0 %v1506_v7  ;;  %v1514_v13 = vld [vmem:[%s1751_s29 + $0x84] ss:$16 sps:$4 sm:$0xff]   ;;  %v1518_v15 = vld [vmem:[%s1751_s29 + $0x80] ss:$16 sps:$4 sm:$0xff]  }
  0x1d   : > { %1077 = vmatpush1.bf16.msra.mxu1 %v1507_v8  ;;  %1037 = vmatprep.subr.bf16.mxu0 %v1508_v9  ;;  %v1516_v14 = vld [vmem:[%s1751_s29 + $0x284] ss:$16 sps:$4 sm:$0xff]   ;;  %v1519_v16 = vld [vmem:[%s1751_s29 + $0x280] ss:$16 sps:$4 sm:$0xff]   ;;  %v1827_v8 = vcombine.low %v250_v49, %v250_v49  ;;  %v1596_v9 = vld [vmem:[%s1751_s29 + $0xe8] ss:$16 sps:$4 sm:$0xff]  }
  0x1e   : > { %1078 = vmatprep.subr.bf16.mxu1 %v1510_v10  ;;  %v1520_v17 = vld [vmem:[%s1751_s29 + $0x64] ss:$16 sps:$4 sm:$0xff]   ;;  %v1524_v19 = vld [vmem:[%s1751_s29 + $0x60] ss:$16 sps:$4 sm:$0xff]   ;;  %v1599_v10 = vld [vmem:[%s1751_s29 + $0x2e8] ss:$16 sps:$4 sm:$0xff]  }
  0x1f   : > { %v1522_v18 = vld [vmem:[%s1751_s29 + $0x264] ss:$16 sps:$4 sm:$0xff]   ;;  %v1525_v20 = vld [vmem:[%s1751_s29 + $0x260] ss:$16 sps:$4 sm:$0xff]   ;;  %v1656_v49 = vld [vmem:[%s1751_s29 + $0x1a8] ss:$16 sps:$4 sm:$0xff]  }
  0x20   : > { %1038 = vmatpush1.bf16.msra.mxu0 %v1512_v11  ;;  %v1526_v21 = vld [vmem:[%s1751_s29 + $0x44] ss:$16 sps:$4 sm:$0xff]   ;;  %v1530_v23 = vld [vmem:[%s1751_s29 + $0x40] ss:$16 sps:$4 sm:$0xff]   ;;  %v1604_v11 = vld [vmem:[%s1751_s29 + $0xcc] ss:$16 sps:$4 sm:$0xff]  }
  0x21   : > { %1079 = vmatpush1.bf16.msra.mxu1 %v1513_v12  ;;  %1039 = vmatprep.subr.bf16.mxu0 %v1514_v13  ;;  %v1528_v22 = vld [vmem:[%s1751_s29 + $0x244] ss:$16 sps:$4 sm:$0xff]   ;;  %v1531_v24 = vld [vmem:[%s1751_s29 + $0x240] ss:$16 sps:$4 sm:$0xff]   ;;  %v1607_v12 = vld [vmem:[%s1751_s29 + $0x2cc] ss:$16 sps:$4 sm:$0xff]  }
  0x22   : > { %1080 = vmatprep.subr.bf16.mxu1 %v1516_v14  ;;  %v1532_v25 = vld [vmem:[%s1751_s29 + $0x24] ss:$16 sps:$4 sm:$0xff]   ;;  %v1536_v27 = vld [vmem:[%s1751_s29 + $0x20] ss:$16 sps:$4 sm:$0xff]   ;;  %v1602_v13 = vld [vmem:[%s1751_s29 + $0xc8] ss:$16 sps:$4 sm:$0xff]  }
  0x23   : > { %v1534_v26 = vld [vmem:[%s1751_s29 + $0x224] ss:$16 sps:$4 sm:$0xff]   ;;  %v1537_v28 = vld [vmem:[%s1751_s29 + $0x220] ss:$16 sps:$4 sm:$0xff]   ;;  %v1605_v14 = vld [vmem:[%s1751_s29 + $0x2c8] ss:$16 sps:$4 sm:$0xff]  }
  0x24   : > { %1040 = vmatpush1.bf16.msra.mxu0 %v1518_v15  ;;  %v1538_v29 = vld [vmem:[%s1751_s29 + $0x4] ss:$16 sps:$4 sm:$0xff]   ;;  %v1542_v31 = vld [vmem:[%s1751_s29] ss:$16 sps:$4 sm:$0xff]   ;;  %v1610_v15 = vld [vmem:[%s1751_s29 + $0xac] ss:$16 sps:$4 sm:$0xff]  }
  0x25   : > { %1081 = vmatpush1.bf16.msra.mxu1 %v1519_v16  ;;  %1041 = vmatprep.subr.bf16.mxu0 %v1520_v17  ;;  %v1540_v30 = vld [vmem:[%s1751_s29 + $0x204] ss:$16 sps:$4 sm:$0xff]   ;;  %v1543_v32 = vld [vmem:[%s1751_s29 + $0x200] ss:$16 sps:$4 sm:$0xff]   ;;  %v1613_v16 = vld [vmem:[%s1751_s29 + $0x2ac] ss:$16 sps:$4 sm:$0xff]  }
  0x26   : > { %1082 = vmatprep.subr.bf16.mxu1 %v1522_v18  ;;  %v1544_v33 = vld [vmem:[%s1751_s29 + $0x1e4] ss:$16 sps:$4 sm:$0xff]   ;;  %v1548_v35 = vld [vmem:[%s1751_s29 + $0x1e0] ss:$16 sps:$4 sm:$0xff]   ;;  %v1608_v17 = vld [vmem:[%s1751_s29 + $0xa8] ss:$16 sps:$4 sm:$0xff]  }
  0x27   : > { %v1546_v34 = vld [vmem:[%s1751_s29 + $0x3e4] ss:$16 sps:$4 sm:$0xff]   ;;  %v1549_v36 = vld [vmem:[%s1751_s29 + $0x3e0] ss:$16 sps:$4 sm:$0xff]   ;;  %v1611_v18 = vld [vmem:[%s1751_s29 + $0x2a8] ss:$16 sps:$4 sm:$0xff]  }
  0x28   : > { %1042 = vmatpush1.bf16.msra.mxu0 %v1524_v19  ;;  %v1550_v37 = vld [vmem:[%s1751_s29 + $0x1c4] ss:$16 sps:$4 sm:$0xff]   ;;  %v1554_v39 = vld [vmem:[%s1751_s29 + $0x1c0] ss:$16 sps:$4 sm:$0xff]   ;;  %v1616_v19 = vld [vmem:[%s1751_s29 + $0x8c] ss:$16 sps:$4 sm:$0xff]  }
  0x29   : > { %1083 = vmatpush1.bf16.msra.mxu1 %v1525_v20  ;;  %1043 = vmatprep.subr.bf16.mxu0 %v1526_v21  ;;  %v1552_v38 = vld [vmem:[%s1751_s29 + $0x3c4] ss:$16 sps:$4 sm:$0xff]   ;;  %v1555_v40 = vld [vmem:[%s1751_s29 + $0x3c0] ss:$16 sps:$4 sm:$0xff]   ;;  %v1619_v20 = vld [vmem:[%s1751_s29 + $0x28c] ss:$16 sps:$4 sm:$0xff]  }
  0x2a   : > { %1084 = vmatprep.subr.bf16.mxu1 %v1528_v22  ;;  %v1556_v41 = vld [vmem:[%s1751_s29 + $0x1a4] ss:$16 sps:$4 sm:$0xff]   ;;  %v1560_v43 = vld [vmem:[%s1751_s29 + $0x1a0] ss:$16 sps:$4 sm:$0xff]   ;;  %v1614_v21 = vld [vmem:[%s1751_s29 + $0x88] ss:$16 sps:$4 sm:$0xff]  }
  0x2b   : > { %v1558_v42 = vld [vmem:[%s1751_s29 + $0x3a4] ss:$16 sps:$4 sm:$0xff]   ;;  %v1561_v44 = vld [vmem:[%s1751_s29 + $0x3a0] ss:$16 sps:$4 sm:$0xff]   ;;  %v1617_v22 = vld [vmem:[%s1751_s29 + $0x288] ss:$16 sps:$4 sm:$0xff]  }
  0x2c   : > { %1044 = vmatpush1.bf16.msra.mxu0 %v1530_v23  ;;  %v1562_v45 = vld [vmem:[%s1751_s29 + $0x184] ss:$16 sps:$4 sm:$0xff]   ;;  %v1566_v50 = vld [vmem:[%s1751_s29 + $0x180] ss:$16 sps:$4 sm:$0xff]   ;;  %v1622_v23 = vld [vmem:[%s1751_s29 + $0x6c] ss:$16 sps:$4 sm:$0xff]  }
  0x2d   : > { %1085 = vmatpush1.bf16.msra.mxu1 %v1531_v24  ;;  %1045 = vmatprep.subr.bf16.mxu0 %v1532_v25  ;;  %v1564_v46 = vld [vmem:[%s1751_s29 + $0x384] ss:$16 sps:$4 sm:$0xff]   ;;  %v1567_v51 = vld [vmem:[%s1751_s29 + $0x380] ss:$16 sps:$4 sm:$0xff]   ;;  %v1625_v24 = vld [vmem:[%s1751_s29 + $0x26c] ss:$16 sps:$4 sm:$0xff]  }
  0x2e   : > { %1086 = vmatprep.subr.bf16.mxu1 %v1534_v26  ;;  %v249_v47 = vld [vmem:[%s1746_s25] sm:$0xff]  ;;  %v1620_v25 = vld [vmem:[%s1751_s29 + $0x68] ss:$16 sps:$4 sm:$0xff]  }
  0x2f   : > { %v1801_v48 = vcombine.high %v249_v47, %v249_v47  ;;  %v1568_v53 = vld [vmem:[%s1751_s29 + $0x164] ss:$16 sps:$4 sm:$0xff]   ;;  %v1572_v55 = vld [vmem:[%s1751_s29 + $0x160] ss:$16 sps:$4 sm:$0xff]   ;;  %v1825_v7 = vcombine.low %v249_v47, %v249_v47  ;;  %v1623_v26 = vld [vmem:[%s1751_s29 + $0x268] ss:$16 sps:$4 sm:$0xff]  }
  0x30   : > { %1046 = vmatpush1.bf16.msra.mxu0 %v1536_v27  ;;  %v1570_v54 = vld [vmem:[%s1751_s29 + $0x364] ss:$16 sps:$4 sm:$0xff]   ;;  %v1573_v56 = vld [vmem:[%s1751_s29 + $0x360] ss:$16 sps:$4 sm:$0xff]   ;;  %v1628_v27 = vld [vmem:[%s1751_s29 + $0x4c] ss:$16 sps:$4 sm:$0xff]  }
  0x31   : > { %1087 = vmatpush1.bf16.msra.mxu1 %v1537_v28  ;;  %1047 = vmatprep.subr.bf16.mxu0 %v1538_v29  ;;  %v1574_v57 = vld [vmem:[%s1751_s29 + $0x144] ss:$16 sps:$4 sm:$0xff]   ;;  %v1578_v59 = vld [vmem:[%s1751_s29 + $0x140] ss:$16 sps:$4 sm:$0xff]   ;;  %v1631_v28 = vld [vmem:[%s1751_s29 + $0x24c] ss:$16 sps:$4 sm:$0xff]  }
  0x32   : > { %1088 = vmatprep.subr.bf16.mxu1 %v1540_v30  ;;  %1065 = vmatprep.mubr.bf16.mxu0 %v1801_v48  ;;  %v1576_v58 = vld [vmem:[%s1751_s29 + $0x344] ss:$16 sps:$4 sm:$0xff]   ;;  %v1579_v60 = vld [vmem:[%s1751_s29 + $0x340] ss:$16 sps:$4 sm:$0xff]   ;;  %v1626_v29 = vld [vmem:[%s1751_s29 + $0x48] ss:$16 sps:$4 sm:$0xff]  }
  0x33   : > { %v1580_v61 = vld [vmem:[%s1751_s29 + $0x124] ss:$16 sps:$4 sm:$0xff]   ;;  %v1584_v63 = vld [vmem:[%s1751_s29 + $0x120] ss:$16 sps:$4 sm:$0xff]   ;;  %v1629_v30 = vld [vmem:[%s1751_s29 + $0x248] ss:$16 sps:$4 sm:$0xff]  }
  0x34   : > { %1048 = vmatpush1.bf16.msra.mxu0 %v1542_v31  ;;  %v1582_v62 = vld [vmem:[%s1751_s29 + $0x324] ss:$16 sps:$4 sm:$0xff]   ;;  %v1585_v0 = vld [vmem:[%s1751_s29 + $0x320] ss:$16 sps:$4 sm:$0xff]   ;;  %v1634_v31 = vld [vmem:[%s1751_s29 + $0x2c] ss:$16 sps:$4 sm:$0xff]  }
  0x35   : > { %1089 = vmatpush1.bf16.msra.mxu1 %v1543_v32  ;;  %1049 = vmatprep.subr.bf16.mxu0 %v1544_v33  ;;  %v1586_v1 = vld [vmem:[%s1751_s29 + $0x104] ss:$16 sps:$4 sm:$0xff]   ;;  %v1590_v3 = vld [vmem:[%s1751_s29 + $0x100] ss:$16 sps:$4 sm:$0xff]   ;;  %v1637_v32 = vld [vmem:[%s1751_s29 + $0x22c] ss:$16 sps:$4 sm:$0xff]  }
  0x36   : > { %1090 = vmatprep.subr.bf16.mxu1 %v1546_v34  ;;  %v1588_v2 = vld [vmem:[%s1751_s29 + $0x304] ss:$16 sps:$4 sm:$0xff]   ;;  %v1591_v4 = vld [vmem:[%s1751_s29 + $0x300] ss:$16 sps:$4 sm:$0xff]   ;;  %v1632_v33 = vld [vmem:[%s1751_s29 + $0x28] ss:$16 sps:$4 sm:$0xff]  }
  0x37   : > { %v1635_v34 = vld [vmem:[%s1751_s29 + $0x228] ss:$16 sps:$4 sm:$0xff]   ;;  %v1658_v47 = vld [vmem:[%s1751_s29 + $0x1ac] ss:$16 sps:$4 sm:$0xff]  }
  0x38   : > { %1050 = vmatpush2.bf16.msra.mxu0 %v1548_v35  ;;  %v1640_v35 = vld [vmem:[%s1751_s29 + $0xc] ss:$16 sps:$4 sm:$0xff]  }
  0x39   : > { %1091 = vmatpush2.bf16.msra.mxu1 %v1549_v36  ;;  %1051 = vmatprep.subr.bf16.mxu0 %v1550_v37  ;;  %v1643_v36 = vld [vmem:[%s1751_s29 + $0x20c] ss:$16 sps:$4 sm:$0xff]   ;;  %v1638_v37 = vld [vmem:[%s1751_s29 + $0x8] ss:$16 sps:$4 sm:$0xff]  }
  0x3a   : > { %1092 = vmatprep.subr.bf16.mxu1 %v1552_v38  ;;  %v1641_v38 = vld [vmem:[%s1751_s29 + $0x208] ss:$16 sps:$4 sm:$0xff]  }
  0x3c   : > { %1052 = vmatpush2.bf16.msra.mxu0 %v1554_v39  ;;  %v1646_v39 = vld [vmem:[%s1751_s29 + $0x1ec] ss:$16 sps:$4 sm:$0xff]  }
  0x3d   : > { %1093 = vmatpush2.bf16.msra.mxu1 %v1555_v40  ;;  %1053 = vmatprep.subr.bf16.mxu0 %v1556_v41  ;;  %v1649_v40 = vld [vmem:[%s1751_s29 + $0x3ec] ss:$16 sps:$4 sm:$0xff]   ;;  %v1644_v41 = vld [vmem:[%s1751_s29 + $0x1e8] ss:$16 sps:$4 sm:$0xff]  }
  0x3e   : > { %1094 = vmatprep.subr.bf16.mxu1 %v1558_v42  ;;  %v1647_v42 = vld [vmem:[%s1751_s29 + $0x3e8] ss:$16 sps:$4 sm:$0xff]  }
  0x40   : > { %1054 = vmatpush2.bf16.msra.mxu0 %v1560_v43  ;;  %v1652_v43 = vld [vmem:[%s1751_s29 + $0x1cc] ss:$16 sps:$4 sm:$0xff]  }
  0x41   : > { %1095 = vmatpush2.bf16.msra.mxu1 %v1561_v44  ;;  %1055 = vmatprep.subr.bf16.mxu0 %v1562_v45  ;;  %v1655_v44 = vld [vmem:[%s1751_s29 + $0x3cc] ss:$16 sps:$4 sm:$0xff]   ;;  %v1650_v45 = vld [vmem:[%s1751_s29 + $0x1c8] ss:$16 sps:$4 sm:$0xff]  }
  0x42   : > { %1096 = vmatprep.subr.bf16.mxu1 %v1564_v46  ;;  %v1653_v46 = vld [vmem:[%s1751_s29 + $0x3c8] ss:$16 sps:$4 sm:$0xff]  }
  0x44   : > { %1056 = vmatpush2.bf16.msra.mxu0 %v1566_v50  ;;  %v1659_v50 = vld [vmem:[%s1751_s29 + $0x3a8] ss:$16 sps:$4 sm:$0xff]  }
  0x45   : > { %1097 = vmatpush2.bf16.msra.mxu1 %v1567_v51  ;;  %1057 = vmatprep.subr.bf16.mxu0 %v1568_v53  ;;  %v1664_v51 = vld [vmem:[%s1751_s29 + $0x18c] ss:$16 sps:$4 sm:$0xff]   ;;  %v1662_v53 = vld [vmem:[%s1751_s29 + $0x188] ss:$16 sps:$4 sm:$0xff]  }
  0x46   : > { %1098 = vmatprep.subr.bf16.mxu1 %v1570_v54  ;;  %v1665_v54 = vld [vmem:[%s1751_s29 + $0x388] ss:$16 sps:$4 sm:$0xff]  }
  0x48   : > { %1058 = vmatpush2.bf16.msra.mxu0 %v1572_v55  ;;  %v1670_v55 = vld [vmem:[%s1751_s29 + $0x16c] ss:$16 sps:$4 sm:$0xff]  }
  0x49   : > { %1099 = vmatpush2.bf16.msra.mxu1 %v1573_v56  ;;  %1059 = vmatprep.subr.bf16.mxu0 %v1574_v57  ;;  %v1673_v56 = vld [vmem:[%s1751_s29 + $0x36c] ss:$16 sps:$4 sm:$0xff]   ;;  %v1668_v57 = vld [vmem:[%s1751_s29 + $0x168] ss:$16 sps:$4 sm:$0xff]  }
  0x4a   : > { %1100 = vmatprep.subr.bf16.mxu1 %v1576_v58  ;;  %v1671_v58 = vld [vmem:[%s1751_s29 + $0x368] ss:$16 sps:$4 sm:$0xff]  }
  0x4c   : > { %1060 = vmatpush2.bf16.msra.mxu0 %v1578_v59  ;;  %v1676_v59 = vld [vmem:[%s1751_s29 + $0x14c] ss:$16 sps:$4 sm:$0xff]  }
  0x4d   : > { %1101 = vmatpush2.bf16.msra.mxu1 %v1579_v60  ;;  %1061 = vmatprep.subr.bf16.mxu0 %v1580_v61  ;;  %v1679_v60 = vld [vmem:[%s1751_s29 + $0x34c] ss:$16 sps:$4 sm:$0xff]   ;;  %v1674_v61 = vld [vmem:[%s1751_s29 + $0x148] ss:$16 sps:$4 sm:$0xff]  }
  0x4e   : > { %1102 = vmatprep.subr.bf16.mxu1 %v1582_v62  ;;  %v1677_v62 = vld [vmem:[%s1751_s29 + $0x348] ss:$16 sps:$4 sm:$0xff]  }
  0x50   : > { %1062 = vmatpush2.bf16.msra.mxu0 %v1584_v63  ;;  %v1682_v63 = vld [vmem:[%s1751_s29 + $0x12c] ss:$16 sps:$4 sm:$0xff]  }
  0x51   : > { %1103 = vmatpush2.bf16.msra.mxu1 %v1585_v0  ;;  %1063 = vmatprep.subr.bf16.mxu0 %v1586_v1  ;;  %v1685_v0 = vld [vmem:[%s1751_s29 + $0x32c] ss:$16 sps:$4 sm:$0xff]   ;;  %v1680_v1 = vld [vmem:[%s1751_s29 + $0x128] ss:$16 sps:$4 sm:$0xff]  }
  0x52   : > { %1104 = vmatprep.subr.bf16.mxu1 %v1588_v2  ;;  %v1683_v2 = vld [vmem:[%s1751_s29 + $0x328] ss:$16 sps:$4 sm:$0xff]  }
  0x54   : > { %1064 = vmatpush2.bf16.msra.mxu0 %v1590_v3  ;;  %v1688_v3 = vld [vmem:[%s1751_s29 + $0x10c] ss:$16 sps:$4 sm:$0xff]  }
  0x55   : > { %1105 = vmatpush2.bf16.msra.mxu1 %v1591_v4  ;;  %1115 = vmatprep.subr.bf16.mxu0 %v1598_v5  ;;  %v1691_v4 = vld [vmem:[%s1751_s29 + $0x30c] ss:$16 sps:$4 sm:$0xff]   ;;  %v1686_v5 = vld [vmem:[%s1751_s29 + $0x108] ss:$16 sps:$4 sm:$0xff]  }
  0x56   : > { %1156 = vmatprep.subr.bf16.mxu1 %v1601_v6  ;;  %v1689_v6 = vld [vmem:[%s1751_s29 + $0x308] ss:$16 sps:$4 sm:$0xff]  }
  0x57   : > { %1066 = vmatmul.mubr.bf16.vlgmr.msra.gmra.mxu0 %v1825_v7 }
  0x58   : > { %1107 = vmatmul.mubr.bf16.vlgmr.msra.gmra.mxu1 %v1827_v8  ;;  %1116 = vmatpush1.bf16.msra.mxu0 %v1596_v9 }
  0x59   : > { %1157 = vmatpush1.bf16.msra.mxu1 %v1599_v10  ;;  %1117 = vmatprep.subr.bf16.mxu0 %v1604_v11  ;;  %v245_v10 = vld [vmem:[#allocation2 + $0x10] sm:$0xff] }
  0x5a   : > { %1158 = vmatprep.subr.bf16.mxu1 %v1607_v12  ;;  %1147 = vmatprep.mubr.bf16.mxu0 %v1801_v48  ;;  %v1661_v48 = vld [vmem:[%s1751_s29 + $0x3ac] ss:$16 sps:$4 sm:$0xff]  }
  0x5b   : > { %1188 = vmatprep.mubr.bf16.mxu1 %v1350_v52  ;;  %v1667_v52 = vld [vmem:[%s1751_s29 + $0x38c] ss:$16 sps:$4 sm:$0xff]  }
  0x5c   : > { %1118 = vmatpush1.bf16.msra.mxu0 %v1602_v13 }
  0x5d   : > { %1159 = vmatpush1.bf16.msra.mxu1 %v1605_v14  ;;  %1119 = vmatprep.subr.bf16.mxu0 %v1610_v15  ;;  %v246_v14 = vld [vmem:[#allocation2] sm:$0xff] }
  0x5e   : > { %1160 = vmatprep.subr.bf16.mxu1 %v1613_v16 }
  0x60   : > { %1120 = vmatpush1.bf16.msra.mxu0 %v1608_v17 }
  0x61   : > { %1161 = vmatpush1.bf16.msra.mxu1 %v1611_v18  ;;  %1121 = vmatprep.subr.bf16.mxu0 %v1616_v19 }
  0x62   : > { %1162 = vmatprep.subr.bf16.mxu1 %v1619_v20 }
  0x64   : > { %1122 = vmatpush1.bf16.msra.mxu0 %v1614_v21 }
  0x65   : > { %1163 = vmatpush1.bf16.msra.mxu1 %v1617_v22  ;;  %1123 = vmatprep.subr.bf16.mxu0 %v1622_v23 }
  0x66   : > { %1164 = vmatprep.subr.bf16.mxu1 %v1625_v24 }
  0x68   : > { %1124 = vmatpush1.bf16.msra.mxu0 %v1620_v25 }
  0x69   : > { %1165 = vmatpush1.bf16.msra.mxu1 %v1623_v26  ;;  %1125 = vmatprep.subr.bf16.mxu0 %v1628_v27  ;;  %v248_v26 = vld [vmem:[#allocation2 + $0x8] sm:$0xff] }
  0x6a   : > { %1166 = vmatprep.subr.bf16.mxu1 %v1631_v28 }
  0x6c   : > { %1126 = vmatpush1.bf16.msra.mxu0 %v1626_v29 }
  0x6d   : > { %1167 = vmatpush1.bf16.msra.mxu1 %v1629_v30  ;;  %1127 = vmatprep.subr.bf16.mxu0 %v1634_v31 }
  0x6e   : > { %1168 = vmatprep.subr.bf16.mxu1 %v1637_v32 }
  0x70   : > { %1128 = vmatpush1.bf16.msra.mxu0 %v1632_v33 }
  0x71   : > { %1169 = vmatpush1.bf16.msra.mxu1 %v1635_v34  ;;  %1129 = vmatprep.subr.bf16.mxu0 %v1640_v35 }
  0x72   : > { %1170 = vmatprep.subr.bf16.mxu1 %v1643_v36 }
  0x74   : > { %1130 = vmatpush1.bf16.msra.mxu0 %v1638_v37 }
  0x75   : > { %1171 = vmatpush1.bf16.msra.mxu1 %v1641_v38  ;;  %1131 = vmatprep.subr.bf16.mxu0 %v1646_v39 }
  0x76   : > { %1172 = vmatprep.subr.bf16.mxu1 %v1649_v40 }
  0x78   : > { %1132 = vmatpush2.bf16.msra.mxu0 %v1644_v41 }
  0x79   : > { %1173 = vmatpush2.bf16.msra.mxu1 %v1647_v42  ;;  %1133 = vmatprep.subr.bf16.mxu0 %v1652_v43 }
  0x7a   : > { %1174 = vmatprep.subr.bf16.mxu1 %v1655_v44 }
  0x7c   : > { %1134 = vmatpush2.bf16.msra.mxu0 %v1650_v45 }
  0x7d   : > { %1175 = vmatpush2.bf16.msra.mxu1 %v1653_v46  ;;  %1135 = vmatprep.subr.bf16.mxu0 %v1658_v47 }
  0x7e   : > { %1176 = vmatprep.subr.bf16.mxu1 %v1661_v48 }
  0x80   : > { %1136 = vmatpush2.bf16.msra.mxu0 %v1656_v49 }
  0x81   : > { %1177 = vmatpush2.bf16.msra.mxu1 %v1659_v50  ;;  %1137 = vmatprep.subr.bf16.mxu0 %v1664_v51 }
  0x82   : > { %1178 = vmatprep.subr.bf16.mxu1 %v1667_v52 }
  0x84   : > { %1138 = vmatpush2.bf16.msra.mxu0 %v1662_v53 }
  0x85   : > { %1179 = vmatpush2.bf16.msra.mxu1 %v1665_v54  ;;  %1139 = vmatprep.subr.bf16.mxu0 %v1670_v55 }
  0x86   : > { %1180 = vmatprep.subr.bf16.mxu1 %v1673_v56 }
  0x88   : > { %1140 = vmatpush2.bf16.msra.mxu0 %v1668_v57 }
  0x89   : > { %1181 = vmatpush2.bf16.msra.mxu1 %v1671_v58  ;;  %1141 = vmatprep.subr.bf16.mxu0 %v1676_v59 }
  0x8a   : > { %1182 = vmatprep.subr.bf16.mxu1 %v1679_v60 }
  0x8c   : > { %1142 = vmatpush2.bf16.msra.mxu0 %v1674_v61 }
  0x8d   : > { %1183 = vmatpush2.bf16.msra.mxu1 %v1677_v62  ;;  %1143 = vmatprep.subr.bf16.mxu0 %v1682_v63 }
  0x8e   : > { %1184 = vmatprep.subr.bf16.mxu1 %v1685_v0 }
  0x90   : > { %1144 = vmatpush2.bf16.msra.mxu0 %v1680_v1 }
  0x91   : > { %1185 = vmatpush2.bf16.msra.mxu1 %v1683_v2  ;;  %1145 = vmatprep.subr.bf16.mxu0 %v1688_v3 }
  0x92   : > { %1186 = vmatprep.subr.bf16.mxu1 %v1691_v4 }
  0x94   : > { %1146 = vmatpush2.bf16.msra.mxu0 %v1686_v5 }
  0x95   : > { %1187 = vmatpush2.bf16.msra.mxu1 %v1689_v6 }
  0x97   : > { %1148 = vmatmul.mubr.bf16.vlgmr.msra.gmra.mxu0 %v1825_v7  ;;  %v247_v7 = vld [vmem:[#allocation2 + $0x18] sm:$0xff] }
  0x98   : > { %1189 = vmatmul.mubr.bf16.vlgmr.msra.gmra.mxu1 %v1827_v8 }
 0x117   : > { %v1067_v9 = vpop.f32.mrf.mxu0 }
 0x118   : > { %v1108_v11 = vpop.f32.mrf.mxu1 }
 0x119   : > { %v1109_v12 = vadd.f32 %v1108_v11, %v1067_v9  ;;  %v1069_v13 = vpop.f32.mrf.mxu0 }
 0x11a   : > { %v1110_v15 = vpop.f32.mrf.mxu1 }
 0x11b   : > { %v1197_v16 = vadd.f32 %v1109_v12, %v245_v10  ;;  %v1111_v17 = vadd.f32 %v1110_v15, %v1069_v13  ;;  %v1071_v18 = vpop.f32.mrf.mxu0 }
 0x11c   : > { %v1112_v19 = vpop.f32.mrf.mxu1 }
 0x11d   : > { %1201 = vst [vmem:[#allocation2 + $0x10] sm:$0xff] %v1197_v16  ;;  %v1198_v20 = vadd.f32 %v1111_v17, %v246_v14  ;;  %v1072_v21 = vpop.f32.mrf.mxu0 }
 0x11e   : > { %v1113_v22 = vpop.f32.mrf.mxu1 }
 0x11f   : > { %1202 = vst [vmem:[#allocation2] sm:$0xff] %v1198_v20 }
 0x157   : > { %v1149_v23 = vpop.f32.mrf.mxu0 }
 0x158   : > { %v1190_v24 = vpop.f32.mrf.mxu1 }
 0x159   : > { %v1191_v8 = vadd.f32 %v1190_v24, %v1149_v23  ;;  %v1151_v25 = vpop.f32.mrf.mxu0 }
 0x15a   : > { %v1192_v27 = vpop.f32.mrf.mxu1 }
 0x15b   : > { %v1199_v28 = vadd.f32 %v1191_v8, %v247_v7  ;;  %v1193_v29 = vadd.f32 %v1192_v27, %v1151_v25  ;;  %v1153_v30 = vpop.f32.mrf.mxu0  ;;  %1208 = sbr.rel (%p1479_p6) target bundleno = 372 (0x174), region = 48 }
 0x15c   : > { %v1194_v31 = vpop.f32.mrf.mxu1 }
 0x15d   : > { %1203 = vst [vmem:[#allocation2 + $0x18] sm:$0xff] %v1199_v28  ;;  %v1200_v32 = vadd.f32 %v1193_v29, %v248_v26  ;;  %v1154_v33 = vpop.f32.mrf.mxu0 }
 0x15e   : > { %v1195_v34 = vpop.f32.mrf.mxu1 }
 0x15f   : > { %1204 = vst [vmem:[#allocation2 + $0x8] sm:$0xff] %v1200_v32 }
 0x160   : > { %v1215_v35 = vlaneseq  ;;  %v1213_v37 = vld [vmem:[%s1920_s2] sm:$0xf]  ;;  %v1209_v43 = vld [vmem:[#allocation2 + $0x10] sm:$0xff]  ;;  %v1266_v52 = vld [vmem:[%s1922_s4 + $0x8] sm:$0xff] }
 0x161   : > { %v1239_v38 = vld [vmem:[%s1921_s3] sm:$0xf]  ;;  %v1269_v63 = vunpack.c.l.bf16 %v1266_v52  ;;  %v1270_v0 = vunpack.c.h.bf16 %v1266_v52 }
 0x162   : > { %v1216_v36 = vshrl.u32 %v1215_v35, 7  ;;  %v1210_v44 = vld [vmem:[#allocation2] sm:$0xff] }
 0x163   : > { %v1265_v45 = vld [vmem:[%s1922_s4] sm:$0xff] }
 0x164   : > { %v1217_v39 = vsub.s32 0, %v1216_v36  ;;  %v1221_v40 = vsub.s32 1, %v1216_v36  ;;  %v1225_v41 = vsub.s32 2, %v1216_v36  ;;  %v1229_v42 = vsub.s32 3, %v1216_v36  ;;  %v1211_v50 = vld [vmem:[#allocation2 + $0x18] sm:$0xff] }
 0x165   : > { %v1267_v59 = vunpack.c.l.bf16 %v1265_v45  ;;  %v1268_v60 = vunpack.c.h.bf16 %v1265_v45 }
 0x166   : > { %v1218_v46 = vrot.slane %v1213_v37, %v1217_v39  ;;  %v1222_v47 = vrot.slane %v1213_v37, %v1221_v40  ;;  %v1244_v48 = vrot.slane %v1239_v38, %v1217_v39  ;;  %v1248_v49 = vrot.slane %v1239_v38, %v1221_v40  ;;  %v1212_v51 = vld [vmem:[#allocation2 + $0x8] sm:$0xff] }
 0x167   : > { %v1226_v53 = vrot.slane %v1213_v37, %v1225_v41  ;;  %v1230_v54 = vrot.slane %v1213_v37, %v1229_v42  ;;  %v1252_v55 = vrot.slane %v1239_v38, %v1225_v41  ;;  %v1256_v56 = vrot.slane %v1239_v38, %v1229_v42 }
 0x168   : > { %v1235_v57 = vmul.f32 %v1218_v46, %v1209_v43  ;;  %v1236_v58 = vmul.f32 %v1222_v47, %v1210_v44 }
 0x169   : > { %v1237_v61 = vmul.f32 %v1226_v53, %v1211_v50  ;;  %v1238_v62 = vmul.f32 %v1230_v54, %v1212_v51 }
 0x16a   : > { %v1261_v1 = vadd.f32 %v1244_v48, %v1235_v57  ;;  %v1262_v2 = vadd.f32 %v1248_v49, %v1236_v58 }
 0x16b   : > { %v1263_v3 = vadd.f32 %v1252_v55, %v1237_v61  ;;  %v1264_v4 = vadd.f32 %v1256_v56, %v1238_v62 }
 0x16c   : > { %v1271_v5 = vadd.f32 %v1267_v59, %v1261_v1  ;;  %v1272_v6 = vadd.f32 %v1268_v60, %v1262_v2 }
 0x16d   : > { %v1273_v9 = vadd.f32 %v1269_v63, %v1263_v3  ;;  %v1274_v10 = vadd.f32 %v1270_v0, %v1264_v4 }
 0x16e   : > { %v1275_v11 = vmax.f32 %v1271_v5, 0.0  ;;  %v1276_v12 = vmax.f32 %v1272_v6, 0.0 }
 0x16f   : > { %v1277_v13 = vmax.f32 %v1273_v9, 0.0  ;;  %v1278_v14 = vmax.f32 %v1274_v10, 0.0 }
 0x170   : > { %v1485_v15 = vpack.c.bf16 %v1276_v12, %v1275_v11 }
 0x171   : > { %v1486_v16 = vpack.c.bf16 %v1278_v14, %v1277_v13 }
 0x172   : > { %1295 = vst [vmem:[%s1923_s5] sm:$0xff] %v1485_v15 }
 0x173   : > { %1296 = vst [vmem:[%s1923_s5 + $0x8] sm:$0xff] %v1486_v16 }
 0x174 PF: > { %s15_s18 = sadd.s32 1, %s1698_s18  }
 0x175   : > { %p12_p7 = scmp.ge.s32.totalorder %s15_s18, 11  }
 0x177   :  { %14 = sbr.rel (!%p12_p7) target bundleno = 1 (0x1), region = 77 }

// kernel: resnet18_sigmoid_forward.39
= control target key start
LH: loop header
LB: loop body
LE: loop exit
PB: predicated region body
PF: predicated region fallthrough
CT: control target
= control target key end

     0   :  { %s1689_s15 = smov 0   ;;  %s1870_s0 = inlined_call_operand.vmem [shape: bf16[8,4608], index: 0, kind: input, shape index: {}]   ;;  %s1871_s1 = inlined_call_operand.vmem [shape: bf16[4608,512], index: 1, kind: input, shape index: {}]   ;;  %s1872_s2 = inlined_call_operand.vmem [shape: f32[1,512], index: 2, kind: input, shape index: {}]   ;;  %s1873_s3 = inlined_call_operand.vmem [shape: f32[1,512], index: 3, kind: input, shape index: {}]   ;;  %s1874_s4 = inlined_call_operand.vmem [shape: bf16[8,512], index: 4, kind: output, shape index: {}]  }
   0x1 LB: > { %s1695_s16 = sadd.s32 4294967295, %s1661_s15   ;;  %p1303_p0 = scmp.ge.s32.totalorder %s1661_s15, 1  ;;  %s1661_s15 = sphi %s1689_s15, %s14_s15  }
   0x2   : > { %p170_p1 = scmp.lt.s32.totalorder %s1661_s15, 10 }
   0x4   : > { %p171_p2 = pnand %p1303_p0, %p170_p1 }
   0x5   : > { %s1304_s17 = sshll.u32 (!%p171_p2), %s1695_s16, 2  ;;  %s1306_s18 = sshll.u32 (!%p171_p2), %s1695_s16, 6 }
   0x6   : > { %174 = sbr.rel (%p171_p2) target bundleno = 370 (0x172), region = 36  ;;  %p198_p3 = scmp.lt.s32.totalorder (!%p171_p2), %s1304_s17, 35 }
   0x7   : > { %p204_p4 = scmp.lt.s32.totalorder (!%p171_p2), %s1306_s18, 575  ;;  %p1309_p5 = scmp.ne.s32.totalorder (!%p171_p2), %s1695_s16, 0 }
   0xb   : > { %s1876_s17 = smov (!%p198_p3, %s1304_s17), 35  ;;  %s1878_s18 = smov (!%p204_p4, %s1306_s18), 575 }
   0xc   : > { %s1305_s19 = sshll.u32 %s1876_s17, 2  ;;  %s1447_s23 = sshll.u32 %s1878_s18, 4 }
   0xd   : > { %s1704_s22 = scalar_lea.vmem %s1870_s0, %s1305_s19  ;;  %s1709_s26 = scalar_lea.vmem %s1871_s1, %s1447_s23 }
   0xe   : > { %213 = sbr.rel (%p1309_p5) target bundleno = 22 (0x16), region = 40 }
  0x13   : > { %v1663_v0 = vmov 0.0  }
  0x14   : > { %214 = vst [vmem:[#allocation2 + $0x10] sm:$0xff] %v1663_v0  ;;  %215 = vst [vmem:[#allocation2] sm:$0xff] %v1663_v0 }
  0x15   : > { %216 = vst [vmem:[#allocation2 + $0x18] sm:$0xff] %v1663_v0  ;;  %217 = vst [vmem:[#allocation2 + $0x8] sm:$0xff] %v1663_v0 }
  0x16 PF: > { %v1459_v1 = vld [vmem:[%s1709_s26 + $0xe4] ss:$16 sps:$4 sm:$0xff]   ;;  %v1463_v3 = vld [vmem:[%s1709_s26 + $0xe0] ss:$16 sps:$4 sm:$0xff]   ;;  %v223_v49 = vld [vmem:[%s1704_s22 + $0x8] sm:$0xff]  ;;  %p1442_p6 = scmp.ne.s32.totalorder %s1695_s16, 8 }
  0x17   : > { %v1461_v2 = vld [vmem:[%s1709_s26 + $0x2e4] ss:$16 sps:$4 sm:$0xff]   ;;  %1006 = vmatprep.subr.bf16.mxu0 %v1459_v1  ;;  %v1464_v4 = vld [vmem:[%s1709_s26 + $0x2e0] ss:$16 sps:$4 sm:$0xff]   ;;  %v1313_v52 = vcombine.high %v223_v49, %v223_v49 }
  0x18   : > { %1047 = vmatprep.subr.bf16.mxu1 %v1461_v2  ;;  %v1465_v5 = vld [vmem:[%s1709_s26 + $0xc4] ss:$16 sps:$4 sm:$0xff]   ;;  %1007 = vmatpush1.bf16.msra.mxu0 %v1463_v3  ;;  %v1469_v7 = vld [vmem:[%s1709_s26 + $0xc0] ss:$16 sps:$4 sm:$0xff]  }
  0x19   : > { %1048 = vmatpush1.bf16.msra.mxu1 %v1464_v4  ;;  %v1467_v6 = vld [vmem:[%s1709_s26 + $0x2c4] ss:$16 sps:$4 sm:$0xff]   ;;  %1008 = vmatprep.subr.bf16.mxu0 %v1465_v5  ;;  %v1470_v8 = vld [vmem:[%s1709_s26 + $0x2c0] ss:$16 sps:$4 sm:$0xff]   ;;  %v1561_v5 = vld [vmem:[%s1709_s26 + $0xec] ss:$16 sps:$4 sm:$0xff]  }
  0x1a   : > { %1049 = vmatprep.subr.bf16.mxu1 %v1467_v6  ;;  %v1471_v9 = vld [vmem:[%s1709_s26 + $0xa4] ss:$16 sps:$4 sm:$0xff]   ;;  %v1475_v11 = vld [vmem:[%s1709_s26 + $0xa0] ss:$16 sps:$4 sm:$0xff]   ;;  %1079 = vmatprep.mubr.bf16.mxu1 %v1313_v52  ;;  %v1564_v6 = vld [vmem:[%s1709_s26 + $0x2ec] ss:$16 sps:$4 sm:$0xff]  }
  0x1b   : > { %v1473_v10 = vld [vmem:[%s1709_s26 + $0x2a4] ss:$16 sps:$4 sm:$0xff]   ;;  %v1476_v12 = vld [vmem:[%s1709_s26 + $0x2a0] ss:$16 sps:$4 sm:$0xff]  }
  0x1c   : > { %1009 = vmatpush1.bf16.msra.mxu0 %v1469_v7  ;;  %v1477_v13 = vld [vmem:[%s1709_s26 + $0x84] ss:$16 sps:$4 sm:$0xff]   ;;  %v1481_v15 = vld [vmem:[%s1709_s26 + $0x80] ss:$16 sps:$4 sm:$0xff]  }
  0x1d   : > { %1050 = vmatpush1.bf16.msra.mxu1 %v1470_v8  ;;  %1010 = vmatprep.subr.bf16.mxu0 %v1471_v9  ;;  %v1479_v14 = vld [vmem:[%s1709_s26 + $0x284] ss:$16 sps:$4 sm:$0xff]   ;;  %v1482_v16 = vld [vmem:[%s1709_s26 + $0x280] ss:$16 sps:$4 sm:$0xff]   ;;  %v1785_v8 = vcombine.low %v223_v49, %v223_v49  ;;  %v1559_v9 = vld [vmem:[%s1709_s26 + $0xe8] ss:$16 sps:$4 sm:$0xff]  }
  0x1e   : > { %1051 = vmatprep.subr.bf16.mxu1 %v1473_v10  ;;  %v1483_v17 = vld [vmem:[%s1709_s26 + $0x64] ss:$16 sps:$4 sm:$0xff]   ;;  %v1487_v19 = vld [vmem:[%s1709_s26 + $0x60] ss:$16 sps:$4 sm:$0xff]   ;;  %v1562_v10 = vld [vmem:[%s1709_s26 + $0x2e8] ss:$16 sps:$4 sm:$0xff]  }
  0x1f   : > { %v1485_v18 = vld [vmem:[%s1709_s26 + $0x264] ss:$16 sps:$4 sm:$0xff]   ;;  %v1488_v20 = vld [vmem:[%s1709_s26 + $0x260] ss:$16 sps:$4 sm:$0xff]   ;;  %v1619_v49 = vld [vmem:[%s1709_s26 + $0x1a8] ss:$16 sps:$4 sm:$0xff]  }
  0x20   : > { %1011 = vmatpush1.bf16.msra.mxu0 %v1475_v11  ;;  %v1489_v21 = vld [vmem:[%s1709_s26 + $0x44] ss:$16 sps:$4 sm:$0xff]   ;;  %v1493_v23 = vld [vmem:[%s1709_s26 + $0x40] ss:$16 sps:$4 sm:$0xff]   ;;  %v1567_v11 = vld [vmem:[%s1709_s26 + $0xcc] ss:$16 sps:$4 sm:$0xff]  }
  0x21   : > { %1052 = vmatpush1.bf16.msra.mxu1 %v1476_v12  ;;  %1012 = vmatprep.subr.bf16.mxu0 %v1477_v13  ;;  %v1491_v22 = vld [vmem:[%s1709_s26 + $0x244] ss:$16 sps:$4 sm:$0xff]   ;;  %v1494_v24 = vld [vmem:[%s1709_s26 + $0x240] ss:$16 sps:$4 sm:$0xff]   ;;  %v1570_v12 = vld [vmem:[%s1709_s26 + $0x2cc] ss:$16 sps:$4 sm:$0xff]  }
  0x22   : > { %1053 = vmatprep.subr.bf16.mxu1 %v1479_v14  ;;  %v1495_v25 = vld [vmem:[%s1709_s26 + $0x24] ss:$16 sps:$4 sm:$0xff]   ;;  %v1499_v27 = vld [vmem:[%s1709_s26 + $0x20] ss:$16 sps:$4 sm:$0xff]   ;;  %v1565_v13 = vld [vmem:[%s1709_s26 + $0xc8] ss:$16 sps:$4 sm:$0xff]  }
  0x23   : > { %v1497_v26 = vld [vmem:[%s1709_s26 + $0x224] ss:$16 sps:$4 sm:$0xff]   ;;  %v1500_v28 = vld [vmem:[%s1709_s26 + $0x220] ss:$16 sps:$4 sm:$0xff]   ;;  %v1568_v14 = vld [vmem:[%s1709_s26 + $0x2c8] ss:$16 sps:$4 sm:$0xff]  }
  0x24   : > { %1013 = vmatpush1.bf16.msra.mxu0 %v1481_v15  ;;  %v1501_v29 = vld [vmem:[%s1709_s26 + $0x4] ss:$16 sps:$4 sm:$0xff]   ;;  %v1505_v31 = vld [vmem:[%s1709_s26] ss:$16 sps:$4 sm:$0xff]   ;;  %v1573_v15 = vld [vmem:[%s1709_s26 + $0xac] ss:$16 sps:$4 sm:$0xff]  }
  0x25   : > { %1054 = vmatpush1.bf16.msra.mxu1 %v1482_v16  ;;  %1014 = vmatprep.subr.bf16.mxu0 %v1483_v17  ;;  %v1503_v30 = vld [vmem:[%s1709_s26 + $0x204] ss:$16 sps:$4 sm:$0xff]   ;;  %v1506_v32 = vld [vmem:[%s1709_s26 + $0x200] ss:$16 sps:$4 sm:$0xff]   ;;  %v1576_v16 = vld [vmem:[%s1709_s26 + $0x2ac] ss:$16 sps:$4 sm:$0xff]  }
  0x26   : > { %1055 = vmatprep.subr.bf16.mxu1 %v1485_v18  ;;  %v1507_v33 = vld [vmem:[%s1709_s26 + $0x1e4] ss:$16 sps:$4 sm:$0xff]   ;;  %v1511_v35 = vld [vmem:[%s1709_s26 + $0x1e0] ss:$16 sps:$4 sm:$0xff]   ;;  %v1571_v17 = vld [vmem:[%s1709_s26 + $0xa8] ss:$16 sps:$4 sm:$0xff]  }
  0x27   : > { %v1509_v34 = vld [vmem:[%s1709_s26 + $0x3e4] ss:$16 sps:$4 sm:$0xff]   ;;  %v1512_v36 = vld [vmem:[%s1709_s26 + $0x3e0] ss:$16 sps:$4 sm:$0xff]   ;;  %v1574_v18 = vld [vmem:[%s1709_s26 + $0x2a8] ss:$16 sps:$4 sm:$0xff]  }
  0x28   : > { %1015 = vmatpush1.bf16.msra.mxu0 %v1487_v19  ;;  %v1513_v37 = vld [vmem:[%s1709_s26 + $0x1c4] ss:$16 sps:$4 sm:$0xff]   ;;  %v1517_v39 = vld [vmem:[%s1709_s26 + $0x1c0] ss:$16 sps:$4 sm:$0xff]   ;;  %v1579_v19 = vld [vmem:[%s1709_s26 + $0x8c] ss:$16 sps:$4 sm:$0xff]  }
  0x29   : > { %1056 = vmatpush1.bf16.msra.mxu1 %v1488_v20  ;;  %1016 = vmatprep.subr.bf16.mxu0 %v1489_v21  ;;  %v1515_v38 = vld [vmem:[%s1709_s26 + $0x3c4] ss:$16 sps:$4 sm:$0xff]   ;;  %v1518_v40 = vld [vmem:[%s1709_s26 + $0x3c0] ss:$16 sps:$4 sm:$0xff]   ;;  %v1582_v20 = vld [vmem:[%s1709_s26 + $0x28c] ss:$16 sps:$4 sm:$0xff]  }
  0x2a   : > { %1057 = vmatprep.subr.bf16.mxu1 %v1491_v22  ;;  %v1519_v41 = vld [vmem:[%s1709_s26 + $0x1a4] ss:$16 sps:$4 sm:$0xff]   ;;  %v1523_v43 = vld [vmem:[%s1709_s26 + $0x1a0] ss:$16 sps:$4 sm:$0xff]   ;;  %v1577_v21 = vld [vmem:[%s1709_s26 + $0x88] ss:$16 sps:$4 sm:$0xff]  }
  0x2b   : > { %v1521_v42 = vld [vmem:[%s1709_s26 + $0x3a4] ss:$16 sps:$4 sm:$0xff]   ;;  %v1524_v44 = vld [vmem:[%s1709_s26 + $0x3a0] ss:$16 sps:$4 sm:$0xff]   ;;  %v1580_v22 = vld [vmem:[%s1709_s26 + $0x288] ss:$16 sps:$4 sm:$0xff]  }
  0x2c   : > { %1017 = vmatpush1.bf16.msra.mxu0 %v1493_v23  ;;  %v1525_v45 = vld [vmem:[%s1709_s26 + $0x184] ss:$16 sps:$4 sm:$0xff]   ;;  %v1529_v50 = vld [vmem:[%s1709_s26 + $0x180] ss:$16 sps:$4 sm:$0xff]   ;;  %v1585_v23 = vld [vmem:[%s1709_s26 + $0x6c] ss:$16 sps:$4 sm:$0xff]  }
  0x2d   : > { %1058 = vmatpush1.bf16.msra.mxu1 %v1494_v24  ;;  %1018 = vmatprep.subr.bf16.mxu0 %v1495_v25  ;;  %v1527_v46 = vld [vmem:[%s1709_s26 + $0x384] ss:$16 sps:$4 sm:$0xff]   ;;  %v1530_v51 = vld [vmem:[%s1709_s26 + $0x380] ss:$16 sps:$4 sm:$0xff]   ;;  %v1588_v24 = vld [vmem:[%s1709_s26 + $0x26c] ss:$16 sps:$4 sm:$0xff]  }
  0x2e   : > { %1059 = vmatprep.subr.bf16.mxu1 %v1497_v26  ;;  %v222_v47 = vld [vmem:[%s1704_s22] sm:$0xff]  ;;  %v1583_v25 = vld [vmem:[%s1709_s26 + $0x68] ss:$16 sps:$4 sm:$0xff]  }
  0x2f   : > { %v1759_v48 = vcombine.high %v222_v47, %v222_v47  ;;  %v1531_v53 = vld [vmem:[%s1709_s26 + $0x164] ss:$16 sps:$4 sm:$0xff]   ;;  %v1535_v55 = vld [vmem:[%s1709_s26 + $0x160] ss:$16 sps:$4 sm:$0xff]   ;;  %v1783_v7 = vcombine.low %v222_v47, %v222_v47  ;;  %v1586_v26 = vld [vmem:[%s1709_s26 + $0x268] ss:$16 sps:$4 sm:$0xff]  }
  0x30   : > { %1019 = vmatpush1.bf16.msra.mxu0 %v1499_v27  ;;  %v1533_v54 = vld [vmem:[%s1709_s26 + $0x364] ss:$16 sps:$4 sm:$0xff]   ;;  %v1536_v56 = vld [vmem:[%s1709_s26 + $0x360] ss:$16 sps:$4 sm:$0xff]   ;;  %v1591_v27 = vld [vmem:[%s1709_s26 + $0x4c] ss:$16 sps:$4 sm:$0xff]  }
  0x31   : > { %1060 = vmatpush1.bf16.msra.mxu1 %v1500_v28  ;;  %1020 = vmatprep.subr.bf16.mxu0 %v1501_v29  ;;  %v1537_v57 = vld [vmem:[%s1709_s26 + $0x144] ss:$16 sps:$4 sm:$0xff]   ;;  %v1541_v59 = vld [vmem:[%s1709_s26 + $0x140] ss:$16 sps:$4 sm:$0xff]   ;;  %v1594_v28 = vld [vmem:[%s1709_s26 + $0x24c] ss:$16 sps:$4 sm:$0xff]  }
  0x32   : > { %1061 = vmatprep.subr.bf16.mxu1 %v1503_v30  ;;  %1038 = vmatprep.mubr.bf16.mxu0 %v1759_v48  ;;  %v1539_v58 = vld [vmem:[%s1709_s26 + $0x344] ss:$16 sps:$4 sm:$0xff]   ;;  %v1542_v60 = vld [vmem:[%s1709_s26 + $0x340] ss:$16 sps:$4 sm:$0xff]   ;;  %v1589_v29 = vld [vmem:[%s1709_s26 + $0x48] ss:$16 sps:$4 sm:$0xff]  }
  0x33   : > { %v1543_v61 = vld [vmem:[%s1709_s26 + $0x124] ss:$16 sps:$4 sm:$0xff]   ;;  %v1547_v63 = vld [vmem:[%s1709_s26 + $0x120] ss:$16 sps:$4 sm:$0xff]   ;;  %v1592_v30 = vld [vmem:[%s1709_s26 + $0x248] ss:$16 sps:$4 sm:$0xff]  }
  0x34   : > { %1021 = vmatpush1.bf16.msra.mxu0 %v1505_v31  ;;  %v1545_v62 = vld [vmem:[%s1709_s26 + $0x324] ss:$16 sps:$4 sm:$0xff]   ;;  %v1548_v0 = vld [vmem:[%s1709_s26 + $0x320] ss:$16 sps:$4 sm:$0xff]   ;;  %v1597_v31 = vld [vmem:[%s1709_s26 + $0x2c] ss:$16 sps:$4 sm:$0xff]  }
  0x35   : > { %1062 = vmatpush1.bf16.msra.mxu1 %v1506_v32  ;;  %1022 = vmatprep.subr.bf16.mxu0 %v1507_v33  ;;  %v1549_v1 = vld [vmem:[%s1709_s26 + $0x104] ss:$16 sps:$4 sm:$0xff]   ;;  %v1553_v3 = vld [vmem:[%s1709_s26 + $0x100] ss:$16 sps:$4 sm:$0xff]   ;;  %v1600_v32 = vld [vmem:[%s1709_s26 + $0x22c] ss:$16 sps:$4 sm:$0xff]  }
  0x36   : > { %1063 = vmatprep.subr.bf16.mxu1 %v1509_v34  ;;  %v1551_v2 = vld [vmem:[%s1709_s26 + $0x304] ss:$16 sps:$4 sm:$0xff]   ;;  %v1554_v4 = vld [vmem:[%s1709_s26 + $0x300] ss:$16 sps:$4 sm:$0xff]   ;;  %v1595_v33 = vld [vmem:[%s1709_s26 + $0x28] ss:$16 sps:$4 sm:$0xff]  }
  0x37   : > { %v1598_v34 = vld [vmem:[%s1709_s26 + $0x228] ss:$16 sps:$4 sm:$0xff]   ;;  %v1621_v47 = vld [vmem:[%s1709_s26 + $0x1ac] ss:$16 sps:$4 sm:$0xff]  }
  0x38   : > { %1023 = vmatpush2.bf16.msra.mxu0 %v1511_v35  ;;  %v1603_v35 = vld [vmem:[%s1709_s26 + $0xc] ss:$16 sps:$4 sm:$0xff]  }
  0x39   : > { %1064 = vmatpush2.bf16.msra.mxu1 %v1512_v36  ;;  %1024 = vmatprep.subr.bf16.mxu0 %v1513_v37  ;;  %v1606_v36 = vld [vmem:[%s1709_s26 + $0x20c] ss:$16 sps:$4 sm:$0xff]   ;;  %v1601_v37 = vld [vmem:[%s1709_s26 + $0x8] ss:$16 sps:$4 sm:$0xff]  }
  0x3a   : > { %1065 = vmatprep.subr.bf16.mxu1 %v1515_v38  ;;  %v1604_v38 = vld [vmem:[%s1709_s26 + $0x208] ss:$16 sps:$4 sm:$0xff]  }
  0x3c   : > { %1025 = vmatpush2.bf16.msra.mxu0 %v1517_v39  ;;  %v1609_v39 = vld [vmem:[%s1709_s26 + $0x1ec] ss:$16 sps:$4 sm:$0xff]  }
  0x3d   : > { %1066 = vmatpush2.bf16.msra.mxu1 %v1518_v40  ;;  %1026 = vmatprep.subr.bf16.mxu0 %v1519_v41  ;;  %v1612_v40 = vld [vmem:[%s1709_s26 + $0x3ec] ss:$16 sps:$4 sm:$0xff]   ;;  %v1607_v41 = vld [vmem:[%s1709_s26 + $0x1e8] ss:$16 sps:$4 sm:$0xff]  }
  0x3e   : > { %1067 = vmatprep.subr.bf16.mxu1 %v1521_v42  ;;  %v1610_v42 = vld [vmem:[%s1709_s26 + $0x3e8] ss:$16 sps:$4 sm:$0xff]  }
  0x40   : > { %1027 = vmatpush2.bf16.msra.mxu0 %v1523_v43  ;;  %v1615_v43 = vld [vmem:[%s1709_s26 + $0x1cc] ss:$16 sps:$4 sm:$0xff]  }
  0x41   : > { %1068 = vmatpush2.bf16.msra.mxu1 %v1524_v44  ;;  %1028 = vmatprep.subr.bf16.mxu0 %v1525_v45  ;;  %v1618_v44 = vld [vmem:[%s1709_s26 + $0x3cc] ss:$16 sps:$4 sm:$0xff]   ;;  %v1613_v45 = vld [vmem:[%s1709_s26 + $0x1c8] ss:$16 sps:$4 sm:$0xff]  }
  0x42   : > { %1069 = vmatprep.subr.bf16.mxu1 %v1527_v46  ;;  %v1616_v46 = vld [vmem:[%s1709_s26 + $0x3c8] ss:$16 sps:$4 sm:$0xff]  }
  0x44   : > { %1029 = vmatpush2.bf16.msra.mxu0 %v1529_v50  ;;  %v1622_v50 = vld [vmem:[%s1709_s26 + $0x3a8] ss:$16 sps:$4 sm:$0xff]  }
  0x45   : > { %1070 = vmatpush2.bf16.msra.mxu1 %v1530_v51  ;;  %1030 = vmatprep.subr.bf16.mxu0 %v1531_v53  ;;  %v1627_v51 = vld [vmem:[%s1709_s26 + $0x18c] ss:$16 sps:$4 sm:$0xff]   ;;  %v1625_v53 = vld [vmem:[%s1709_s26 + $0x188] ss:$16 sps:$4 sm:$0xff]  }
  0x46   : > { %1071 = vmatprep.subr.bf16.mxu1 %v1533_v54  ;;  %v1628_v54 = vld [vmem:[%s1709_s26 + $0x388] ss:$16 sps:$4 sm:$0xff]  }
  0x48   : > { %1031 = vmatpush2.bf16.msra.mxu0 %v1535_v55  ;;  %v1633_v55 = vld [vmem:[%s1709_s26 + $0x16c] ss:$16 sps:$4 sm:$0xff]  }
  0x49   : > { %1072 = vmatpush2.bf16.msra.mxu1 %v1536_v56  ;;  %1032 = vmatprep.subr.bf16.mxu0 %v1537_v57  ;;  %v1636_v56 = vld [vmem:[%s1709_s26 + $0x36c] ss:$16 sps:$4 sm:$0xff]   ;;  %v1631_v57 = vld [vmem:[%s1709_s26 + $0x168] ss:$16 sps:$4 sm:$0xff]  }
  0x4a   : > { %1073 = vmatprep.subr.bf16.mxu1 %v1539_v58  ;;  %v1634_v58 = vld [vmem:[%s1709_s26 + $0x368] ss:$16 sps:$4 sm:$0xff]  }
  0x4c   : > { %1033 = vmatpush2.bf16.msra.mxu0 %v1541_v59  ;;  %v1639_v59 = vld [vmem:[%s1709_s26 + $0x14c] ss:$16 sps:$4 sm:$0xff]  }
  0x4d   : > { %1074 = vmatpush2.bf16.msra.mxu1 %v1542_v60  ;;  %1034 = vmatprep.subr.bf16.mxu0 %v1543_v61  ;;  %v1642_v60 = vld [vmem:[%s1709_s26 + $0x34c] ss:$16 sps:$4 sm:$0xff]   ;;  %v1637_v61 = vld [vmem:[%s1709_s26 + $0x148] ss:$16 sps:$4 sm:$0xff]  }
  0x4e   : > { %1075 = vmatprep.subr.bf16.mxu1 %v1545_v62  ;;  %v1640_v62 = vld [vmem:[%s1709_s26 + $0x348] ss:$16 sps:$4 sm:$0xff]  }
  0x50   : > { %1035 = vmatpush2.bf16.msra.mxu0 %v1547_v63  ;;  %v1645_v63 = vld [vmem:[%s1709_s26 + $0x12c] ss:$16 sps:$4 sm:$0xff]  }
  0x51   : > { %1076 = vmatpush2.bf16.msra.mxu1 %v1548_v0  ;;  %1036 = vmatprep.subr.bf16.mxu0 %v1549_v1  ;;  %v1648_v0 = vld [vmem:[%s1709_s26 + $0x32c] ss:$16 sps:$4 sm:$0xff]   ;;  %v1643_v1 = vld [vmem:[%s1709_s26 + $0x128] ss:$16 sps:$4 sm:$0xff]  }
  0x52   : > { %1077 = vmatprep.subr.bf16.mxu1 %v1551_v2  ;;  %v1646_v2 = vld [vmem:[%s1709_s26 + $0x328] ss:$16 sps:$4 sm:$0xff]  }
  0x54   : > { %1037 = vmatpush2.bf16.msra.mxu0 %v1553_v3  ;;  %v1651_v3 = vld [vmem:[%s1709_s26 + $0x10c] ss:$16 sps:$4 sm:$0xff]  }
  0x55   : > { %1078 = vmatpush2.bf16.msra.mxu1 %v1554_v4  ;;  %1088 = vmatprep.subr.bf16.mxu0 %v1561_v5  ;;  %v1654_v4 = vld [vmem:[%s1709_s26 + $0x30c] ss:$16 sps:$4 sm:$0xff]   ;;  %v1649_v5 = vld [vmem:[%s1709_s26 + $0x108] ss:$16 sps:$4 sm:$0xff]  }
  0x56   : > { %1129 = vmatprep.subr.bf16.mxu1 %v1564_v6  ;;  %v1652_v6 = vld [vmem:[%s1709_s26 + $0x308] ss:$16 sps:$4 sm:$0xff]  }
  0x57   : > { %1039 = vmatmul.mubr.bf16.vlgmr.msra.gmra.mxu0 %v1783_v7 }
  0x58   : > { %1080 = vmatmul.mubr.bf16.vlgmr.msra.gmra.mxu1 %v1785_v8  ;;  %1089 = vmatpush1.bf16.msra.mxu0 %v1559_v9 }
  0x59   : > { %1130 = vmatpush1.bf16.msra.mxu1 %v1562_v10  ;;  %1090 = vmatprep.subr.bf16.mxu0 %v1567_v11  ;;  %v218_v10 = vld [vmem:[#allocation2 + $0x10] sm:$0xff] }
  0x5a   : > { %1131 = vmatprep.subr.bf16.mxu1 %v1570_v12  ;;  %1120 = vmatprep.mubr.bf16.mxu0 %v1759_v48  ;;  %v1624_v48 = vld [vmem:[%s1709_s26 + $0x3ac] ss:$16 sps:$4 sm:$0xff]  }
  0x5b   : > { %1161 = vmatprep.mubr.bf16.mxu1 %v1313_v52  ;;  %v1630_v52 = vld [vmem:[%s1709_s26 + $0x38c] ss:$16 sps:$4 sm:$0xff]  }
  0x5c   : > { %1091 = vmatpush1.bf16.msra.mxu0 %v1565_v13 }
  0x5d   : > { %1132 = vmatpush1.bf16.msra.mxu1 %v1568_v14  ;;  %1092 = vmatprep.subr.bf16.mxu0 %v1573_v15  ;;  %v219_v14 = vld [vmem:[#allocation2] sm:$0xff] }
  0x5e   : > { %1133 = vmatprep.subr.bf16.mxu1 %v1576_v16 }
  0x60   : > { %1093 = vmatpush1.bf16.msra.mxu0 %v1571_v17 }
  0x61   : > { %1134 = vmatpush1.bf16.msra.mxu1 %v1574_v18  ;;  %1094 = vmatprep.subr.bf16.mxu0 %v1579_v19 }
  0x62   : > { %1135 = vmatprep.subr.bf16.mxu1 %v1582_v20 }
  0x64   : > { %1095 = vmatpush1.bf16.msra.mxu0 %v1577_v21 }
  0x65   : > { %1136 = vmatpush1.bf16.msra.mxu1 %v1580_v22  ;;  %1096 = vmatprep.subr.bf16.mxu0 %v1585_v23 }
  0x66   : > { %1137 = vmatprep.subr.bf16.mxu1 %v1588_v24 }
  0x68   : > { %1097 = vmatpush1.bf16.msra.mxu0 %v1583_v25 }
  0x69   : > { %1138 = vmatpush1.bf16.msra.mxu1 %v1586_v26  ;;  %1098 = vmatprep.subr.bf16.mxu0 %v1591_v27  ;;  %v221_v26 = vld [vmem:[#allocation2 + $0x8] sm:$0xff] }
  0x6a   : > { %1139 = vmatprep.subr.bf16.mxu1 %v1594_v28 }
  0x6c   : > { %1099 = vmatpush1.bf16.msra.mxu0 %v1589_v29 }
  0x6d   : > { %1140 = vmatpush1.bf16.msra.mxu1 %v1592_v30  ;;  %1100 = vmatprep.subr.bf16.mxu0 %v1597_v31 }
  0x6e   : > { %1141 = vmatprep.subr.bf16.mxu1 %v1600_v32 }
  0x70   : > { %1101 = vmatpush1.bf16.msra.mxu0 %v1595_v33 }
  0x71   : > { %1142 = vmatpush1.bf16.msra.mxu1 %v1598_v34  ;;  %1102 = vmatprep.subr.bf16.mxu0 %v1603_v35 }
  0x72   : > { %1143 = vmatprep.subr.bf16.mxu1 %v1606_v36 }
  0x74   : > { %1103 = vmatpush1.bf16.msra.mxu0 %v1601_v37 }
  0x75   : > { %1144 = vmatpush1.bf16.msra.mxu1 %v1604_v38  ;;  %1104 = vmatprep.subr.bf16.mxu0 %v1609_v39 }
  0x76   : > { %1145 = vmatprep.subr.bf16.mxu1 %v1612_v40 }
  0x78   : > { %1105 = vmatpush2.bf16.msra.mxu0 %v1607_v41 }
  0x79   : > { %1146 = vmatpush2.bf16.msra.mxu1 %v1610_v42  ;;  %1106 = vmatprep.subr.bf16.mxu0 %v1615_v43 }
  0x7a   : > { %1147 = vmatprep.subr.bf16.mxu1 %v1618_v44 }
  0x7c   : > { %1107 = vmatpush2.bf16.msra.mxu0 %v1613_v45 }
  0x7d   : > { %1148 = vmatpush2.bf16.msra.mxu1 %v1616_v46  ;;  %1108 = vmatprep.subr.bf16.mxu0 %v1621_v47 }
  0x7e   : > { %1149 = vmatprep.subr.bf16.mxu1 %v1624_v48 }
  0x80   : > { %1109 = vmatpush2.bf16.msra.mxu0 %v1619_v49 }
  0x81   : > { %1150 = vmatpush2.bf16.msra.mxu1 %v1622_v50  ;;  %1110 = vmatprep.subr.bf16.mxu0 %v1627_v51 }
  0x82   : > { %1151 = vmatprep.subr.bf16.mxu1 %v1630_v52 }
  0x84   : > { %1111 = vmatpush2.bf16.msra.mxu0 %v1625_v53 }
  0x85   : > { %1152 = vmatpush2.bf16.msra.mxu1 %v1628_v54  ;;  %1112 = vmatprep.subr.bf16.mxu0 %v1633_v55 }
  0x86   : > { %1153 = vmatprep.subr.bf16.mxu1 %v1636_v56 }
  0x88   : > { %1113 = vmatpush2.bf16.msra.mxu0 %v1631_v57 }
  0x89   : > { %1154 = vmatpush2.bf16.msra.mxu1 %v1634_v58  ;;  %1114 = vmatprep.subr.bf16.mxu0 %v1639_v59 }
  0x8a   : > { %1155 = vmatprep.subr.bf16.mxu1 %v1642_v60 }
  0x8c   : > { %1115 = vmatpush2.bf16.msra.mxu0 %v1637_v61 }
  0x8d   : > { %1156 = vmatpush2.bf16.msra.mxu1 %v1640_v62  ;;  %1116 = vmatprep.subr.bf16.mxu0 %v1645_v63 }
  0x8e   : > { %1157 = vmatprep.subr.bf16.mxu1 %v1648_v0 }
  0x90   : > { %1117 = vmatpush2.bf16.msra.mxu0 %v1643_v1 }
  0x91   : > { %1158 = vmatpush2.bf16.msra.mxu1 %v1646_v2  ;;  %1118 = vmatprep.subr.bf16.mxu0 %v1651_v3 }
  0x92   : > { %1159 = vmatprep.subr.bf16.mxu1 %v1654_v4 }
  0x94   : > { %1119 = vmatpush2.bf16.msra.mxu0 %v1649_v5 }
  0x95   : > { %1160 = vmatpush2.bf16.msra.mxu1 %v1652_v6 }
  0x97   : > { %1121 = vmatmul.mubr.bf16.vlgmr.msra.gmra.mxu0 %v1783_v7  ;;  %v220_v7 = vld [vmem:[#allocation2 + $0x18] sm:$0xff] }
  0x98   : > { %1162 = vmatmul.mubr.bf16.vlgmr.msra.gmra.mxu1 %v1785_v8 }
 0x117   : > { %v1040_v9 = vpop.f32.mrf.mxu0 }
 0x118   : > { %v1081_v11 = vpop.f32.mrf.mxu1 }
 0x119   : > { %v1082_v12 = vadd.f32 %v1081_v11, %v1040_v9  ;;  %v1042_v13 = vpop.f32.mrf.mxu0 }
 0x11a   : > { %v1083_v15 = vpop.f32.mrf.mxu1 }
 0x11b   : > { %v1170_v16 = vadd.f32 %v1082_v12, %v218_v10  ;;  %v1084_v17 = vadd.f32 %v1083_v15, %v1042_v13  ;;  %v1044_v18 = vpop.f32.mrf.mxu0 }
 0x11c   : > { %v1085_v19 = vpop.f32.mrf.mxu1 }
 0x11d   : > { %1174 = vst [vmem:[#allocation2 + $0x10] sm:$0xff] %v1170_v16  ;;  %v1171_v20 = vadd.f32 %v1084_v17, %v219_v14  ;;  %v1045_v21 = vpop.f32.mrf.mxu0 }
 0x11e   : > { %v1086_v22 = vpop.f32.mrf.mxu1 }
 0x11f   : > { %1175 = vst [vmem:[#allocation2] sm:$0xff] %v1171_v20 }
 0x157   : > { %v1122_v23 = vpop.f32.mrf.mxu0 }
 0x158   : > { %v1163_v24 = vpop.f32.mrf.mxu1 }
 0x159   : > { %v1164_v8 = vadd.f32 %v1163_v24, %v1122_v23  ;;  %v1124_v25 = vpop.f32.mrf.mxu0 }
 0x15a   : > { %v1165_v27 = vpop.f32.mrf.mxu1 }
 0x15b   : > { %v1172_v28 = vadd.f32 %v1164_v8, %v220_v7  ;;  %v1166_v29 = vadd.f32 %v1165_v27, %v1124_v25  ;;  %v1126_v30 = vpop.f32.mrf.mxu0  ;;  %1181 = sbr.rel (%p1442_p6) target bundleno = 370 (0x172), region = 44 }
 0x15c   : > { %v1167_v31 = vpop.f32.mrf.mxu1 }
 0x15d   : > { %1176 = vst [vmem:[#allocation2 + $0x18] sm:$0xff] %v1172_v28  ;;  %v1173_v32 = vadd.f32 %v1166_v29, %v221_v26  ;;  %v1127_v33 = vpop.f32.mrf.mxu0 }
 0x15e   : > { %v1168_v34 = vpop.f32.mrf.mxu1 }
 0x15f   : > { %1177 = vst [vmem:[#allocation2 + $0x8] sm:$0xff] %v1173_v32 }
 0x160   : > { %v1188_v35 = vlaneseq  ;;  %v1186_v37 = vld [vmem:[%s1872_s2] sm:$0xf]  ;;  %v1182_v43 = vld [vmem:[#allocation2 + $0x10] sm:$0xff] }
 0x161   : > { %v1212_v38 = vld [vmem:[%s1873_s3] sm:$0xf] }
 0x162   : > { %v1189_v36 = vshrl.u32 %v1188_v35, 7  ;;  %v1183_v44 = vld [vmem:[#allocation2] sm:$0xff] }
 0x164   : > { %v1190_v39 = vsub.s32 0, %v1189_v36  ;;  %v1194_v40 = vsub.s32 1, %v1189_v36  ;;  %v1198_v41 = vsub.s32 2, %v1189_v36  ;;  %v1202_v42 = vsub.s32 3, %v1189_v36  ;;  %v1184_v49 = vld [vmem:[#allocation2 + $0x18] sm:$0xff] }
 0x166   : > { %v1191_v45 = vrot.slane %v1186_v37, %v1190_v39  ;;  %v1195_v46 = vrot.slane %v1186_v37, %v1194_v40  ;;  %v1217_v47 = vrot.slane %v1212_v38, %v1190_v39  ;;  %v1221_v48 = vrot.slane %v1212_v38, %v1194_v40  ;;  %v1185_v50 = vld [vmem:[#allocation2 + $0x8] sm:$0xff] }
 0x167   : > { %v1199_v51 = vrot.slane %v1186_v37, %v1198_v41  ;;  %v1203_v52 = vrot.slane %v1186_v37, %v1202_v42  ;;  %v1225_v53 = vrot.slane %v1212_v38, %v1198_v41  ;;  %v1229_v54 = vrot.slane %v1212_v38, %v1202_v42 }
 0x168   : > { %v1208_v55 = vmul.f32 %v1191_v45, %v1182_v43  ;;  %v1209_v56 = vmul.f32 %v1195_v46, %v1183_v44 }
 0x169   : > { %v1210_v57 = vmul.f32 %v1199_v51, %v1184_v49  ;;  %v1211_v58 = vmul.f32 %v1203_v52, %v1185_v50 }
 0x16a   : > { %v1234_v59 = vadd.f32 %v1217_v47, %v1208_v55  ;;  %v1235_v60 = vadd.f32 %v1221_v48, %v1209_v56 }
 0x16b   : > { %v1236_v61 = vadd.f32 %v1225_v53, %v1210_v57  ;;  %v1237_v62 = vadd.f32 %v1229_v54, %v1211_v58 }
 0x16c   : > { %v1238_v63 = vmax.f32 %v1234_v59, 0.0  ;;  %v1239_v0 = vmax.f32 %v1235_v60, 0.0 }
 0x16d   : > { %v1240_v1 = vmax.f32 %v1236_v61, 0.0  ;;  %v1241_v2 = vmax.f32 %v1237_v62, 0.0 }
 0x16e   : > { %v1448_v3 = vpack.c.bf16 %v1239_v0, %v1238_v63 }
 0x16f   : > { %v1449_v4 = vpack.c.bf16 %v1241_v2, %v1240_v1 }
 0x170   : > { %1258 = vst [vmem:[%s1874_s4] sm:$0xff] %v1448_v3 }
 0x171   : > { %1259 = vst [vmem:[%s1874_s4 + $0x8] sm:$0xff] %v1449_v4 }
 0x172 PF: > { %s14_s15 = sadd.s32 1, %s1661_s15  }
 0x173   : > { %p11_p7 = scmp.ge.s32.totalorder %s14_s15, 11  }
 0x175   :  { %13 = sbr.rel (!%p11_p7) target bundleno = 1 (0x1), region = 73 }

// kernel: resnet18_sigmoid_forward.41
= control target key start
LH: loop header
LB: loop body
LE: loop exit
PB: predicated region body
PF: predicated region fallthrough
CT: control target
= control target key end

     0   :  { %s3295_s1 = inlined_call_operand.vmem [shape: bf16[512,1024], index: 1, kind: input, shape index: {}]   ;;  %s3296_s0 = inlined_call_operand.vmem [shape: bf16[8,512], index: 0, kind: input, shape index: {}]   ;;  %s3297_s2 = inlined_call_operand.vmem [shape: f32[1,1024], index: 2, kind: input, shape index: {}]   ;;  %s3298_s3 = inlined_call_operand.vmem [shape: f32[1,1024], index: 3, kind: input, shape index: {}]   ;;  %s3299_s4 = inlined_call_operand.vmem [shape: f32[8,1024], index: 4, kind: output, shape index: {}]  }
   0x1   :  { %v95_v0 = vld [vmem:[%s3295_s1 + $0x1c0] sm:$0xff]  ;;  %v2517_v54 = vld [vmem:[%s3296_s0 + $0x8] sm:$0xff] }
   0x2   :  { %v99_v1 = vld [vmem:[%s3295_s1 + $0x1e0] sm:$0xff]  ;;  %v2531_v59 = vcombine.high %v2517_v54, %v2517_v54 }
   0x3   :  { %v223_v2 = vld [vmem:[%s3295_s1 + $0x5c0] sm:$0xff]  ;;  %v2165_v3 = vcombine.high %v95_v0, %v99_v1  ;;  %v2164_v5 = vcombine.low %v95_v0, %v99_v1 }
   0x4   :  { %v227_v4 = vld [vmem:[%s3295_s1 + $0x5e0] sm:$0xff]  ;;  %1662 = vmatprep.mubr.bf16.mxu1 %v2531_v59 }
   0x5   :  { %v87_v6 = vld [vmem:[%s3295_s1 + $0x180] sm:$0xff]  ;;  %v2293_v8 = vcombine.high %v223_v2, %v227_v4  ;;  %v2292_v9 = vcombine.low %v223_v2, %v227_v4  ;;  %1589 = vmatprep.subr.bf16.mxu0 %v2165_v3 }
   0x6   :  { %v91_v7 = vld [vmem:[%s3295_s1 + $0x1a0] sm:$0xff]  ;;  %1590 = vmatpush1.bf16.msra.mxu0 %v2164_v5 }
   0x7   :  { %v2157_v10 = vcombine.high %v87_v6, %v91_v7  ;;  %v215_v11 = vld [vmem:[%s3295_s1 + $0x580] sm:$0xff]  ;;  %1630 = vmatprep.subr.bf16.mxu1 %v2293_v8  ;;  %v2156_v18 = vcombine.low %v87_v6, %v91_v7 }
   0x8   :  { %v219_v12 = vld [vmem:[%s3295_s1 + $0x5a0] sm:$0xff]  ;;  %1631 = vmatpush1.bf16.msra.mxu1 %v2292_v9 }
   0x9   :  { %v79_v13 = vld [vmem:[%s3295_s1 + $0x140] sm:$0xff]  ;;  %v2285_v14 = vcombine.high %v215_v11, %v219_v12  ;;  %1591 = vmatprep.subr.bf16.mxu0 %v2157_v10  ;;  %v2284_v19 = vcombine.low %v215_v11, %v219_v12 }
   0xa   :  { %v83_v15 = vld [vmem:[%s3295_s1 + $0x160] sm:$0xff]  ;;  %1592 = vmatpush1.bf16.msra.mxu0 %v2156_v18 }
   0xb   :  { %v207_v16 = vld [vmem:[%s3295_s1 + $0x540] sm:$0xff]  ;;  %v2149_v20 = vcombine.high %v79_v13, %v83_v15  ;;  %1632 = vmatprep.subr.bf16.mxu1 %v2285_v14  ;;  %v2148_v26 = vcombine.low %v79_v13, %v83_v15 }
   0xc   :  { %v211_v17 = vld [vmem:[%s3295_s1 + $0x560] sm:$0xff]  ;;  %1633 = vmatpush1.bf16.msra.mxu1 %v2284_v19 }
   0xd   :  { %v2277_v21 = vcombine.high %v207_v16, %v211_v17  ;;  %v71_v22 = vld [vmem:[%s3295_s1 + $0x100] sm:$0xff]  ;;  %1593 = vmatprep.subr.bf16.mxu0 %v2149_v20  ;;  %v2276_v27 = vcombine.low %v207_v16, %v211_v17 }
   0xe   :  { %v75_v23 = vld [vmem:[%s3295_s1 + $0x120] sm:$0xff]  ;;  %1594 = vmatpush1.bf16.msra.mxu0 %v2148_v26 }
   0xf   :  { %v199_v24 = vld [vmem:[%s3295_s1 + $0x500] sm:$0xff]  ;;  %v2141_v28 = vcombine.high %v71_v22, %v75_v23  ;;  %1634 = vmatprep.subr.bf16.mxu1 %v2277_v21  ;;  %v2140_v34 = vcombine.low %v71_v22, %v75_v23 }
  0x10   :  { %v203_v25 = vld [vmem:[%s3295_s1 + $0x520] sm:$0xff]  ;;  %1635 = vmatpush1.bf16.msra.mxu1 %v2276_v27 }
  0x11   :  { %v2269_v29 = vcombine.high %v199_v24, %v203_v25  ;;  %v63_v30 = vld [vmem:[%s3295_s1 + $0xc0] sm:$0xff]  ;;  %1595 = vmatprep.subr.bf16.mxu0 %v2141_v28  ;;  %v2268_v35 = vcombine.low %v199_v24, %v203_v25 }
  0x12   :  { %v67_v31 = vld [vmem:[%s3295_s1 + $0xe0] sm:$0xff]  ;;  %1596 = vmatpush1.bf16.msra.mxu0 %v2140_v34 }
  0x13   :  { %v191_v32 = vld [vmem:[%s3295_s1 + $0x4c0] sm:$0xff]  ;;  %v2133_v36 = vcombine.high %v63_v30, %v67_v31  ;;  %1636 = vmatprep.subr.bf16.mxu1 %v2269_v29  ;;  %v2132_v42 = vcombine.low %v63_v30, %v67_v31 }
  0x14   :  { %v195_v33 = vld [vmem:[%s3295_s1 + $0x4e0] sm:$0xff]  ;;  %1637 = vmatpush1.bf16.msra.mxu1 %v2268_v35 }
  0x15   :  { %v2261_v37 = vcombine.high %v191_v32, %v195_v33  ;;  %v55_v38 = vld [vmem:[%s3295_s1 + $0x80] sm:$0xff]  ;;  %1597 = vmatprep.subr.bf16.mxu0 %v2133_v36  ;;  %v2260_v43 = vcombine.low %v191_v32, %v195_v33 }
  0x16   :  { %v59_v39 = vld [vmem:[%s3295_s1 + $0xa0] sm:$0xff]  ;;  %1598 = vmatpush1.bf16.msra.mxu0 %v2132_v42 }
  0x17   :  { %v183_v40 = vld [vmem:[%s3295_s1 + $0x480] sm:$0xff]  ;;  %v2125_v44 = vcombine.high %v55_v38, %v59_v39  ;;  %1638 = vmatprep.subr.bf16.mxu1 %v2261_v37  ;;  %v2124_v50 = vcombine.low %v55_v38, %v59_v39 }
  0x18   :  { %v187_v41 = vld [vmem:[%s3295_s1 + $0x4a0] sm:$0xff]  ;;  %1639 = vmatpush1.bf16.msra.mxu1 %v2260_v43 }
  0x19   :  { %v2253_v45 = vcombine.high %v183_v40, %v187_v41  ;;  %v47_v46 = vld [vmem:[%s3295_s1 + $0x40] sm:$0xff]  ;;  %1599 = vmatprep.subr.bf16.mxu0 %v2125_v44  ;;  %v2252_v51 = vcombine.low %v183_v40, %v187_v41 }
  0x1a   :  { %v51_v47 = vld [vmem:[%s3295_s1 + $0x60] sm:$0xff]  ;;  %1600 = vmatpush1.bf16.msra.mxu0 %v2124_v50 }
  0x1b   :  { %v175_v48 = vld [vmem:[%s3295_s1 + $0x440] sm:$0xff]  ;;  %v2117_v52 = vcombine.high %v47_v46, %v51_v47  ;;  %1640 = vmatprep.subr.bf16.mxu1 %v2253_v45  ;;  %v2116_v62 = vcombine.low %v47_v46, %v51_v47 }
  0x1c   :  { %v179_v49 = vld [vmem:[%s3295_s1 + $0x460] sm:$0xff]  ;;  %1641 = vmatpush1.bf16.msra.mxu1 %v2252_v51 }
  0x1d   :  { %v2512_v53 = vld [vmem:[%s3296_s0] sm:$0xff]  ;;  %v2245_v55 = vcombine.high %v175_v48, %v179_v49  ;;  %1601 = vmatprep.subr.bf16.mxu0 %v2117_v52  ;;  %v2244_v63 = vcombine.low %v175_v48, %v179_v49 }
  0x1e   :  { %v39_v56 = vld [vmem:[%s3295_s1] sm:$0xff]  ;;  %v2527_v58 = vcombine.high %v2512_v53, %v2512_v53  ;;  %1602 = vmatpush1.bf16.msra.mxu0 %v2116_v62 }
  0x1f   :  { %v43_v57 = vld [vmem:[%s3295_s1 + $0x20] sm:$0xff]  ;;  %1642 = vmatprep.subr.bf16.mxu1 %v2245_v55 }
  0x20   :  { %v167_v60 = vld [vmem:[%s3295_s1 + $0x400] sm:$0xff]  ;;  %1621 = vmatprep.mubr.bf16.mxu0 %v2527_v58  ;;  %v2109_v0 = vcombine.high %v39_v56, %v43_v57  ;;  %v2108_v6 = vcombine.low %v39_v56, %v43_v57  ;;  %1643 = vmatpush1.bf16.msra.mxu1 %v2244_v63 }
  0x21   :  { %v171_v61 = vld [vmem:[%s3295_s1 + $0x420] sm:$0xff] }
  0x22   :  { %v2237_v1 = vcombine.high %v167_v60, %v171_v61  ;;  %v159_v2 = vld [vmem:[%s3295_s1 + $0x3c0] sm:$0xff]  ;;  %1603 = vmatprep.subr.bf16.mxu0 %v2109_v0  ;;  %v2236_v7 = vcombine.low %v167_v60, %v171_v61 }
  0x23   :  { %v163_v3 = vld [vmem:[%s3295_s1 + $0x3e0] sm:$0xff]  ;;  %1604 = vmatpush1.bf16.msra.mxu0 %v2108_v6  ;;  %v96_v6 = vld [vmem:[%s3295_s1 + $0x1c8] sm:$0xff] }
  0x24   :  { %v287_v4 = vld [vmem:[%s3295_s1 + $0x7c0] sm:$0xff]  ;;  %v2229_v8 = vcombine.high %v159_v2, %v163_v3  ;;  %1644 = vmatprep.subr.bf16.mxu1 %v2237_v1  ;;  %v2228_v14 = vcombine.low %v159_v2, %v163_v3 }
  0x25   :  { %v291_v5 = vld [vmem:[%s3295_s1 + $0x7e0] sm:$0xff]  ;;  %1645 = vmatpush1.bf16.msra.mxu1 %v2236_v7  ;;  %v100_v7 = vld [vmem:[%s3295_s1 + $0x1e8] sm:$0xff] }
  0x26   :  { %v2357_v9 = vcombine.high %v287_v4, %v291_v5  ;;  %v151_v10 = vld [vmem:[%s3295_s1 + $0x380] sm:$0xff]  ;;  %1605 = vmatprep.subr.bf16.mxu0 %v2229_v8  ;;  %v2356_v15 = vcombine.low %v287_v4, %v291_v5  ;;  %v224_v8 = vld [vmem:[%s3295_s1 + $0x5c8] sm:$0xff] }
  0x27   :  { %v155_v11 = vld [vmem:[%s3295_s1 + $0x3a0] sm:$0xff]  ;;  %1606 = vmatpush2.bf16.msra.mxu0 %v2228_v14  ;;  %v88_v14 = vld [vmem:[%s3295_s1 + $0x188] sm:$0xff] }
  0x28   :  { %v279_v12 = vld [vmem:[%s3295_s1 + $0x780] sm:$0xff]  ;;  %v2221_v16 = vcombine.high %v151_v10, %v155_v11  ;;  %1646 = vmatprep.subr.bf16.mxu1 %v2357_v9  ;;  %v2220_v22 = vcombine.low %v151_v10, %v155_v11  ;;  %v228_v9 = vld [vmem:[%s3295_s1 + $0x5e8] sm:$0xff] }
  0x29   :  { %v283_v13 = vld [vmem:[%s3295_s1 + $0x7a0] sm:$0xff]  ;;  %1647 = vmatpush2.bf16.msra.mxu1 %v2356_v15  ;;  %v92_v15 = vld [vmem:[%s3295_s1 + $0x1a8] sm:$0xff] }
  0x2a   :  { %v2349_v17 = vcombine.high %v279_v12, %v283_v13  ;;  %v143_v18 = vld [vmem:[%s3295_s1 + $0x340] sm:$0xff]  ;;  %1607 = vmatprep.subr.bf16.mxu0 %v2221_v16  ;;  %v2348_v23 = vcombine.low %v279_v12, %v283_v13  ;;  %v2167_v12 = vcombine.high %v96_v6, %v100_v7  ;;  %v2295_v13 = vcombine.high %v224_v8, %v228_v9 }
  0x2b   :  { %v147_v19 = vld [vmem:[%s3295_s1 + $0x360] sm:$0xff]  ;;  %1608 = vmatpush2.bf16.msra.mxu0 %v2220_v22  ;;  %v2657_v16 = vcombine.low %v2512_v53, %v2512_v53  ;;  %v2159_v22 = vcombine.high %v88_v14, %v92_v15 }
  0x2c   :  { %v271_v20 = vld [vmem:[%s3295_s1 + $0x740] sm:$0xff]  ;;  %v2213_v24 = vcombine.high %v143_v18, %v147_v19  ;;  %1648 = vmatprep.subr.bf16.mxu1 %v2349_v17  ;;  %v2212_v30 = vcombine.low %v143_v18, %v147_v19  ;;  %v216_v17 = vld [vmem:[%s3295_s1 + $0x588] sm:$0xff]  ;;  %v2667_v19 = vcombine.low %v2517_v54, %v2517_v54 }
  0x2d   :  { %v275_v21 = vld [vmem:[%s3295_s1 + $0x760] sm:$0xff]  ;;  %1649 = vmatpush2.bf16.msra.mxu1 %v2348_v23  ;;  %v220_v18 = vld [vmem:[%s3295_s1 + $0x5a8] sm:$0xff] }
  0x2e   :  { %v2341_v25 = vcombine.high %v271_v20, %v275_v21  ;;  %v135_v26 = vld [vmem:[%s3295_s1 + $0x300] sm:$0xff]  ;;  %1609 = vmatprep.subr.bf16.mxu0 %v2213_v24  ;;  %v2340_v31 = vcombine.low %v271_v20, %v275_v21  ;;  %v2166_v20 = vcombine.low %v96_v6, %v100_v7  ;;  %v2294_v21 = vcombine.low %v224_v8, %v228_v9  ;;  %v80_v23 = vld [vmem:[%s3295_s1 + $0x148] sm:$0xff] }
  0x2f   :  { %v139_v27 = vld [vmem:[%s3295_s1 + $0x320] sm:$0xff]  ;;  %1610 = vmatpush2.bf16.msra.mxu0 %v2212_v30  ;;  %v2287_v53 = vcombine.high %v216_v17, %v220_v18  ;;  %v84_v24 = vld [vmem:[%s3295_s1 + $0x168] sm:$0xff] }
  0x30   :  { %v263_v28 = vld [vmem:[%s3295_s1 + $0x700] sm:$0xff]  ;;  %v2205_v32 = vcombine.high %v135_v26, %v139_v27  ;;  %1650 = vmatprep.subr.bf16.mxu1 %v2341_v25  ;;  %v2204_v38 = vcombine.low %v135_v26, %v139_v27  ;;  %v208_v54 = vld [vmem:[%s3295_s1 + $0x548] sm:$0xff]  ;;  %v2158_v26 = vcombine.low %v88_v14, %v92_v15  ;;  %v2286_v27 = vcombine.low %v216_v17, %v220_v18 }
  0x31   :  { %v267_v29 = vld [vmem:[%s3295_s1 + $0x720] sm:$0xff]  ;;  %1651 = vmatpush2.bf16.msra.mxu1 %v2340_v31  ;;  %v212_v25 = vld [vmem:[%s3295_s1 + $0x568] sm:$0xff] }
  0x32   :  { %v2333_v33 = vcombine.high %v263_v28, %v267_v29  ;;  %v127_v34 = vld [vmem:[%s3295_s1 + $0x2c0] sm:$0xff]  ;;  %1611 = vmatprep.subr.bf16.mxu0 %v2205_v32  ;;  %v2332_v39 = vcombine.low %v263_v28, %v267_v29  ;;  %v2151_v28 = vcombine.high %v80_v23, %v84_v24  ;;  %v2279_v29 = vcombine.high %v208_v54, %v212_v25  ;;  %v72_v30 = vld [vmem:[%s3295_s1 + $0x108] sm:$0xff] }
  0x33   :  { %v131_v35 = vld [vmem:[%s3295_s1 + $0x2e0] sm:$0xff]  ;;  %1612 = vmatpush2.bf16.msra.mxu0 %v2204_v38  ;;  %v76_v31 = vld [vmem:[%s3295_s1 + $0x128] sm:$0xff] }
  0x34   :  { %v255_v36 = vld [vmem:[%s3295_s1 + $0x6c0] sm:$0xff]  ;;  %v2197_v40 = vcombine.high %v127_v34, %v131_v35  ;;  %1652 = vmatprep.subr.bf16.mxu1 %v2333_v33  ;;  %v2196_v46 = vcombine.low %v127_v34, %v131_v35  ;;  %v200_v32 = vld [vmem:[%s3295_s1 + $0x508] sm:$0xff]  ;;  %v2150_v34 = vcombine.low %v80_v23, %v84_v24  ;;  %v2278_v35 = vcombine.low %v208_v54, %v212_v25 }
  0x35   :  { %v259_v37 = vld [vmem:[%s3295_s1 + $0x6e0] sm:$0xff]  ;;  %1653 = vmatpush2.bf16.msra.mxu1 %v2332_v39  ;;  %v204_v33 = vld [vmem:[%s3295_s1 + $0x528] sm:$0xff] }
  0x36   :  { %v2325_v41 = vcombine.high %v255_v36, %v259_v37  ;;  %v119_v42 = vld [vmem:[%s3295_s1 + $0x280] sm:$0xff]  ;;  %1613 = vmatprep.subr.bf16.mxu0 %v2197_v40  ;;  %v2324_v47 = vcombine.low %v255_v36, %v259_v37  ;;  %v2143_v36 = vcombine.high %v72_v30, %v76_v31  ;;  %v2271_v37 = vcombine.high %v200_v32, %v204_v33  ;;  %v64_v38 = vld [vmem:[%s3295_s1 + $0xc8] sm:$0xff] }
  0x37   :  { %v123_v43 = vld [vmem:[%s3295_s1 + $0x2a0] sm:$0xff]  ;;  %1614 = vmatpush2.bf16.msra.mxu0 %v2196_v46  ;;  %v68_v39 = vld [vmem:[%s3295_s1 + $0xe8] sm:$0xff] }
  0x38   :  { %v247_v44 = vld [vmem:[%s3295_s1 + $0x680] sm:$0xff]  ;;  %v2189_v48 = vcombine.high %v119_v42, %v123_v43  ;;  %1654 = vmatprep.subr.bf16.mxu1 %v2325_v41  ;;  %v2188_v56 = vcombine.low %v119_v42, %v123_v43  ;;  %v192_v40 = vld [vmem:[%s3295_s1 + $0x4c8] sm:$0xff]  ;;  %v2142_v42 = vcombine.low %v72_v30, %v76_v31  ;;  %v2270_v43 = vcombine.low %v200_v32, %v204_v33 }
  0x39   :  { %v251_v45 = vld [vmem:[%s3295_s1 + $0x6a0] sm:$0xff]  ;;  %1655 = vmatpush2.bf16.msra.mxu1 %v2324_v47  ;;  %v196_v41 = vld [vmem:[%s3295_s1 + $0x4e8] sm:$0xff] }
  0x3a   :  { %v2317_v49 = vcombine.high %v247_v44, %v251_v45  ;;  %v111_v50 = vld [vmem:[%s3295_s1 + $0x240] sm:$0xff]  ;;  %1615 = vmatprep.subr.bf16.mxu0 %v2189_v48  ;;  %v2316_v57 = vcombine.low %v247_v44, %v251_v45  ;;  %v2135_v44 = vcombine.high %v64_v38, %v68_v39  ;;  %v2263_v45 = vcombine.high %v192_v40, %v196_v41  ;;  %v56_v46 = vld [vmem:[%s3295_s1 + $0x88] sm:$0xff] }
  0x3b   :  { %v115_v51 = vld [vmem:[%s3295_s1 + $0x260] sm:$0xff]  ;;  %1616 = vmatpush2.bf16.msra.mxu0 %v2188_v56  ;;  %v60_v47 = vld [vmem:[%s3295_s1 + $0xa8] sm:$0xff] }
  0x3c   :  { %v239_v52 = vld [vmem:[%s3295_s1 + $0x640] sm:$0xff]  ;;  %v2181_v60 = vcombine.high %v111_v50, %v115_v51  ;;  %1656 = vmatprep.subr.bf16.mxu1 %v2317_v49  ;;  %v2180_v2 = vcombine.low %v111_v50, %v115_v51  ;;  %v184_v48 = vld [vmem:[%s3295_s1 + $0x488] sm:$0xff]  ;;  %v2134_v50 = vcombine.low %v64_v38, %v68_v39  ;;  %v2262_v51 = vcombine.low %v192_v40, %v196_v41 }
  0x3d   :  { %v243_v55 = vld [vmem:[%s3295_s1 + $0x660] sm:$0xff]  ;;  %1657 = vmatpush2.bf16.msra.mxu1 %v2316_v57  ;;  %v188_v49 = vld [vmem:[%s3295_s1 + $0x4a8] sm:$0xff] }
  0x3e   :  { %v2309_v61 = vcombine.high %v239_v52, %v243_v55  ;;  %v103_v62 = vld [vmem:[%s3295_s1 + $0x200] sm:$0xff]  ;;  %1617 = vmatprep.subr.bf16.mxu0 %v2181_v60  ;;  %v2308_v3 = vcombine.low %v239_v52, %v243_v55  ;;  %v2127_v52 = vcombine.high %v56_v46, %v60_v47  ;;  %v2255_v55 = vcombine.high %v184_v48, %v188_v49  ;;  %v48_v56 = vld [vmem:[%s3295_s1 + $0x48] sm:$0xff] }
  0x3f   :  { %v107_v63 = vld [vmem:[%s3295_s1 + $0x220] sm:$0xff]  ;;  %1618 = vmatpush2.bf16.msra.mxu0 %v2180_v2  ;;  %v52_v57 = vld [vmem:[%s3295_s1 + $0x68] sm:$0xff] }
  0x40   :  { %v231_v0 = vld [vmem:[%s3295_s1 + $0x600] sm:$0xff]  ;;  %v2173_v4 = vcombine.high %v103_v62, %v107_v63  ;;  %1658 = vmatprep.subr.bf16.mxu1 %v2309_v61  ;;  %v2172_v10 = vcombine.low %v103_v62, %v107_v63  ;;  %v176_v60 = vld [vmem:[%s3295_s1 + $0x448] sm:$0xff]  ;;  %v2126_v62 = vcombine.low %v56_v46, %v60_v47  ;;  %v2254_v63 = vcombine.low %v184_v48, %v188_v49 }
  0x41   :  { %v235_v1 = vld [vmem:[%s3295_s1 + $0x620] sm:$0xff]  ;;  %1659 = vmatpush2.bf16.msra.mxu1 %v2308_v3  ;;  %v180_v61 = vld [vmem:[%s3295_s1 + $0x468] sm:$0xff]  ;;  %v2118_v6 = vcombine.low %v48_v56, %v52_v57 }
  0x42   :  { %v2301_v5 = vcombine.high %v231_v0, %v235_v1  ;;  %1619 = vmatprep.subr.bf16.mxu0 %v2173_v4  ;;  %v2300_v11 = vcombine.low %v231_v0, %v235_v1  ;;  %v2119_v0 = vcombine.high %v48_v56, %v52_v57  ;;  %v2247_v1 = vcombine.high %v176_v60, %v180_v61  ;;  %v40_v2 = vld [vmem:[%s3295_s1 + $0x8] sm:$0xff] }
  0x43   :  { %1620 = vmatpush2.bf16.msra.mxu0 %v2172_v10  ;;  %v44_v3 = vld [vmem:[%s3295_s1 + $0x28] sm:$0xff]  ;;  %v2246_v7 = vcombine.low %v176_v60, %v180_v61 }
  0x44   :  { %1660 = vmatprep.subr.bf16.mxu1 %v2301_v5  ;;  %1671 = vmatprep.subr.bf16.mxu0 %v2167_v12  ;;  %v168_v4 = vld [vmem:[%s3295_s1 + $0x408] sm:$0xff]  ;;  %v2111_v8 = vcombine.high %v40_v2, %v44_v3  ;;  %v2110_v14 = vcombine.low %v40_v2, %v44_v3 }
  0x45   :  { %1661 = vmatpush2.bf16.msra.mxu1 %v2300_v11  ;;  %v172_v5 = vld [vmem:[%s3295_s1 + $0x428] sm:$0xff] }
  0x46   :  { %1712 = vmatprep.subr.bf16.mxu1 %v2295_v13  ;;  %1622 = vmatmul.mubr.bf16.vlgmr.msra.gmra.mxu0 %v2657_v16  ;;  %v2239_v9 = vcombine.high %v168_v4, %v172_v5  ;;  %v160_v10 = vld [vmem:[%s3295_s1 + $0x3c8] sm:$0xff]  ;;  %v2238_v15 = vcombine.low %v168_v4, %v172_v5 }
  0x47   :  { %1672 = vmatpush1.bf16.msra.mxu0 %v2166_v20  ;;  %1703 = vmatprep.mubr.bf16.mxu0 %v2527_v58  ;;  %v164_v11 = vld [vmem:[%s3295_s1 + $0x3e8] sm:$0xff] }
  0x48   :  { %1663 = vmatmul.mubr.bf16.vlgmr.msra.gmra.mxu1 %v2667_v19  ;;  %1673 = vmatprep.subr.bf16.mxu0 %v2159_v22  ;;  %v288_v12 = vld [vmem:[%s3295_s1 + $0x7c8] sm:$0xff]  ;;  %v2231_v17 = vcombine.high %v160_v10, %v164_v11  ;;  %v2230_v23 = vcombine.low %v160_v10, %v164_v11 }
  0x49   :  { %1713 = vmatpush1.bf16.msra.mxu1 %v2294_v21  ;;  %1744 = vmatprep.mubr.bf16.mxu1 %v2531_v59  ;;  %v292_v13 = vld [vmem:[%s3295_s1 + $0x7e8] sm:$0xff] }
  0x4a   :  { %1714 = vmatprep.subr.bf16.mxu1 %v2287_v53  ;;  %v2359_v18 = vcombine.high %v288_v12, %v292_v13  ;;  %v152_v20 = vld [vmem:[%s3295_s1 + $0x388] sm:$0xff]  ;;  %v2358_v24 = vcombine.low %v288_v12, %v292_v13 }
  0x4b   :  { %1674 = vmatpush1.bf16.msra.mxu0 %v2158_v26  ;;  %v156_v21 = vld [vmem:[%s3295_s1 + $0x3a8] sm:$0xff] }
  0x4c   :  { %1675 = vmatprep.subr.bf16.mxu0 %v2151_v28  ;;  %v280_v22 = vld [vmem:[%s3295_s1 + $0x788] sm:$0xff]  ;;  %v2223_v54 = vcombine.high %v152_v20, %v156_v21  ;;  %v2222_v30 = vcombine.low %v152_v20, %v156_v21 }
  0x4d   :  { %1715 = vmatpush1.bf16.msra.mxu1 %v2286_v27  ;;  %v284_v53 = vld [vmem:[%s3295_s1 + $0x7a8] sm:$0xff] }
  0x4e   :  { %1716 = vmatprep.subr.bf16.mxu1 %v2279_v29  ;;  %v2351_v25 = vcombine.high %v280_v22, %v284_v53  ;;  %v144_v26 = vld [vmem:[%s3295_s1 + $0x348] sm:$0xff]  ;;  %v2350_v31 = vcombine.low %v280_v22, %v284_v53 }
  0x4f   :  { %1676 = vmatpush1.bf16.msra.mxu0 %v2150_v34  ;;  %v148_v27 = vld [vmem:[%s3295_s1 + $0x368] sm:$0xff] }
  0x50   :  { %1677 = vmatprep.subr.bf16.mxu0 %v2143_v36  ;;  %v272_v28 = vld [vmem:[%s3295_s1 + $0x748] sm:$0xff]  ;;  %v2215_v32 = vcombine.high %v144_v26, %v148_v27  ;;  %v2214_v38 = vcombine.low %v144_v26, %v148_v27 }
  0x51   :  { %1717 = vmatpush1.bf16.msra.mxu1 %v2278_v35  ;;  %v276_v29 = vld [vmem:[%s3295_s1 + $0x768] sm:$0xff] }
  0x52   :  { %1718 = vmatprep.subr.bf16.mxu1 %v2271_v37  ;;  %v2343_v33 = vcombine.high %v272_v28, %v276_v29  ;;  %v136_v34 = vld [vmem:[%s3295_s1 + $0x308] sm:$0xff]  ;;  %v2342_v39 = vcombine.low %v272_v28, %v276_v29 }
  0x53   :  { %1678 = vmatpush1.bf16.msra.mxu0 %v2142_v42  ;;  %v140_v35 = vld [vmem:[%s3295_s1 + $0x328] sm:$0xff] }
  0x54   :  { %1679 = vmatprep.subr.bf16.mxu0 %v2135_v44  ;;  %v264_v36 = vld [vmem:[%s3295_s1 + $0x708] sm:$0xff]  ;;  %v2207_v40 = vcombine.high %v136_v34, %v140_v35  ;;  %v2206_v46 = vcombine.low %v136_v34, %v140_v35 }
  0x55   :  { %1719 = vmatpush1.bf16.msra.mxu1 %v2270_v43  ;;  %v268_v37 = vld [vmem:[%s3295_s1 + $0x728] sm:$0xff] }
  0x56   :  { %1720 = vmatprep.subr.bf16.mxu1 %v2263_v45  ;;  %v2335_v41 = vcombine.high %v264_v36, %v268_v37  ;;  %v128_v42 = vld [vmem:[%s3295_s1 + $0x2c8] sm:$0xff]  ;;  %v2334_v47 = vcombine.low %v264_v36, %v268_v37 }
  0x57   :  { %1680 = vmatpush1.bf16.msra.mxu0 %v2134_v50  ;;  %v132_v43 = vld [vmem:[%s3295_s1 + $0x2e8] sm:$0xff] }
  0x58   :  { %1681 = vmatprep.subr.bf16.mxu0 %v2127_v52  ;;  %v256_v44 = vld [vmem:[%s3295_s1 + $0x6c8] sm:$0xff]  ;;  %v2199_v48 = vcombine.high %v128_v42, %v132_v43  ;;  %v2198_v56 = vcombine.low %v128_v42, %v132_v43 }
  0x59   :  { %1721 = vmatpush1.bf16.msra.mxu1 %v2262_v51  ;;  %v260_v45 = vld [vmem:[%s3295_s1 + $0x6e8] sm:$0xff] }
  0x5a   :  { %1722 = vmatprep.subr.bf16.mxu1 %v2255_v55  ;;  %v2327_v49 = vcombine.high %v256_v44, %v260_v45  ;;  %v120_v50 = vld [vmem:[%s3295_s1 + $0x288] sm:$0xff]  ;;  %v2326_v57 = vcombine.low %v256_v44, %v260_v45 }
  0x5b   :  { %1682 = vmatpush1.bf16.msra.mxu0 %v2126_v62  ;;  %v124_v51 = vld [vmem:[%s3295_s1 + $0x2a8] sm:$0xff] }
  0x5c   :  { %1683 = vmatprep.subr.bf16.mxu0 %v2119_v0  ;;  %v248_v52 = vld [vmem:[%s3295_s1 + $0x688] sm:$0xff]  ;;  %v2191_v60 = vcombine.high %v120_v50, %v124_v51  ;;  %v2190_v2 = vcombine.low %v120_v50, %v124_v51 }
  0x5d   :  { %1723 = vmatpush1.bf16.msra.mxu1 %v2254_v63  ;;  %v252_v55 = vld [vmem:[%s3295_s1 + $0x6a8] sm:$0xff] }
  0x5e   :  { %1724 = vmatprep.subr.bf16.mxu1 %v2247_v1  ;;  %v2319_v61 = vcombine.high %v248_v52, %v252_v55  ;;  %v112_v62 = vld [vmem:[%s3295_s1 + $0x248] sm:$0xff]  ;;  %v2318_v3 = vcombine.low %v248_v52, %v252_v55 }
  0x5f   :  { %1684 = vmatpush1.bf16.msra.mxu0 %v2118_v6  ;;  %v116_v63 = vld [vmem:[%s3295_s1 + $0x268] sm:$0xff] }
  0x60   :  { %1685 = vmatprep.subr.bf16.mxu0 %v2111_v8  ;;  %v240_v0 = vld [vmem:[%s3295_s1 + $0x648] sm:$0xff]  ;;  %v2183_v4 = vcombine.high %v112_v62, %v116_v63  ;;  %v2182_v10 = vcombine.low %v112_v62, %v116_v63 }
  0x61   :  { %1725 = vmatpush1.bf16.msra.mxu1 %v2246_v7  ;;  %v244_v1 = vld [vmem:[%s3295_s1 + $0x668] sm:$0xff] }
  0x62   :  { %1726 = vmatprep.subr.bf16.mxu1 %v2239_v9  ;;  %v2311_v5 = vcombine.high %v240_v0, %v244_v1  ;;  %v104_v6 = vld [vmem:[%s3295_s1 + $0x208] sm:$0xff]  ;;  %v2310_v11 = vcombine.low %v240_v0, %v244_v1 }
  0x63   :  { %1686 = vmatpush1.bf16.msra.mxu0 %v2110_v14  ;;  %v108_v7 = vld [vmem:[%s3295_s1 + $0x228] sm:$0xff]  ;;  %v97_v14 = vld [vmem:[%s3295_s1 + $0x1d0] sm:$0xff] }
  0x64   :  { %1687 = vmatprep.subr.bf16.mxu0 %v2231_v17  ;;  %v232_v8 = vld [vmem:[%s3295_s1 + $0x608] sm:$0xff]  ;;  %v2175_v12 = vcombine.high %v104_v6, %v108_v7  ;;  %v225_v17 = vld [vmem:[%s3295_s1 + $0x5d0] sm:$0xff]  ;;  %v2174_v20 = vcombine.low %v104_v6, %v108_v7 }
  0x65   :  { %1727 = vmatpush1.bf16.msra.mxu1 %v2238_v15  ;;  %v236_v9 = vld [vmem:[%s3295_s1 + $0x628] sm:$0xff]  ;;  %v101_v15 = vld [vmem:[%s3295_s1 + $0x1f0] sm:$0xff] }
  0x66   :  { %1728 = vmatprep.subr.bf16.mxu1 %v2359_v18  ;;  %v2303_v13 = vcombine.high %v232_v8, %v236_v9  ;;  %v229_v18 = vld [vmem:[%s3295_s1 + $0x5f0] sm:$0xff]  ;;  %v2302_v21 = vcombine.low %v232_v8, %v236_v9  ;;  %v2169_v22 = vcombine.high %v97_v14, %v101_v15  ;;  %v2168_v26 = vcombine.low %v97_v14, %v101_v15 }
  0x67   :  { %1688 = vmatpush2.bf16.msra.mxu0 %v2230_v23  ;;  %v2297_v53 = vcombine.high %v225_v17, %v229_v18  ;;  %v89_v23 = vld [vmem:[%s3295_s1 + $0x190] sm:$0xff]  ;;  %v2296_v27 = vcombine.low %v225_v17, %v229_v18 }
  0x68   :  { %1689 = vmatprep.subr.bf16.mxu0 %v2223_v54  ;;  %v217_v54 = vld [vmem:[%s3295_s1 + $0x590] sm:$0xff] }
  0x69   :  { %1729 = vmatpush2.bf16.msra.mxu1 %v2358_v24  ;;  %v93_v24 = vld [vmem:[%s3295_s1 + $0x1b0] sm:$0xff] }
  0x6a   :  { %1730 = vmatprep.subr.bf16.mxu1 %v2351_v25  ;;  %v221_v25 = vld [vmem:[%s3295_s1 + $0x5b0] sm:$0xff]  ;;  %v2161_v28 = vcombine.high %v89_v23, %v93_v24  ;;  %v2160_v34 = vcombine.low %v89_v23, %v93_v24 }
  0x6b   :  { %1690 = vmatpush2.bf16.msra.mxu0 %v2222_v30  ;;  %v2289_v29 = vcombine.high %v217_v54, %v221_v25  ;;  %v81_v30 = vld [vmem:[%s3295_s1 + $0x150] sm:$0xff]  ;;  %v2288_v35 = vcombine.low %v217_v54, %v221_v25 }
  0x6c   :  { %1691 = vmatprep.subr.bf16.mxu0 %v2215_v32  ;;  %v209_v32 = vld [vmem:[%s3295_s1 + $0x550] sm:$0xff] }
  0x6d   :  { %1731 = vmatpush2.bf16.msra.mxu1 %v2350_v31  ;;  %v85_v31 = vld [vmem:[%s3295_s1 + $0x170] sm:$0xff] }
  0x6e   :  { %1732 = vmatprep.subr.bf16.mxu1 %v2343_v33  ;;  %v213_v33 = vld [vmem:[%s3295_s1 + $0x570] sm:$0xff]  ;;  %v2153_v36 = vcombine.high %v81_v30, %v85_v31  ;;  %v2152_v42 = vcombine.low %v81_v30, %v85_v31 }
  0x6f   :  { %1692 = vmatpush2.bf16.msra.mxu0 %v2214_v38  ;;  %v2281_v37 = vcombine.high %v209_v32, %v213_v33  ;;  %v73_v38 = vld [vmem:[%s3295_s1 + $0x110] sm:$0xff]  ;;  %v2280_v43 = vcombine.low %v209_v32, %v213_v33 }
  0x70   :  { %1693 = vmatprep.subr.bf16.mxu0 %v2207_v40  ;;  %v201_v40 = vld [vmem:[%s3295_s1 + $0x510] sm:$0xff] }
  0x71   :  { %1733 = vmatpush2.bf16.msra.mxu1 %v2342_v39  ;;  %v77_v39 = vld [vmem:[%s3295_s1 + $0x130] sm:$0xff] }
  0x72   :  { %1734 = vmatprep.subr.bf16.mxu1 %v2335_v41  ;;  %v205_v41 = vld [vmem:[%s3295_s1 + $0x530] sm:$0xff]  ;;  %v2145_v44 = vcombine.high %v73_v38, %v77_v39  ;;  %v2144_v50 = vcombine.low %v73_v38, %v77_v39 }
  0x73   :  { %1694 = vmatpush2.bf16.msra.mxu0 %v2206_v46  ;;  %v2273_v45 = vcombine.high %v201_v40, %v205_v41  ;;  %v65_v46 = vld [vmem:[%s3295_s1 + $0xd0] sm:$0xff]  ;;  %v2272_v51 = vcombine.low %v201_v40, %v205_v41 }
  0x74   :  { %1695 = vmatprep.subr.bf16.mxu0 %v2199_v48  ;;  %v193_v48 = vld [vmem:[%s3295_s1 + $0x4d0] sm:$0xff] }
  0x75   :  { %1735 = vmatpush2.bf16.msra.mxu1 %v2334_v47  ;;  %v69_v47 = vld [vmem:[%s3295_s1 + $0xf0] sm:$0xff] }
  0x76   :  { %1736 = vmatprep.subr.bf16.mxu1 %v2327_v49  ;;  %v197_v49 = vld [vmem:[%s3295_s1 + $0x4f0] sm:$0xff]  ;;  %v2137_v52 = vcombine.high %v65_v46, %v69_v47  ;;  %v2136_v62 = vcombine.low %v65_v46, %v69_v47 }
  0x77   :  { %1696 = vmatpush2.bf16.msra.mxu0 %v2198_v56  ;;  %v2265_v55 = vcombine.high %v193_v48, %v197_v49  ;;  %v57_v56 = vld [vmem:[%s3295_s1 + $0x90] sm:$0xff]  ;;  %v2264_v63 = vcombine.low %v193_v48, %v197_v49 }
  0x78   :  { %1697 = vmatprep.subr.bf16.mxu0 %v2191_v60  ;;  %v185_v60 = vld [vmem:[%s3295_s1 + $0x490] sm:$0xff] }
  0x79   :  { %1737 = vmatpush2.bf16.msra.mxu1 %v2326_v57  ;;  %v61_v57 = vld [vmem:[%s3295_s1 + $0xb0] sm:$0xff] }
  0x7a   :  { %1738 = vmatprep.subr.bf16.mxu1 %v2319_v61  ;;  %v189_v61 = vld [vmem:[%s3295_s1 + $0x4b0] sm:$0xff]  ;;  %v2129_v0 = vcombine.high %v57_v56, %v61_v57  ;;  %v2128_v6 = vcombine.low %v57_v56, %v61_v57 }
  0x7b   :  { %1698 = vmatpush2.bf16.msra.mxu0 %v2190_v2  ;;  %v2257_v1 = vcombine.high %v185_v60, %v189_v61  ;;  %v49_v2 = vld [vmem:[%s3295_s1 + $0x50] sm:$0xff]  ;;  %v2256_v7 = vcombine.low %v185_v60, %v189_v61 }
  0x7c   :  { %1699 = vmatprep.subr.bf16.mxu0 %v2183_v4  ;;  %v177_v4 = vld [vmem:[%s3295_s1 + $0x450] sm:$0xff] }
  0x7d   :  { %1739 = vmatpush2.bf16.msra.mxu1 %v2318_v3  ;;  %v53_v3 = vld [vmem:[%s3295_s1 + $0x70] sm:$0xff] }
  0x7e   :  { %1740 = vmatprep.subr.bf16.mxu1 %v2311_v5  ;;  %v181_v5 = vld [vmem:[%s3295_s1 + $0x470] sm:$0xff]  ;;  %v2121_v8 = vcombine.high %v49_v2, %v53_v3  ;;  %v2120_v14 = vcombine.low %v49_v2, %v53_v3 }
  0x7f   :  { %1700 = vmatpush2.bf16.msra.mxu0 %v2182_v10  ;;  %v2249_v9 = vcombine.high %v177_v4, %v181_v5  ;;  %v41_v10 = vld [vmem:[%s3295_s1 + $0x10] sm:$0xff]  ;;  %v2248_v15 = vcombine.low %v177_v4, %v181_v5 }
  0x80   :  { %1701 = vmatprep.subr.bf16.mxu0 %v2175_v12  ;;  %v169_v12 = vld [vmem:[%s3295_s1 + $0x410] sm:$0xff] }
  0x81   :  { %1741 = vmatpush2.bf16.msra.mxu1 %v2310_v11  ;;  %v45_v11 = vld [vmem:[%s3295_s1 + $0x30] sm:$0xff] }
  0x82   :  { %1742 = vmatprep.subr.bf16.mxu1 %v2303_v13  ;;  %v173_v13 = vld [vmem:[%s3295_s1 + $0x430] sm:$0xff]  ;;  %v2113_v17 = vcombine.high %v41_v10, %v45_v11  ;;  %v2112_v23 = vcombine.low %v41_v10, %v45_v11 }
  0x83   :  { %1702 = vmatpush2.bf16.msra.mxu0 %v2174_v20  ;;  %v2241_v18 = vcombine.high %v169_v12, %v173_v13  ;;  %v161_v20 = vld [vmem:[%s3295_s1 + $0x3d0] sm:$0xff]  ;;  %v2240_v24 = vcombine.low %v169_v12, %v173_v13 }
  0x84   :  { %1753 = vmatprep.subr.bf16.mxu0 %v2169_v22  ;;  %v289_v22 = vld [vmem:[%s3295_s1 + $0x7d0] sm:$0xff] }
  0x85   :  { %1743 = vmatpush2.bf16.msra.mxu1 %v2302_v21  ;;  %v165_v21 = vld [vmem:[%s3295_s1 + $0x3f0] sm:$0xff] }
  0x86   :  { %1794 = vmatprep.subr.bf16.mxu1 %v2297_v53  ;;  %1704 = vmatmul.mubr.bf16.vlgmr.msra.gmra.mxu0 %v2657_v16  ;;  %v293_v53 = vld [vmem:[%s3295_s1 + $0x7f0] sm:$0xff]  ;;  %v2233_v54 = vcombine.high %v161_v20, %v165_v21  ;;  %v2232_v30 = vcombine.low %v161_v20, %v165_v21 }
  0x87   :  { %1754 = vmatpush1.bf16.msra.mxu0 %v2168_v26  ;;  %1785 = vmatprep.mubr.bf16.mxu0 %v2527_v58  ;;  %v2361_v25 = vcombine.high %v289_v22, %v293_v53  ;;  %v153_v26 = vld [vmem:[%s3295_s1 + $0x390] sm:$0xff]  ;;  %v2360_v31 = vcombine.low %v289_v22, %v293_v53 }
  0x88   :  { %1745 = vmatmul.mubr.bf16.vlgmr.msra.gmra.mxu1 %v2667_v19  ;;  %1755 = vmatprep.subr.bf16.mxu0 %v2161_v28  ;;  %v281_v28 = vld [vmem:[%s3295_s1 + $0x790] sm:$0xff] }
  0x89   :  { %1795 = vmatpush1.bf16.msra.mxu1 %v2296_v27  ;;  %1826 = vmatprep.mubr.bf16.mxu1 %v2531_v59  ;;  %v157_v27 = vld [vmem:[%s3295_s1 + $0x3b0] sm:$0xff] }
  0x8a   :  { %1796 = vmatprep.subr.bf16.mxu1 %v2289_v29  ;;  %v285_v29 = vld [vmem:[%s3295_s1 + $0x7b0] sm:$0xff]  ;;  %v2225_v32 = vcombine.high %v153_v26, %v157_v27  ;;  %v2224_v38 = vcombine.low %v153_v26, %v157_v27 }
  0x8b   :  { %1756 = vmatpush1.bf16.msra.mxu0 %v2160_v34  ;;  %v2353_v33 = vcombine.high %v281_v28, %v285_v29  ;;  %v145_v34 = vld [vmem:[%s3295_s1 + $0x350] sm:$0xff]  ;;  %v2352_v39 = vcombine.low %v281_v28, %v285_v29 }
  0x8c   :  { %1757 = vmatprep.subr.bf16.mxu0 %v2153_v36  ;;  %v273_v36 = vld [vmem:[%s3295_s1 + $0x750] sm:$0xff] }
  0x8d   :  { %1797 = vmatpush1.bf16.msra.mxu1 %v2288_v35  ;;  %v149_v35 = vld [vmem:[%s3295_s1 + $0x370] sm:$0xff] }
  0x8e   :  { %1798 = vmatprep.subr.bf16.mxu1 %v2281_v37  ;;  %v277_v37 = vld [vmem:[%s3295_s1 + $0x770] sm:$0xff]  ;;  %v2217_v40 = vcombine.high %v145_v34, %v149_v35  ;;  %v2216_v46 = vcombine.low %v145_v34, %v149_v35 }
  0x8f   :  { %1758 = vmatpush1.bf16.msra.mxu0 %v2152_v42  ;;  %v2345_v41 = vcombine.high %v273_v36, %v277_v37  ;;  %v137_v42 = vld [vmem:[%s3295_s1 + $0x310] sm:$0xff]  ;;  %v2344_v47 = vcombine.low %v273_v36, %v277_v37 }
  0x90   :  { %1759 = vmatprep.subr.bf16.mxu0 %v2145_v44  ;;  %v265_v44 = vld [vmem:[%s3295_s1 + $0x710] sm:$0xff] }
  0x91   :  { %1799 = vmatpush1.bf16.msra.mxu1 %v2280_v43  ;;  %v141_v43 = vld [vmem:[%s3295_s1 + $0x330] sm:$0xff] }
  0x92   :  { %1800 = vmatprep.subr.bf16.mxu1 %v2273_v45  ;;  %v269_v45 = vld [vmem:[%s3295_s1 + $0x730] sm:$0xff]  ;;  %v2209_v48 = vcombine.high %v137_v42, %v141_v43  ;;  %v2208_v56 = vcombine.low %v137_v42, %v141_v43 }
  0x93   :  { %1760 = vmatpush1.bf16.msra.mxu0 %v2144_v50  ;;  %v2337_v49 = vcombine.high %v265_v44, %v269_v45  ;;  %v129_v50 = vld [vmem:[%s3295_s1 + $0x2d0] sm:$0xff]  ;;  %v2336_v57 = vcombine.low %v265_v44, %v269_v45 }
  0x94   :  { %1761 = vmatprep.subr.bf16.mxu0 %v2137_v52  ;;  %v257_v52 = vld [vmem:[%s3295_s1 + $0x6d0] sm:$0xff] }
  0x95   :  { %1801 = vmatpush1.bf16.msra.mxu1 %v2272_v51  ;;  %v133_v51 = vld [vmem:[%s3295_s1 + $0x2f0] sm:$0xff] }
  0x96   :  { %1802 = vmatprep.subr.bf16.mxu1 %v2265_v55  ;;  %v261_v55 = vld [vmem:[%s3295_s1 + $0x6f0] sm:$0xff]  ;;  %v2201_v60 = vcombine.high %v129_v50, %v133_v51  ;;  %v2200_v2 = vcombine.low %v129_v50, %v133_v51 }
  0x97   :  { %1762 = vmatpush1.bf16.msra.mxu0 %v2136_v62  ;;  %v2329_v61 = vcombine.high %v257_v52, %v261_v55  ;;  %v121_v62 = vld [vmem:[%s3295_s1 + $0x290] sm:$0xff]  ;;  %v2328_v3 = vcombine.low %v257_v52, %v261_v55 }
  0x98   :  { %1763 = vmatprep.subr.bf16.mxu0 %v2129_v0  ;;  %v249_v0 = vld [vmem:[%s3295_s1 + $0x690] sm:$0xff] }
  0x99   :  { %1803 = vmatpush1.bf16.msra.mxu1 %v2264_v63  ;;  %v125_v63 = vld [vmem:[%s3295_s1 + $0x2b0] sm:$0xff] }
  0x9a   :  { %1804 = vmatprep.subr.bf16.mxu1 %v2257_v1  ;;  %v253_v1 = vld [vmem:[%s3295_s1 + $0x6b0] sm:$0xff]  ;;  %v2193_v4 = vcombine.high %v121_v62, %v125_v63  ;;  %v2192_v10 = vcombine.low %v121_v62, %v125_v63 }
  0x9b   :  { %1764 = vmatpush1.bf16.msra.mxu0 %v2128_v6  ;;  %v2321_v5 = vcombine.high %v249_v0, %v253_v1  ;;  %v113_v6 = vld [vmem:[%s3295_s1 + $0x250] sm:$0xff]  ;;  %v2320_v11 = vcombine.low %v249_v0, %v253_v1  ;;  %v58_v0 = vld [vmem:[%s3295_s1 + $0x98] sm:$0xff] }
  0x9c   :  { %1765 = vmatprep.subr.bf16.mxu0 %v2121_v8  ;;  %v241_v8 = vld [vmem:[%s3295_s1 + $0x650] sm:$0xff]  ;;  %v62_v1 = vld [vmem:[%s3295_s1 + $0xb8] sm:$0xff] }
  0x9d   :  { %1805 = vmatpush1.bf16.msra.mxu1 %v2256_v7  ;;  %v117_v7 = vld [vmem:[%s3295_s1 + $0x270] sm:$0xff] }
  0x9e   :  { %1806 = vmatprep.subr.bf16.mxu1 %v2249_v9  ;;  %v245_v9 = vld [vmem:[%s3295_s1 + $0x670] sm:$0xff]  ;;  %v2185_v12 = vcombine.high %v113_v6, %v117_v7  ;;  %v2184_v20 = vcombine.low %v113_v6, %v117_v7  ;;  %v2131_v6 = vcombine.high %v58_v0, %v62_v1 }
  0x9f   :  { %1766 = vmatpush1.bf16.msra.mxu0 %v2120_v14  ;;  %v2313_v13 = vcombine.high %v241_v8, %v245_v9  ;;  %v105_v14 = vld [vmem:[%s3295_s1 + $0x210] sm:$0xff]  ;;  %v2312_v21 = vcombine.low %v241_v8, %v245_v9  ;;  %v50_v8 = vld [vmem:[%s3295_s1 + $0x58] sm:$0xff] }
  0xa0   :  { %1767 = vmatprep.subr.bf16.mxu0 %v2113_v17  ;;  %v233_v17 = vld [vmem:[%s3295_s1 + $0x610] sm:$0xff]  ;;  %v54_v9 = vld [vmem:[%s3295_s1 + $0x78] sm:$0xff] }
  0xa1   :  { %1807 = vmatpush1.bf16.msra.mxu1 %v2248_v15  ;;  %v109_v15 = vld [vmem:[%s3295_s1 + $0x230] sm:$0xff] }
  0xa2   :  { %1808 = vmatprep.subr.bf16.mxu1 %v2241_v18  ;;  %v237_v18 = vld [vmem:[%s3295_s1 + $0x630] sm:$0xff]  ;;  %v2177_v22 = vcombine.high %v105_v14, %v109_v15  ;;  %v2176_v26 = vcombine.low %v105_v14, %v109_v15  ;;  %v2123_v14 = vcombine.high %v50_v8, %v54_v9 }
  0xa3   :  { %1768 = vmatpush1.bf16.msra.mxu0 %v2112_v23  ;;  %v2305_v53 = vcombine.high %v233_v17, %v237_v18  ;;  %v98_v23 = vld [vmem:[%s3295_s1 + $0x1d8] sm:$0xff]  ;;  %v2304_v27 = vcombine.low %v233_v17, %v237_v18 }
  0xa4   :  { %1769 = vmatprep.subr.bf16.mxu0 %v2233_v54  ;;  %v226_v54 = vld [vmem:[%s3295_s1 + $0x5d8] sm:$0xff] }
  0xa5   :  { %1809 = vmatpush1.bf16.msra.mxu1 %v2240_v24  ;;  %v102_v24 = vld [vmem:[%s3295_s1 + $0x1f8] sm:$0xff] }
  0xa6   :  { %1810 = vmatprep.subr.bf16.mxu1 %v2361_v25  ;;  %v230_v25 = vld [vmem:[%s3295_s1 + $0x5f8] sm:$0xff]  ;;  %v2171_v28 = vcombine.high %v98_v23, %v102_v24  ;;  %v2170_v34 = vcombine.low %v98_v23, %v102_v24 }
  0xa7   :  { %1770 = vmatpush2.bf16.msra.mxu0 %v2232_v30  ;;  %v2299_v29 = vcombine.high %v226_v54, %v230_v25  ;;  %v90_v30 = vld [vmem:[%s3295_s1 + $0x198] sm:$0xff]  ;;  %v2298_v35 = vcombine.low %v226_v54, %v230_v25 }
  0xa8   :  { %1771 = vmatprep.subr.bf16.mxu0 %v2225_v32  ;;  %v218_v32 = vld [vmem:[%s3295_s1 + $0x598] sm:$0xff] }
  0xa9   :  { %1811 = vmatpush2.bf16.msra.mxu1 %v2360_v31  ;;  %v94_v31 = vld [vmem:[%s3295_s1 + $0x1b8] sm:$0xff] }
  0xaa   :  { %1812 = vmatprep.subr.bf16.mxu1 %v2353_v33  ;;  %v222_v33 = vld [vmem:[%s3295_s1 + $0x5b8] sm:$0xff]  ;;  %v2163_v36 = vcombine.high %v90_v30, %v94_v31  ;;  %v2162_v42 = vcombine.low %v90_v30, %v94_v31 }
  0xab   :  { %1772 = vmatpush2.bf16.msra.mxu0 %v2224_v38  ;;  %v2291_v37 = vcombine.high %v218_v32, %v222_v33  ;;  %v82_v38 = vld [vmem:[%s3295_s1 + $0x158] sm:$0xff]  ;;  %v2290_v43 = vcombine.low %v218_v32, %v222_v33 }
  0xac   :  { %1773 = vmatprep.subr.bf16.mxu0 %v2217_v40  ;;  %v210_v40 = vld [vmem:[%s3295_s1 + $0x558] sm:$0xff] }
  0xad   :  { %1813 = vmatpush2.bf16.msra.mxu1 %v2352_v39  ;;  %v86_v39 = vld [vmem:[%s3295_s1 + $0x178] sm:$0xff] }
  0xae   :  { %1814 = vmatprep.subr.bf16.mxu1 %v2345_v41  ;;  %v214_v41 = vld [vmem:[%s3295_s1 + $0x578] sm:$0xff]  ;;  %v2155_v44 = vcombine.high %v82_v38, %v86_v39  ;;  %v2154_v50 = vcombine.low %v82_v38, %v86_v39 }
  0xaf   :  { %1774 = vmatpush2.bf16.msra.mxu0 %v2216_v46  ;;  %v2283_v45 = vcombine.high %v210_v40, %v214_v41  ;;  %v74_v46 = vld [vmem:[%s3295_s1 + $0x118] sm:$0xff]  ;;  %v2282_v51 = vcombine.low %v210_v40, %v214_v41 }
  0xb0   :  { %1775 = vmatprep.subr.bf16.mxu0 %v2209_v48  ;;  %v202_v48 = vld [vmem:[%s3295_s1 + $0x518] sm:$0xff] }
  0xb1   :  { %1815 = vmatpush2.bf16.msra.mxu1 %v2344_v47  ;;  %v78_v47 = vld [vmem:[%s3295_s1 + $0x138] sm:$0xff] }
  0xb2   :  { %1816 = vmatprep.subr.bf16.mxu1 %v2337_v49  ;;  %v206_v49 = vld [vmem:[%s3295_s1 + $0x538] sm:$0xff]  ;;  %v2147_v52 = vcombine.high %v74_v46, %v78_v47 }
  0xb3   :  { %1776 = vmatpush2.bf16.msra.mxu0 %v2208_v56  ;;  %v2275_v55 = vcombine.high %v202_v48, %v206_v49  ;;  %v70_v56 = vld [vmem:[%s3295_s1 + $0xf8] sm:$0xff] }
  0xb4   :  { %1777 = vmatprep.subr.bf16.mxu0 %v2201_v60  ;;  %v2146_v60 = vcombine.low %v74_v46, %v78_v47  ;;  %v42_v17 = vld [vmem:[%s3295_s1 + $0x18] sm:$0xff] }
  0xb5   :  { %1817 = vmatpush2.bf16.msra.mxu1 %v2336_v57  ;;  %v198_v57 = vld [vmem:[%s3295_s1 + $0x4f8] sm:$0xff] }
  0xb6   :  { %1818 = vmatprep.subr.bf16.mxu1 %v2329_v61  ;;  %v2274_v61 = vcombine.low %v202_v48, %v206_v49  ;;  %v46_v18 = vld [vmem:[%s3295_s1 + $0x38] sm:$0xff] }
  0xb7   :  { %1778 = vmatpush2.bf16.msra.mxu0 %v2200_v2  ;;  %v186_v2 = vld [vmem:[%s3295_s1 + $0x498] sm:$0xff]  ;;  %v2115_v23 = vcombine.high %v42_v17, %v46_v18 }
  0xb8   :  { %1779 = vmatprep.subr.bf16.mxu0 %v2193_v4  ;;  %v162_v54 = vld [vmem:[%s3295_s1 + $0x3d8] sm:$0xff] }
  0xb9   :  { %1819 = vmatpush2.bf16.msra.mxu1 %v2328_v3  ;;  %v190_v3 = vld [vmem:[%s3295_s1 + $0x4b8] sm:$0xff] }
  0xba   :  { %1820 = vmatprep.subr.bf16.mxu1 %v2321_v5  ;;  %v2259_v7 = vcombine.high %v186_v2, %v190_v3  ;;  %v166_v25 = vld [vmem:[%s3295_s1 + $0x3f8] sm:$0xff] }
  0xbb   :  { %1780 = vmatpush2.bf16.msra.mxu0 %v2192_v10  ;;  %v178_v10 = vld [vmem:[%s3295_s1 + $0x458] sm:$0xff]  ;;  %v2235_v30 = vcombine.high %v162_v54, %v166_v25 }
  0xbc   :  { %1781 = vmatprep.subr.bf16.mxu0 %v2185_v12  ;;  %v2130_v12 = vcombine.low %v58_v0, %v62_v1  ;;  %v154_v32 = vld [vmem:[%s3295_s1 + $0x398] sm:$0xff] }
  0xbd   :  { %1821 = vmatpush2.bf16.msra.mxu1 %v2320_v11  ;;  %v182_v11 = vld [vmem:[%s3295_s1 + $0x478] sm:$0xff] }
  0xbe   :  { %1822 = vmatprep.subr.bf16.mxu1 %v2313_v13  ;;  %v2258_v13 = vcombine.low %v186_v2, %v190_v3  ;;  %v2251_v15 = vcombine.high %v178_v10, %v182_v11  ;;  %v158_v33 = vld [vmem:[%s3295_s1 + $0x3b8] sm:$0xff] }
  0xbf   :  { %1782 = vmatpush2.bf16.msra.mxu0 %v2184_v20  ;;  %v170_v20 = vld [vmem:[%s3295_s1 + $0x418] sm:$0xff]  ;;  %v2227_v38 = vcombine.high %v154_v32, %v158_v33 }
  0xc0   :  { %1783 = vmatprep.subr.bf16.mxu0 %v2177_v22  ;;  %v2122_v22 = vcombine.low %v50_v8, %v54_v9  ;;  %v146_v40 = vld [vmem:[%s3295_s1 + $0x358] sm:$0xff] }
  0xc1   :  { %1823 = vmatpush2.bf16.msra.mxu1 %v2312_v21  ;;  %v174_v21 = vld [vmem:[%s3295_s1 + $0x438] sm:$0xff] }
  0xc2   :  { %1824 = vmatprep.subr.bf16.mxu1 %v2305_v53  ;;  %v2250_v53 = vcombine.low %v178_v10, %v182_v11  ;;  %v2243_v24 = vcombine.high %v170_v20, %v174_v21  ;;  %v150_v41 = vld [vmem:[%s3295_s1 + $0x378] sm:$0xff] }
  0xc3   :  { %1784 = vmatpush2.bf16.msra.mxu0 %v2176_v26  ;;  %v290_v26 = vld [vmem:[%s3295_s1 + $0x7d8] sm:$0xff]  ;;  %v2219_v46 = vcombine.high %v146_v40, %v150_v41 }
  0xc4   :  { %1835 = vmatprep.subr.bf16.mxu0 %v2171_v28  ;;  %v2114_v28 = vcombine.low %v42_v17, %v46_v18  ;;  %v138_v48 = vld [vmem:[%s3295_s1 + $0x318] sm:$0xff] }
  0xc5   :  { %1825 = vmatpush2.bf16.msra.mxu1 %v2304_v27  ;;  %v294_v27 = vld [vmem:[%s3295_s1 + $0x7f8] sm:$0xff] }
  0xc6   :  { %1876 = vmatprep.subr.bf16.mxu1 %v2299_v29  ;;  %1786 = vmatmul.mubr.bf16.vlgmr.msra.gmra.mxu0 %v2657_v16  ;;  %v2242_v29 = vcombine.low %v170_v20, %v174_v21  ;;  %v2363_v31 = vcombine.high %v290_v26, %v294_v27  ;;  %v142_v49 = vld [vmem:[%s3295_s1 + $0x338] sm:$0xff] }
  0xc7   :  { %1836 = vmatpush1.bf16.msra.mxu0 %v2170_v34  ;;  %1867 = vmatprep.mubr.bf16.mxu0 %v2527_v58  ;;  %v66_v58 = vld [vmem:[%s3295_s1 + $0xd8] sm:$0xff] }
  0xc8   :  { %1827 = vmatmul.mubr.bf16.vlgmr.msra.gmra.mxu1 %v2667_v19  ;;  %1837 = vmatprep.subr.bf16.mxu0 %v2163_v36  ;;  %v2139_v62 = vcombine.high %v66_v58, %v70_v56  ;;  %v2138_v4 = vcombine.low %v66_v58, %v70_v56  ;;  %v282_v34 = vld [vmem:[%s3295_s1 + $0x798] sm:$0xff]  ;;  %v2234_v36 = vcombine.low %v162_v54, %v166_v25 }
  0xc9   :  { %1877 = vmatpush1.bf16.msra.mxu1 %v2298_v35  ;;  %1908 = vmatprep.mubr.bf16.mxu1 %v2531_v59  ;;  %v194_v59 = vld [vmem:[%s3295_s1 + $0x4d8] sm:$0xff]  ;;  %v2211_v58 = vcombine.high %v138_v48, %v142_v49 }
  0xca   :  { %1878 = vmatprep.subr.bf16.mxu1 %v2291_v37  ;;  %v2267_v63 = vcombine.high %v194_v59, %v198_v57  ;;  %v2266_v5 = vcombine.low %v194_v59, %v198_v57  ;;  %v286_v35 = vld [vmem:[%s3295_s1 + $0x7b8] sm:$0xff]  ;;  %v2362_v37 = vcombine.low %v290_v26, %v294_v27 }
  0xcb   :  { %1838 = vmatpush1.bf16.msra.mxu0 %v2162_v42  ;;  %v2355_v39 = vcombine.high %v282_v34, %v286_v35  ;;  %v274_v42 = vld [vmem:[%s3295_s1 + $0x758] sm:$0xff] }
  0xcc   :  { %1839 = vmatprep.subr.bf16.mxu0 %v2155_v44  ;;  %v2226_v44 = vcombine.low %v154_v32, %v158_v33  ;;  %v130_v59 = vld [vmem:[%s3295_s1 + $0x2d8] sm:$0xff]  ;;  %v3245_v33 = vld [vmem:[%s3298_s3] sm:$0xff] }
  0xcd   :  { %1879 = vmatpush1.bf16.msra.mxu1 %v2290_v43  ;;  %v278_v43 = vld [vmem:[%s3295_s1 + $0x778] sm:$0xff] }
  0xce   :  { %1880 = vmatprep.subr.bf16.mxu1 %v2283_v45  ;;  %v2354_v45 = vcombine.low %v282_v34, %v286_v35  ;;  %v2347_v47 = vcombine.high %v274_v42, %v278_v43  ;;  %v134_v57 = vld [vmem:[%s3295_s1 + $0x2f8] sm:$0xff] }
  0xcf   :  { %1840 = vmatpush1.bf16.msra.mxu0 %v2154_v50  ;;  %v266_v50 = vld [vmem:[%s3295_s1 + $0x718] sm:$0xff]  ;;  %v2203_v0 = vcombine.high %v130_v59, %v134_v57 }
  0xd0   :  { %1841 = vmatprep.subr.bf16.mxu0 %v2147_v52  ;;  %v2218_v52 = vcombine.low %v146_v40, %v150_v41  ;;  %v122_v2 = vld [vmem:[%s3295_s1 + $0x298] sm:$0xff] }
  0xd1   :  { %1881 = vmatpush1.bf16.msra.mxu1 %v2282_v51  ;;  %v270_v51 = vld [vmem:[%s3295_s1 + $0x738] sm:$0xff] }
  0xd2   :  { %1882 = vmatprep.subr.bf16.mxu1 %v2275_v55  ;;  %v2346_v55 = vcombine.low %v274_v42, %v278_v43  ;;  %v2339_v56 = vcombine.high %v266_v50, %v270_v51  ;;  %v126_v3 = vld [vmem:[%s3295_s1 + $0x2b8] sm:$0xff] }
  0xd3   :  { %1842 = vmatpush1.bf16.msra.mxu0 %v2146_v60  ;;  %v258_v60 = vld [vmem:[%s3295_s1 + $0x6d8] sm:$0xff]  ;;  %v2195_v8 = vcombine.high %v122_v2, %v126_v3 }
  0xd4   :  { %1843 = vmatprep.subr.bf16.mxu0 %v2139_v62  ;;  %v2210_v62 = vcombine.low %v138_v48, %v142_v49  ;;  %v114_v10 = vld [vmem:[%s3295_s1 + $0x258] sm:$0xff] }
  0xd5   :  { %1883 = vmatpush1.bf16.msra.mxu1 %v2274_v61  ;;  %v262_v61 = vld [vmem:[%s3295_s1 + $0x6f8] sm:$0xff] }
  0xd6   :  { %1884 = vmatprep.subr.bf16.mxu1 %v2267_v63  ;;  %v2338_v63 = vcombine.low %v266_v50, %v270_v51  ;;  %v2331_v1 = vcombine.high %v258_v60, %v262_v61  ;;  %v118_v11 = vld [vmem:[%s3295_s1 + $0x278] sm:$0xff] }
  0xd7   :  { %1844 = vmatpush1.bf16.msra.mxu0 %v2138_v4  ;;  %v250_v4 = vld [vmem:[%s3295_s1 + $0x698] sm:$0xff]  ;;  %v2187_v17 = vcombine.high %v114_v10, %v118_v11 }
  0xd8   :  { %1845 = vmatprep.subr.bf16.mxu0 %v2131_v6  ;;  %v2202_v6 = vcombine.low %v130_v59, %v134_v57  ;;  %v106_v20 = vld [vmem:[%s3295_s1 + $0x218] sm:$0xff] }
  0xd9   :  { %1885 = vmatpush1.bf16.msra.mxu1 %v2266_v5  ;;  %v254_v5 = vld [vmem:[%s3295_s1 + $0x6b8] sm:$0xff] }
  0xda   :  { %1886 = vmatprep.subr.bf16.mxu1 %v2259_v7  ;;  %v2330_v7 = vcombine.low %v258_v60, %v262_v61  ;;  %v2323_v9 = vcombine.high %v250_v4, %v254_v5  ;;  %v110_v21 = vld [vmem:[%s3295_s1 + $0x238] sm:$0xff] }
  0xdb   :  { %1846 = vmatpush1.bf16.msra.mxu0 %v2130_v12  ;;  %v242_v12 = vld [vmem:[%s3295_s1 + $0x658] sm:$0xff]  ;;  %v2179_v25 = vcombine.high %v106_v20, %v110_v21 }
  0xdc   :  { %1847 = vmatprep.subr.bf16.mxu0 %v2123_v14  ;;  %v2194_v14 = vcombine.low %v122_v2, %v126_v3 }
  0xdd   :  { %1887 = vmatpush1.bf16.msra.mxu1 %v2258_v13  ;;  %v246_v13 = vld [vmem:[%s3295_s1 + $0x678] sm:$0xff] }
  0xde   :  { %1888 = vmatprep.subr.bf16.mxu1 %v2251_v15  ;;  %v2322_v15 = vcombine.low %v250_v4, %v254_v5  ;;  %v2315_v18 = vcombine.high %v242_v12, %v246_v13  ;;  %v2314_v54 = vcombine.low %v242_v12, %v246_v13 }
  0xdf   :  { %1848 = vmatpush1.bf16.msra.mxu0 %v2122_v22  ;;  %v234_v22 = vld [vmem:[%s3295_s1 + $0x618] sm:$0xff] }
  0xe0   :  { %1849 = vmatprep.subr.bf16.mxu0 %v2115_v23  ;;  %v1946_v23 = vlaneseq }
  0xe1   :  { %1889 = vmatpush1.bf16.msra.mxu1 %v2250_v53  ;;  %v238_v53 = vld [vmem:[%s3295_s1 + $0x638] sm:$0xff] }
  0xe2   :  { %1890 = vmatprep.subr.bf16.mxu1 %v2243_v24  ;;  %v2186_v24 = vcombine.low %v114_v10, %v118_v11  ;;  %v2307_v26 = vcombine.high %v234_v22, %v238_v53  ;;  %v3233_v27 = vshrl.u32 %v1946_v23, 7 }
  0xe3   :  { %1850 = vmatpush1.bf16.msra.mxu0 %v2114_v28  ;;  %v2178_v28 = vcombine.low %v106_v20, %v110_v21 }
  0xe4   :  { %1851 = vmatprep.subr.bf16.mxu0 %v2235_v30  ;;  %v1948_v30 = vsub.s32 0, %v3233_v27  ;;  %v1952_v32 = vsub.s32 1, %v3233_v27 }
  0xe5   :  { %1891 = vmatpush1.bf16.msra.mxu1 %v2242_v29  ;;  %v2306_v29 = vcombine.low %v234_v22, %v238_v53 }
  0xe6   :  { %1892 = vmatprep.subr.bf16.mxu1 %v2363_v31  ;;  %v3239_v31 = vld [vmem:[%s3297_s2] sm:$0xff] }
  0xe7   :  { %1852 = vmatpush2.bf16.msra.mxu0 %v2234_v36  ;;  %v1949_v35 = vrot.slane %v3239_v31, %v1948_v30  ;;  %v1953_v40 = vrot.slane %v3239_v31, %v1952_v32 }
  0xe8   :  { %1853 = vmatprep.subr.bf16.mxu0 %v2227_v38  ;;  %v1999_v38 = vrot.slane %v3245_v33, %v1948_v30  ;;  %v1968_v30 = vsub.s32 5, %v3233_v27 }
  0xe9   :  { %1893 = vmatpush2.bf16.msra.mxu1 %v2362_v37 }
  0xea   :  { %1894 = vmatprep.subr.bf16.mxu1 %v2355_v39 }
  0xeb   :  { %1854 = vmatpush2.bf16.msra.mxu0 %v2226_v44  ;;  %v2003_v44 = vrot.slane %v3245_v33, %v1952_v32 }
  0xec   :  { %1855 = vmatprep.subr.bf16.mxu0 %v2219_v46 }
  0xed   :  { %1895 = vmatpush2.bf16.msra.mxu1 %v2354_v45 }
  0xee   :  { %1896 = vmatprep.subr.bf16.mxu1 %v2347_v47 }
  0xef   :  { %1856 = vmatpush2.bf16.msra.mxu0 %v2218_v52 }
  0xf0   :  { %1857 = vmatprep.subr.bf16.mxu0 %v2211_v58 }
  0xf1   :  { %1897 = vmatpush2.bf16.msra.mxu1 %v2346_v55 }
  0xf2   :  { %1898 = vmatprep.subr.bf16.mxu1 %v2339_v56 }
  0xf3   :  { %1858 = vmatpush2.bf16.msra.mxu0 %v2210_v62  ;;  %v1956_v62 = vsub.s32 2, %v3233_v27 }
  0xf4   :  { %1859 = vmatprep.subr.bf16.mxu0 %v2203_v0 }
  0xf5   :  { %1899 = vmatpush2.bf16.msra.mxu1 %v2338_v63  ;;  %v1960_v63 = vsub.s32 3, %v3233_v27  ;;  %v2007_v4 = vrot.slane %v3245_v33, %v1956_v62 }
  0xf6   :  { %1900 = vmatprep.subr.bf16.mxu1 %v2331_v1  ;;  %v1957_v1 = vrot.slane %v3239_v31, %v1956_v62  ;;  %v1976_v62 = vsub.s32 7, %v3233_v27 }
  0xf7   :  { %1860 = vmatpush2.bf16.msra.mxu0 %v2202_v6  ;;  %v1961_v6 = vrot.slane %v3239_v31, %v1960_v63  ;;  %v2011_v10 = vrot.slane %v3245_v33, %v1960_v63 }
  0xf8   :  { %1861 = vmatprep.subr.bf16.mxu0 %v2195_v8 }
  0xf9   :  { %1901 = vmatpush2.bf16.msra.mxu1 %v2330_v7 }
  0xfa   :  { %1902 = vmatprep.subr.bf16.mxu1 %v2323_v9 }
  0xfb   :  { %1862 = vmatpush2.bf16.msra.mxu0 %v2194_v14 }
  0xfc   :  { %1863 = vmatprep.subr.bf16.mxu0 %v2187_v17 }
  0xfd   :  { %1903 = vmatpush2.bf16.msra.mxu1 %v2322_v15 }
  0xfe   :  { %1904 = vmatprep.subr.bf16.mxu1 %v2315_v18 }
  0xff   :  { %1864 = vmatpush2.bf16.msra.mxu0 %v2186_v24 }
 0x100   :  { %1865 = vmatprep.subr.bf16.mxu0 %v2179_v25 }
 0x101   :  { %1905 = vmatpush2.bf16.msra.mxu1 %v2314_v54 }
 0x102   :  { %1906 = vmatprep.subr.bf16.mxu1 %v2307_v26 }
 0x103   :  { %1866 = vmatpush2.bf16.msra.mxu0 %v2178_v28 }
 0x105   :  { %1907 = vmatpush2.bf16.msra.mxu1 %v2306_v29  ;;  %v1964_v29 = vsub.s32 4, %v3233_v27 }
 0x106   :  { %v1623_v34 = vpop.f32.mrf.mxu0  ;;  %1868 = vmatmul.mubr.bf16.vlgmr.msra.gmra.mxu0 %v2657_v16 }
 0x108   :  { %v1664_v36 = vpop.f32.mrf.mxu1  ;;  %1909 = vmatmul.mubr.bf16.vlgmr.msra.gmra.mxu1 %v2667_v19  ;;  %v1625_v39 = vpop.f32.mrf.mxu0 }
 0x109   :  { %v1665_v37 = vadd.f32 %v1664_v36, %v1623_v34  ;;  %v1965_v34 = vrot.slane %v3239_v31, %v1964_v29 }
 0x10a   :  { %v1666_v41 = vpop.f32.mrf.mxu1  ;;  %v1627_v45 = vpop.f32.mrf.mxu0 }
 0x10b   :  { %v1986_v42 = vmul.f32 %v1949_v35, %v1665_v37  ;;  %v1667_v43 = vadd.f32 %v1666_v41, %v1625_v39  ;;  %v2015_v37 = vrot.slane %v3245_v33, %v1964_v29  ;;  %v1969_v39 = vrot.slane %v3239_v31, %v1968_v30 }
 0x10c   :  { %v1668_v46 = vpop.f32.mrf.mxu1  ;;  %v1628_v49 = vpop.f32.mrf.mxu0 }
 0x10d   :  { %v2036_v47 = vadd.f32 %v1999_v38, %v1986_v42  ;;  %v1987_v48 = vmul.f32 %v1953_v40, %v1667_v43  ;;  %v2019_v43 = vrot.slane %v3245_v33, %v1968_v30 }
 0x10e   :  { %v1669_v16 = vpop.f32.mrf.mxu1 }
 0x10f   :  { %v2044_v50 = vsub.f32 0.0, %v2036_v47  ;;  %v2037_v51 = vadd.f32 %v2003_v44, %v1987_v48 }
 0x111   :  { %v2052_v19 = vmul.f32 1.442695, %v2044_v50  ;;  %v2045_v52 = vsub.f32 0.0, %v2037_v51 }
 0x113   :  { %2368 = vpow2.f32 %v2052_v19  ;;  %v2054_v55 = vmul.f32 1.442695, %v2045_v52 }
 0x115   :  { %2370 = vpow2.f32 %v2054_v55 }
 0x120   :  { %v2369_v58 = vpop.eup %2368 }
 0x121   :  { %v2068_v56 = vadd.f32 1.0, %v2369_v58 }
 0x122   :  { %v2371_v59 = vpop.eup %2370 }
 0x123   :  { %2372 = vrcp.f32 %v2068_v56  ;;  %v2069_v57 = vadd.f32 1.0, %v2371_v59 }
 0x125   :  { %2374 = vrcp.f32 %v2069_v57 }
 0x130   :  { %v2373_v60 = vpop.eup %2372 }
 0x131   :  { %2092 = vst [vmem:[%s3299_s4] sm:$0xff] %v2373_v60 }
 0x132   :  { %v2375_v61 = vpop.eup %2374 }
 0x133   :  { %2093 = vst [vmem:[%s3299_s4 + $0x8] sm:$0xff] %v2375_v61  ;;  %v1972_v61 = vsub.s32 6, %v3233_v27 }
 0x146   :  { %v1705_v0 = vpop.f32.mrf.mxu0 }
 0x148   :  { %v1746_v2 = vpop.f32.mrf.mxu1  ;;  %v1707_v5 = vpop.f32.mrf.mxu0 }
 0x149   :  { %v1747_v3 = vadd.f32 %v1746_v2, %v1705_v0  ;;  %v1973_v0 = vrot.slane %v3239_v31, %v1972_v61 }
 0x14a   :  { %v1748_v7 = vpop.f32.mrf.mxu1  ;;  %v1709_v11 = vpop.f32.mrf.mxu0 }
 0x14b   :  { %v1988_v8 = vmul.f32 %v1957_v1, %v1747_v3  ;;  %v1749_v9 = vadd.f32 %v1748_v7, %v1707_v5  ;;  %v2023_v3 = vrot.slane %v3245_v33, %v1972_v61  ;;  %v1977_v5 = vrot.slane %v3239_v31, %v1976_v62 }
 0x14c   :  { %v1750_v12 = vpop.f32.mrf.mxu1  ;;  %v1710_v15 = vpop.f32.mrf.mxu0 }
 0x14d   :  { %v2038_v13 = vadd.f32 %v2007_v4, %v1988_v8  ;;  %v1989_v14 = vmul.f32 %v1961_v6, %v1749_v9  ;;  %v2027_v9 = vrot.slane %v3245_v33, %v1976_v62 }
 0x14e   :  { %v1751_v17 = vpop.f32.mrf.mxu1 }
 0x14f   :  { %v2046_v18 = vsub.f32 0.0, %v2038_v13  ;;  %v2039_v20 = vadd.f32 %v2011_v10, %v1989_v14 }
 0x151   :  { %v2056_v21 = vmul.f32 1.442695, %v2046_v18  ;;  %v2047_v22 = vsub.f32 0.0, %v2039_v20 }
 0x153   :  { %2376 = vpow2.f32 %v2056_v21  ;;  %v2058_v53 = vmul.f32 1.442695, %v2047_v22 }
 0x155   :  { %2378 = vpow2.f32 %v2058_v53 }
 0x160   :  { %v2377_v23 = vpop.eup %2376 }
 0x161   :  { %v2070_v24 = vadd.f32 1.0, %v2377_v23 }
 0x162   :  { %v2379_v54 = vpop.eup %2378 }
 0x163   :  { %2380 = vrcp.f32 %v2070_v24  ;;  %v2071_v25 = vadd.f32 1.0, %v2379_v54 }
 0x165   :  { %2382 = vrcp.f32 %v2071_v25 }
 0x170   :  { %v2381_v26 = vpop.eup %2380 }
 0x171   :  { %2094 = vst [vmem:[%s3299_s4 + $0x10] sm:$0xff] %v2381_v26 }
 0x172   :  { %v2383_v28 = vpop.eup %2382 }
 0x173   :  { %2095 = vst [vmem:[%s3299_s4 + $0x18] sm:$0xff] %v2383_v28 }
 0x186   :  { %v1787_v32 = vpop.f32.mrf.mxu0 }
 0x188   :  { %v1828_v35 = vpop.f32.mrf.mxu1  ;;  %v1789_v38 = vpop.f32.mrf.mxu0 }
 0x189   :  { %v1829_v36 = vadd.f32 %v1828_v35, %v1787_v32 }
 0x18a   :  { %v1830_v40 = vpop.f32.mrf.mxu1  ;;  %v1791_v44 = vpop.f32.mrf.mxu0 }
 0x18b   :  { %v1990_v41 = vmul.f32 %v1965_v34, %v1829_v36  ;;  %v1831_v42 = vadd.f32 %v1830_v40, %v1789_v38 }
 0x18c   :  { %v1832_v45 = vpop.f32.mrf.mxu1  ;;  %v1792_v48 = vpop.f32.mrf.mxu0 }
 0x18d   :  { %v2040_v46 = vadd.f32 %v2015_v37, %v1990_v41  ;;  %v1991_v47 = vmul.f32 %v1969_v39, %v1831_v42 }
 0x18e   :  { %v1833_v49 = vpop.f32.mrf.mxu1 }
 0x18f   :  { %v2048_v16 = vsub.f32 0.0, %v2040_v46  ;;  %v2041_v50 = vadd.f32 %v2019_v43, %v1991_v47 }
 0x191   :  { %v2060_v51 = vmul.f32 1.442695, %v2048_v16  ;;  %v2049_v19 = vsub.f32 0.0, %v2041_v50 }
 0x193   :  { %2384 = vpow2.f32 %v2060_v51  ;;  %v2062_v52 = vmul.f32 1.442695, %v2049_v19 }
 0x195   :  { %2386 = vpow2.f32 %v2062_v52 }
 0x1a0   :  { %v2385_v55 = vpop.eup %2384 }
 0x1a1   :  { %v2072_v58 = vadd.f32 1.0, %v2385_v55 }
 0x1a2   :  { %v2387_v56 = vpop.eup %2386 }
 0x1a3   :  { %2388 = vrcp.f32 %v2072_v58  ;;  %v2073_v59 = vadd.f32 1.0, %v2387_v56 }
 0x1a5   :  { %2390 = vrcp.f32 %v2073_v59 }
 0x1b0   :  { %v2389_v57 = vpop.eup %2388 }
 0x1b1   :  { %2096 = vst [vmem:[%s3299_s4 + $0x20] sm:$0xff] %v2389_v57 }
 0x1b2   :  { %v2391_v60 = vpop.eup %2390 }
 0x1b3   :  { %2097 = vst [vmem:[%s3299_s4 + $0x28] sm:$0xff] %v2391_v60 }
 0x1c6   :  { %v1869_v63 = vpop.f32.mrf.mxu0 }
 0x1c8   :  { %v1910_v1 = vpop.f32.mrf.mxu1  ;;  %v1871_v4 = vpop.f32.mrf.mxu0 }
 0x1c9   :  { %v1911_v2 = vadd.f32 %v1910_v1, %v1869_v63 }
 0x1ca   :  { %v1912_v6 = vpop.f32.mrf.mxu1  ;;  %v1873_v10 = vpop.f32.mrf.mxu0 }
 0x1cb   :  { %v1992_v7 = vmul.f32 %v1973_v0, %v1911_v2  ;;  %v1913_v8 = vadd.f32 %v1912_v6, %v1871_v4 }
 0x1cc   :  { %v1914_v11 = vpop.f32.mrf.mxu1  ;;  %v1874_v27 = vpop.f32.mrf.mxu0 }
 0x1cd   :  { %v2042_v12 = vadd.f32 %v2023_v3, %v1992_v7  ;;  %v1993_v13 = vmul.f32 %v1977_v5, %v1913_v8 }
 0x1ce   :  { %v1915_v14 = vpop.f32.mrf.mxu1 }
 0x1cf   :  { %v2050_v15 = vsub.f32 0.0, %v2042_v12  ;;  %v2043_v17 = vadd.f32 %v2027_v9, %v1993_v13 }
 0x1d1   :  { %v2064_v18 = vmul.f32 1.442695, %v2050_v15  ;;  %v2051_v20 = vsub.f32 0.0, %v2043_v17 }
 0x1d3   :  { %2392 = vpow2.f32 %v2064_v18  ;;  %v2066_v21 = vmul.f32 1.442695, %v2051_v20 }
 0x1d5   :  { %2394 = vpow2.f32 %v2066_v21 }
 0x1e0   :  { %v2393_v22 = vpop.eup %2392 }
 0x1e1   :  { %v2074_v31 = vadd.f32 1.0, %v2393_v22 }
 0x1e2   :  { %v2395_v53 = vpop.eup %2394 }
 0x1e3   :  { %2396 = vrcp.f32 %v2074_v31  ;;  %v2075_v23 = vadd.f32 1.0, %v2395_v53 }
 0x1e5   :  { %2398 = vrcp.f32 %v2075_v23 }
 0x1f0   :  { %v2397_v33 = vpop.eup %2396 }
 0x1f1   :  { %2098 = vst [vmem:[%s3299_s4 + $0x30] sm:$0xff] %v2397_v33 }
 0x1f2   :  { %v2399_v24 = vpop.eup %2398 }
 0x1f3   :  { %2099 = vst [vmem:[%s3299_s4 + $0x38] sm:$0xff] %v2399_v24 }

</bundles_post_ra>
